<compile_context>
chip_gen: v5e
topology: v5e:2x2
jax: 0.10.0
libtpu: 0.0.40
codegen_flags: <defaults>
</compile_context>

<pallas_src>
import functools

import jax
import jax.numpy as jnp
from jax.experimental import pallas as pl
from jax.experimental.pallas import tpu as pltpu


# ----------------------------------------------------------------------------- #
# small helpers
# ----------------------------------------------------------------------------- #
def _pick_tile(m):
    """Largest row tile (multiple of 8 sublanes) dividing m while leaving >=2 grid steps."""
    for t in (512, 256, 128, 64, 32, 16, 8):
        if m % t == 0 and m // t >= 2:
            return t
    return m


def _gelu(x):
    # TODO(synk): PyTorch nn.GELU() is exact (erf); tanh approximation used for Mosaic-safe lowering.
    return 0.5 * x * (1.0 + jnp.tanh(0.7978845608028654 * (x + 0.044715 * x * x * x)))


def _ln(y, g, b):
    mu = jnp.mean(y, axis=-1, keepdims=True)
    yc = y - mu
    var = jnp.mean(yc * yc, axis=-1, keepdims=True)
    return yc * jax.lax.rsqrt(var + 1e-5) * g + b


# ----------------------------------------------------------------------------- #
# Pallas kernels
# ----------------------------------------------------------------------------- #
def _linear_ln_kernel(x_ref, w_ref, *rest, has_bias):
    """y = LN(x @ w (+ b)); bf16 matmul operands, f32 accumulation + LN."""
    if has_bias:
        b_ref, g_ref, bln_ref, o_ref = rest
    else:
        g_ref, bln_ref, o_ref = rest
    y = jnp.dot(x_ref[...].astype(jnp.bfloat16), w_ref[...],
                preferred_element_type=jnp.float32)
    if has_bias:
        y = y + b_ref[...]
    o_ref[...] = _ln(y, g_ref[...], bln_ref[...]).astype(o_ref.dtype)


def linear_ln_pallas(x, w, b, g, beta):
    """Fused LN(x @ w + b).  x: (M, K) f32, w: (K, N) bf16, b/g/beta: (1, N) f32 (b optional)."""
    M, K = x.shape
    N = w.shape[1]
    tm = _pick_tile(M)
    has_bias = b is not None
    row = lambda i: (i, 0)
    full = lambda i: (0, 0)
    in_specs = [pl.BlockSpec((tm, K), row), pl.BlockSpec((K, N), full)]
    ins = [x, w]
    if has_bias:
        in_specs.append(pl.BlockSpec((1, N), full))
        ins.append(b)
    in_specs += [pl.BlockSpec((1, N), full), pl.BlockSpec((1, N), full)]
    ins += [g, beta]
    return pl.pallas_call(
        functools.partial(_linear_ln_kernel, has_bias=has_bias),
        out_shape=jax.ShapeDtypeStruct((M, N), jnp.float32),
        grid_spec=pltpu.PrefetchScalarGridSpec(
            num_scalar_prefetch=0, grid=(M // tm,),
            in_specs=in_specs,
            out_specs=pl.BlockSpec((tm, N), row)),
        compiler_params=pltpu.CompilerParams(dimension_semantics=("parallel",)),
    )(*ins)


def _ln_kernel(x_ref, g_ref, b_ref, o_ref):
    o_ref[...] = _ln(x_ref[...].astype(jnp.float32), g_ref[...], b_ref[...]).astype(o_ref.dtype)


def layernorm_pallas(x, g, b):
    """Row-wise LayerNorm.  x: (M, C) f32, g/b: (1, C) f32."""
    M, C = x.shape
    tm = _pick_tile(M)
    return pl.pallas_call(
        _ln_kernel,
        out_shape=jax.ShapeDtypeStruct((M, C), jnp.float32),
        grid_spec=pltpu.PrefetchScalarGridSpec(
            num_scalar_prefetch=0, grid=(M // tm,),
            in_specs=[pl.BlockSpec((tm, C), lambda i: (i, 0)),
                      pl.BlockSpec((1, C), lambda i: (0, 0)),
                      pl.BlockSpec((1, C), lambda i: (0, 0))],
            out_specs=pl.BlockSpec((tm, C), lambda i: (i, 0))),
        compiler_params=pltpu.CompilerParams(dimension_semantics=("parallel",)),
    )(x, g, b)


def _swin_block_kernel(x_ref, wqkv_ref, bqkv_ref, bias_ref, wproj_ref, bproj_ref,
                       g1_ref, b1_ref, wfc1_ref, bfc1_ref, wfc2_ref, bfc2_ref,
                       g2_ref, b2_ref, o_ref, *, num_heads, head_dim, scales):
    """One full SwinV2 block for ONE window per grid step:
       qkv proj -> scaled-cosine attention (all heads) -> out proj -> LN -> residual
       -> fc1 -> GELU -> fc2 -> LN -> residual.
       bf16 MXU operands, f32 elementwise / accumulation."""
    D = head_dim
    C = num_heads * D
    x = x_ref[...]                                                     # (L, C) f32
    qkv = jnp.dot(x.astype(jnp.bfloat16), wqkv_ref[...],
                  preferred_element_type=jnp.float32) + bqkv_ref[...]  # (L, 3C)
    y = None
    for h in range(num_heads):                                         # tiny static unroll
        q = qkv[:, h * D:(h + 1) * D]
        k = qkv[:, C + h * D:C + (h + 1) * D]
        v = qkv[:, 2 * C + h * D:2 * C + (h + 1) * D]
        # cosine normalization kept in f32 (eps would underflow in bf16)
        qn = q * jax.lax.rsqrt(jnp.sum(q * q, axis=-1, keepdims=True) + 1e-12)
        kn = k * jax.lax.rsqrt(jnp.sum(k * k, axis=-1, keepdims=True) + 1e-12)
        logits = jax.lax.dot_general(
            qn.astype(jnp.bfloat16), kn.astype(jnp.bfloat16),
            (((1,), (1,)), ((), ())), preferred_element_type=jnp.float32)      # (L, L)
        logits = logits * scales[h] + bias_ref[h]
        mx = jnp.max(logits, axis=-1, keepdims=True)
        p = jnp.exp(logits - mx)
        p = p * pl.reciprocal(jnp.sum(p, axis=-1, keepdims=True), approx=True)
        o_h = jnp.dot(p.astype(jnp.bfloat16), v.astype(jnp.bfloat16),
                      preferred_element_type=jnp.float32)                       # (L, D)
        # head-concat + out-projection folded:  o @ Wp == sum_h o_h @ Wp[hD:(h+1)D, :]
        part = jnp.dot(o_h.astype(jnp.bfloat16), wproj_ref[h * D:(h + 1) * D, :],
                       preferred_element_type=jnp.float32)                      # (L, C)
        y = part if y is None else y + part
    y = y + bproj_ref[...]
    xa = x + _ln(y, g1_ref[...], b1_ref[...])                          # SwinV2 res-post-norm
    # MLP half
    h1 = jnp.dot(xa.astype(jnp.bfloat16), wfc1_ref[...],
                 preferred_element_type=jnp.float32) + bfc1_ref[...]
    h1 = _gelu(h1)
    y2 = jnp.dot(h1.astype(jnp.bfloat16), wfc2_ref[...],
                 preferred_element_type=jnp.float32) + bfc2_ref[...]
    o_ref[...] = (xa + _ln(y2, g2_ref[...], b2_ref[...])).astype(o_ref.dtype)


def swin_block_pallas(xw, blk, *, num_heads, win_len):
    """xw: (nW*L, C) window-major tokens.  One grid step == one window (parallel)."""
    M, C = xw.shape
    L = win_len
    nW = M // L
    D = C // num_heads
    Hd = blk["w_fc1"].shape[1]
    row = lambda i: (i, 0)
    full2 = lambda i: (0, 0)
    return pl.pallas_call(
        functools.partial(_swin_block_kernel, num_heads=num_heads, head_dim=D,
                          scales=blk["scales"]),
        out_shape=jax.ShapeDtypeStruct((M, C), jnp.float32),
        grid_spec=pltpu.PrefetchScalarGridSpec(
            num_scalar_prefetch=0, grid=(nW,),
            in_specs=[
                pl.BlockSpec((L, C), row),                             # x (one window)
                pl.BlockSpec((C, 3 * C), full2),                       # w_qkv (bf16)
                pl.BlockSpec((1, 3 * C), full2),                       # fused qkv bias
                pl.BlockSpec((num_heads, L, L), lambda i: (0, 0, 0)),  # rel-pos bias table
                pl.BlockSpec((C, C), full2),                           # w_proj (bf16)
                pl.BlockSpec((1, C), full2),                           # b_proj
                pl.BlockSpec((1, C), full2),                           # ln1 gamma
                pl.BlockSpec((1, C), full2),                           # ln1 beta
                pl.BlockSpec((C, Hd), full2),                          # w_fc1 (bf16)
                pl.BlockSpec((1, Hd), full2),                          # b_fc1
                pl.BlockSpec((Hd, C), full2),                          # w_fc2 (bf16)
                pl.BlockSpec((1, C), full2),                           # b_fc2
                pl.BlockSpec((1, C), full2),                           # ln2 gamma
                pl.BlockSpec((1, C), full2),                           # ln2 beta
            ],
            out_specs=pl.BlockSpec((L, C), row)),
        compiler_params=pltpu.CompilerParams(dimension_semantics=("parallel",)),
    )(xw, blk["w_qkv"], blk["qkv_bias"], blk["attn_bias"],
      blk["w_proj"], blk["b_proj"], blk["g1"], blk["b1"],
      blk["w_fc1"], blk["b_fc1"], blk["w_fc2"], blk["b_fc2"],
      blk["g2"], blk["b2"])


# ----------------------------------------------------------------------------- #
# parameters + one-time preprocessing (all parameter-only work hoisted here)
# ----------------------------------------------------------------------------- #
class KeyGen:
    def __init__(self, key):
        self.key = key

    def __call__(self):
        self.key, k = jax.random.split(self.key)
        return k


def init_params(key):
    kg = KeyGen(key)
    embed_dim, depths, num_heads = 32, (1, 1), (2, 4)
    window_size, patch_size, in_chans, mlp_ratio, cpb_hidden = 8, 4, 3, 4, 512

    def tn(shape, std=0.02):
        return std * jax.random.truncated_normal(kg(), -2.0, 2.0, shape, jnp.float32)

    P = {
        "cfg": dict(embed_dim=embed_dim, depths=depths, num_heads=num_heads,
                    window_size=window_size, patch_size=patch_size,
                    in_chans=in_chans, mlp_ratio=mlp_ratio),
        "patch_w": tn((in_chans * patch_size * patch_size, embed_dim)),
        "patch_b": jnp.zeros((embed_dim,), jnp.float32),
        "patch_ln_g": jnp.ones((embed_dim,), jnp.float32),
        "patch_ln_b": jnp.zeros((embed_dim,), jnp.float32),
    }
    stages = []
    C = embed_dim
    for s, (depth, nH) in enumerate(zip(depths, num_heads)):
        blocks = []
        for _ in range(depth):
            blocks.append(dict(
                w_qkv=tn((C, 3 * C)),
                q_bias=jnp.zeros((C,), jnp.float32),
                v_bias=jnp.zeros((C,), jnp.float32),
                logit_scale=jnp.full((nH, 1, 1), jnp.log(10.0), jnp.float32),
                cpb_w1=tn((2, cpb_hidden)),
                cpb_b1=jnp.zeros((cpb_hidden,), jnp.float32),
                cpb_w2=tn((cpb_hidden, nH)),
                w_proj=tn((C, C)),
                b_proj=jnp.zeros((C,), jnp.float32),
                g1=jnp.ones((C,), jnp.float32), b1=jnp.zeros((C,), jnp.float32),
                w_fc1=tn((C, mlp_ratio * C)), b_fc1=jnp.zeros((mlp_ratio * C,), jnp.float32),
                w_fc2=tn((mlp_ratio * C, C)), b_fc2=jnp.zeros((C,), jnp.float32),
                g2=jnp.ones((C,), jnp.float32), b2=jnp.zeros((C,), jnp.float32),
            ))
        stage = dict(blocks=blocks,
                     out_ln_g=jnp.ones((C,), jnp.float32),
                     out_ln_b=jnp.zeros((C,), jnp.float32))
        if s < len(depths) - 1:
            stage["merge_w"] = tn((4 * C, 2 * C))
            stage["merge_ln_g"] = jnp.ones((2 * C,), jnp.float32)
            stage["merge_ln_b"] = jnp.zeros((2 * C,), jnp.float32)
        stages.append(stage)
        C *= 2
    P["stages"] = stages
    return P


def rel_position_bias(window, num_heads, cpb_w1, cpb_b1, cpb_w2):
    """SwinV2 continuous relative-position bias (tiny parameter-only MLP; runs once at prepare)."""
    Wh = Ww = window
    rh = jnp.arange(-(Wh - 1), Wh, dtype=jnp.float32)
    rw = jnp.arange(-(Ww - 1), Ww, dtype=jnp.float32)
    tab = jnp.stack(jnp.meshgrid(rh, rw, indexing="ij"), axis=-1).reshape(-1, 2)
    tab = tab / float(window - 1) * 8.0
    tab = jnp.sign(tab) * jnp.log2(jnp.abs(tab) + 1.0) / jnp.log2(8.0)
    ch, cw = jnp.meshgrid(jnp.arange(Wh), jnp.arange(Ww), indexing="ij")
    coords = jnp.stack([ch, cw]).reshape(2, -1)
    rel = coords[:, :, None] - coords[:, None, :]
    idx = (rel[0] + Wh - 1) * (2 * Ww - 1) + (rel[1] + Ww - 1)  # (L, L)
    hid = jax.nn.relu(tab @ cpb_w1 + cpb_b1)
    table_bias = hid @ cpb_w2  # (T, nH)
    bias = table_bias[idx.reshape(-1)].reshape(Wh * Ww, Wh * Ww, num_heads)
    bias = 16.0 * jax.nn.sigmoid(bias)
    return jnp.transpose(bias, (2, 0, 1)).astype(jnp.float32)  # (nH, L, L)


def prepare_model(P, H, W):
    """One-time parameter preprocessing: bf16 matmul weights, f32 biases/LN params,
    precomputed relative-position bias tables, clamped logit scales (static floats),
    and fused qkv bias (q_bias | 0 | v_bias)."""
    cfg = P["cfg"]
    ps = cfg["patch_size"]
    Hc, Wc = H // ps, W // ps
    bf = lambda a: a.astype(jnp.bfloat16)
    r1 = lambda a: a.reshape(1, -1).astype(jnp.float32)

    prep = dict(
        cfg=cfg,
        patch_w=bf(P["patch_w"]), patch_b=r1(P["patch_b"]),
        patch_ln_g=r1(P["patch_ln_g"]), patch_ln_b=r1(P["patch_ln_b"]),
        stages=[],
    )
    for s, stage in enumerate(P["stages"]):
        nH = cfg["num_heads"][s]
        window = min(cfg["window_size"], Hc, Wc)
        blocks = []
        for blk in stage["blocks"]:
            scale = jnp.exp(jnp.minimum(blk["logit_scale"], jnp.log(100.0))).reshape(-1)
            blocks.append(dict(
                w_qkv=bf(blk["w_qkv"]),
                qkv_bias=r1(jnp.concatenate(
                    [blk["q_bias"], jnp.zeros_like(blk["q_bias"]), blk["v_bias"]])),
                attn_bias=rel_position_bias(window, nH, blk["cpb_w1"],
                                            blk["cpb_b1"], blk["cpb_w2"]),
                scales=tuple(float(v) for v in jax.device_get(scale)),
                w_proj=bf(blk["w_proj"]), b_proj=r1(blk["b_proj"]),
                g1=r1(blk["g1"]), b1=r1(blk["b1"]),
                w_fc1=bf(blk["w_fc1"]), b_fc1=r1(blk["b_fc1"]),
                w_fc2=bf(blk["w_fc2"]), b_fc2=r1(blk["b_fc2"]),
                g2=r1(blk["g2"]), b2=r1(blk["b2"]),
            ))
        st = dict(blocks=blocks, window=window, num_heads=nH,
                  out_ln_g=r1(stage["out_ln_g"]), out_ln_b=r1(stage["out_ln_b"]))
        if "merge_w" in stage:
            st["merge_w"] = bf(stage["merge_w"])
            st["merge_ln_g"] = r1(stage["merge_ln_g"])
            st["merge_ln_b"] = r1(stage["merge_ln_b"])
            Hc //= 2
            Wc //= 2
        prep["stages"].append(st)
    return prep


# ----------------------------------------------------------------------------- #
# SwinV2 backbone forward
# ----------------------------------------------------------------------------- #
def swin_backbone(prep, x):
    """x: (N, 3, H, W) NCHW.  Returns list of per-stage NCHW feature maps."""
    cfg = prep["cfg"]
    N, Cin, H, W = x.shape
    ps = cfg["patch_size"]
    Hc, Wc = H // ps, W // ps

    # patch embedding: Conv2d(3, embed_dim, k=4, s=4) as patch-extraction + fused matmul+LN
    patches = x.reshape(N, Cin, Hc, ps, Wc, ps).transpose(0, 2, 4, 1, 3, 5)
    patches = patches.reshape(N * Hc * Wc, Cin * ps * ps).astype(jnp.float32)
    t = linear_ln_pallas(patches, prep["patch_w"], prep["patch_b"],
                         prep["patch_ln_g"], prep["patch_ln_b"])

    C = cfg["embed_dim"]
    feats = []
    for st in prep["stages"]:
        window, nH = st["window"], st["num_heads"]
        L = window * window
        # TODO(synk): shifted-window attention mask not needed (depths=(1,1) -> shift=0 only).
        # window partition ONCE per stage (pure layout choice since shift=0)
        tw = t.reshape(N, Hc // window, window, Wc // window, window, C)
        tw = tw.transpose(0, 1, 3, 2, 4, 5).reshape(-1, C)          # (nW*L, C) window-major
        for blk in st["blocks"]:
            tw = swin_block_pallas(tw, blk, num_heads=nH, win_len=L)  # fused attn+MLP block
        # window reverse ONCE per stage
        t = tw.reshape(N, Hc // window, Wc // window, window, window, C)
        t = t.transpose(0, 1, 3, 2, 4, 5).reshape(N * Hc * Wc, C)

        f = layernorm_pallas(t, st["out_ln_g"], st["out_ln_b"])
        feats.append(f.reshape(N, Hc, Wc, C).transpose(0, 3, 1, 2))  # NCHW

        if "merge_w" in st:  # patch merging (fused reduction linear + LN, no bias)
            xr = t.reshape(N, Hc, Wc, C)
            m = jnp.concatenate([xr[:, 0::2, 0::2, :], xr[:, 1::2, 0::2, :],
                                 xr[:, 0::2, 1::2, :], xr[:, 1::2, 1::2, :]],
                                axis=-1).reshape(N * (Hc // 2) * (Wc // 2), 4 * C)
            t = linear_ln_pallas(m, st["merge_w"], None,
                                 st["merge_ln_g"], st["merge_ln_b"])
            Hc //= 2
            Wc //= 2
            C *= 2
    return feats


def swin_color_feats(prep, colors):
    """colors: (B, V, C, H, W) -> list of (B, V, c_i, h_i, w_i)."""
    B, V, C, H, W = colors.shape
    feats = swin_backbone(prep, colors.reshape(B * V, C, H, W))
    return [f.reshape(B, V, *f.shape[1:]) for f in feats]


# ----------------------------------------------------------------------------- #
if __name__ == "__main__":
    key = jax.random.PRNGKey(0)
    pkey, xkey = jax.random.split(key)
    params = init_params(pkey)

    B, V, C, H, W = 2, 2, 3, 32, 32
    prep = prepare_model(params, H, W)          # one-time parameter preprocessing
    colors = jax.random.normal(xkey, (B, V, C, H, W), dtype=jnp.float32)

    feats = jax.jit(lambda c: swin_color_feats(prep, c))(colors)
    feats = jax.block_until_ready(feats)

    assert feats[0].shape == (B, V, 32, 8, 8), feats[0].shape
    assert feats[1].shape == (B, V, 64, 4, 4), feats[1].shape
    assert all(bool(jnp.all(jnp.isfinite(f))) for f in feats)
    print("KERNEL_OK")
</pallas_src>

<mosaic_0001>
module attributes {stable_mosaic.version = 11 : i64} {
  func.func @_linear_ln_kernel(%arg0: i32, %arg1: memref<128x48xf32, #tpu.memory_space<vmem>>, %arg2: memref<48x32xbf16, #tpu.memory_space<vmem>>, %arg3: memref<1x32xf32, #tpu.memory_space<vmem>>, %arg4: memref<1x32xf32, #tpu.memory_space<vmem>>, %arg5: memref<1x32xf32, #tpu.memory_space<vmem>>, %arg6: memref<128x32xf32, #tpu.memory_space<vmem>>) attributes {dimension_semantics = [#tpu.dimension_semantics<parallel>], iteration_bounds = array<i64: 2>, scalar_prefetch = 0 : i64, scratch_operands = 0 : i64, tpu.core_type = #tpu.core_type<tc>, window_params = [{transform_indices = @transform_0, window_bounds = array<i64: 128, 48>}, {pipeline_mode = #tpu.pipeline_mode<synchronous>, transform_indices = @transform_1, window_bounds = array<i64: 48, 32>}, {pipeline_mode = #tpu.pipeline_mode<synchronous>, transform_indices = @transform_2, window_bounds = array<i64: 1, 32>}, {pipeline_mode = #tpu.pipeline_mode<synchronous>, transform_indices = @transform_3, window_bounds = array<i64: 1, 32>}, {pipeline_mode = #tpu.pipeline_mode<synchronous>, transform_indices = @transform_4, window_bounds = array<i64: 1, 32>}, {transform_indices = @transform_5, window_bounds = array<i64: 128, 32>}]} {
    %c0 = arith.constant 0 : index
    %c0_0 = arith.constant 0 : index
    %0 = vector.load %arg1[%c0, %c0_0] : memref<128x48xf32, #tpu.memory_space<vmem>>, vector<128x48xf32>
    %1 = arith.truncf %0 : vector<128x48xf32> to vector<128x48xbf16>
    %c0_1 = arith.constant 0 : index
    %c0_2 = arith.constant 0 : index
    %2 = vector.load %arg2[%c0_1, %c0_2] : memref<48x32xbf16, #tpu.memory_space<vmem>>, vector<48x32xbf16>
    %cst = arith.constant dense<0.000000e+00> : vector<128x32xf32>
    %3 = tpu.matmul %1, %2, %cst {dimension_numbers = #tpu.dot_dimension_numbers<[1], [0], [0], [1], [0, 0, 1, 1], [], []>} : vector<128x48xbf16>, vector<48x32xbf16>, vector<128x32xf32> -> vector<128x32xf32>
    %c0_3 = arith.constant 0 : index
    %c0_4 = arith.constant 0 : index
    %4 = vector.load %arg3[%c0_3, %c0_4] : memref<1x32xf32, #tpu.memory_space<vmem>>, vector<1x32xf32>
    %5 = vector.broadcast %4 : vector<1x32xf32> to vector<128x32xf32>
    %6 = arith.addf %3, %5 : vector<128x32xf32>
    %c0_5 = arith.constant 0 : index
    %c0_6 = arith.constant 0 : index
    %7 = vector.load %arg4[%c0_5, %c0_6] : memref<1x32xf32, #tpu.memory_space<vmem>>, vector<1x32xf32>
    %c0_7 = arith.constant 0 : index
    %c0_8 = arith.constant 0 : index
    %8 = vector.load %arg5[%c0_7, %c0_8] : memref<1x32xf32, #tpu.memory_space<vmem>>, vector<1x32xf32>
    %cst_9 = arith.constant dense<0.000000e+00> : vector<128xf32>
    %9 = vector.multi_reduction <add>, %6, %cst_9 [1] : vector<128x32xf32> to vector<128xf32>
    %10 = vector.shape_cast %9 : vector<128xf32> to vector<128x1xf32>
    %cst_10 = arith.constant 3.200000e+01 : f32
    %11 = vector.broadcast %cst_10 : f32 to vector<128x1xf32>
    %12 = arith.divf %10, %11 : vector<128x1xf32>
    %13 = vector.broadcast %12 : vector<128x1xf32> to vector<128x32xf32>
    %14 = arith.subf %6, %13 : vector<128x32xf32>
    %15 = arith.mulf %14, %14 : vector<128x32xf32>
    %cst_11 = arith.constant dense<0.000000e+00> : vector<128xf32>
    %16 = vector.multi_reduction <add>, %15, %cst_11 [1] : vector<128x32xf32> to vector<128xf32>
    %17 = vector.shape_cast %16 : vector<128xf32> to vector<128x1xf32>
    %cst_12 = arith.constant 3.200000e+01 : f32
    %18 = vector.broadcast %cst_12 : f32 to vector<128x1xf32>
    %19 = arith.divf %17, %18 : vector<128x1xf32>
    %cst_13 = arith.constant 9.99999974E-6 : f32
    %20 = vector.broadcast %cst_13 : f32 to vector<128x1xf32>
    %21 = arith.addf %19, %20 : vector<128x1xf32>
    %22 = math.rsqrt %21 : vector<128x1xf32>
    %23 = vector.broadcast %22 : vector<128x1xf32> to vector<128x32xf32>
    %24 = arith.mulf %14, %23 : vector<128x32xf32>
    %25 = vector.broadcast %7 : vector<1x32xf32> to vector<128x32xf32>
    %26 = arith.mulf %24, %25 : vector<128x32xf32>
    %27 = vector.broadcast %8 : vector<1x32xf32> to vector<128x32xf32>
    %28 = arith.addf %26, %27 : vector<128x32xf32>
    %c0_14 = arith.constant 0 : index
    %c0_15 = arith.constant 0 : index
    %29 = vector.load %arg6[%c0_14, %c0_15] : memref<128x32xf32, #tpu.memory_space<vmem>>, vector<128x32xf32>
    tpu.vector_store %arg6[%c0_14, %c0_15], %28 {strides = array<i32>} : memref<128x32xf32, #tpu.memory_space<vmem>>, vector<128x32xf32>,
    return
  }
  func.func @transform_0(%arg0: i32) -> (i32, i32) {
    %c0_i32 = arith.constant 0 : i32
    %c0_i32_0 = arith.constant 0 : i32
    return %arg0, %c0_i32 : i32, i32
  }
  func.func @transform_1(%arg0: i32) -> (i32, i32) {
    %c0_i32 = arith.constant 0 : i32
    %c0_i32_0 = arith.constant 0 : i32
    %c0_i32_1 = arith.constant 0 : i32
    return %c0_i32, %c0_i32_0 : i32, i32
  }
  func.func @transform_2(%arg0: i32) -> (i32, i32) {
    %c0_i32 = arith.constant 0 : i32
    %c0_i32_0 = arith.constant 0 : i32
    %c0_i32_1 = arith.constant 0 : i32
    return %c0_i32, %c0_i32_0 : i32, i32
  }
  func.func @transform_3(%arg0: i32) -> (i32, i32) {
    %c0_i32 = arith.constant 0 : i32
    %c0_i32_0 = arith.constant 0 : i32
    %c0_i32_1 = arith.constant 0 : i32
    return %c0_i32, %c0_i32_0 : i32, i32
  }
  func.func @transform_4(%arg0: i32) -> (i32, i32) {
    %c0_i32 = arith.constant 0 : i32
    %c0_i32_0 = arith.constant 0 : i32
    %c0_i32_1 = arith.constant 0 : i32
    return %c0_i32, %c0_i32_0 : i32, i32
  }
  func.func @transform_5(%arg0: i32) -> (i32, i32) {
    %c0_i32 = arith.constant 0 : i32
    %c0_i32_0 = arith.constant 0 : i32
    return %arg0, %c0_i32 : i32, i32
  }
}

module attributes {stable_mosaic.version = 11 : i64} {
  func.func @_swin_block_kernel(%arg0: i32, %arg1: memref<64x32xf32, #tpu.memory_space<vmem>>, %arg2: memref<32x96xbf16, #tpu.memory_space<vmem>>, %arg3: memref<1x96xf32, #tpu.memory_space<vmem>>, %arg4: memref<2x64x64xf32, #tpu.memory_space<vmem>>, %arg5: memref<32x32xbf16, #tpu.memory_space<vmem>>, %arg6: memref<1x32xf32, #tpu.memory_space<vmem>>, %arg7: memref<1x32xf32, #tpu.memory_space<vmem>>, %arg8: memref<1x32xf32, #tpu.memory_space<vmem>>, %arg9: memref<32x128xbf16, #tpu.memory_space<vmem>>, %arg10: memref<1x128xf32, #tpu.memory_space<vmem>>, %arg11: memref<128x32xbf16, #tpu.memory_space<vmem>>, %arg12: memref<1x32xf32, #tpu.memory_space<vmem>>, %arg13: memref<1x32xf32, #tpu.memory_space<vmem>>, %arg14: memref<1x32xf32, #tpu.memory_space<vmem>>, %arg15: memref<64x32xf32, #tpu.memory_space<vmem>>) attributes {dimension_semantics = [#tpu.dimension_semantics<parallel>], iteration_bounds = array<i64: 4>, scalar_prefetch = 0 : i64, scratch_operands = 0 : i64, tpu.core_type = #tpu.core_type<tc>, window_params = [{transform_indices = @transform_0, window_bounds = array<i64: 64, 32>}, {pipeline_mode = #tpu.pipeline_mode<synchronous>, transform_indices = @transform_1, window_bounds = array<i64: 32, 96>}, {pipeline_mode = #tpu.pipeline_mode<synchronous>, transform_indices = @transform_2, window_bounds = array<i64: 1, 96>}, {pipeline_mode = #tpu.pipeline_mode<synchronous>, transform_indices = @transform_3, window_bounds = array<i64: 2, 64, 64>}, {pipeline_mode = #tpu.pipeline_mode<synchronous>, transform_indices = @transform_4, window_bounds = array<i64: 32, 32>}, {pipeline_mode = #tpu.pipeline_mode<synchronous>, transform_indices = @transform_5, window_bounds = array<i64: 1, 32>}, {pipeline_mode = #tpu.pipeline_mode<synchronous>, transform_indices = @transform_6, window_bounds = array<i64: 1, 32>}, {pipeline_mode = #tpu.pipeline_mode<synchronous>, transform_indices = @transform_7, window_bounds = array<i64: 1, 32>}, {pipeline_mode = #tpu.pipeline_mode<synchronous>, transform_indices = @transform_8, window_bounds = array<i64: 32, 128>}, {pipeline_mode = #tpu.pipeline_mode<synchronous>, transform_indices = @transform_9, window_bounds = array<i64: 1, 128>}, {pipeline_mode = #tpu.pipeline_mode<synchronous>, transform_indices = @transform_10, window_bounds = array<i64: 128, 32>}, {pipeline_mode = #tpu.pipeline_mode<synchronous>, transform_indices = @transform_11, window_bounds = array<i64: 1, 32>}, {pipeline_mode = #tpu.pipeline_mode<synchronous>, transform_indices = @transform_12, window_bounds = array<i64: 1, 32>}, {pipeline_mode = #tpu.pipeline_mode<synchronous>, transform_indices = @transform_13, window_bounds = array<i64: 1, 32>}, {transform_indices = @transform_14, window_bounds = array<i64: 64, 32>}]} {
    %c0 = arith.constant 0 : index
    %c0_0 = arith.constant 0 : index
    %0 = vector.load %arg1[%c0, %c0_0] : memref<64x32xf32, #tpu.memory_space<vmem>>, vector<64x32xf32>
    %1 = arith.truncf %0 : vector<64x32xf32> to vector<64x32xbf16>
    %c0_1 = arith.constant 0 : index
    %c0_2 = arith.constant 0 : index
    %2 = vector.load %arg2[%c0_1, %c0_2] : memref<32x96xbf16, #tpu.memory_space<vmem>>, vector<32x96xbf16>
    %cst = arith.constant dense<0.000000e+00> : vector<64x96xf32>
    %3 = tpu.matmul %1, %2, %cst {dimension_numbers = #tpu.dot_dimension_numbers<[1], [0], [0], [1], [0, 0, 1, 1], [], []>} : vector<64x32xbf16>, vector<32x96xbf16>, vector<64x96xf32> -> vector<64x96xf32>
    %c0_3 = arith.constant 0 : index
    %c0_4 = arith.constant 0 : index
    %4 = vector.load %arg3[%c0_3, %c0_4] : memref<1x96xf32, #tpu.memory_space<vmem>>, vector<1x96xf32>
    %5 = vector.broadcast %4 : vector<1x96xf32> to vector<64x96xf32>
    %6 = arith.addf %3, %5 : vector<64x96xf32>
    %7 = vector.extract_strided_slice %6 {offsets = [0, 0], sizes = [64, 16], strides = [1, 1]} : vector<64x96xf32> to vector<64x16xf32>
    %8 = vector.extract_strided_slice %6 {offsets = [0, 32], sizes = [64, 16], strides = [1, 1]} : vector<64x96xf32> to vector<64x16xf32>
    %9 = vector.extract_strided_slice %6 {offsets = [0, 64], sizes = [64, 16], strides = [1, 1]} : vector<64x96xf32> to vector<64x16xf32>
    %10 = arith.mulf %7, %7 : vector<64x16xf32>
    %cst_5 = arith.constant dense<0.000000e+00> : vector<64xf32>
    %11 = vector.multi_reduction <add>, %10, %cst_5 [1] : vector<64x16xf32> to vector<64xf32>
    %12 = vector.shape_cast %11 : vector<64xf32> to vector<64x1xf32>
    %cst_6 = arith.constant 9.99999996E-13 : f32
    %13 = vector.broadcast %cst_6 : f32 to vector<64x1xf32>
    %14 = arith.addf %12, %13 : vector<64x1xf32>
    %15 = math.rsqrt %14 : vector<64x1xf32>
    %16 = vector.broadcast %15 : vector<64x1xf32> to vector<64x16xf32>
    %17 = arith.mulf %7, %16 : vector<64x16xf32>
    %18 = arith.mulf %8, %8 : vector<64x16xf32>
    %cst_7 = arith.constant dense<0.000000e+00> : vector<64xf32>
    %19 = vector.multi_reduction <add>, %18, %cst_7 [1] : vector<64x16xf32> to vector<64xf32>
    %20 = vector.shape_cast %19 : vector<64xf32> to vector<64x1xf32>
    %cst_8 = arith.constant 9.99999996E-13 : f32
    %21 = vector.broadcast %cst_8 : f32 to vector<64x1xf32>
    %22 = arith.addf %20, %21 : vector<64x1xf32>
    %23 = math.rsqrt %22 : vector<64x1xf32>
    %24 = vector.broadcast %23 : vector<64x1xf32> to vector<64x16xf32>
    %25 = arith.mulf %8, %24 : vector<64x16xf32>
    %26 = arith.truncf %17 : vector<64x16xf32> to vector<64x16xbf16>
    %27 = arith.truncf %25 : vector<64x16xf32> to vector<64x16xbf16>
    %cst_9 = arith.constant dense<0.000000e+00> : vector<64x64xf32>
    %28 = tpu.matmul %26, %27, %cst_9 {dimension_numbers = #tpu.dot_dimension_numbers<[1], [1], [0], [0], [0, 0, 1, 0], [], []>} : vector<64x16xbf16>, vector<64x16xbf16>, vector<64x64xf32> -> vector<64x64xf32>
    %cst_10 = arith.constant 1.000000e+01 : f32
    %29 = vector.broadcast %cst_10 : f32 to vector<64x64xf32>
    %30 = arith.mulf %28, %29 : vector<64x64xf32>
    %c0_11 = arith.constant 0 : index
    %c0_12 = arith.constant 0 : index
    %c0_13 = arith.constant 0 : index
    %31 = vector.load %arg4[%c0_11, %c0_12, %c0_13] : memref<2x64x64xf32, #tpu.memory_space<vmem>>, vector<1x64x64xf32>
    %32 = vector.shape_cast %31 : vector<1x64x64xf32> to vector<64x64xf32>
    %33 = arith.addf %30, %32 : vector<64x64xf32>
    %cst_14 = arith.constant dense<0xFF800000> : vector<64xf32>
    %34 = vector.multi_reduction <maximumf>, %33, %cst_14 [1] : vector<64x64xf32> to vector<64xf32>
    %35 = vector.shape_cast %34 : vector<64xf32> to vector<64x1xf32>
    %36 = vector.broadcast %35 : vector<64x1xf32> to vector<64x64xf32>
    %37 = arith.subf %33, %36 : vector<64x64xf32>
    %38 = math.exp %37 : vector<64x64xf32>
    %cst_15 = arith.constant dense<0.000000e+00> : vector<64xf32>
    %39 = vector.multi_reduction <add>, %38, %cst_15 [1] : vector<64x64xf32> to vector<64xf32>
    %40 = vector.shape_cast %39 : vector<64xf32> to vector<64x1xf32>
    %41 = tpu.reciprocal %40 {approx = true} : vector<64x1xf32> -> vector<64x1xf32>
    %42 = vector.broadcast %41 : vector<64x1xf32> to vector<64x64xf32>
    %43 = arith.mulf %38, %42 : vector<64x64xf32>
    %44 = arith.truncf %43 : vector<64x64xf32> to vector<64x64xbf16>
    %45 = arith.truncf %9 : vector<64x16xf32> to vector<64x16xbf16>
    %cst_16 = arith.constant dense<0.000000e+00> : vector<64x16xf32>
    %46 = tpu.matmul %44, %45, %cst_16 {dimension_numbers = #tpu.dot_dimension_numbers<[1], [0], [0], [1], [0, 0, 1, 1], [], []>} : vector<64x64xbf16>, vector<64x16xbf16>, vector<64x16xf32> -> vector<64x16xf32>
    %47 = arith.truncf %46 : vector<64x16xf32> to vector<64x16xbf16>
    %c0_17 = arith.constant 0 : index
    %c0_18 = arith.constant 0 : index
    %48 = vector.load %arg5[%c0_17, %c0_18] : memref<32x32xbf16, #tpu.memory_space<vmem>>, vector<16x32xbf16>
    %cst_19 = arith.constant dense<0.000000e+00> : vector<64x32xf32>
    %49 = tpu.matmul %47, %48, %cst_19 {dimension_numbers = #tpu.dot_dimension_numbers<[1], [0], [0], [1], [0, 0, 1, 1], [], []>} : vector<64x16xbf16>, vector<16x32xbf16>, vector<64x32xf32> -> vector<64x32xf32>
    %50 = vector.extract_strided_slice %6 {offsets = [0, 16], sizes = [64, 16], strides = [1, 1]} : vector<64x96xf32> to vector<64x16xf32>
    %51 = vector.extract_strided_slice %6 {offsets = [0, 48], sizes = [64, 16], strides = [1, 1]} : vector<64x96xf32> to vector<64x16xf32>
    %52 = vector.extract_strided_slice %6 {offsets = [0, 80], sizes = [64, 16], strides = [1, 1]} : vector<64x96xf32> to vector<64x16xf32>
    %53 = arith.mulf %50, %50 : vector<64x16xf32>
    %cst_20 = arith.constant dense<0.000000e+00> : vector<64xf32>
    %54 = vector.multi_reduction <add>, %53, %cst_20 [1] : vector<64x16xf32> to vector<64xf32>
    %55 = vector.shape_cast %54 : vector<64xf32> to vector<64x1xf32>
    %cst_21 = arith.constant 9.99999996E-13 : f32
    %56 = vector.broadcast %cst_21 : f32 to vector<64x1xf32>
    %57 = arith.addf %55, %56 : vector<64x1xf32>
    %58 = math.rsqrt %57 : vector<64x1xf32>
    %59 = vector.broadcast %58 : vector<64x1xf32> to vector<64x16xf32>
    %60 = arith.mulf %50, %59 : vector<64x16xf32>
    %61 = arith.mulf %51, %51 : vector<64x16xf32>
    %cst_22 = arith.constant dense<0.000000e+00> : vector<64xf32>
    %62 = vector.multi_reduction <add>, %61, %cst_22 [1] : vector<64x16xf32> to vector<64xf32>
    %63 = vector.shape_cast %62 : vector<64xf32> to vector<64x1xf32>
    %cst_23 = arith.constant 9.99999996E-13 : f32
    %64 = vector.broadcast %cst_23 : f32 to vector<64x1xf32>
    %65 = arith.addf %63, %64 : vector<64x1xf32>
    %66 = math.rsqrt %65 : vector<64x1xf32>
    %67 = vector.broadcast %66 : vector<64x1xf32> to vector<64x16xf32>
    %68 = arith.mulf %51, %67 : vector<64x16xf32>
    %69 = arith.truncf %60 : vector<64x16xf32> to vector<64x16xbf16>
    %70 = arith.truncf %68 : vector<64x16xf32> to vector<64x16xbf16>
    %cst_24 = arith.constant dense<0.000000e+00> : vector<64x64xf32>
    %71 = tpu.matmul %69, %70, %cst_24 {dimension_numbers = #tpu.dot_dimension_numbers<[1], [1], [0], [0], [0, 0, 1, 0], [], []>} : vector<64x16xbf16>, vector<64x16xbf16>, vector<64x64xf32> -> vector<64x64xf32>
    %cst_25 = arith.constant 1.000000e+01 : f32
    %72 = vector.broadcast %cst_25 : f32 to vector<64x64xf32>
    %73 = arith.mulf %71, %72 : vector<64x64xf32>
    %c1 = arith.constant 1 : index
    %c0_26 = arith.constant 0 : index
    %c0_27 = arith.constant 0 : index
    %74 = vector.load %arg4[%c1, %c0_26, %c0_27] : memref<2x64x64xf32, #tpu.memory_space<vmem>>, vector<1x64x64xf32>
    %75 = vector.shape_cast %74 : vector<1x64x64xf32> to vector<64x64xf32>
    %76 = arith.addf %73, %75 : vector<64x64xf32>
    %cst_28 = arith.constant dense<0xFF800000> : vector<64xf32>
    %77 = vector.multi_reduction <maximumf>, %76, %cst_28 [1] : vector<64x64xf32> to vector<64xf32>
    %78 = vector.shape_cast %77 : vector<64xf32> to vector<64x1xf32>
    %79 = vector.broadcast %78 : vector<64x1xf32> to vector<64x64xf32>
    %80 = arith.subf %76, %79 : vector<64x64xf32>
    %81 = math.exp %80 : vector<64x64xf32>
    %cst_29 = arith.constant dense<0.000000e+00> : vector<64xf32>
    %82 = vector.multi_reduction <add>, %81, %cst_29 [1] : vector<64x64xf32> to vector<64xf32>
    %83 = vector.shape_cast %82 : vector<64xf32> to vector<64x1xf32>
    %84 = tpu.reciprocal %83 {approx = true} : vector<64x1xf32> -> vector<64x1xf32>
    %85 = vector.broadcast %84 : vector<64x1xf32> to vector<64x64xf32>
    %86 = arith.mulf %81, %85 : vector<64x64xf32>
    %87 = arith.truncf %86 : vector<64x64xf32> to vector<64x64xbf16>
    %88 = arith.truncf %52 : vector<64x16xf32> to vector<64x16xbf16>
    %cst_30 = arith.constant dense<0.000000e+00> : vector<64x16xf32>
    %89 = tpu.matmul %87, %88, %cst_30 {dimension_numbers = #tpu.dot_dimension_numbers<[1], [0], [0], [1], [0, 0, 1, 1], [], []>} : vector<64x64xbf16>, vector<64x16xbf16>, vector<64x16xf32> -> vector<64x16xf32>
    %90 = arith.truncf %89 : vector<64x16xf32> to vector<64x16xbf16>
    %c16 = arith.constant 16 : index
    %c0_31 = arith.constant 0 : index
    %91 = vector.load %arg5[%c16, %c0_31] : memref<32x32xbf16, #tpu.memory_space<vmem>>, vector<16x32xbf16>
    %cst_32 = arith.constant dense<0.000000e+00> : vector<64x32xf32>
    %92 = tpu.matmul %90, %91, %cst_32 {dimension_numbers = #tpu.dot_dimension_numbers<[1], [0], [0], [1], [0, 0, 1, 1], [], []>} : vector<64x16xbf16>, vector<16x32xbf16>, vector<64x32xf32> -> vector<64x32xf32>
    %93 = arith.addf %49, %92 : vector<64x32xf32>
    %c0_33 = arith.constant 0 : index
    %c0_34 = arith.constant 0 : index
    %94 = vector.load %arg6[%c0_33, %c0_34] : memref<1x32xf32, #tpu.memory_space<vmem>>, vector<1x32xf32>
    %95 = vector.broadcast %94 : vector<1x32xf32> to vector<64x32xf32>
    %96 = arith.addf %93, %95 : vector<64x32xf32>
    %c0_35 = arith.constant 0 : index
    %c0_36 = arith.constant 0 : index
    %97 = vector.load %arg7[%c0_35, %c0_36] : memref<1x32xf32, #tpu.memory_space<vmem>>, vector<1x32xf32>
    %c0_37 = arith.constant 0 : index
    %c0_38 = arith.constant 0 : index
    %98 = vector.load %arg8[%c0_37, %c0_38] : memref<1x32xf32, #tpu.memory_space<vmem>>, vector<1x32xf32>
    %cst_39 = arith.constant dense<0.000000e+00> : vector<64xf32>
    %99 = vector.multi_reduction <add>, %96, %cst_39 [1] : vector<64x32xf32> to vector<64xf32>
    %100 = vector.shape_cast %99 : vector<64xf32> to vector<64x1xf32>
    %cst_40 = arith.constant 3.200000e+01 : f32
    %101 = vector.broadcast %cst_40 : f32 to vector<64x1xf32>
    %102 = arith.divf %100, %101 : vector<64x1xf32>
    %103 = vector.broadcast %102 : vector<64x1xf32> to vector<64x32xf32>
    %104 = arith.subf %96, %103 : vector<64x32xf32>
    %105 = arith.mulf %104, %104 : vector<64x32xf32>
    %cst_41 = arith.constant dense<0.000000e+00> : vector<64xf32>
    %106 = vector.multi_reduction <add>, %105, %cst_41 [1] : vector<64x32xf32> to vector<64xf32>
    %107 = vector.shape_cast %106 : vector<64xf32> to vector<64x1xf32>
    %cst_42 = arith.constant 3.200000e+01 : f32
    %108 = vector.broadcast %cst_42 : f32 to vector<64x1xf32>
    %109 = arith.divf %107, %108 : vector<64x1xf32>
    %cst_43 = arith.constant 9.99999974E-6 : f32
    %110 = vector.broadcast %cst_43 : f32 to vector<64x1xf32>
    %111 = arith.addf %109, %110 : vector<64x1xf32>
    %112 = math.rsqrt %111 : vector<64x1xf32>
    %113 = vector.broadcast %112 : vector<64x1xf32> to vector<64x32xf32>
    %114 = arith.mulf %104, %113 : vector<64x32xf32>
    %115 = vector.broadcast %97 : vector<1x32xf32> to vector<64x32xf32>
    %116 = arith.mulf %114, %115 : vector<64x32xf32>
    %117 = vector.broadcast %98 : vector<1x32xf32> to vector<64x32xf32>
    %118 = arith.addf %116, %117 : vector<64x32xf32>
    %119 = arith.addf %0, %118 : vector<64x32xf32>
    %120 = arith.truncf %119 : vector<64x32xf32> to vector<64x32xbf16>
    %c0_44 = arith.constant 0 : index
    %c0_45 = arith.constant 0 : index
    %121 = vector.load %arg9[%c0_44, %c0_45] : memref<32x128xbf16, #tpu.memory_space<vmem>>, vector<32x128xbf16>
    %cst_46 = arith.constant dense<0.000000e+00> : vector<64x128xf32>
    %122 = tpu.matmul %120, %121, %cst_46 {dimension_numbers = #tpu.dot_dimension_numbers<[1], [0], [0], [1], [0, 0, 1, 1], [], []>} : vector<64x32xbf16>, vector<32x128xbf16>, vector<64x128xf32> -> vector<64x128xf32>
    %c0_47 = arith.constant 0 : index
    %c0_48 = arith.constant 0 : index
    %123 = vector.load %arg10[%c0_47, %c0_48] : memref<1x128xf32, #tpu.memory_space<vmem>>, vector<1x128xf32>
    %124 = vector.broadcast %123 : vector<1x128xf32> to vector<64x128xf32>
    %125 = arith.addf %122, %124 : vector<64x128xf32>
    %cst_49 = arith.constant 5.000000e-01 : f32
    %126 = vector.broadcast %cst_49 : f32 to vector<64x128xf32>
    %127 = arith.mulf %126, %125 : vector<64x128xf32>
    %cst_50 = arith.constant 4.471500e-02 : f32
    %128 = vector.broadcast %cst_50 : f32 to vector<64x128xf32>
    %129 = arith.mulf %128, %125 : vector<64x128xf32>
    %130 = arith.mulf %129, %125 : vector<64x128xf32>
    %131 = arith.mulf %130, %125 : vector<64x128xf32>
    %132 = arith.addf %125, %131 : vector<64x128xf32>
    %cst_51 = arith.constant 0.797884583 : f32
    %133 = vector.broadcast %cst_51 : f32 to vector<64x128xf32>
    %134 = arith.mulf %133, %132 : vector<64x128xf32>
    %135 = math.tanh %134 : vector<64x128xf32>
    %cst_52 = arith.constant 1.000000e+00 : f32
    %136 = vector.broadcast %cst_52 : f32 to vector<64x128xf32>
    %137 = arith.addf %136, %135 : vector<64x128xf32>
    %138 = arith.mulf %127, %137 : vector<64x128xf32>
    %139 = arith.truncf %138 : vector<64x128xf32> to vector<64x128xbf16>
    %c0_53 = arith.constant 0 : index
    %c0_54 = arith.constant 0 : index
    %140 = vector.load %arg11[%c0_53, %c0_54] : memref<128x32xbf16, #tpu.memory_space<vmem>>, vector<128x32xbf16>
    %cst_55 = arith.constant dense<0.000000e+00> : vector<64x32xf32>
    %141 = tpu.matmul %139, %140, %cst_55 {dimension_numbers = #tpu.dot_dimension_numbers<[1], [0], [0], [1], [0, 0, 1, 1], [], []>} : vector<64x128xbf16>, vector<128x32xbf16>, vector<64x32xf32> -> vector<64x32xf32>
    %c0_56 = arith.constant 0 : index
    %c0_57 = arith.constant 0 : index
    %142 = vector.load %arg12[%c0_56, %c0_57] : memref<1x32xf32, #tpu.memory_space<vmem>>, vector<1x32xf32>
    %143 = vector.broadcast %142 : vector<1x32xf32> to vector<64x32xf32>
    %144 = arith.addf %141, %143 : vector<64x32xf32>
    %c0_58 = arith.constant 0 : index
    %c0_59 = arith.constant 0 : index
    %145 = vector.load %arg13[%c0_58, %c0_59] : memref<1x32xf32, #tpu.memory_space<vmem>>, vector<1x32xf32>
    %c0_60 = arith.constant 0 : index
    %c0_61 = arith.constant 0 : index
    %146 = vector.load %arg14[%c0_60, %c0_61] : memref<1x32xf32, #tpu.memory_space<vmem>>, vector<1x32xf32>
    %cst_62 = arith.constant dense<0.000000e+00> : vector<64xf32>
    %147 = vector.multi_reduction <add>, %144, %cst_62 [1] : vector<64x32xf32> to vector<64xf32>
    %148 = vector.shape_cast %147 : vector<64xf32> to vector<64x1xf32>
    %cst_63 = arith.constant 3.200000e+01 : f32
    %149 = vector.broadcast %cst_63 : f32 to vector<64x1xf32>
    %150 = arith.divf %148, %149 : vector<64x1xf32>
    %151 = vector.broadcast %150 : vector<64x1xf32> to vector<64x32xf32>
    %152 = arith.subf %144, %151 : vector<64x32xf32>
    %153 = arith.mulf %152, %152 : vector<64x32xf32>
    %cst_64 = arith.constant dense<0.000000e+00> : vector<64xf32>
    %154 = vector.multi_reduction <add>, %153, %cst_64 [1] : vector<64x32xf32> to vector<64xf32>
    %155 = vector.shape_cast %154 : vector<64xf32> to vector<64x1xf32>
    %cst_65 = arith.constant 3.200000e+01 : f32
    %156 = vector.broadcast %cst_65 : f32 to vector<64x1xf32>
    %157 = arith.divf %155, %156 : vector<64x1xf32>
    %cst_66 = arith.constant 9.99999974E-6 : f32
    %158 = vector.broadcast %cst_66 : f32 to vector<64x1xf32>
    %159 = arith.addf %157, %158 : vector<64x1xf32>
    %160 = math.rsqrt %159 : vector<64x1xf32>
    %161 = vector.broadcast %160 : vector<64x1xf32> to vector<64x32xf32>
    %162 = arith.mulf %152, %161 : vector<64x32xf32>
    %163 = vector.broadcast %145 : vector<1x32xf32> to vector<64x32xf32>
    %164 = arith.mulf %162, %163 : vector<64x32xf32>
    %165 = vector.broadcast %146 : vector<1x32xf32> to vector<64x32xf32>
    %166 = arith.addf %164, %165 : vector<64x32xf32>
    %167 = arith.addf %119, %166 : vector<64x32xf32>
    %c0_67 = arith.constant 0 : index
    %c0_68 = arith.constant 0 : index
    %168 = vector.load %arg15[%c0_67, %c0_68] : memref<64x32xf32, #tpu.memory_space<vmem>>, vector<64x32xf32>
    tpu.vector_store %arg15[%c0_67, %c0_68], %167 {strides = array<i32>} : memref<64x32xf32, #tpu.memory_space<vmem>>, vector<64x32xf32>,
    return
  }
  func.func @transform_0(%arg0: i32) -> (i32, i32) {
    %c0_i32 = arith.constant 0 : i32
    %c0_i32_0 = arith.constant 0 : i32
    return %arg0, %c0_i32 : i32, i32
  }
  func.func @transform_1(%arg0: i32) -> (i32, i32) {
    %c0_i32 = arith.constant 0 : i32
    %c0_i32_0 = arith.constant 0 : i32
    %c0_i32_1 = arith.constant 0 : i32
    return %c0_i32, %c0_i32_0 : i32, i32
  }
  func.func @transform_2(%arg0: i32) -> (i32, i32) {
    %c0_i32 = arith.constant 0 : i32
    %c0_i32_0 = arith.constant 0 : i32
    %c0_i32_1 = arith.constant 0 : i32
    return %c0_i32, %c0_i32_0 : i32, i32
  }
  func.func @transform_3(%arg0: i32) -> (i32, i32, i32) {
    %c0_i32 = arith.constant 0 : i32
    %c0_i32_0 = arith.constant 0 : i32
    %c0_i32_1 = arith.constant 0 : i32
    %c0_i32_2 = arith.constant 0 : i32
    return %c0_i32, %c0_i32_0, %c0_i32_1 : i32, i32, i32
  }
  func.func @transform_4(%arg0: i32) -> (i32, i32) {
    %c0_i32 = arith.constant 0 : i32
    %c0_i32_0 = arith.constant 0 : i32
    %c0_i32_1 = arith.constant 0 : i32
    return %c0_i32, %c0_i32_0 : i32, i32
  }
  func.func @transform_5(%arg0: i32) -> (i32, i32) {
    %c0_i32 = arith.constant 0 : i32
    %c0_i32_0 = arith.constant 0 : i32
    %c0_i32_1 = arith.constant 0 : i32
    return %c0_i32, %c0_i32_0 : i32, i32
  }
  func.func @transform_6(%arg0: i32) -> (i32, i32) {
    %c0_i32 = arith.constant 0 : i32
    %c0_i32_0 = arith.constant 0 : i32
    %c0_i32_1 = arith.constant 0 : i32
    return %c0_i32, %c0_i32_0 : i32, i32
  }
  func.func @transform_7(%arg0: i32) -> (i32, i32) {
    %c0_i32 = arith.constant 0 : i32
    %c0_i32_0 = arith.constant 0 : i32
    %c0_i32_1 = arith.constant 0 : i32
    return %c0_i32, %c0_i32_0 : i32, i32
  }
  func.func @transform_8(%arg0: i32) -> (i32, i32) {
    %c0_i32 = arith.constant 0 : i32
    %c0_i32_0 = arith.constant 0 : i32
    %c0_i32_1 = arith.constant 0 : i32
    return %c0_i32, %c0_i32_0 : i32, i32
  }
  func.func @transform_9(%arg0: i32) -> (i32, i32) {
    %c0_i32 = arith.constant 0 : i32
    %c0_i32_0 = arith.constant 0 : i32
    %c0_i32_1 = arith.constant 0 : i32
    return %c0_i32, %c0_i32_0 : i32, i32
  }
  func.func @transform_10(%arg0: i32) -> (i32, i32) {
    %c0_i32 = arith.constant 0 : i32
    %c0_i32_0 = arith.constant 0 : i32
    %c0_i32_1 = arith.constant 0 : i32
    return %c0_i32, %c0_i32_0 : i32, i32
  }
  func.func @transform_11(%arg0: i32) -> (i32, i32) {
    %c0_i32 = arith.constant 0 : i32
    %c0_i32_0 = arith.constant 0 : i32
    %c0_i32_1 = arith.constant 0 : i32
    return %c0_i32, %c0_i32_0 : i32, i32
  }
  func.func @transform_12(%arg0: i32) -> (i32, i32) {
    %c0_i32 = arith.constant 0 : i32
    %c0_i32_0 = arith.constant 0 : i32
    %c0_i32_1 = arith.constant 0 : i32
    return %c0_i32, %c0_i32_0 : i32, i32
  }
  func.func @transform_13(%arg0: i32) -> (i32, i32) {
    %c0_i32 = arith.constant 0 : i32
    %c0_i32_0 = arith.constant 0 : i32
    %c0_i32_1 = arith.constant 0 : i32
    return %c0_i32, %c0_i32_0 : i32, i32
  }
  func.func @transform_14(%arg0: i32) -> (i32, i32) {
    %c0_i32 = arith.constant 0 : i32
    %c0_i32_0 = arith.constant 0 : i32
    return %arg0, %c0_i32 : i32, i32
  }
}

module attributes {stable_mosaic.version = 11 : i64} {
  func.func @_ln_kernel(%arg0: i32, %arg1: memref<128x32xf32, #tpu.memory_space<vmem>>, %arg2: memref<1x32xf32, #tpu.memory_space<vmem>>, %arg3: memref<1x32xf32, #tpu.memory_space<vmem>>, %arg4: memref<128x32xf32, #tpu.memory_space<vmem>>) attributes {dimension_semantics = [#tpu.dimension_semantics<parallel>], iteration_bounds = array<i64: 2>, scalar_prefetch = 0 : i64, scratch_operands = 0 : i64, tpu.core_type = #tpu.core_type<tc>, window_params = [{transform_indices = @transform_0, window_bounds = array<i64: 128, 32>}, {pipeline_mode = #tpu.pipeline_mode<synchronous>, transform_indices = @transform_1, window_bounds = array<i64: 1, 32>}, {pipeline_mode = #tpu.pipeline_mode<synchronous>, transform_indices = @transform_2, window_bounds = array<i64: 1, 32>}, {transform_indices = @transform_3, window_bounds = array<i64: 128, 32>}]} {
    %c0 = arith.constant 0 : index
    %c0_0 = arith.constant 0 : index
    %0 = vector.load %arg1[%c0, %c0_0] : memref<128x32xf32, #tpu.memory_space<vmem>>, vector<128x32xf32>
    %c0_1 = arith.constant 0 : index
    %c0_2 = arith.constant 0 : index
    %1 = vector.load %arg2[%c0_1, %c0_2] : memref<1x32xf32, #tpu.memory_space<vmem>>, vector<1x32xf32>
    %c0_3 = arith.constant 0 : index
    %c0_4 = arith.constant 0 : index
    %2 = vector.load %arg3[%c0_3, %c0_4] : memref<1x32xf32, #tpu.memory_space<vmem>>, vector<1x32xf32>
    %cst = arith.constant dense<0.000000e+00> : vector<128xf32>
    %3 = vector.multi_reduction <add>, %0, %cst [1] : vector<128x32xf32> to vector<128xf32>
    %4 = vector.shape_cast %3 : vector<128xf32> to vector<128x1xf32>
    %cst_5 = arith.constant 3.200000e+01 : f32
    %5 = vector.broadcast %cst_5 : f32 to vector<128x1xf32>
    %6 = arith.divf %4, %5 : vector<128x1xf32>
    %7 = vector.broadcast %6 : vector<128x1xf32> to vector<128x32xf32>
    %8 = arith.subf %0, %7 : vector<128x32xf32>
    %9 = arith.mulf %8, %8 : vector<128x32xf32>
    %cst_6 = arith.constant dense<0.000000e+00> : vector<128xf32>
    %10 = vector.multi_reduction <add>, %9, %cst_6 [1] : vector<128x32xf32> to vector<128xf32>
    %11 = vector.shape_cast %10 : vector<128xf32> to vector<128x1xf32>
    %cst_7 = arith.constant 3.200000e+01 : f32
    %12 = vector.broadcast %cst_7 : f32 to vector<128x1xf32>
    %13 = arith.divf %11, %12 : vector<128x1xf32>
    %cst_8 = arith.constant 9.99999974E-6 : f32
    %14 = vector.broadcast %cst_8 : f32 to vector<128x1xf32>
    %15 = arith.addf %13, %14 : vector<128x1xf32>
    %16 = math.rsqrt %15 : vector<128x1xf32>
    %17 = vector.broadcast %16 : vector<128x1xf32> to vector<128x32xf32>
    %18 = arith.mulf %8, %17 : vector<128x32xf32>
    %19 = vector.broadcast %1 : vector<1x32xf32> to vector<128x32xf32>
    %20 = arith.mulf %18, %19 : vector<128x32xf32>
    %21 = vector.broadcast %2 : vector<1x32xf32> to vector<128x32xf32>
    %22 = arith.addf %20, %21 : vector<128x32xf32>
    %c0_9 = arith.constant 0 : index
    %c0_10 = arith.constant 0 : index
    %23 = vector.load %arg4[%c0_9, %c0_10] : memref<128x32xf32, #tpu.memory_space<vmem>>, vector<128x32xf32>
    tpu.vector_store %arg4[%c0_9, %c0_10], %22 {strides = array<i32>} : memref<128x32xf32, #tpu.memory_space<vmem>>, vector<128x32xf32>,
    return
  }
  func.func @transform_0(%arg0: i32) -> (i32, i32) {
    %c0_i32 = arith.constant 0 : i32
    %c0_i32_0 = arith.constant 0 : i32
    return %arg0, %c0_i32 : i32, i32
  }
  func.func @transform_1(%arg0: i32) -> (i32, i32) {
    %c0_i32 = arith.constant 0 : i32
    %c0_i32_0 = arith.constant 0 : i32
    %c0_i32_1 = arith.constant 0 : i32
    return %c0_i32, %c0_i32_0 : i32, i32
  }
  func.func @transform_2(%arg0: i32) -> (i32, i32) {
    %c0_i32 = arith.constant 0 : i32
    %c0_i32_0 = arith.constant 0 : i32
    %c0_i32_1 = arith.constant 0 : i32
    return %c0_i32, %c0_i32_0 : i32, i32
  }
  func.func @transform_3(%arg0: i32) -> (i32, i32) {
    %c0_i32 = arith.constant 0 : i32
    %c0_i32_0 = arith.constant 0 : i32
    return %arg0, %c0_i32 : i32, i32
  }
}

module attributes {stable_mosaic.version = 11 : i64} {
  func.func @_linear_ln_kernel(%arg0: i32, %arg1: memref<32x128xf32, #tpu.memory_space<vmem>>, %arg2: memref<128x64xbf16, #tpu.memory_space<vmem>>, %arg3: memref<1x64xf32, #tpu.memory_space<vmem>>, %arg4: memref<1x64xf32, #tpu.memory_space<vmem>>, %arg5: memref<32x64xf32, #tpu.memory_space<vmem>>) attributes {dimension_semantics = [#tpu.dimension_semantics<parallel>], iteration_bounds = array<i64: 2>, scalar_prefetch = 0 : i64, scratch_operands = 0 : i64, tpu.core_type = #tpu.core_type<tc>, window_params = [{transform_indices = @transform_0, window_bounds = array<i64: 32, 128>}, {pipeline_mode = #tpu.pipeline_mode<synchronous>, transform_indices = @transform_1, window_bounds = array<i64: 128, 64>}, {pipeline_mode = #tpu.pipeline_mode<synchronous>, transform_indices = @transform_2, window_bounds = array<i64: 1, 64>}, {pipeline_mode = #tpu.pipeline_mode<synchronous>, transform_indices = @transform_3, window_bounds = array<i64: 1, 64>}, {transform_indices = @transform_4, window_bounds = array<i64: 32, 64>}]} {
    %c0 = arith.constant 0 : index
    %c0_0 = arith.constant 0 : index
    %0 = vector.load %arg1[%c0, %c0_0] : memref<32x128xf32, #tpu.memory_space<vmem>>, vector<32x128xf32>
    %1 = arith.truncf %0 : vector<32x128xf32> to vector<32x128xbf16>
    %c0_1 = arith.constant 0 : index
    %c0_2 = arith.constant 0 : index
    %2 = vector.load %arg2[%c0_1, %c0_2] : memref<128x64xbf16, #tpu.memory_space<vmem>>, vector<128x64xbf16>
    %cst = arith.constant dense<0.000000e+00> : vector<32x64xf32>
    %3 = tpu.matmul %1, %2, %cst {dimension_numbers = #tpu.dot_dimension_numbers<[1], [0], [0], [1], [0, 0, 1, 1], [], []>} : vector<32x128xbf16>, vector<128x64xbf16>, vector<32x64xf32> -> vector<32x64xf32>
    %c0_3 = arith.constant 0 : index
    %c0_4 = arith.constant 0 : index
    %4 = vector.load %arg3[%c0_3, %c0_4] : memref<1x64xf32, #tpu.memory_space<vmem>>, vector<1x64xf32>
    %c0_5 = arith.constant 0 : index
    %c0_6 = arith.constant 0 : index
    %5 = vector.load %arg4[%c0_5, %c0_6] : memref<1x64xf32, #tpu.memory_space<vmem>>, vector<1x64xf32>
    %cst_7 = arith.constant dense<0.000000e+00> : vector<32xf32>
    %6 = vector.multi_reduction <add>, %3, %cst_7 [1] : vector<32x64xf32> to vector<32xf32>
    %7 = vector.shape_cast %6 : vector<32xf32> to vector<32x1xf32>
    %cst_8 = arith.constant 6.400000e+01 : f32
    %8 = vector.broadcast %cst_8 : f32 to vector<32x1xf32>
    %9 = arith.divf %7, %8 : vector<32x1xf32>
    %10 = vector.broadcast %9 : vector<32x1xf32> to vector<32x64xf32>
    %11 = arith.subf %3, %10 : vector<32x64xf32>
    %12 = arith.mulf %11, %11 : vector<32x64xf32>
    %cst_9 = arith.constant dense<0.000000e+00> : vector<32xf32>
    %13 = vector.multi_reduction <add>, %12, %cst_9 [1] : vector<32x64xf32> to vector<32xf32>
    %14 = vector.shape_cast %13 : vector<32xf32> to vector<32x1xf32>
    %cst_10 = arith.constant 6.400000e+01 : f32
    %15 = vector.broadcast %cst_10 : f32 to vector<32x1xf32>
    %16 = arith.divf %14, %15 : vector<32x1xf32>
    %cst_11 = arith.constant 9.99999974E-6 : f32
    %17 = vector.broadcast %cst_11 : f32 to vector<32x1xf32>
    %18 = arith.addf %16, %17 : vector<32x1xf32>
    %19 = math.rsqrt %18 : vector<32x1xf32>
    %20 = vector.broadcast %19 : vector<32x1xf32> to vector<32x64xf32>
    %21 = arith.mulf %11, %20 : vector<32x64xf32>
    %22 = vector.broadcast %4 : vector<1x64xf32> to vector<32x64xf32>
    %23 = arith.mulf %21, %22 : vector<32x64xf32>
    %24 = vector.broadcast %5 : vector<1x64xf32> to vector<32x64xf32>
    %25 = arith.addf %23, %24 : vector<32x64xf32>
    %c0_12 = arith.constant 0 : index
    %c0_13 = arith.constant 0 : index
    %26 = vector.load %arg5[%c0_12, %c0_13] : memref<32x64xf32, #tpu.memory_space<vmem>>, vector<32x64xf32>
    tpu.vector_store %arg5[%c0_12, %c0_13], %25 {strides = array<i32>} : memref<32x64xf32, #tpu.memory_space<vmem>>, vector<32x64xf32>,
    return
  }
  func.func @transform_0(%arg0: i32) -> (i32, i32) {
    %c0_i32 = arith.constant 0 : i32
    %c0_i32_0 = arith.constant 0 : i32
    return %arg0, %c0_i32 : i32, i32
  }
  func.func @transform_1(%arg0: i32) -> (i32, i32) {
    %c0_i32 = arith.constant 0 : i32
    %c0_i32_0 = arith.constant 0 : i32
    %c0_i32_1 = arith.constant 0 : i32
    return %c0_i32, %c0_i32_0 : i32, i32
  }
  func.func @transform_2(%arg0: i32) -> (i32, i32) {
    %c0_i32 = arith.constant 0 : i32
    %c0_i32_0 = arith.constant 0 : i32
    %c0_i32_1 = arith.constant 0 : i32
    return %c0_i32, %c0_i32_0 : i32, i32
  }
  func.func @transform_3(%arg0: i32) -> (i32, i32) {
    %c0_i32 = arith.constant 0 : i32
    %c0_i32_0 = arith.constant 0 : i32
    %c0_i32_1 = arith.constant 0 : i32
    return %c0_i32, %c0_i32_0 : i32, i32
  }
  func.func @transform_4(%arg0: i32) -> (i32, i32) {
    %c0_i32 = arith.constant 0 : i32
    %c0_i32_0 = arith.constant 0 : i32
    return %arg0, %c0_i32 : i32, i32
  }
}

module attributes {stable_mosaic.version = 11 : i64} {
  func.func @_ln_kernel(%arg0: i32, %arg1: memref<32x64xf32, #tpu.memory_space<vmem>>, %arg2: memref<1x64xf32, #tpu.memory_space<vmem>>, %arg3: memref<1x64xf32, #tpu.memory_space<vmem>>, %arg4: memref<32x64xf32, #tpu.memory_space<vmem>>) attributes {dimension_semantics = [#tpu.dimension_semantics<parallel>], iteration_bounds = array<i64: 2>, scalar_prefetch = 0 : i64, scratch_operands = 0 : i64, tpu.core_type = #tpu.core_type<tc>, window_params = [{transform_indices = @transform_0, window_bounds = array<i64: 32, 64>}, {pipeline_mode = #tpu.pipeline_mode<synchronous>, transform_indices = @transform_1, window_bounds = array<i64: 1, 64>}, {pipeline_mode = #tpu.pipeline_mode<synchronous>, transform_indices = @transform_2, window_bounds = array<i64: 1, 64>}, {transform_indices = @transform_3, window_bounds = array<i64: 32, 64>}]} {
    %c0 = arith.constant 0 : index
    %c0_0 = arith.constant 0 : index
    %0 = vector.load %arg1[%c0, %c0_0] : memref<32x64xf32, #tpu.memory_space<vmem>>, vector<32x64xf32>
    %c0_1 = arith.constant 0 : index
    %c0_2 = arith.constant 0 : index
    %1 = vector.load %arg2[%c0_1, %c0_2] : memref<1x64xf32, #tpu.memory_space<vmem>>, vector<1x64xf32>
    %c0_3 = arith.constant 0 : index
    %c0_4 = arith.constant 0 : index
    %2 = vector.load %arg3[%c0_3, %c0_4] : memref<1x64xf32, #tpu.memory_space<vmem>>, vector<1x64xf32>
    %cst = arith.constant dense<0.000000e+00> : vector<32xf32>
    %3 = vector.multi_reduction <add>, %0, %cst [1] : vector<32x64xf32> to vector<32xf32>
    %4 = vector.shape_cast %3 : vector<32xf32> to vector<32x1xf32>
    %cst_5 = arith.constant 6.400000e+01 : f32
    %5 = vector.broadcast %cst_5 : f32 to vector<32x1xf32>
    %6 = arith.divf %4, %5 : vector<32x1xf32>
    %7 = vector.broadcast %6 : vector<32x1xf32> to vector<32x64xf32>
    %8 = arith.subf %0, %7 : vector<32x64xf32>
    %9 = arith.mulf %8, %8 : vector<32x64xf32>
    %cst_6 = arith.constant dense<0.000000e+00> : vector<32xf32>
    %10 = vector.multi_reduction <add>, %9, %cst_6 [1] : vector<32x64xf32> to vector<32xf32>
    %11 = vector.shape_cast %10 : vector<32xf32> to vector<32x1xf32>
    %cst_7 = arith.constant 6.400000e+01 : f32
    %12 = vector.broadcast %cst_7 : f32 to vector<32x1xf32>
    %13 = arith.divf %11, %12 : vector<32x1xf32>
    %cst_8 = arith.constant 9.99999974E-6 : f32
    %14 = vector.broadcast %cst_8 : f32 to vector<32x1xf32>
    %15 = arith.addf %13, %14 : vector<32x1xf32>
    %16 = math.rsqrt %15 : vector<32x1xf32>
    %17 = vector.broadcast %16 : vector<32x1xf32> to vector<32x64xf32>
    %18 = arith.mulf %8, %17 : vector<32x64xf32>
    %19 = vector.broadcast %1 : vector<1x64xf32> to vector<32x64xf32>
    %20 = arith.mulf %18, %19 : vector<32x64xf32>
    %21 = vector.broadcast %2 : vector<1x64xf32> to vector<32x64xf32>
    %22 = arith.addf %20, %21 : vector<32x64xf32>
    %c0_9 = arith.constant 0 : index
    %c0_10 = arith.constant 0 : index
    %23 = vector.load %arg4[%c0_9, %c0_10] : memref<32x64xf32, #tpu.memory_space<vmem>>, vector<32x64xf32>
    tpu.vector_store %arg4[%c0_9, %c0_10], %22 {strides = array<i32>} : memref<32x64xf32, #tpu.memory_space<vmem>>, vector<32x64xf32>,
    return
  }
  func.func @transform_0(%arg0: i32) -> (i32, i32) {
    %c0_i32 = arith.constant 0 : i32
    %c0_i32_0 = arith.constant 0 : i32
    return %arg0, %c0_i32 : i32, i32
  }
  func.func @transform_1(%arg0: i32) -> (i32, i32) {
    %c0_i32 = arith.constant 0 : i32
    %c0_i32_0 = arith.constant 0 : i32
    %c0_i32_1 = arith.constant 0 : i32
    return %c0_i32, %c0_i32_0 : i32, i32
  }
  func.func @transform_2(%arg0: i32) -> (i32, i32) {
    %c0_i32 = arith.constant 0 : i32
    %c0_i32_0 = arith.constant 0 : i32
    %c0_i32_1 = arith.constant 0 : i32
    return %c0_i32, %c0_i32_0 : i32, i32
  }
  func.func @transform_3(%arg0: i32) -> (i32, i32) {
    %c0_i32 = arith.constant 0 : i32
    %c0_i32_0 = arith.constant 0 : i32
    return %arg0, %c0_i32 : i32, i32
  }
}

module attributes {stable_mosaic.version = 11 : i64} {
  func.func @_swin_block_kernel(%arg0: i32, %arg1: memref<16x64xf32, #tpu.memory_space<vmem>>, %arg2: memref<64x192xbf16, #tpu.memory_space<vmem>>, %arg3: memref<1x192xf32, #tpu.memory_space<vmem>>, %arg4: memref<4x16x16xf32, #tpu.memory_space<vmem>>, %arg5: memref<64x64xbf16, #tpu.memory_space<vmem>>, %arg6: memref<1x64xf32, #tpu.memory_space<vmem>>, %arg7: memref<1x64xf32, #tpu.memory_space<vmem>>, %arg8: memref<1x64xf32, #tpu.memory_space<vmem>>, %arg9: memref<64x256xbf16, #tpu.memory_space<vmem>>, %arg10: memref<1x256xf32, #tpu.memory_space<vmem>>, %arg11: memref<256x64xbf16, #tpu.memory_space<vmem>>, %arg12: memref<1x64xf32, #tpu.memory_space<vmem>>, %arg13: memref<1x64xf32, #tpu.memory_space<vmem>>, %arg14: memref<1x64xf32, #tpu.memory_space<vmem>>, %arg15: memref<16x64xf32, #tpu.memory_space<vmem>>) attributes {dimension_semantics = [#tpu.dimension_semantics<parallel>], iteration_bounds = array<i64: 4>, scalar_prefetch = 0 : i64, scratch_operands = 0 : i64, tpu.core_type = #tpu.core_type<tc>, window_params = [{transform_indices = @transform_0, window_bounds = array<i64: 16, 64>}, {pipeline_mode = #tpu.pipeline_mode<synchronous>, transform_indices = @transform_1, window_bounds = array<i64: 64, 192>}, {pipeline_mode = #tpu.pipeline_mode<synchronous>, transform_indices = @transform_2, window_bounds = array<i64: 1, 192>}, {pipeline_mode = #tpu.pipeline_mode<synchronous>, transform_indices = @transform_3, window_bounds = array<i64: 4, 16, 16>}, {pipeline_mode = #tpu.pipeline_mode<synchronous>, transform_indices = @transform_4, window_bounds = array<i64: 64, 64>}, {pipeline_mode = #tpu.pipeline_mode<synchronous>, transform_indices = @transform_5, window_bounds = array<i64: 1, 64>}, {pipeline_mode = #tpu.pipeline_mode<synchronous>, transform_indices = @transform_6, window_bounds = array<i64: 1, 64>}, {pipeline_mode = #tpu.pipeline_mode<synchronous>, transform_indices = @transform_7, window_bounds = array<i64: 1, 64>}, {pipeline_mode = #tpu.pipeline_mode<synchronous>, transform_indices = @transform_8, window_bounds = array<i64: 64, 256>}, {pipeline_mode = #tpu.pipeline_mode<synchronous>, transform_indices = @transform_9, window_bounds = array<i64: 1, 256>}, {pipeline_mode = #tpu.pipeline_mode<synchronous>, transform_indices = @transform_10, window_bounds = array<i64: 256, 64>}, {pipeline_mode = #tpu.pipeline_mode<synchronous>, transform_indices = @transform_11, window_bounds = array<i64: 1, 64>}, {pipeline_mode = #tpu.pipeline_mode<synchronous>, transform_indices = @transform_12, window_bounds = array<i64: 1, 64>}, {pipeline_mode = #tpu.pipeline_mode<synchronous>, transform_indices = @transform_13, window_bounds = array<i64: 1, 64>}, {transform_indices = @transform_14, window_bounds = array<i64: 16, 64>}]} {
    %c0 = arith.constant 0 : index
    %c0_0 = arith.constant 0 : index
    %0 = vector.load %arg1[%c0, %c0_0] : memref<16x64xf32, #tpu.memory_space<vmem>>, vector<16x64xf32>
    %1 = arith.truncf %0 : vector<16x64xf32> to vector<16x64xbf16>
    %c0_1 = arith.constant 0 : index
    %c0_2 = arith.constant 0 : index
    %2 = vector.load %arg2[%c0_1, %c0_2] : memref<64x192xbf16, #tpu.memory_space<vmem>>, vector<64x192xbf16>
    %cst = arith.constant dense<0.000000e+00> : vector<16x192xf32>
    %3 = tpu.matmul %1, %2, %cst {dimension_numbers = #tpu.dot_dimension_numbers<[1], [0], [0], [1], [0, 0, 1, 1], [], []>} : vector<16x64xbf16>, vector<64x192xbf16>, vector<16x192xf32> -> vector<16x192xf32>
    %c0_3 = arith.constant 0 : index
    %c0_4 = arith.constant 0 : index
    %4 = vector.load %arg3[%c0_3, %c0_4] : memref<1x192xf32, #tpu.memory_space<vmem>>, vector<1x192xf32>
    %5 = vector.broadcast %4 : vector<1x192xf32> to vector<16x192xf32>
    %6 = arith.addf %3, %5 : vector<16x192xf32>
    %7 = vector.extract_strided_slice %6 {offsets = [0, 0], sizes = [16, 16], strides = [1, 1]} : vector<16x192xf32> to vector<16x16xf32>
    %8 = vector.extract_strided_slice %6 {offsets = [0, 64], sizes = [16, 16], strides = [1, 1]} : vector<16x192xf32> to vector<16x16xf32>
    %9 = vector.extract_strided_slice %6 {offsets = [0, 128], sizes = [16, 16], strides = [1, 1]} : vector<16x192xf32> to vector<16x16xf32>
    %10 = arith.mulf %7, %7 : vector<16x16xf32>
    %cst_5 = arith.constant dense<0.000000e+00> : vector<16xf32>
    %11 = vector.multi_reduction <add>, %10, %cst_5 [1] : vector<16x16xf32> to vector<16xf32>
    %12 = vector.shape_cast %11 : vector<16xf32> to vector<16x1xf32>
    %cst_6 = arith.constant 9.99999996E-13 : f32
    %13 = vector.broadcast %cst_6 : f32 to vector<16x1xf32>
    %14 = arith.addf %12, %13 : vector<16x1xf32>
    %15 = math.rsqrt %14 : vector<16x1xf32>
    %16 = vector.broadcast %15 : vector<16x1xf32> to vector<16x16xf32>
    %17 = arith.mulf %7, %16 : vector<16x16xf32>
    %18 = arith.mulf %8, %8 : vector<16x16xf32>
    %cst_7 = arith.constant dense<0.000000e+00> : vector<16xf32>
    %19 = vector.multi_reduction <add>, %18, %cst_7 [1] : vector<16x16xf32> to vector<16xf32>
    %20 = vector.shape_cast %19 : vector<16xf32> to vector<16x1xf32>
    %cst_8 = arith.constant 9.99999996E-13 : f32
    %21 = vector.broadcast %cst_8 : f32 to vector<16x1xf32>
    %22 = arith.addf %20, %21 : vector<16x1xf32>
    %23 = math.rsqrt %22 : vector<16x1xf32>
    %24 = vector.broadcast %23 : vector<16x1xf32> to vector<16x16xf32>
    %25 = arith.mulf %8, %24 : vector<16x16xf32>
    %26 = arith.truncf %17 : vector<16x16xf32> to vector<16x16xbf16>
    %27 = arith.truncf %25 : vector<16x16xf32> to vector<16x16xbf16>
    %cst_9 = arith.constant dense<0.000000e+00> : vector<16x16xf32>
    %28 = tpu.matmul %26, %27, %cst_9 {dimension_numbers = #tpu.dot_dimension_numbers<[1], [1], [0], [0], [0, 0, 1, 0], [], []>} : vector<16x16xbf16>, vector<16x16xbf16>, vector<16x16xf32> -> vector<16x16xf32>
    %cst_10 = arith.constant 1.000000e+01 : f32
    %29 = vector.broadcast %cst_10 : f32 to vector<16x16xf32>
    %30 = arith.mulf %28, %29 : vector<16x16xf32>
    %c0_11 = arith.constant 0 : index
    %c0_12 = arith.constant 0 : index
    %c0_13 = arith.constant 0 : index
    %31 = vector.load %arg4[%c0_11, %c0_12, %c0_13] : memref<4x16x16xf32, #tpu.memory_space<vmem>>, vector<1x16x16xf32>
    %32 = vector.shape_cast %31 : vector<1x16x16xf32> to vector<16x16xf32>
    %33 = arith.addf %30, %32 : vector<16x16xf32>
    %cst_14 = arith.constant dense<0xFF800000> : vector<16xf32>
    %34 = vector.multi_reduction <maximumf>, %33, %cst_14 [1] : vector<16x16xf32> to vector<16xf32>
    %35 = vector.shape_cast %34 : vector<16xf32> to vector<16x1xf32>
    %36 = vector.broadcast %35 : vector<16x1xf32> to vector<16x16xf32>
    %37 = arith.subf %33, %36 : vector<16x16xf32>
    %38 = math.exp %37 : vector<16x16xf32>
    %cst_15 = arith.constant dense<0.000000e+00> : vector<16xf32>
    %39 = vector.multi_reduction <add>, %38, %cst_15 [1] : vector<16x16xf32> to vector<16xf32>
    %40 = vector.shape_cast %39 : vector<16xf32> to vector<16x1xf32>
    %41 = tpu.reciprocal %40 {approx = true} : vector<16x1xf32> -> vector<16x1xf32>
    %42 = vector.broadcast %41 : vector<16x1xf32> to vector<16x16xf32>
    %43 = arith.mulf %38, %42 : vector<16x16xf32>
    %44 = arith.truncf %43 : vector<16x16xf32> to vector<16x16xbf16>
    %45 = arith.truncf %9 : vector<16x16xf32> to vector<16x16xbf16>
    %cst_16 = arith.constant dense<0.000000e+00> : vector<16x16xf32>
    %46 = tpu.matmul %44, %45, %cst_16 {dimension_numbers = #tpu.dot_dimension_numbers<[1], [0], [0], [1], [0, 0, 1, 1], [], []>} : vector<16x16xbf16>, vector<16x16xbf16>, vector<16x16xf32> -> vector<16x16xf32>
    %47 = arith.truncf %46 : vector<16x16xf32> to vector<16x16xbf16>
    %c0_17 = arith.constant 0 : index
    %c0_18 = arith.constant 0 : index
    %48 = vector.load %arg5[%c0_17, %c0_18] : memref<64x64xbf16, #tpu.memory_space<vmem>>, vector<16x64xbf16>
    %cst_19 = arith.constant dense<0.000000e+00> : vector<16x64xf32>
    %49 = tpu.matmul %47, %48, %cst_19 {dimension_numbers = #tpu.dot_dimension_numbers<[1], [0], [0], [1], [0, 0, 1, 1], [], []>} : vector<16x16xbf16>, vector<16x64xbf16>, vector<16x64xf32> -> vector<16x64xf32>
    %50 = vector.extract_strided_slice %6 {offsets = [0, 16], sizes = [16, 16], strides = [1, 1]} : vector<16x192xf32> to vector<16x16xf32>
    %51 = vector.extract_strided_slice %6 {offsets = [0, 80], sizes = [16, 16], strides = [1, 1]} : vector<16x192xf32> to vector<16x16xf32>
    %52 = vector.extract_strided_slice %6 {offsets = [0, 144], sizes = [16, 16], strides = [1, 1]} : vector<16x192xf32> to vector<16x16xf32>
    %53 = arith.mulf %50, %50 : vector<16x16xf32>
    %cst_20 = arith.constant dense<0.000000e+00> : vector<16xf32>
    %54 = vector.multi_reduction <add>, %53, %cst_20 [1] : vector<16x16xf32> to vector<16xf32>
    %55 = vector.shape_cast %54 : vector<16xf32> to vector<16x1xf32>
    %cst_21 = arith.constant 9.99999996E-13 : f32
    %56 = vector.broadcast %cst_21 : f32 to vector<16x1xf32>
    %57 = arith.addf %55, %56 : vector<16x1xf32>
    %58 = math.rsqrt %57 : vector<16x1xf32>
    %59 = vector.broadcast %58 : vector<16x1xf32> to vector<16x16xf32>
    %60 = arith.mulf %50, %59 : vector<16x16xf32>
    %61 = arith.mulf %51, %51 : vector<16x16xf32>
    %cst_22 = arith.constant dense<0.000000e+00> : vector<16xf32>
    %62 = vector.multi_reduction <add>, %61, %cst_22 [1] : vector<16x16xf32> to vector<16xf32>
    %63 = vector.shape_cast %62 : vector<16xf32> to vector<16x1xf32>
    %cst_23 = arith.constant 9.99999996E-13 : f32
    %64 = vector.broadcast %cst_23 : f32 to vector<16x1xf32>
    %65 = arith.addf %63, %64 : vector<16x1xf32>
    %66 = math.rsqrt %65 : vector<16x1xf32>
    %67 = vector.broadcast %66 : vector<16x1xf32> to vector<16x16xf32>
    %68 = arith.mulf %51, %67 : vector<16x16xf32>
    %69 = arith.truncf %60 : vector<16x16xf32> to vector<16x16xbf16>
    %70 = arith.truncf %68 : vector<16x16xf32> to vector<16x16xbf16>
    %cst_24 = arith.constant dense<0.000000e+00> : vector<16x16xf32>
    %71 = tpu.matmul %69, %70, %cst_24 {dimension_numbers = #tpu.dot_dimension_numbers<[1], [1], [0], [0], [0, 0, 1, 0], [], []>} : vector<16x16xbf16>, vector<16x16xbf16>, vector<16x16xf32> -> vector<16x16xf32>
    %cst_25 = arith.constant 1.000000e+01 : f32
    %72 = vector.broadcast %cst_25 : f32 to vector<16x16xf32>
    %73 = arith.mulf %71, %72 : vector<16x16xf32>
    %c1 = arith.constant 1 : index
    %c0_26 = arith.constant 0 : index
    %c0_27 = arith.constant 0 : index
    %74 = vector.load %arg4[%c1, %c0_26, %c0_27] : memref<4x16x16xf32, #tpu.memory_space<vmem>>, vector<1x16x16xf32>
    %75 = vector.shape_cast %74 : vector<1x16x16xf32> to vector<16x16xf32>
    %76 = arith.addf %73, %75 : vector<16x16xf32>
    %cst_28 = arith.constant dense<0xFF800000> : vector<16xf32>
    %77 = vector.multi_reduction <maximumf>, %76, %cst_28 [1] : vector<16x16xf32> to vector<16xf32>
    %78 = vector.shape_cast %77 : vector<16xf32> to vector<16x1xf32>
    %79 = vector.broadcast %78 : vector<16x1xf32> to vector<16x16xf32>
    %80 = arith.subf %76, %79 : vector<16x16xf32>
    %81 = math.exp %80 : vector<16x16xf32>
    %cst_29 = arith.constant dense<0.000000e+00> : vector<16xf32>
    %82 = vector.multi_reduction <add>, %81, %cst_29 [1] : vector<16x16xf32> to vector<16xf32>
    %83 = vector.shape_cast %82 : vector<16xf32> to vector<16x1xf32>
    %84 = tpu.reciprocal %83 {approx = true} : vector<16x1xf32> -> vector<16x1xf32>
    %85 = vector.broadcast %84 : vector<16x1xf32> to vector<16x16xf32>
    %86 = arith.mulf %81, %85 : vector<16x16xf32>
    %87 = arith.truncf %86 : vector<16x16xf32> to vector<16x16xbf16>
    %88 = arith.truncf %52 : vector<16x16xf32> to vector<16x16xbf16>
    %cst_30 = arith.constant dense<0.000000e+00> : vector<16x16xf32>
    %89 = tpu.matmul %87, %88, %cst_30 {dimension_numbers = #tpu.dot_dimension_numbers<[1], [0], [0], [1], [0, 0, 1, 1], [], []>} : vector<16x16xbf16>, vector<16x16xbf16>, vector<16x16xf32> -> vector<16x16xf32>
    %90 = arith.truncf %89 : vector<16x16xf32> to vector<16x16xbf16>
    %c16 = arith.constant 16 : index
    %c0_31 = arith.constant 0 : index
    %91 = vector.load %arg5[%c16, %c0_31] : memref<64x64xbf16, #tpu.memory_space<vmem>>, vector<16x64xbf16>
    %cst_32 = arith.constant dense<0.000000e+00> : vector<16x64xf32>
    %92 = tpu.matmul %90, %91, %cst_32 {dimension_numbers = #tpu.dot_dimension_numbers<[1], [0], [0], [1], [0, 0, 1, 1], [], []>} : vector<16x16xbf16>, vector<16x64xbf16>, vector<16x64xf32> -> vector<16x64xf32>
    %93 = arith.addf %49, %92 : vector<16x64xf32>
    %94 = vector.extract_strided_slice %6 {offsets = [0, 32], sizes = [16, 16], strides = [1, 1]} : vector<16x192xf32> to vector<16x16xf32>
    %95 = vector.extract_strided_slice %6 {offsets = [0, 96], sizes = [16, 16], strides = [1, 1]} : vector<16x192xf32> to vector<16x16xf32>
    %96 = vector.extract_strided_slice %6 {offsets = [0, 160], sizes = [16, 16], strides = [1, 1]} : vector<16x192xf32> to vector<16x16xf32>
    %97 = arith.mulf %94, %94 : vector<16x16xf32>
    %cst_33 = arith.constant dense<0.000000e+00> : vector<16xf32>
    %98 = vector.multi_reduction <add>, %97, %cst_33 [1] : vector<16x16xf32> to vector<16xf32>
    %99 = vector.shape_cast %98 : vector<16xf32> to vector<16x1xf32>
    %cst_34 = arith.constant 9.99999996E-13 : f32
    %100 = vector.broadcast %cst_34 : f32 to vector<16x1xf32>
    %101 = arith.addf %99, %100 : vector<16x1xf32>
    %102 = math.rsqrt %101 : vector<16x1xf32>
    %103 = vector.broadcast %102 : vector<16x1xf32> to vector<16x16xf32>
    %104 = arith.mulf %94, %103 : vector<16x16xf32>
    %105 = arith.mulf %95, %95 : vector<16x16xf32>
    %cst_35 = arith.constant dense<0.000000e+00> : vector<16xf32>
    %106 = vector.multi_reduction <add>, %105, %cst_35 [1] : vector<16x16xf32> to vector<16xf32>
    %107 = vector.shape_cast %106 : vector<16xf32> to vector<16x1xf32>
    %cst_36 = arith.constant 9.99999996E-13 : f32
    %108 = vector.broadcast %cst_36 : f32 to vector<16x1xf32>
    %109 = arith.addf %107, %108 : vector<16x1xf32>
    %110 = math.rsqrt %109 : vector<16x1xf32>
    %111 = vector.broadcast %110 : vector<16x1xf32> to vector<16x16xf32>
    %112 = arith.mulf %95, %111 : vector<16x16xf32>
    %113 = arith.truncf %104 : vector<16x16xf32> to vector<16x16xbf16>
    %114 = arith.truncf %112 : vector<16x16xf32> to vector<16x16xbf16>
    %cst_37 = arith.constant dense<0.000000e+00> : vector<16x16xf32>
    %115 = tpu.matmul %113, %114, %cst_37 {dimension_numbers = #tpu.dot_dimension_numbers<[1], [1], [0], [0], [0, 0, 1, 0], [], []>} : vector<16x16xbf16>, vector<16x16xbf16>, vector<16x16xf32> -> vector<16x16xf32>
    %cst_38 = arith.constant 1.000000e+01 : f32
    %116 = vector.broadcast %cst_38 : f32 to vector<16x16xf32>
    %117 = arith.mulf %115, %116 : vector<16x16xf32>
    %c2 = arith.constant 2 : index
    %c0_39 = arith.constant 0 : index
    %c0_40 = arith.constant 0 : index
    %118 = vector.load %arg4[%c2, %c0_39, %c0_40] : memref<4x16x16xf32, #tpu.memory_space<vmem>>, vector<1x16x16xf32>
    %119 = vector.shape_cast %118 : vector<1x16x16xf32> to vector<16x16xf32>
    %120 = arith.addf %117, %119 : vector<16x16xf32>
    %cst_41 = arith.constant dense<0xFF800000> : vector<16xf32>
    %121 = vector.multi_reduction <maximumf>, %120, %cst_41 [1] : vector<16x16xf32> to vector<16xf32>
    %122 = vector.shape_cast %121 : vector<16xf32> to vector<16x1xf32>
    %123 = vector.broadcast %122 : vector<16x1xf32> to vector<16x16xf32>
    %124 = arith.subf %120, %123 : vector<16x16xf32>
    %125 = math.exp %124 : vector<16x16xf32>
    %cst_42 = arith.constant dense<0.000000e+00> : vector<16xf32>
    %126 = vector.multi_reduction <add>, %125, %cst_42 [1] : vector<16x16xf32> to vector<16xf32>
    %127 = vector.shape_cast %126 : vector<16xf32> to vector<16x1xf32>
    %128 = tpu.reciprocal %127 {approx = true} : vector<16x1xf32> -> vector<16x1xf32>
    %129 = vector.broadcast %128 : vector<16x1xf32> to vector<16x16xf32>
    %130 = arith.mulf %125, %129 : vector<16x16xf32>
    %131 = arith.truncf %130 : vector<16x16xf32> to vector<16x16xbf16>
    %132 = arith.truncf %96 : vector<16x16xf32> to vector<16x16xbf16>
    %cst_43 = arith.constant dense<0.000000e+00> : vector<16x16xf32>
    %133 = tpu.matmul %131, %132, %cst_43 {dimension_numbers = #tpu.dot_dimension_numbers<[1], [0], [0], [1], [0, 0, 1, 1], [], []>} : vector<16x16xbf16>, vector<16x16xbf16>, vector<16x16xf32> -> vector<16x16xf32>
    %134 = arith.truncf %133 : vector<16x16xf32> to vector<16x16xbf16>
    %c32 = arith.constant 32 : index
    %c0_44 = arith.constant 0 : index
    %135 = vector.load %arg5[%c32, %c0_44] : memref<64x64xbf16, #tpu.memory_space<vmem>>, vector<16x64xbf16>
    %cst_45 = arith.constant dense<0.000000e+00> : vector<16x64xf32>
    %136 = tpu.matmul %134, %135, %cst_45 {dimension_numbers = #tpu.dot_dimension_numbers<[1], [0], [0], [1], [0, 0, 1, 1], [], []>} : vector<16x16xbf16>, vector<16x64xbf16>, vector<16x64xf32> -> vector<16x64xf32>
    %137 = arith.addf %93, %136 : vector<16x64xf32>
    %138 = vector.extract_strided_slice %6 {offsets = [0, 48], sizes = [16, 16], strides = [1, 1]} : vector<16x192xf32> to vector<16x16xf32>
    %139 = vector.extract_strided_slice %6 {offsets = [0, 112], sizes = [16, 16], strides = [1, 1]} : vector<16x192xf32> to vector<16x16xf32>
    %140 = vector.extract_strided_slice %6 {offsets = [0, 176], sizes = [16, 16], strides = [1, 1]} : vector<16x192xf32> to vector<16x16xf32>
    %141 = arith.mulf %138, %138 : vector<16x16xf32>
    %cst_46 = arith.constant dense<0.000000e+00> : vector<16xf32>
    %142 = vector.multi_reduction <add>, %141, %cst_46 [1] : vector<16x16xf32> to vector<16xf32>
    %143 = vector.shape_cast %142 : vector<16xf32> to vector<16x1xf32>
    %cst_47 = arith.constant 9.99999996E-13 : f32
    %144 = vector.broadcast %cst_47 : f32 to vector<16x1xf32>
    %145 = arith.addf %143, %144 : vector<16x1xf32>
    %146 = math.rsqrt %145 : vector<16x1xf32>
    %147 = vector.broadcast %146 : vector<16x1xf32> to vector<16x16xf32>
    %148 = arith.mulf %138, %147 : vector<16x16xf32>
    %149 = arith.mulf %139, %139 : vector<16x16xf32>
    %cst_48 = arith.constant dense<0.000000e+00> : vector<16xf32>
    %150 = vector.multi_reduction <add>, %149, %cst_48 [1] : vector<16x16xf32> to vector<16xf32>
    %151 = vector.shape_cast %150 : vector<16xf32> to vector<16x1xf32>
    %cst_49 = arith.constant 9.99999996E-13 : f32
    %152 = vector.broadcast %cst_49 : f32 to vector<16x1xf32>
    %153 = arith.addf %151, %152 : vector<16x1xf32>
    %154 = math.rsqrt %153 : vector<16x1xf32>
    %155 = vector.broadcast %154 : vector<16x1xf32> to vector<16x16xf32>
    %156 = arith.mulf %139, %155 : vector<16x16xf32>
    %157 = arith.truncf %148 : vector<16x16xf32> to vector<16x16xbf16>
    %158 = arith.truncf %156 : vector<16x16xf32> to vector<16x16xbf16>
    %cst_50 = arith.constant dense<0.000000e+00> : vector<16x16xf32>
    %159 = tpu.matmul %157, %158, %cst_50 {dimension_numbers = #tpu.dot_dimension_numbers<[1], [1], [0], [0], [0, 0, 1, 0], [], []>} : vector<16x16xbf16>, vector<16x16xbf16>, vector<16x16xf32> -> vector<16x16xf32>
    %cst_51 = arith.constant 1.000000e+01 : f32
    %160 = vector.broadcast %cst_51 : f32 to vector<16x16xf32>
    %161 = arith.mulf %159, %160 : vector<16x16xf32>
    %c3 = arith.constant 3 : index
    %c0_52 = arith.constant 0 : index
    %c0_53 = arith.constant 0 : index
    %162 = vector.load %arg4[%c3, %c0_52, %c0_53] : memref<4x16x16xf32, #tpu.memory_space<vmem>>, vector<1x16x16xf32>
    %163 = vector.shape_cast %162 : vector<1x16x16xf32> to vector<16x16xf32>
    %164 = arith.addf %161, %163 : vector<16x16xf32>
    %cst_54 = arith.constant dense<0xFF800000> : vector<16xf32>
    %165 = vector.multi_reduction <maximumf>, %164, %cst_54 [1] : vector<16x16xf32> to vector<16xf32>
    %166 = vector.shape_cast %165 : vector<16xf32> to vector<16x1xf32>
    %167 = vector.broadcast %166 : vector<16x1xf32> to vector<16x16xf32>
    %168 = arith.subf %164, %167 : vector<16x16xf32>
    %169 = math.exp %168 : vector<16x16xf32>
    %cst_55 = arith.constant dense<0.000000e+00> : vector<16xf32>
    %170 = vector.multi_reduction <add>, %169, %cst_55 [1] : vector<16x16xf32> to vector<16xf32>
    %171 = vector.shape_cast %170 : vector<16xf32> to vector<16x1xf32>
    %172 = tpu.reciprocal %171 {approx = true} : vector<16x1xf32> -> vector<16x1xf32>
    %173 = vector.broadcast %172 : vector<16x1xf32> to vector<16x16xf32>
    %174 = arith.mulf %169, %173 : vector<16x16xf32>
    %175 = arith.truncf %174 : vector<16x16xf32> to vector<16x16xbf16>
    %176 = arith.truncf %140 : vector<16x16xf32> to vector<16x16xbf16>
    %cst_56 = arith.constant dense<0.000000e+00> : vector<16x16xf32>
    %177 = tpu.matmul %175, %176, %cst_56 {dimension_numbers = #tpu.dot_dimension_numbers<[1], [0], [0], [1], [0, 0, 1, 1], [], []>} : vector<16x16xbf16>, vector<16x16xbf16>, vector<16x16xf32> -> vector<16x16xf32>
    %178 = arith.truncf %177 : vector<16x16xf32> to vector<16x16xbf16>
    %c48 = arith.constant 48 : index
    %c0_57 = arith.constant 0 : index
    %179 = vector.load %arg5[%c48, %c0_57] : memref<64x64xbf16, #tpu.memory_space<vmem>>, vector<16x64xbf16>
    %cst_58 = arith.constant dense<0.000000e+00> : vector<16x64xf32>
    %180 = tpu.matmul %178, %179, %cst_58 {dimension_numbers = #tpu.dot_dimension_numbers<[1], [0], [0], [1], [0, 0, 1, 1], [], []>} : vector<16x16xbf16>, vector<16x64xbf16>, vector<16x64xf32> -> vector<16x64xf32>
    %181 = arith.addf %137, %180 : vector<16x64xf32>
    %c0_59 = arith.constant 0 : index
    %c0_60 = arith.constant 0 : index
    %182 = vector.load %arg6[%c0_59, %c0_60] : memref<1x64xf32, #tpu.memory_space<vmem>>, vector<1x64xf32>
    %183 = vector.broadcast %182 : vector<1x64xf32> to vector<16x64xf32>
    %184 = arith.addf %181, %183 : vector<16x64xf32>
    %c0_61 = arith.constant 0 : index
    %c0_62 = arith.constant 0 : index
    %185 = vector.load %arg7[%c0_61, %c0_62] : memref<1x64xf32, #tpu.memory_space<vmem>>, vector<1x64xf32>
    %c0_63 = arith.constant 0 : index
    %c0_64 = arith.constant 0 : index
    %186 = vector.load %arg8[%c0_63, %c0_64] : memref<1x64xf32, #tpu.memory_space<vmem>>, vector<1x64xf32>
    %cst_65 = arith.constant dense<0.000000e+00> : vector<16xf32>
    %187 = vector.multi_reduction <add>, %184, %cst_65 [1] : vector<16x64xf32> to vector<16xf32>
    %188 = vector.shape_cast %187 : vector<16xf32> to vector<16x1xf32>
    %cst_66 = arith.constant 6.400000e+01 : f32
    %189 = vector.broadcast %cst_66 : f32 to vector<16x1xf32>
    %190 = arith.divf %188, %189 : vector<16x1xf32>
    %191 = vector.broadcast %190 : vector<16x1xf32> to vector<16x64xf32>
    %192 = arith.subf %184, %191 : vector<16x64xf32>
    %193 = arith.mulf %192, %192 : vector<16x64xf32>
    %cst_67 = arith.constant dense<0.000000e+00> : vector<16xf32>
    %194 = vector.multi_reduction <add>, %193, %cst_67 [1] : vector<16x64xf32> to vector<16xf32>
    %195 = vector.shape_cast %194 : vector<16xf32> to vector<16x1xf32>
    %cst_68 = arith.constant 6.400000e+01 : f32
    %196 = vector.broadcast %cst_68 : f32 to vector<16x1xf32>
    %197 = arith.divf %195, %196 : vector<16x1xf32>
    %cst_69 = arith.constant 9.99999974E-6 : f32
    %198 = vector.broadcast %cst_69 : f32 to vector<16x1xf32>
    %199 = arith.addf %197, %198 : vector<16x1xf32>
    %200 = math.rsqrt %199 : vector<16x1xf32>
    %201 = vector.broadcast %200 : vector<16x1xf32> to vector<16x64xf32>
    %202 = arith.mulf %192, %201 : vector<16x64xf32>
    %203 = vector.broadcast %185 : vector<1x64xf32> to vector<16x64xf32>
    %204 = arith.mulf %202, %203 : vector<16x64xf32>
    %205 = vector.broadcast %186 : vector<1x64xf32> to vector<16x64xf32>
    %206 = arith.addf %204, %205 : vector<16x64xf32>
    %207 = arith.addf %0, %206 : vector<16x64xf32>
    %208 = arith.truncf %207 : vector<16x64xf32> to vector<16x64xbf16>
    %c0_70 = arith.constant 0 : index
    %c0_71 = arith.constant 0 : index
    %209 = vector.load %arg9[%c0_70, %c0_71] : memref<64x256xbf16, #tpu.memory_space<vmem>>, vector<64x256xbf16>
    %cst_72 = arith.constant dense<0.000000e+00> : vector<16x256xf32>
    %210 = tpu.matmul %208, %209, %cst_72 {dimension_numbers = #tpu.dot_dimension_numbers<[1], [0], [0], [1], [0, 0, 1, 1], [], []>} : vector<16x64xbf16>, vector<64x256xbf16>, vector<16x256xf32> -> vector<16x256xf32>
    %c0_73 = arith.constant 0 : index
    %c0_74 = arith.constant 0 : index
    %211 = vector.load %arg10[%c0_73, %c0_74] : memref<1x256xf32, #tpu.memory_space<vmem>>, vector<1x256xf32>
    %212 = vector.broadcast %211 : vector<1x256xf32> to vector<16x256xf32>
    %213 = arith.addf %210, %212 : vector<16x256xf32>
    %cst_75 = arith.constant 5.000000e-01 : f32
    %214 = vector.broadcast %cst_75 : f32 to vector<16x256xf32>
    %215 = arith.mulf %214, %213 : vector<16x256xf32>
    %cst_76 = arith.constant 4.471500e-02 : f32
    %216 = vector.broadcast %cst_76 : f32 to vector<16x256xf32>
    %217 = arith.mulf %216, %213 : vector<16x256xf32>
    %218 = arith.mulf %217, %213 : vector<16x256xf32>
    %219 = arith.mulf %218, %213 : vector<16x256xf32>
    %220 = arith.addf %213, %219 : vector<16x256xf32>
    %cst_77 = arith.constant 0.797884583 : f32
    %221 = vector.broadcast %cst_77 : f32 to vector<16x256xf32>
    %222 = arith.mulf %221, %220 : vector<16x256xf32>
    %223 = math.tanh %222 : vector<16x256xf32>
    %cst_78 = arith.constant 1.000000e+00 : f32
    %224 = vector.broadcast %cst_78 : f32 to vector<16x256xf32>
    %225 = arith.addf %224, %223 : vector<16x256xf32>
    %226 = arith.mulf %215, %225 : vector<16x256xf32>
    %227 = arith.truncf %226 : vector<16x256xf32> to vector<16x256xbf16>
    %c0_79 = arith.constant 0 : index
    %c0_80 = arith.constant 0 : index
    %228 = vector.load %arg11[%c0_79, %c0_80] : memref<256x64xbf16, #tpu.memory_space<vmem>>, vector<256x64xbf16>
    %cst_81 = arith.constant dense<0.000000e+00> : vector<16x64xf32>
    %229 = tpu.matmul %227, %228, %cst_81 {dimension_numbers = #tpu.dot_dimension_numbers<[1], [0], [0], [1], [0, 0, 1, 1], [], []>} : vector<16x256xbf16>, vector<256x64xbf16>, vector<16x64xf32> -> vector<16x64xf32>
    %c0_82 = arith.constant 0 : index
    %c0_83 = arith.constant 0 : index
    %230 = vector.load %arg12[%c0_82, %c0_83] : memref<1x64xf32, #tpu.memory_space<vmem>>, vector<1x64xf32>
    %231 = vector.broadcast %230 : vector<1x64xf32> to vector<16x64xf32>
    %232 = arith.addf %229, %231 : vector<16x64xf32>
    %c0_84 = arith.constant 0 : index
    %c0_85 = arith.constant 0 : index
    %233 = vector.load %arg13[%c0_84, %c0_85] : memref<1x64xf32, #tpu.memory_space<vmem>>, vector<1x64xf32>
    %c0_86 = arith.constant 0 : index
    %c0_87 = arith.constant 0 : index
    %234 = vector.load %arg14[%c0_86, %c0_87] : memref<1x64xf32, #tpu.memory_space<vmem>>, vector<1x64xf32>
    %cst_88 = arith.constant dense<0.000000e+00> : vector<16xf32>
    %235 = vector.multi_reduction <add>, %232, %cst_88 [1] : vector<16x64xf32> to vector<16xf32>
    %236 = vector.shape_cast %235 : vector<16xf32> to vector<16x1xf32>
    %cst_89 = arith.constant 6.400000e+01 : f32
    %237 = vector.broadcast %cst_89 : f32 to vector<16x1xf32>
    %238 = arith.divf %236, %237 : vector<16x1xf32>
    %239 = vector.broadcast %238 : vector<16x1xf32> to vector<16x64xf32>
    %240 = arith.subf %232, %239 : vector<16x64xf32>
    %241 = arith.mulf %240, %240 : vector<16x64xf32>
    %cst_90 = arith.constant dense<0.000000e+00> : vector<16xf32>
    %242 = vector.multi_reduction <add>, %241, %cst_90 [1] : vector<16x64xf32> to vector<16xf32>
    %243 = vector.shape_cast %242 : vector<16xf32> to vector<16x1xf32>
    %cst_91 = arith.constant 6.400000e+01 : f32
    %244 = vector.broadcast %cst_91 : f32 to vector<16x1xf32>
    %245 = arith.divf %243, %244 : vector<16x1xf32>
    %cst_92 = arith.constant 9.99999974E-6 : f32
    %246 = vector.broadcast %cst_92 : f32 to vector<16x1xf32>
    %247 = arith.addf %245, %246 : vector<16x1xf32>
    %248 = math.rsqrt %247 : vector<16x1xf32>
    %249 = vector.broadcast %248 : vector<16x1xf32> to vector<16x64xf32>
    %250 = arith.mulf %240, %249 : vector<16x64xf32>
    %251 = vector.broadcast %233 : vector<1x64xf32> to vector<16x64xf32>
    %252 = arith.mulf %250, %251 : vector<16x64xf32>
    %253 = vector.broadcast %234 : vector<1x64xf32> to vector<16x64xf32>
    %254 = arith.addf %252, %253 : vector<16x64xf32>
    %255 = arith.addf %207, %254 : vector<16x64xf32>
    %c0_93 = arith.constant 0 : index
    %c0_94 = arith.constant 0 : index
    %256 = vector.load %arg15[%c0_93, %c0_94] : memref<16x64xf32, #tpu.memory_space<vmem>>, vector<16x64xf32>
    tpu.vector_store %arg15[%c0_93, %c0_94], %255 {strides = array<i32>} : memref<16x64xf32, #tpu.memory_space<vmem>>, vector<16x64xf32>,
    return
  }
  func.func @transform_0(%arg0: i32) -> (i32, i32) {
    %c0_i32 = arith.constant 0 : i32
    %c0_i32_0 = arith.constant 0 : i32
    return %arg0, %c0_i32 : i32, i32
  }
  func.func @transform_1(%arg0: i32) -> (i32, i32) {
    %c0_i32 = arith.constant 0 : i32
    %c0_i32_0 = arith.constant 0 : i32
    %c0_i32_1 = arith.constant 0 : i32
    return %c0_i32, %c0_i32_0 : i32, i32
  }
  func.func @transform_2(%arg0: i32) -> (i32, i32) {
    %c0_i32 = arith.constant 0 : i32
    %c0_i32_0 = arith.constant 0 : i32
    %c0_i32_1 = arith.constant 0 : i32
    return %c0_i32, %c0_i32_0 : i32, i32
  }
  func.func @transform_3(%arg0: i32) -> (i32, i32, i32) {
    %c0_i32 = arith.constant 0 : i32
    %c0_i32_0 = arith.constant 0 : i32
    %c0_i32_1 = arith.constant 0 : i32
    %c0_i32_2 = arith.constant 0 : i32
    return %c0_i32, %c0_i32_0, %c0_i32_1 : i32, i32, i32
  }
  func.func @transform_4(%arg0: i32) -> (i32, i32) {
    %c0_i32 = arith.constant 0 : i32
    %c0_i32_0 = arith.constant 0 : i32
    %c0_i32_1 = arith.constant 0 : i32
    return %c0_i32, %c0_i32_0 : i32, i32
  }
  func.func @transform_5(%arg0: i32) -> (i32, i32) {
    %c0_i32 = arith.constant 0 : i32
    %c0_i32_0 = arith.constant 0 : i32
    %c0_i32_1 = arith.constant 0 : i32
    return %c0_i32, %c0_i32_0 : i32, i32
  }
  func.func @transform_6(%arg0: i32) -> (i32, i32) {
    %c0_i32 = arith.constant 0 : i32
    %c0_i32_0 = arith.constant 0 : i32
    %c0_i32_1 = arith.constant 0 : i32
    return %c0_i32, %c0_i32_0 : i32, i32
  }
  func.func @transform_7(%arg0: i32) -> (i32, i32) {
    %c0_i32 = arith.constant 0 : i32
    %c0_i32_0 = arith.constant 0 : i32
    %c0_i32_1 = arith.constant 0 : i32
    return %c0_i32, %c0_i32_0 : i32, i32
  }
  func.func @transform_8(%arg0: i32) -> (i32, i32) {
    %c0_i32 = arith.constant 0 : i32
    %c0_i32_0 = arith.constant 0 : i32
    %c0_i32_1 = arith.constant 0 : i32
    return %c0_i32, %c0_i32_0 : i32, i32
  }
  func.func @transform_9(%arg0: i32) -> (i32, i32) {
    %c0_i32 = arith.constant 0 : i32
    %c0_i32_0 = arith.constant 0 : i32
    %c0_i32_1 = arith.constant 0 : i32
    return %c0_i32, %c0_i32_0 : i32, i32
  }
  func.func @transform_10(%arg0: i32) -> (i32, i32) {
    %c0_i32 = arith.constant 0 : i32
    %c0_i32_0 = arith.constant 0 : i32
    %c0_i32_1 = arith.constant 0 : i32
    return %c0_i32, %c0_i32_0 : i32, i32
  }
  func.func @transform_11(%arg0: i32) -> (i32, i32) {
    %c0_i32 = arith.constant 0 : i32
    %c0_i32_0 = arith.constant 0 : i32
    %c0_i32_1 = arith.constant 0 : i32
    return %c0_i32, %c0_i32_0 : i32, i32
  }
  func.func @transform_12(%arg0: i32) -> (i32, i32) {
    %c0_i32 = arith.constant 0 : i32
    %c0_i32_0 = arith.constant 0 : i32
    %c0_i32_1 = arith.constant 0 : i32
    return %c0_i32, %c0_i32_0 : i32, i32
  }
  func.func @transform_13(%arg0: i32) -> (i32, i32) {
    %c0_i32 = arith.constant 0 : i32
    %c0_i32_0 = arith.constant 0 : i32
    %c0_i32_1 = arith.constant 0 : i32
    return %c0_i32, %c0_i32_0 : i32, i32
  }
  func.func @transform_14(%arg0: i32) -> (i32, i32) {
    %c0_i32 = arith.constant 0 : i32
    %c0_i32_0 = arith.constant 0 : i32
    return %arg0, %c0_i32 : i32, i32
  }
}

</mosaic_0001>

<bundles_post_ra>
// kernel: _lambda_.6
= control target key start
LH: loop header
LB: loop body
LE: loop exit
PB: predicated region body
PF: predicated region fallthrough
CT: control target
= control target key end

     0   :  { %s955_s18 = smov 0   ;;  %s1411_s0 = inlined_call_operand.vmem [shape: f32[256,48], index: 0, kind: input, shape index: {}]   ;;  %s1412_s1 = inlined_call_operand.vmem [shape: bf16[48,32], index: 1, kind: input, shape index: {}]   ;;  %s1413_s2 = inlined_call_operand.vmem [shape: f32[1,32], index: 2, kind: input, shape index: {}, may-alias: {2,4}]   ;;  %s1414_s3 = inlined_call_operand.vmem [shape: f32[1,32], index: 3, kind: input, shape index: {}]   ;;  %s1415_s4 = inlined_call_operand.vmem [shape: f32[1,32], index: 4, kind: input, shape index: {}, may-alias: {2,4}]   ;;  %s1416_s5 = inlined_call_operand.vmem [shape: f32[256,32], index: 5, kind: output, shape index: {}]  }
   0x1 LB: > { %s827_s19 = sadd.s32 4294967295, %s922_s18   ;;  %p831_p0 = scmp.ge.s32.totalorder %s922_s18, 1  ;;  %s922_s18 = sphi %s955_s18, %s15_s18  }
   0x2   : > { %p188_p1 = scmp.lt.s32.totalorder %s922_s18, 3 }
   0x4   : > { %p189_p2 = pnand %p831_p0, %p188_p1 }
   0x5   : > { %s832_s22 = sshll.u32 (!%p189_p2), %s827_s19, 4 }
   0x6   : > { %192 = sbr.rel (%p189_p2) target bundleno = 475 (0x1db), region = 40  ;;  %p217_p3 = scmp.lt.s32.totalorder (!%p189_p2), %s832_s22, 31 }
   0xb   : > { %v860_v0 = vld [vmem:[%s1412_s1 + $0x10] sm:$0xff]  ;;  %v859_v1 = vld [vmem:[%s1412_s1 + $0x8] sm:$0xff]  ;;  %s1418_s22 = smov (!%p217_p3, %s832_s22), 31  ;;  %v858_v2 = vld [vmem:[%s1412_s1] sm:$0xff]  ;;  %vm281_vm0 = vcmask 392192   ;;  %vm357_vm1 = vcmask 261120  }
   0xc   : > { %311 = vmatpush.bf16.msra.mxu0 %v860_v0  ;;  %861 = vmatpush.bf16.msra.mxu1 %v860_v0  ;;  %s833_s25 = sshll.u32 %s1418_s22, 3  ;;  %v1009_v27 = vld [vmem:[%s1413_s2] ss:$0 sm:$0xff] }
   0xd   : > { %862 = vmatpush.bf16.msra.mxu2 %v860_v0  ;;  %863 = vmatpush.bf16.msra.mxu3 %v860_v0  ;;  %s980_s30 = scalar_lea.vmem %s1411_s0, %s833_s25  ;;  %s1248_s14 = scalar_lea.vmem %s1416_s5, %s833_s25 }
   0xe   : > { %v229_v3 = vld [vmem:[%s980_s30] sm:$0xff]  ;;  %v230_v4 = vld [vmem:[%s980_s30 + $0x8] sm:$0xff]  ;;  %v231_v15 = vld [vmem:[%s980_s30 + $0x10] sm:$0xff] }
   0xf   : > { %v233_v5 = vld [vmem:[%s980_s30 + $0x20] sm:$0xff]  ;;  %v234_v6 = vld [vmem:[%s980_s30 + $0x28] sm:$0xff]  ;;  %v245_v9 = vpack.c.bf16 %v230_v4, %v229_v3  ;;  %v232_v16 = vld [vmem:[%s980_s30 + $0x18] sm:$0xff] }
  0x10   : > { %312 = vmatpush.bf16.msra.mxu0 %v859_v1  ;;  %864 = vmatpush.bf16.msra.mxu1 %v859_v1  ;;  %v237_v7 = vld [vmem:[%s980_s30 + $0x40] sm:$0xff]  ;;  %v238_v8 = vld [vmem:[%s980_s30 + $0x48] sm:$0xff]  ;;  %v247_v10 = vpack.c.bf16 %v234_v6, %v233_v5  ;;  %v239_v17 = vld [vmem:[%s980_s30 + $0x50] sm:$0xff]  ;;  %v246_v23 = vpack.c.bf16 %v232_v16, %v231_v15 }
  0x11   : > { %865 = vmatpush.bf16.msra.mxu2 %v859_v1  ;;  %866 = vmatpush.bf16.msra.mxu3 %v859_v1  ;;  %v241_v11 = vld [vmem:[%s980_s30 + $0x60] sm:$0xff]  ;;  %v242_v12 = vld [vmem:[%s980_s30 + $0x68] sm:$0xff]  ;;  %v249_v13 = vpack.c.bf16 %v238_v8, %v237_v7  ;;  %v235_v18 = vld [vmem:[%s980_s30 + $0x30] sm:$0xff] }
  0x12   : > { %v251_v14 = vpack.c.bf16 %v242_v12, %v241_v11  ;;  %v236_v19 = vld [vmem:[%s980_s30 + $0x38] sm:$0xff]  ;;  %v243_v21 = vld [vmem:[%s980_s30 + $0x70] sm:$0xff]  ;;  %v924_v12 = vmov 32.0  }
  0x13   : > { %v240_v20 = vld [vmem:[%s980_s30 + $0x58] sm:$0xff]  ;;  %v248_v24 = vpack.c.bf16 %v236_v19, %v235_v18  ;;  %882 = vrcp.f32 %v924_v12 }
  0x14   : > { %313 = vmatpush.bf16.msra.mxu0 %v858_v2  ;;  %867 = vmatpush.bf16.msra.mxu1 %v858_v2  ;;  %v244_v22 = vld [vmem:[%s980_s30 + $0x78] sm:$0xff]  ;;  %v250_v25 = vpack.c.bf16 %v240_v20, %v239_v17 }
  0x15   : > { %868 = vmatpush.bf16.msra.mxu2 %v858_v2  ;;  %869 = vmatpush.bf16.msra.mxu3 %v858_v2  ;;  %v252_v26 = vpack.c.bf16 %v244_v22, %v243_v21 }
  0x17   : > { %848 = vmatmul.msk.bf16.vlgmr.msra.gmra.mxu0 %vm281_vm0, %v245_v9  ;;  %850 = vmatmul.msk.bf16.vlgmr.msra.gmra.mxu1 %vm281_vm0, %v247_v10 }
  0x18   : > { %852 = vmatmul.msk.bf16.vlgmr.msra.gmra.mxu2 %vm281_vm0, %v249_v13  ;;  %854 = vmatmul.msk.bf16.vlgmr.msra.gmra.mxu3 %vm281_vm0, %v251_v14 }
  0x19   : > { %v883_v13 = vpop.eup %882 }
  0x1a   : > { %v407_v14 = vmul.f32 32.0, %v883_v13  ;;  %vm411_vm2 = vweird.f32 %v883_v13 }
  0x1c   : > { %v408_v15 = vsub.f32 1.0, %v407_v14 }
  0x1e   : > { %v409_v16 = vmul.f32 %v883_v13, %v408_v15 }
  0x20   : > { %v410_v17 = vadd.f32 %v883_v13, %v409_v16 }
  0x22   : > { %v1091_v18 = vsel %vm411_vm2, %v883_v13, %v410_v17 }
  0x27   : > { %849 = vmatmul.msk.bf16.gmra.mxu0 %vm281_vm0, %v246_v23  ;;  %851 = vmatmul.msk.bf16.gmra.mxu1 %vm281_vm0, %v248_v24 }
  0x28   : > { %853 = vmatmul.msk.bf16.gmra.mxu2 %vm281_vm0, %v250_v25  ;;  %855 = vmatmul.msk.bf16.gmra.mxu3 %vm281_vm0, %v252_v26 }
  0x94   : > { %v315_v28 = vpop.f32.mrf.mxu0  ;;  %v325_v29 = vpop.f32.mrf.mxu1 }
  0x95   : > { %v1012_v30 = vadd.f32 %v1009_v27, %v315_v28  ;;  %v1015_v31 = vadd.f32 %v1009_v27, %v325_v29 }
  0x97   : > { %v370_v32 = vsel %vm357_vm1, %v1015_v31, 0.0  ;;  %v358_v33 = vsel %vm357_vm1, %v1012_v30, 0.0 }
  0x98   : > { %371 = vadd.xlane.f32.xlu2 %v370_v32  ;;  %359 = vadd.xlane.f32.xlu0 %v358_v33 }
  0x9b   : > { %v335_v34 = vpop.f32.mrf.mxu2  ;;  %v345_v35 = vpop.f32.mrf.mxu3 }
  0x9c   : > { %v1022_v36 = vadd.f32 %v1009_v27, %v335_v34  ;;  %v1025_v37 = vadd.f32 %v1009_v27, %v345_v35  ;;  %v317_v38 = vpop.f32.mrf.mxu0  ;;  %v327_v41 = vpop.f32.mrf.mxu1 }
  0x9d   : > { %v1032_v42 = vadd.f32 %v1009_v27, %v317_v38  ;;  %v1035_v43 = vadd.f32 %v1009_v27, %v327_v41 }
  0x9e   : > { %v382_v39 = vsel %vm357_vm1, %v1022_v36, 0.0  ;;  %v394_v40 = vsel %vm357_vm1, %v1025_v37, 0.0 }
  0x9f   : > { %v373_v49 = vsel %vm357_vm1, %v1035_v43, 0.0  ;;  %v361_v50 = vsel %vm357_vm1, %v1032_v42, 0.0 }
  0xa0   : > { %383 = vadd.xlane.f32.xlu2 %v382_v39  ;;  %395 = vadd.xlane.f32.xlu0 %v394_v40 }
  0xa3   : > { %v337_v44 = vpop.f32.mrf.mxu2  ;;  %v347_v45 = vpop.f32.mrf.mxu3 }
  0xa4   : > { %v1038_v46 = vadd.f32 %v1009_v27, %v347_v45  ;;  %v320_v48 = vpop.f32.mrf.mxu0  ;;  %v1050_v52 = vadd.f32 %v1009_v27, %v337_v44  ;;  %v330_v58 = vpop.f32.mrf.mxu1 }
  0xa5   : > { %v1047_v51 = vadd.f32 %v1009_v27, %v320_v48  ;;  %v1060_v59 = vadd.f32 %v1009_v27, %v330_v58 }
  0xa6   : > { %v397_v47 = vsel %vm357_vm1, %v1038_v46, 0.0  ;;  %v385_v56 = vsel %vm357_vm1, %v1050_v52, 0.0 }
  0xa7   : > { %398 = vadd.xlane.f32.xlu1 %v397_v47  ;;  %v364_v54 = vsel %vm357_vm1, %v1047_v51, 0.0  ;;  %v376_v63 = vsel %vm357_vm1, %v1060_v59, 0.0 }
  0xa8   : > { %374 = vadd.xlane.f32.xlu2 %v373_v49  ;;  %362 = vadd.xlane.f32.xlu0 %v361_v50 }
  0xab   : > { %v340_v53 = vpop.f32.mrf.mxu2  ;;  %v350_v55 = vpop.f32.mrf.mxu3 }
  0xac   : > { %v1057_v57 = vadd.f32 %v1009_v27, %v340_v53  ;;  %v322_v2 = vpop.f32.mrf.mxu0  ;;  %v1072_v3 = vadd.f32 %v1009_v27, %v350_v55  ;;  %v332_v9 = vpop.f32.mrf.mxu1 }
  0xad   : > { %v1078_v5 = vadd.f32 %v1009_v27, %v322_v2  ;;  %v1087_v10 = vadd.f32 %v1009_v27, %v332_v9 }
  0xae   : > { %v388_v62 = vsel %vm357_vm1, %v1057_v57, 0.0  ;;  %v400_v6 = vsel %vm357_vm1, %v1072_v3, 0.0 }
  0xaf   : > { %365 = vadd.xlane.f32.xlu1 %v364_v54  ;;  %v367_v8 = vsel %vm357_vm1, %v1078_v5, 0.0  ;;  %v379_v11 = vsel %vm357_vm1, %v1087_v10, 0.0 }
  0xb0   : > { %386 = vadd.xlane.f32.xlu0 %v385_v56 }
  0xb3   : > { %v342_v60 = vpop.f32.mrf.mxu2  ;;  %v352_v1 = vpop.f32.mrf.mxu3 }
  0xb4   : > { %v1063_v61 = vadd.f32 %v1009_v27, %v342_v60  ;;  %v1075_v4 = vadd.f32 %v1009_v27, %v352_v1 }
  0xb6   : > { %v391_v0 = vsel %vm357_vm1, %v1063_v61, 0.0  ;;  %v403_v7 = vsel %vm357_vm1, %v1075_v4, 0.0 }
  0xb7   : > { %392 = vadd.xlane.f32.xlu2 %v391_v0  ;;  %389 = vadd.xlane.f32.xlu1 %v388_v62 }
  0xb8   : > { %377 = vadd.xlane.f32.xlu0 %v376_v63 }
  0xbf   : > { %401 = vadd.xlane.f32.xlu2 %v400_v6  ;;  %368 = vadd.xlane.f32.xlu1 %v367_v8 }
  0xc0   : > { %404 = vadd.xlane.f32.xlu0 %v403_v7 }
  0xc7   : > { %380 = vadd.xlane.f32.xlu1 %v379_v11 }
 0x10b   : > { %v372_v19 = vpop.xlane.xlu2 %371  ;;  %v360_v20 = vpop.xlane.xlu0 %359 }
 0x10c   : > { %v417_v21 = vmul.f32 %v1091_v18, %v372_v19  ;;  %v413_v22 = vmul.f32 %v1091_v18, %v360_v20 }
 0x10e   : > { %v1096_v23 = vsub.f32 %v1015_v31, %v417_v21  ;;  %v1099_v24 = vsub.f32 %v1012_v30, %v413_v22 }
 0x110   : > { %v449_v25 = vmul.f32 %v1096_v23, %v1096_v23  ;;  %v445_v26 = vmul.f32 %v1099_v24, %v1099_v24 }
 0x112   : > { %v473_v27 = vsel %vm357_vm1, %v449_v25, 0.0  ;;  %v461_v28 = vsel %vm357_vm1, %v445_v26, 0.0 }
 0x113   : > { %474 = vadd.xlane.f32.xlu2 %v473_v27  ;;  %v384_v29 = vpop.xlane.xlu2 %383  ;;  %462 = vadd.xlane.f32.xlu1 %v461_v28  ;;  %v396_v32 = vpop.xlane.xlu0 %395 }
 0x114   : > { %v421_v31 = vmul.f32 %v1091_v18, %v384_v29  ;;  %v425_v33 = vmul.f32 %v1091_v18, %v396_v32 }
 0x116   : > { %v1110_v30 = vsub.f32 %v1022_v36, %v421_v31  ;;  %v1113_v34 = vsub.f32 %v1025_v37, %v425_v33 }
 0x118   : > { %v453_v35 = vmul.f32 %v1110_v30, %v1110_v30  ;;  %v457_v38 = vmul.f32 %v1113_v34, %v1113_v34 }
 0x11a   : > { %v1119_v39 = vpop.xlane.xlu1 %398  ;;  %v485_v40 = vsel %vm357_vm1, %v453_v35, 0.0  ;;  %v497_v41 = vsel %vm357_vm1, %v457_v38, 0.0 }
 0x11b   : > { %v375_v44 = vpop.xlane.xlu2 %374  ;;  %486 = vadd.xlane.f32.xlu0 %v485_v40  ;;  %498 = vadd.xlane.f32.xlu1 %v497_v41  ;;  %v363_v36 = vpop.xlane.xlu0 %362 }
 0x11c   : > { %v418_v45 = vmul.f32 %v1091_v18, %v375_v44  ;;  %v414_v37 = vmul.f32 %v1091_v18, %v363_v36 }
 0x11e   : > { %v1126_v47 = vsub.f32 %v1035_v43, %v418_v45  ;;  %v1129_v48 = vsub.f32 %v1032_v42, %v414_v37 }
 0x120   : > { %v450_v49 = vmul.f32 %v1126_v47, %v1126_v47  ;;  %v446_v50 = vmul.f32 %v1129_v48, %v1129_v48 }
 0x122   : > { %v366_v53 = vpop.xlane.xlu1 %365  ;;  %v476_v54 = vsel %vm357_vm1, %v450_v49, 0.0  ;;  %v464_v55 = vsel %vm357_vm1, %v446_v50, 0.0 }
 0x123   : > { %v415_v56 = vmul.f32 %v1091_v18, %v366_v53  ;;  %477 = vadd.xlane.f32.xlu0 %v476_v54  ;;  %465 = vadd.xlane.f32.xlu2 %v464_v55  ;;  %v387_v43 = vpop.xlane.xlu0 %386 }
 0x124   : > { %v422_v58 = vmul.f32 %v1091_v18, %v387_v43 }
 0x125   : > { %v1140_v42 = vsub.f32 %v1047_v51, %v415_v56 }
 0x126   : > { %v1143_v60 = vsub.f32 %v1050_v52, %v422_v58 }
 0x127   : > { %v447_v62 = vmul.f32 %v1140_v42, %v1140_v42 }
 0x128   : > { %v454_v63 = vmul.f32 %v1143_v60, %v1143_v60 }
 0x129   : > { %v467_v2 = vsel %vm357_vm1, %v447_v62, 0.0 }
 0x12a   : > { %v393_v0 = vpop.xlane.xlu2 %392  ;;  %v390_v1 = vpop.xlane.xlu1 %389  ;;  %v488_v6 = vsel %vm357_vm1, %v454_v63, 0.0 }
 0x12b   : > { %v424_v7 = vmul.f32 %v1091_v18, %v393_v0  ;;  %v423_v51 = vmul.f32 %v1091_v18, %v390_v1  ;;  %468 = vadd.xlane.f32.xlu0 %v467_v2  ;;  %489 = vadd.xlane.f32.xlu1 %v488_v6  ;;  %v378_v52 = vpop.xlane.xlu0 %377 }
 0x12c   : > { %v419_v8 = vmul.f32 %v1091_v18, %v378_v52 }
 0x12d   : > { %v1155_v9 = vsub.f32 %v1063_v61, %v424_v7  ;;  %v1158_v11 = vsub.f32 %v1057_v57, %v423_v51 }
 0x12e   : > { %v1161_v12 = vsub.f32 %v1060_v59, %v419_v8 }
 0x12f   : > { %v455_v13 = vmul.f32 %v1158_v11, %v1158_v11  ;;  %v456_v14 = vmul.f32 %v1155_v9, %v1155_v9 }
 0x130   : > { %v451_v15 = vmul.f32 %v1161_v12, %v1161_v12 }
 0x131   : > { %v491_v16 = vsel %vm357_vm1, %v455_v13, 0.0  ;;  %v494_v57 = vsel %vm357_vm1, %v456_v14, 0.0 }
 0x132   : > { %v402_v17 = vpop.xlane.xlu2 %401  ;;  %v369_v61 = vpop.xlane.xlu1 %368  ;;  %492 = vadd.xlane.f32.xlu2 %v491_v16  ;;  %v479_v19 = vsel %vm357_vm1, %v451_v15, 0.0 }
 0x133   : > { %v427_v59 = vmul.f32 %v1091_v18, %v402_v17  ;;  %v416_v20 = vmul.f32 %v1091_v18, %v369_v61  ;;  %495 = vadd.xlane.f32.xlu0 %v494_v57  ;;  %480 = vadd.xlane.f32.xlu1 %v479_v19  ;;  %v405_v21 = vpop.xlane.xlu0 %404 }
 0x134   : > { %v428_v26 = vmul.f32 %v1091_v18, %v405_v21  ;;  %v1228_v21 = vld [vmem:[%s1414_s3] ss:$0 sm:$0xff] }
 0x135   : > { %v1175_v22 = vsub.f32 %v1072_v3, %v427_v59  ;;  %v1178_v25 = vsub.f32 %v1078_v5, %v416_v20  ;;  %v426_v5 = vmul.f32 %v1091_v18, %v1119_v39 }
 0x136   : > { %v1186_v29 = vsub.f32 %v1075_v4, %v428_v26 }
 0x137   : > { %v459_v27 = vmul.f32 %v1175_v22, %v1175_v22  ;;  %v448_v28 = vmul.f32 %v1178_v25, %v1178_v25  ;;  %v1201_v40 = vsub.f32 %v1038_v46, %v426_v5 }
 0x138   : > { %v460_v38 = vmul.f32 %v1186_v29, %v1186_v29 }
 0x139   : > { %v503_v31 = vsel %vm357_vm1, %v459_v27, 0.0  ;;  %v470_v3 = vsel %vm357_vm1, %v448_v28, 0.0  ;;  %v458_v39 = vmul.f32 %v1201_v40, %v1201_v40 }
 0x13a   : > { %v381_v32 = vpop.xlane.xlu1 %380  ;;  %v506_v44 = vsel %vm357_vm1, %v460_v38, 0.0 }
 0x13b   : > { %v420_v33 = vmul.f32 %v1091_v18, %v381_v32  ;;  %504 = vadd.xlane.f32.xlu0 %v503_v31  ;;  %471 = vadd.xlane.f32.xlu1 %v470_v3  ;;  %v1236_v31 = vld [vmem:[%s1415_s4] ss:$0 sm:$0xff] }
 0x13d   : > { %v1194_v35 = vsub.f32 %v1087_v10, %v420_v33  ;;  %v500_v10 = vsel %vm357_vm1, %v458_v39, 0.0 }
 0x13f   : > { %v452_v4 = vmul.f32 %v1194_v35, %v1194_v35 }
 0x141   : > { %v482_v41 = vsel %vm357_vm1, %v452_v4, 0.0 }
 0x142   : > { %483 = vadd.xlane.f32.xlu2 %v482_v41 }
 0x143   : > { %507 = vadd.xlane.f32.xlu1 %v506_v44 }
 0x14a   : > { %501 = vadd.xlane.f32.xlu2 %v500_v10 }
 0x186   : > { %v475_v36 = vpop.xlane.xlu2 %474  ;;  %v463_v45 = vpop.xlane.xlu1 %462 }
 0x187   : > { %v513_v37 = vmul.f32 %v475_v36, %v1091_v18  ;;  %v509_v49 = vmul.f32 %v463_v45, %v1091_v18 }
 0x189   : > { %v529_v46 = vadd.f32 1e-05, %v513_v37  ;;  %v525_v50 = vadd.f32 1e-05, %v509_v49 }
 0x18b   : > { %884 = vrsqrt.f32 %v529_v46  ;;  %vm587_vm5 = vweird.f32 %v529_v46  ;;  %vm547_vm7 = vweird.f32 %v525_v50 }
 0x18c   : > { %886 = vrsqrt.f32 %v525_v50 }
 0x18e   : > { %v499_v53 = vpop.xlane.xlu1 %498  ;;  %v487_v54 = vpop.xlane.xlu0 %486 }
 0x18f   : > { %v521_v55 = vmul.f32 %v499_v53, %v1091_v18  ;;  %v517_v56 = vmul.f32 %v487_v54, %v1091_v18 }
 0x191   : > { %v885_v43 = vpop.eup %884  ;;  %v1212_v58 = vadd.f32 1e-05, %v521_v55  ;;  %v1214_v62 = vadd.f32 1e-05, %v517_v56 }
 0x192   : > { %v887_v63 = vpop.eup %886  ;;  %v582_v0 = vmul.f32 %v885_v43, %v529_v46  ;;  %vm588_vm3 = vweird.f32 %v885_v43 }
 0x193   : > { %v542_v1 = vmul.f32 %v887_v63, %v525_v50  ;;  %888 = vrsqrt.f32 %v1212_v58  ;;  %vm548_vm4 = vweird.f32 %v887_v63  ;;  %vm589_vm6 = vmor %vm587_vm5, %vm588_vm3  ;;  %vm667_vm11 = vweird.f32 %v1212_v58 }
 0x194   : > { %v583_v2 = vmul.f32 %v885_v43, %v582_v0  ;;  %890 = vrsqrt.f32 %v1214_v62  ;;  %vm549_vm8 = vmor %vm547_vm7, %vm548_vm4  ;;  %vm627_vm13 = vweird.f32 %v1214_v62 }
 0x195   : > { %v543_v6 = vmul.f32 %v887_v63, %v542_v1 }
 0x196   : > { %v584_v7 = vmul.f32 0.5, %v583_v2  ;;  %v466_v51 = vpop.xlane.xlu2 %465  ;;  %v478_v52 = vpop.xlane.xlu0 %477 }
 0x197   : > { %v544_v8 = vmul.f32 0.5, %v543_v6  ;;  %v510_v13 = vmul.f32 %v466_v51, %v1091_v18  ;;  %v514_v14 = vmul.f32 %v478_v52, %v1091_v18 }
 0x198   : > { %v585_v15 = vsub.f32 1.5, %v584_v7 }
 0x199   : > { %v889_v16 = vpop.eup %888  ;;  %v545_v17 = vsub.f32 1.5, %v544_v8  ;;  %v1220_v61 = vadd.f32 1e-05, %v510_v13  ;;  %v1222_v57 = vadd.f32 1e-05, %v514_v14 }
 0x19a   : > { %v891_v19 = vpop.eup %890  ;;  %v586_v59 = vmul.f32 %v885_v43, %v585_v15  ;;  %v662_v20 = vmul.f32 %v889_v16, %v1212_v58  ;;  %vm668_vm9 = vweird.f32 %v889_v16 }
 0x19b   : > { %v546_v26 = vmul.f32 %v887_v63, %v545_v17  ;;  %v622_v27 = vmul.f32 %v891_v19, %v1214_v62  ;;  %892 = vrsqrt.f32 %v1220_v61  ;;  %vm628_vm10 = vweird.f32 %v891_v19  ;;  %vm669_vm12 = vmor %vm667_vm11, %vm668_vm9 }
 0x19c   : > { %v590_v28 = vsel %vm589_vm6, %v885_v43, %v586_v59  ;;  %v663_v32 = vmul.f32 %v889_v16, %v662_v20  ;;  %894 = vrsqrt.f32 %v1222_v57  ;;  %vm629_vm14 = vmor %vm627_vm13, %vm628_vm10  ;;  %vm557_vm15 = vweird.f32 %v1220_v61 }
 0x19d   : > { %v705_v3 = vmul.f32 %v590_v28, %v1096_v23  ;;  %v550_v33 = vsel %vm549_vm8, %v887_v63, %v546_v26  ;;  %v623_v5 = vmul.f32 %v891_v19, %v622_v27  ;;  %vm597_vm4 = vweird.f32 %v1222_v57 }
 0x19e   : > { %v701_v38 = vmul.f32 %v550_v33, %v1099_v24  ;;  %v664_v4 = vmul.f32 0.5, %v663_v32  ;;  %v490_v41 = vpop.xlane.xlu1 %489  ;;  %v469_v44 = vpop.xlane.xlu0 %468 }
 0x19f   : > { %v724_v39 = vmul.f32 %v1228_v21, %v705_v3  ;;  %v624_v10 = vmul.f32 0.5, %v623_v5  ;;  %v518_v36 = vmul.f32 %v490_v41, %v1091_v18  ;;  %v511_v45 = vmul.f32 %v469_v44, %v1091_v18 }
 0x1a0   : > { %v720_v23 = vmul.f32 %v1228_v21, %v701_v38  ;;  %v665_v24 = vsub.f32 1.5, %v664_v4 }
 0x1a1   : > { %v893_v37 = vpop.eup %892  ;;  %v743_v49 = vadd.f32 %v1236_v31, %v724_v39  ;;  %v625_v46 = vsub.f32 1.5, %v624_v10  ;;  %v1252_v50 = vadd.f32 1e-05, %v518_v36  ;;  %v1254_v53 = vadd.f32 1e-05, %v511_v45 }
 0x1a2   : > { %v895_v54 = vpop.eup %894  ;;  %v739_v55 = vadd.f32 %v1236_v31, %v720_v23  ;;  %v666_v56 = vmul.f32 %v889_v16, %v665_v24  ;;  %v552_v43 = vmul.f32 %v893_v37, %v1220_v61  ;;  %vm558_vm0 = vweird.f32 %v893_v37 }
 0x1a3   : > { %759 = vst.msk [vmem:[%s1248_s14 + $0x20] sm:$0xff] %vm357_vm1, %v743_v49  ;;  %v626_v63 = vmul.f32 %v891_v19, %v625_v46  ;;  %v592_v0 = vmul.f32 %v895_v54, %v1222_v57  ;;  %896 = vrsqrt.f32 %v1252_v50  ;;  %vm598_vm2 = vweird.f32 %v895_v54  ;;  %vm559_vm3 = vmor %vm557_vm15, %vm558_vm0 }
 0x1a4   : > { %755 = vst.msk [vmem:[%s1248_s14] sm:$0xff] %vm357_vm1, %v739_v55  ;;  %v670_v1 = vsel %vm669_vm12, %v889_v16, %v666_v56  ;;  %v553_v2 = vmul.f32 %v893_v37, %v552_v43  ;;  %898 = vrsqrt.f32 %v1254_v53  ;;  %vm599_vm5 = vmor %vm597_vm4, %vm598_vm2  ;;  %vm637_vm8 = vweird.f32 %v1252_v50 }
 0x1a5   : > { %v713_v58 = vmul.f32 %v670_v1, %v1113_v34  ;;  %v630_v6 = vsel %vm629_vm14, %v891_v19, %v626_v63  ;;  %v593_v7 = vmul.f32 %v895_v54, %v592_v0  ;;  %v493_v51 = vpop.xlane.xlu2 %492  ;;  %vm567_vm10 = vweird.f32 %v1254_v53 }
 0x1a6   : > { %v709_v52 = vmul.f32 %v630_v6, %v1110_v30  ;;  %v554_v62 = vmul.f32 0.5, %v553_v2  ;;  %v519_v8 = vmul.f32 %v493_v51, %v1091_v18  ;;  %v481_v13 = vpop.xlane.xlu1 %480  ;;  %v496_v14 = vpop.xlane.xlu0 %495 }
 0x1a7   : > { %v732_v15 = vmul.f32 %v1228_v21, %v713_v58  ;;  %v594_v16 = vmul.f32 0.5, %v593_v7  ;;  %v515_v17 = vmul.f32 %v481_v13, %v1091_v18  ;;  %v520_v34 = vmul.f32 %v496_v14, %v1091_v18 }
 0x1a8   : > { %v728_v19 = vmul.f32 %v1228_v21, %v709_v52  ;;  %v555_v59 = vsub.f32 1.5, %v554_v62  ;;  %v1276_v30 = vadd.f32 1e-05, %v519_v8 }
 0x1a9   : > { %v897_v20 = vpop.eup %896  ;;  %v751_v26 = vadd.f32 %v1236_v31, %v732_v15  ;;  %v595_v27 = vsub.f32 1.5, %v594_v16  ;;  %v1279_v28 = vadd.f32 1e-05, %v515_v17  ;;  %v1283_v38 = vadd.f32 1e-05, %v520_v34 }
 0x1aa   : > { %v899_v32 = vpop.eup %898  ;;  %v747_v3 = vadd.f32 %v1236_v31, %v728_v19  ;;  %v556_v33 = vmul.f32 %v893_v37, %v555_v59  ;;  %v632_v5 = vmul.f32 %v897_v20, %v1252_v50  ;;  %900 = vrsqrt.f32 %v1276_v30 }
 0x1ab   : > { %767 = vst.msk [vmem:[%s1248_s14 + $0x60] sm:$0xff] %vm357_vm1, %v751_v26  ;;  %v596_v4 = vmul.f32 %v895_v54, %v595_v27  ;;  %v562_v41 = vmul.f32 %v899_v32, %v1254_v53  ;;  %902 = vrsqrt.f32 %v1279_v28  ;;  %vm638_vm6 = vweird.f32 %v897_v20 }
 0x1ac   : > { %763 = vst.msk [vmem:[%s1248_s14 + $0x40] sm:$0xff] %vm357_vm1, %v747_v3  ;;  %v560_v44 = vsel %vm559_vm3, %v893_v37, %v556_v33  ;;  %v633_v39 = vmul.f32 %v897_v20, %v632_v5  ;;  %904 = vrsqrt.f32 %v1283_v38  ;;  %vm568_vm7 = vweird.f32 %v899_v32  ;;  %vm639_vm9 = vmor %vm637_vm8, %vm638_vm6 }
 0x1ad   : > { %v702_v10 = vmul.f32 %v560_v44, %v1129_v48  ;;  %v600_v36 = vsel %vm599_vm5, %v895_v54, %v596_v4  ;;  %v563_v61 = vmul.f32 %v899_v32, %v562_v41  ;;  %vm569_vm11 = vmor %vm567_vm10, %vm568_vm7  ;;  %vm647_vm12 = vweird.f32 %v1276_v30 }
 0x1ae   : > { %v706_v45 = vmul.f32 %v600_v36, %v1126_v47  ;;  %v634_v23 = vmul.f32 0.5, %v633_v39  ;;  %v472_v57 = vpop.xlane.xlu1 %471  ;;  %v505_v24 = vpop.xlane.xlu0 %504  ;;  %vm607_vm13 = vweird.f32 %v1279_v28  ;;  %vm657_vm4 = vweird.f32 %v1283_v38 }
 0x1af   : > { %v721_v49 = vmul.f32 %v1228_v21, %v702_v10  ;;  %v564_v46 = vmul.f32 0.5, %v563_v61  ;;  %v512_v37 = vmul.f32 %v472_v57, %v1091_v18  ;;  %v523_v55 = vmul.f32 %v505_v24, %v1091_v18 }
 0x1b0   : > { %v725_v56 = vmul.f32 %v1228_v21, %v706_v45  ;;  %v635_v48 = vsub.f32 1.5, %v634_v23  ;;  %v1303_v54 = vpop.eup %900 }
 0x1b1   : > { %v740_v47 = vadd.f32 %v1236_v31, %v721_v49  ;;  %v565_v43 = vsub.f32 1.5, %v564_v46  ;;  %v1306_v63 = vadd.f32 1e-05, %v512_v37  ;;  %v1308_v0 = vadd.f32 1e-05, %v523_v55  ;;  %v1310_v1 = vpop.eup %902 }
 0x1b2   : > { %v744_v2 = vadd.f32 %v1236_v31, %v725_v56  ;;  %v636_v58 = vmul.f32 %v897_v20, %v635_v48  ;;  %v642_v6 = vmul.f32 %v1303_v54, %v1276_v30  ;;  %v602_v51 = vmul.f32 %v1310_v1, %v1279_v28  ;;  %v905_v52 = vpop.eup %904 }
 0x1b3   : > { %756 = vst.msk [vmem:[%s1248_s14 + $0x8] sm:$0xff] %vm357_vm1, %v740_v47  ;;  %v566_v7 = vmul.f32 %v899_v32, %v565_v43  ;;  %906 = vrsqrt.f32 %v1306_v63  ;;  %v652_v14 = vmul.f32 %v905_v52, %v1283_v38  ;;  %vm648_vm14 = vweird.f32 %v1303_v54 }
 0x1b4   : > { %760 = vst.msk [vmem:[%s1248_s14 + $0x28] sm:$0xff] %vm357_vm1, %v744_v2  ;;  %v640_v62 = vsel %vm639_vm9, %v897_v20, %v636_v58  ;;  %v643_v50 = vmul.f32 %v1303_v54, %v642_v6  ;;  %908 = vrsqrt.f32 %v1308_v0  ;;  %v603_v53 = vmul.f32 %v1310_v1, %v602_v51  ;;  %vm649_vm0 = vmor %vm647_vm12, %vm648_vm14 }
 0x1b5   : > { %v710_v8 = vmul.f32 %v640_v62, %v1143_v60  ;;  %v570_v13 = vsel %vm569_vm11, %v899_v32, %v566_v7  ;;  %v484_v15 = vpop.xlane.xlu2 %483  ;;  %v653_v59 = vmul.f32 %v905_v52, %v652_v14  ;;  %vm608_vm15 = vweird.f32 %v1310_v1 }
 0x1b6   : > { %v703_v16 = vmul.f32 %v570_v13, %v1140_v42  ;;  %v644_v17 = vmul.f32 0.5, %v643_v50  ;;  %v604_v19 = vmul.f32 0.5, %v603_v53  ;;  %v516_v20 = vmul.f32 %v484_v15, %v1091_v18  ;;  %v508_v60 = vpop.xlane.xlu1 %507  ;;  %vm609_vm3 = vmor %vm607_vm13, %vm608_vm15 }
 0x1b7   : > { %v729_v34 = vmul.f32 %v1228_v21, %v710_v8  ;;  %v654_v33 = vmul.f32 0.5, %v653_v59  ;;  %v524_v10 = vmul.f32 %v508_v60, %v1091_v18  ;;  %vm658_vm2 = vweird.f32 %v905_v52 }
 0x1b8   : > { %v722_v26 = vmul.f32 %v1228_v21, %v703_v16  ;;  %v645_v27 = vsub.f32 1.5, %v644_v17  ;;  %v605_v3 = vsub.f32 1.5, %v604_v19  ;;  %v1339_v5 = vadd.f32 1e-05, %v516_v20  ;;  %vm659_vm5 = vmor %vm657_vm4, %vm658_vm2 }
 0x1b9   : > { %v907_v42 = vpop.eup %906  ;;  %v748_v32 = vadd.f32 %v1236_v31, %v729_v34  ;;  %v655_v61 = vsub.f32 1.5, %v654_v33  ;;  %v540_v48 = vadd.f32 1e-05, %v524_v10  ;;  %vm577_vm8 = vweird.f32 %v1306_v63 }
 0x1ba   : > { %v909_v4 = vpop.eup %908  ;;  %v741_v41 = vadd.f32 %v1236_v31, %v722_v26  ;;  %v646_v44 = vmul.f32 %v1303_v54, %v645_v27  ;;  %v572_v39 = vmul.f32 %v907_v42, %v1306_v63  ;;  %v606_v36 = vmul.f32 %v1310_v1, %v605_v3 }
 0x1bb   : > { %764 = vst.msk [vmem:[%s1248_s14 + $0x48] sm:$0xff] %vm357_vm1, %v748_v32  ;;  %v682_v45 = vmul.f32 %v909_v4, %v1308_v0  ;;  %910 = vrsqrt.f32 %v1339_v5  ;;  %v656_v49 = vmul.f32 %v905_v52, %v655_v61  ;;  %vm578_vm6 = vweird.f32 %v907_v42 }
 0x1bc   : > { %757 = vst.msk [vmem:[%s1248_s14 + $0x10] sm:$0xff] %vm357_vm1, %v741_v41  ;;  %v650_v23 = vsel %vm649_vm0, %v1303_v54, %v646_v44  ;;  %v573_v57 = vmul.f32 %v907_v42, %v572_v39  ;;  %v610_v24 = vsel %vm609_vm3, %v1310_v1, %v606_v36  ;;  %912 = vrsqrt.f32 %v540_v48  ;;  %vm579_vm9 = vmor %vm577_vm8, %vm578_vm6 }
 0x1bd   : > { %v711_v30 = vmul.f32 %v650_v23, %v1158_v11  ;;  %v683_v46 = vmul.f32 %v909_v4, %v682_v45  ;;  %v502_v37 = vpop.xlane.xlu2 %501  ;;  %v707_v55 = vmul.f32 %v610_v24, %v1161_v12  ;;  %v660_v38 = vsel %vm659_vm5, %v905_v52, %v656_v49 }
 0x1be   : > { %v574_v56 = vmul.f32 0.5, %v573_v57  ;;  %v522_v28 = vmul.f32 %v502_v37, %v1091_v18  ;;  %v712_v43 = vmul.f32 %v660_v38, %v1155_v9  ;;  %vm688_vm7 = vweird.f32 %v909_v4 }
 0x1bf   : > { %v730_v54 = vmul.f32 %v1228_v21, %v711_v30  ;;  %v684_v47 = vmul.f32 0.5, %v683_v46  ;;  %v726_v11 = vmul.f32 %v1228_v21, %v707_v55  ;;  %vm687_vm10 = vweird.f32 %v1308_v0 }
 0x1c0   : > { %v575_v1 = vsub.f32 1.5, %v574_v56  ;;  %v538_v58 = vadd.f32 1e-05, %v522_v28  ;;  %v731_v7 = vmul.f32 %v1228_v21, %v712_v43  ;;  %vm689_vm11 = vmor %vm687_vm10, %vm688_vm7  ;;  %vm617_vm13 = vweird.f32 %v1339_v5 }
 0x1c1   : > { %v749_v12 = vadd.f32 %v1236_v31, %v730_v54  ;;  %v685_v2 = vsub.f32 1.5, %v684_v47  ;;  %v911_v6 = vpop.eup %910  ;;  %v745_v18 = vadd.f32 %v1236_v31, %v726_v11  ;;  %vm697_vm0 = vweird.f32 %v540_v48 }
 0x1c2   : > { %v576_v51 = vmul.f32 %v907_v42, %v575_v1  ;;  %v612_v52 = vmul.f32 %v911_v6, %v1339_v5  ;;  %914 = vrsqrt.f32 %v538_v58  ;;  %v750_v62 = vadd.f32 %v1236_v31, %v731_v7  ;;  %v913_v53 = vpop.eup %912 }
 0x1c3   : > { %765 = vst.msk [vmem:[%s1248_s14 + $0x50] sm:$0xff] %vm357_vm1, %v749_v12  ;;  %v686_v9 = vmul.f32 %v909_v4, %v685_v2  ;;  %v692_v16 = vmul.f32 %v913_v53, %v540_v48  ;;  %vm618_vm12 = vweird.f32 %v911_v6  ;;  %vm698_vm15 = vweird.f32 %v913_v53 }
 0x1c4   : > { %761 = vst.msk [vmem:[%s1248_s14 + $0x30] sm:$0xff] %vm357_vm1, %v745_v18  ;;  %v580_v50 = vsel %vm579_vm9, %v907_v42, %v576_v51  ;;  %v613_v13 = vmul.f32 %v911_v6, %v612_v52  ;;  %vm619_vm14 = vmor %vm617_vm13, %vm618_vm12  ;;  %vm677_vm4 = vweird.f32 %v538_v58 }
 0x1c5   : > { %v704_v8 = vmul.f32 %v580_v50, %v1178_v25  ;;  %v690_v63 = vsel %vm689_vm11, %v909_v4, %v686_v9  ;;  %766 = vst.msk [vmem:[%s1248_s14 + $0x58] sm:$0xff] %vm357_vm1, %v750_v62  ;;  %v693_v25 = vmul.f32 %v913_v53, %v692_v16  ;;  %vm699_vm2 = vmor %vm697_vm0, %vm698_vm15 }
 0x1c6   : > { %v715_v0 = vmul.f32 %v690_v63, %v1175_v22  ;;  %v614_v15 = vmul.f32 0.5, %v613_v13 }
 0x1c7   : > { %v723_v14 = vmul.f32 %v1228_v21, %v704_v8  ;;  %v694_v22 = vmul.f32 0.5, %v693_v25 }
 0x1c8   : > { %v734_v17 = vmul.f32 %v1228_v21, %v715_v0  ;;  %v915_v34 = vpop.eup %914  ;;  %v615_v59 = vsub.f32 1.5, %v614_v15 }
 0x1c9   : > { %v742_v19 = vadd.f32 %v1236_v31, %v723_v14  ;;  %v672_v60 = vmul.f32 %v915_v34, %v538_v58  ;;  %v695_v32 = vsub.f32 1.5, %v694_v22  ;;  %vm678_vm3 = vweird.f32 %v915_v34 }
 0x1ca   : > { %v753_v20 = vadd.f32 %v1236_v31, %v734_v17  ;;  %v616_v26 = vmul.f32 %v911_v6, %v615_v59  ;;  %vm679_vm5 = vmor %vm677_vm4, %vm678_vm3 }
 0x1cb   : > { %758 = vst.msk [vmem:[%s1248_s14 + $0x18] sm:$0xff] %vm357_vm1, %v742_v19  ;;  %v673_v27 = vmul.f32 %v915_v34, %v672_v60  ;;  %v696_v4 = vmul.f32 %v913_v53, %v695_v32 }
 0x1cc   : > { %769 = vst.msk [vmem:[%s1248_s14 + $0x70] sm:$0xff] %vm357_vm1, %v753_v20  ;;  %v620_v42 = vsel %vm619_vm14, %v911_v6, %v616_v26 }
 0x1cd   : > { %v708_v3 = vmul.f32 %v620_v42, %v1194_v35  ;;  %v674_v33 = vmul.f32 0.5, %v673_v27  ;;  %v700_v5 = vsel %vm699_vm2, %v913_v53, %v696_v4 }
 0x1ce   : > { %v716_v10 = vmul.f32 %v700_v5, %v1186_v29 }
 0x1cf   : > { %v727_v41 = vmul.f32 %v1228_v21, %v708_v3  ;;  %v675_v44 = vsub.f32 1.5, %v674_v33 }
 0x1d0   : > { %v735_v35 = vmul.f32 %v1228_v21, %v716_v10 }
 0x1d1   : > { %v746_v39 = vadd.f32 %v1236_v31, %v727_v41  ;;  %v676_v36 = vmul.f32 %v915_v34, %v675_v44 }
 0x1d2   : > { %v754_v23 = vadd.f32 %v1236_v31, %v735_v35 }
 0x1d3   : > { %762 = vst.msk [vmem:[%s1248_s14 + $0x38] sm:$0xff] %vm357_vm1, %v746_v39  ;;  %v680_v61 = vsel %vm679_vm5, %v915_v34, %v676_v36 }
 0x1d4   : > { %v714_v45 = vmul.f32 %v680_v61, %v1201_v40  ;;  %770 = vst.msk [vmem:[%s1248_s14 + $0x78] sm:$0xff] %vm357_vm1, %v754_v23 }
 0x1d6   : > { %v733_v57 = vmul.f32 %v1228_v21, %v714_v45 }
 0x1d8   : > { %v752_v30 = vadd.f32 %v1236_v31, %v733_v57 }
 0x1da   : > { %768 = vst.msk [vmem:[%s1248_s14 + $0x68] sm:$0xff] %vm357_vm1, %v752_v30 }
 0x1db PF: > { %s15_s18 = sadd.s32 1, %s922_s18  }
 0x1dc   : > { %p12_p4 = scmp.ge.s32.totalorder %s15_s18, 4  }
 0x1de   :  { %14 = sbr.rel (!%p12_p4) target bundleno = 1 (0x1), region = 70 }

// kernel: _lambda_.8
= control target key start
LH: loop header
LB: loop body
LE: loop exit
PB: predicated region body
PF: predicated region fallthrough
CT: control target
= control target key end

     0   :  { %8 = vsyncpa [#allocation3], 0  ;;  %s1385_s0 = inlined_call_operand.vmem [shape: f32[256,32], index: 0, kind: input, shape index: {}]   ;;  %s1386_s1 = inlined_call_operand.vmem [shape: f32[1,32], index: 1, kind: input, shape index: {}]   ;;  %s1387_s2 = inlined_call_operand.vmem [shape: f32[1,32], index: 2, kind: input, shape index: {}]   ;;  %s1388_s3 = inlined_call_operand.hbm [shape: f32[256,32], index: 3, kind: output, shape index: {}]  }
   0x1   :  { %10 = vsyncpa [#allocation3 + $0x1], 0  ;;  %s860_s12 = smov 0   ;;  %s862_s13 = smov 0  }
   0x2   :  { %s864_s14 = smov 0   ;;  %s866_s15 = smov 0  }
   0x3 LB: > { %s881_s16 = sadd.s32 4294967295, %s835_s15   ;;  %s682_s17 = sadd.s32 4294967294, %s835_s15   ;;  %s835_s15 = sphi %s866_s15, %s1394_s15   ;;  %s831_s14 = sphi %s864_s14, %s1393_s14   ;;  %s827_s13 = sphi %s862_s13, %s1392_s13   ;;  %s823_s12 = sphi %s860_s12, %s1391_s12  }
   0x4   : > { %s885_s18 = sadd.s32 1, %s835_s15   ;;  %s91_s19 = sadd.s32 1, %s831_s14 }
   0x5   : > { %s88_s20 = ssub.s32 %s835_s15, %s885_s18  ;;  %p101_p0 = scmp.ne.s32.totalorder %s831_s14, %s827_s13 }
   0x6   : > { %p89_p1 = scmp.eq.s32.totalorder %s88_s20, 0  ;;  %p102_p2 = scmp.eq.s32.totalorder %s881_s16, 1 }
   0x7   : > { %p107_p3 = scmp.ne.s32.totalorder %s827_s13, %s823_s12  ;;  %p108_p4 = scmp.eq.s32.totalorder %s682_s17, 1 }
   0x8   : > { %s896_s21 = scalar_select %p89_p1, %s831_s14, %s91_s19  }
   0x9   : > { %p898_p5 = por %p102_p2, %p101_p0  ;;  %p902_p6 = por %p108_p4, %p107_p3 }
   0xa   : > { %p685_p7 = scmp.ge.s32.totalorder %s835_s15, 1  ;;  %p141_p8 = scmp.lt.s32.totalorder %s835_s15, 3 }
   0xc   : > { %p142_p9 = pnand %p685_p7, %p141_p8 }
   0xd   : > { %s687_s24 = sshll.u32 (!%p142_p9), %s881_s16, 4  ;;  %s162_s29 = sand.u32 (!%p142_p9), 1, %s827_s13  }
   0xe   : > { %145 = sbr.rel (%p142_p9) target bundleno = 344 (0x158), region = 32  ;;  %p166_p10 = scmp.lt.s32.totalorder (!%p142_p9), %s687_s24, 31 }
   0xf   : > { %s686_s7 = sshll.u32 (!%p142_p9), %s162_s29, 7  ;;  %s694_s9 = sshll.u32 (!%p142_p9), %s881_s16, 7 }
  0x10   : > { %s1169_s8 = scalar_lea.vmem (!%p142_p9), [#allocation2], %s686_s7  ;;  %s616_s17 = scalar_lea.hbm (!%p142_p9), %s1388_s3, %s694_s9 }
  0x11   : > { %s617_s16 = sshll.u32 (!%p142_p9), %s1169_s8, 4  ;;  %s619_s19 = sshll.u32 (!%p142_p9), %s616_s17, 4  ;;  %s618_s16 = int_to_ptr.vmem [resolvable:$true] %s617_s16  ;;  %s620_s19 = int_to_ptr.hbm [resolvable:$true] %s619_s19 }
  0x12   : > { %s605_s20 = scalar_lea.sflag (!%p142_p9), [#allocation3], %s162_s29 }
  0x13   : > { %s1396_s24 = smov (!%p166_p10, %s687_s24), 31  ;;  %vm190_vm0 = vcmask 261120   ;;  %v837_v32 = vmov 32.0  }
  0x14   : > { %s688_s25 = sshll.u32 %s1396_s24, 3  ;;  %739 = vrcp.f32 %v837_v32  ;;  %s787_s24 = sshra.s32 %s620_s19, 4  ;;  %s788_s24 = int_to_ptr.hbm [resolvable:$true] %s787_s24 }
  0x15   : > { %s912_s28 = scalar_lea.vmem %s1385_s0, %s688_s25  ;;  %s789_s25 = scalar_lea.hbm %s788_s24, 128 }
  0x16   : > { %v915_v0 = vld [vmem:[%s912_s28 + $0x20] sm:$0xff]  ;;  %v174_v1 = vld [vmem:[%s912_s28 + $0x10] sm:$0xff]  ;;  %v924_v6 = vld [vmem:[%s912_s28 + $0x28] sm:$0xff]  ;;  %p790_p11 = scmp.ne.s32.totalorder %s788_s24, %s789_s25  ;;  %p794_p0 = scmp.lt.s32.totalorder %s788_s24, %s1388_s3 }
  0x17   : > { %v172_v2 = vld [vmem:[%s912_s28] sm:$0xff]  ;;  %v203_v3 = vsel %vm190_vm0, %v915_v0, 0.0  ;;  %v197_v4 = vsel %vm190_vm0, %v174_v1, 0.0  ;;  %v927_v7 = vld [vmem:[%s912_s28 + $0x18] sm:$0xff]  ;;  %v930_v8 = vld [vmem:[%s912_s28 + $0x8] sm:$0xff]  ;;  %v206_v9 = vsel %vm190_vm0, %v924_v6, 0.0 }
  0x18   : > { %v191_v5 = vsel %vm190_vm0, %v172_v2, 0.0  ;;  %204 = vadd.xlane.f32.xlu2 %v203_v3  ;;  %198 = vadd.xlane.f32.xlu1 %v197_v4  ;;  %v200_v10 = vsel %vm190_vm0, %v927_v7, 0.0  ;;  %v194_v11 = vsel %vm190_vm0, %v930_v8, 0.0  ;;  %v939_v12 = vld [vmem:[%s912_s28 + $0x40] sm:$0xff]  ;;  %v942_v13 = vld [vmem:[%s912_s28 + $0x38] sm:$0xff]  ;;  %v945_v14 = vld [vmem:[%s912_s28 + $0x30] sm:$0xff]  ;;  %p791_p12 = pnand %p790_p11, %p898_p5 }
  0x19   : > { %192 = vadd.xlane.f32.xlu0 %v191_v5  ;;  %v215_v15 = vsel %vm190_vm0, %v939_v12, 0.0  ;;  %v212_v16 = vsel %vm190_vm0, %v942_v13, 0.0  ;;  %v209_v17 = vsel %vm190_vm0, %v945_v14, 0.0  ;;  %v954_v18 = vld [vmem:[%s912_s28 + $0x58] sm:$0xff]  ;;  %v957_v19 = vld [vmem:[%s912_s28 + $0x50] sm:$0xff]  ;;  %v960_v20 = vld [vmem:[%s912_s28 + $0x48] sm:$0xff] }
  0x1a   : > { %v224_v21 = vsel %vm190_vm0, %v954_v18, 0.0  ;;  %v221_v22 = vsel %vm190_vm0, %v957_v19, 0.0  ;;  %v218_v23 = vsel %vm190_vm0, %v960_v20, 0.0  ;;  %v969_v24 = vld [vmem:[%s912_s28 + $0x70] sm:$0xff]  ;;  %v972_v25 = vld [vmem:[%s912_s28 + $0x68] sm:$0xff]  ;;  %v975_v26 = vld [vmem:[%s912_s28 + $0x60] sm:$0xff]  ;;  %v740_v33 = vpop.eup %739  ;;  %p792_p13 = pneg %p791_p12 }
  0x1b   : > { %v233_v27 = vsel %vm190_vm0, %v969_v24, 0.0  ;;  %v230_v28 = vsel %vm190_vm0, %v972_v25, 0.0  ;;  %v227_v29 = vsel %vm190_vm0, %v975_v26, 0.0  ;;  %v984_v30 = vld [vmem:[%s912_s28 + $0x78] sm:$0xff]  ;;  %v240_v34 = vmul.f32 32.0, %v740_v33  ;;  %s793_s28 = scalar_lea.hbm %s1388_s3, 256 }
  0x1c   : > { %v236_v31 = vsel %vm190_vm0, %v984_v30, 0.0  ;;  %vm244_vm1 = vweird.f32 %v740_v33  ;;  %p795_p1 = scmp.lt.s32.totalorder %s793_s28, %s789_s25 }
  0x1d   : > { %v241_v35 = vsub.f32 1.0, %v240_v34 }
  0x1e   : > { %p796_p2 = por %p795_p1, %p794_p0 }
  0x1f   : > { %v242_v36 = vmul.f32 %v740_v33, %v241_v35 }
  0x20   : > { %207 = vadd.xlane.f32.xlu2 %v206_v9  ;;  %201 = vadd.xlane.f32.xlu1 %v200_v10  ;;  %p797_p3 = pnand %p796_p2, %p792_p13 }
  0x21   : > { %195 = vadd.xlane.f32.xlu0 %v194_v11  ;;  %v243_v37 = vadd.f32 %v740_v33, %v242_v36 }
  0x23   : > { %v988_v38 = vsel %vm244_vm1, %v740_v33, %v243_v37 }
  0x28   : > { %216 = vadd.xlane.f32.xlu2 %v215_v15  ;;  %213 = vadd.xlane.f32.xlu1 %v212_v16 }
  0x29   : > { %210 = vadd.xlane.f32.xlu0 %v209_v17 }
  0x30   : > { %225 = vadd.xlane.f32.xlu2 %v224_v21  ;;  %222 = vadd.xlane.f32.xlu1 %v221_v22 }
  0x31   : > { %219 = vadd.xlane.f32.xlu0 %v218_v23 }
  0x38   : > { %234 = vadd.xlane.f32.xlu2 %v233_v27  ;;  %231 = vadd.xlane.f32.xlu1 %v230_v28 }
  0x39   : > { %228 = vadd.xlane.f32.xlu0 %v227_v29 }
  0x41   : > { %237 = vadd.xlane.f32.xlu0 %v236_v31 }
  0x8b   : > { %v205_v39 = vpop.xlane.xlu2 %204  ;;  %v199_v40 = vpop.xlane.xlu1 %198 }
  0x8c   : > { %v248_v41 = vmul.f32 %v988_v38, %v199_v40  ;;  %v193_v42 = vpop.xlane.xlu0 %192  ;;  %v250_v58 = vmul.f32 %v988_v38, %v205_v39 }
  0x8d   : > { %v246_v43 = vmul.f32 %v988_v38, %v193_v42 }
  0x8e   : > { %v992_v44 = vsub.f32 %v174_v1, %v248_v41 }
  0x8f   : > { %v994_v45 = vsub.f32 %v172_v2, %v246_v43  ;;  %v1024_v2 = vsub.f32 %v915_v0, %v250_v58 }
  0x90   : > { %v280_v46 = vmul.f32 %v992_v44, %v992_v44 }
  0x91   : > { %v278_v47 = vmul.f32 %v994_v45, %v994_v45  ;;  %v282_v11 = vmul.f32 %v1024_v2, %v1024_v2 }
  0x92   : > { %v300_v48 = vsel %vm190_vm0, %v280_v46, 0.0 }
  0x93   : > { %v208_v49 = vpop.xlane.xlu2 %207  ;;  %v202_v50 = vpop.xlane.xlu1 %201  ;;  %301 = vadd.xlane.f32.xlu0 %v300_v48  ;;  %v294_v51 = vsel %vm190_vm0, %v278_v47, 0.0 }
  0x94   : > { %v251_v52 = vmul.f32 %v988_v38, %v208_v49  ;;  %v249_v53 = vmul.f32 %v988_v38, %v202_v50  ;;  %295 = vadd.xlane.f32.xlu1 %v294_v51  ;;  %v196_v54 = vpop.xlane.xlu0 %195 }
  0x95   : > { %v247_v55 = vmul.f32 %v988_v38, %v196_v54 }
  0x96   : > { %v1006_v56 = vsub.f32 %v924_v6, %v251_v52  ;;  %v1009_v57 = vsub.f32 %v927_v7, %v249_v53 }
  0x97   : > { %v1013_v59 = vsub.f32 %v930_v8, %v247_v55 }
  0x98   : > { %v283_v60 = vmul.f32 %v1006_v56, %v1006_v56  ;;  %v281_v61 = vmul.f32 %v1009_v57, %v1009_v57 }
  0x99   : > { %v279_v62 = vmul.f32 %v1013_v59, %v1013_v59 }
  0x9a   : > { %v309_v63 = vsel %vm190_vm0, %v283_v60, 0.0  ;;  %v303_v1 = vsel %vm190_vm0, %v281_v61, 0.0 }
  0x9b   : > { %v217_v3 = vpop.xlane.xlu2 %216  ;;  %310 = vadd.xlane.f32.xlu0 %v309_v63  ;;  %v297_v4 = vsel %vm190_vm0, %v279_v62, 0.0  ;;  %v214_v5 = vpop.xlane.xlu1 %213 }
  0x9c   : > { %v254_v6 = vmul.f32 %v988_v38, %v217_v3  ;;  %304 = vadd.xlane.f32.xlu1 %v303_v1  ;;  %298 = vadd.xlane.f32.xlu2 %v297_v4  ;;  %v211_v7 = vpop.xlane.xlu0 %210  ;;  %v253_v9 = vmul.f32 %v988_v38, %v214_v5 }
  0x9d   : > { %v252_v8 = vmul.f32 %v988_v38, %v211_v7 }
  0x9e   : > { %v1031_v10 = vsub.f32 %v939_v12, %v254_v6  ;;  %v1041_v16 = vsub.f32 %v942_v13, %v253_v9  ;;  %v306_v12 = vsel %vm190_vm0, %v282_v11, 0.0 }
  0x9f   : > { %v1034_v0 = vsub.f32 %v945_v14, %v252_v8 }
  0xa0   : > { %v286_v15 = vmul.f32 %v1031_v10, %v1031_v10  ;;  %v285_v31 = vmul.f32 %v1041_v16, %v1041_v16 }
  0xa1   : > { %v284_v17 = vmul.f32 %v1034_v0, %v1034_v0 }
  0xa2   : > { %v318_v21 = vsel %vm190_vm0, %v286_v15, 0.0  ;;  %v315_v36 = vsel %vm190_vm0, %v285_v31, 0.0 }
  0xa3   : > { %v226_v22 = vpop.xlane.xlu2 %225  ;;  %319 = vadd.xlane.f32.xlu0 %v318_v21  ;;  %v312_v14 = vsel %vm190_vm0, %v284_v17, 0.0  ;;  %v223_v23 = vpop.xlane.xlu1 %222 }
  0xa4   : > { %v257_v27 = vmul.f32 %v988_v38, %v226_v22  ;;  %307 = vadd.xlane.f32.xlu2 %v306_v12  ;;  %313 = vadd.xlane.f32.xlu1 %v312_v14  ;;  %v220_v28 = vpop.xlane.xlu0 %219  ;;  %v256_v29 = vmul.f32 %v988_v38, %v223_v23 }
  0xa5   : > { %v255_v13 = vmul.f32 %v988_v38, %v220_v28 }
  0xa6   : > { %v1054_v32 = vsub.f32 %v954_v18, %v257_v27  ;;  %v1062_v35 = vsub.f32 %v957_v19, %v256_v29 }
  0xa7   : > { %v1057_v33 = vsub.f32 %v960_v20, %v255_v13 }
  0xa8   : > { %v289_v34 = vmul.f32 %v1054_v32, %v1054_v32  ;;  %v288_v46 = vmul.f32 %v1062_v35, %v1062_v35 }
  0xa9   : > { %v287_v37 = vmul.f32 %v1057_v33, %v1057_v33 }
  0xaa   : > { %v327_v39 = vsel %vm190_vm0, %v289_v34, 0.0  ;;  %v324_v51 = vsel %vm190_vm0, %v288_v46, 0.0 }
  0xab   : > { %v235_v40 = vpop.xlane.xlu2 %234  ;;  %328 = vadd.xlane.f32.xlu0 %v327_v39  ;;  %v321_v18 = vsel %vm190_vm0, %v287_v37, 0.0  ;;  %v232_v41 = vpop.xlane.xlu1 %231 }
  0xac   : > { %v260_v20 = vmul.f32 %v988_v38, %v235_v40  ;;  %316 = vadd.xlane.f32.xlu2 %v315_v36  ;;  %322 = vadd.xlane.f32.xlu1 %v321_v18  ;;  %v229_v42 = vpop.xlane.xlu0 %228  ;;  %v259_v43 = vmul.f32 %v988_v38, %v232_v41 }
  0xad   : > { %v258_v19 = vmul.f32 %v988_v38, %v229_v42 }
  0xae   : > { %v1075_v47 = vsub.f32 %v969_v24, %v260_v20  ;;  %v1083_v50 = vsub.f32 %v972_v25, %v259_v43 }
  0xaf   : > { %v1078_v48 = vsub.f32 %v975_v26, %v258_v19 }
  0xb0   : > { %v292_v49 = vmul.f32 %v1075_v47, %v1075_v47  ;;  %v291_v55 = vmul.f32 %v1083_v50, %v1083_v50 }
  0xb1   : > { %v290_v52 = vmul.f32 %v1078_v48, %v1078_v48 }
  0xb2   : > { %v336_v53 = vsel %vm190_vm0, %v292_v49, 0.0  ;;  %v333_v58 = vsel %vm190_vm0, %v291_v55, 0.0 }
  0xb3   : > { %337 = vadd.xlane.f32.xlu0 %v336_v53  ;;  %v330_v24 = vsel %vm190_vm0, %v290_v52, 0.0 }
  0xb4   : > { %325 = vadd.xlane.f32.xlu2 %v324_v51  ;;  %331 = vadd.xlane.f32.xlu1 %v330_v24  ;;  %v238_v26 = vpop.xlane.xlu0 %237  ;;  %v1131_v51 = vld [vmem:[%s1386_s1] ss:$0 sm:$0xff] }
  0xb5   : > { %v261_v54 = vmul.f32 %v988_v38, %v238_v26 }
  0xb7   : > { %v1094_v25 = vsub.f32 %v984_v30, %v261_v54 }
  0xb9   : > { %v293_v60 = vmul.f32 %v1094_v25, %v1094_v25 }
  0xbb   : > { %v339_v61 = vsel %vm190_vm0, %v293_v60, 0.0  ;;  %v1146_v60 = vld [vmem:[%s1387_s2] ss:$0 sm:$0xff] }
  0xbc   : > { %334 = vadd.xlane.f32.xlu2 %v333_v58  ;;  %340 = vadd.xlane.f32.xlu1 %v339_v61 }
 0x106   : > { %v302_v62 = vpop.xlane.xlu0 %301 }
 0x107   : > { %v296_v63 = vpop.xlane.xlu1 %295  ;;  %v344_v1 = vmul.f32 %v302_v62, %v988_v38 }
 0x108   : > { %v342_v3 = vmul.f32 %v296_v63, %v988_v38 }
 0x109   : > { %v360_v4 = vadd.f32 1e-05, %v344_v1 }
 0x10a   : > { %v358_v5 = vadd.f32 1e-05, %v342_v3 }
 0x10b   : > { %741 = vrsqrt.f32 %v360_v4  ;;  %vm400_vm4 = vweird.f32 %v360_v4 }
 0x10c   : > { %743 = vrsqrt.f32 %v358_v5  ;;  %vm380_vm5 = vweird.f32 %v358_v5 }
 0x10e   : > { %v311_v30 = vpop.xlane.xlu0 %310 }
 0x10f   : > { %v305_v6 = vpop.xlane.xlu1 %304  ;;  %v299_v7 = vpop.xlane.xlu2 %298  ;;  %v347_v8 = vmul.f32 %v311_v30, %v988_v38 }
 0x110   : > { %v345_v9 = vmul.f32 %v305_v6, %v988_v38  ;;  %v343_v11 = vmul.f32 %v299_v7, %v988_v38 }
 0x111   : > { %v742_v15 = vpop.eup %741  ;;  %v1105_v17 = vadd.f32 1e-05, %v347_v8 }
 0x112   : > { %v744_v21 = vpop.eup %743  ;;  %v395_v22 = vmul.f32 %v742_v15, %v360_v4  ;;  %v1107_v12 = vadd.f32 1e-05, %v345_v9  ;;  %v1109_v14 = vadd.f32 1e-05, %v343_v11  ;;  %vm401_vm2 = vweird.f32 %v742_v15 }
 0x113   : > { %v375_v23 = vmul.f32 %v744_v21, %v358_v5  ;;  %745 = vrsqrt.f32 %v1105_v17  ;;  %vm381_vm3 = vweird.f32 %v744_v21  ;;  %vm402_vm6 = vmor %vm400_vm4, %vm401_vm2  ;;  %vm430_vm8 = vweird.f32 %v1105_v17 }
 0x114   : > { %v396_v27 = vmul.f32 %v742_v15, %v395_v22  ;;  %747 = vrsqrt.f32 %v1107_v12  ;;  %vm382_vm7 = vmor %vm380_vm5, %vm381_vm3  ;;  %vm410_vm12 = vweird.f32 %v1107_v12  ;;  %vm390_vm13 = vweird.f32 %v1109_v14 }
 0x115   : > { %v376_v28 = vmul.f32 %v744_v21, %v375_v23  ;;  %749 = vrsqrt.f32 %v1109_v14 }
 0x116   : > { %v397_v13 = vmul.f32 0.5, %v396_v27  ;;  %v320_v29 = vpop.xlane.xlu0 %319 }
 0x117   : > { %v377_v31 = vmul.f32 0.5, %v376_v28  ;;  %v308_v34 = vpop.xlane.xlu2 %307  ;;  %v314_v36 = vpop.xlane.xlu1 %313  ;;  %v350_v18 = vmul.f32 %v320_v29, %v988_v38 }
 0x118   : > { %v398_v37 = vsub.f32 1.5, %v397_v13  ;;  %v346_v39 = vmul.f32 %v308_v34, %v988_v38  ;;  %v348_v40 = vmul.f32 %v314_v36, %v988_v38 }
 0x119   : > { %v1117_v41 = vpop.eup %745  ;;  %v378_v20 = vsub.f32 1.5, %v377_v31  ;;  %v1141_v58 = vadd.f32 1e-05, %v350_v18 }
 0x11a   : > { %v1119_v42 = vpop.eup %747  ;;  %v399_v19 = vmul.f32 %v742_v15, %v398_v37  ;;  %v425_v43 = vmul.f32 %v1117_v41, %v1105_v17  ;;  %v1124_v46 = vadd.f32 1e-05, %v346_v39  ;;  %v1136_v24 = vadd.f32 1e-05, %v348_v40 }
 0x11b   : > { %v1126_v49 = vpop.eup %749  ;;  %v379_v52 = vmul.f32 %v744_v21, %v378_v20  ;;  %v405_v53 = vmul.f32 %v1119_v42, %v1107_v12  ;;  %vm431_vm9 = vweird.f32 %v1117_v41  ;;  %vm411_vm10 = vweird.f32 %v1119_v42 }
 0x11c   : > { %v403_v26 = vsel %vm402_vm6, %v742_v15, %v399_v19  ;;  %v385_v54 = vmul.f32 %v1126_v49, %v1109_v14  ;;  %v426_v55 = vmul.f32 %v1117_v41, %v425_v43  ;;  %751 = vrsqrt.f32 %v1124_v46  ;;  %vm432_vm14 = vmor %vm430_vm8, %vm431_vm9 }
 0x11d   : > { %v383_v61 = vsel %vm382_vm7, %v744_v21, %v379_v52  ;;  %v536_v62 = vmul.f32 %v403_v26, %v992_v44  ;;  %v406_v63 = vmul.f32 %v1119_v42, %v405_v53  ;;  %753 = vrsqrt.f32 %v1136_v24  ;;  %vm412_vm15 = vmor %vm410_vm12, %vm411_vm10 }
 0x11e   : > { %v534_v1 = vmul.f32 %v383_v61, %v994_v45  ;;  %v386_v3 = vmul.f32 %v1126_v49, %v385_v54  ;;  %v427_v4 = vmul.f32 0.5, %v426_v55  ;;  %755 = vrsqrt.f32 %v1141_v58  ;;  %v329_v27 = vpop.xlane.xlu0 %328 }
 0x11f   : > { %v555_v5 = vmul.f32 %v1131_v51, %v536_v62  ;;  %v407_v30 = vmul.f32 0.5, %v406_v63  ;;  %v317_v6 = vpop.xlane.xlu2 %316  ;;  %v323_v15 = vpop.xlane.xlu1 %322  ;;  %vm391_vm11 = vweird.f32 %v1126_v49  ;;  %vm420_vm1 = vweird.f32 %v1124_v46 }
 0x120   : > { %v553_v44 = vmul.f32 %v1131_v51, %v534_v1  ;;  %v387_v7 = vmul.f32 0.5, %v386_v3  ;;  %v428_v8 = vsub.f32 1.5, %v427_v4  ;;  %v349_v11 = vmul.f32 %v317_v6, %v988_v38  ;;  %vm392_vm2 = vmor %vm390_vm13, %vm391_vm11 }
 0x121   : > { %v574_v45 = vadd.f32 %v1146_v60, %v555_v5  ;;  %v408_v9 = vsub.f32 1.5, %v407_v30  ;;  %v351_v14 = vmul.f32 %v323_v15, %v988_v38  ;;  %v353_v39 = vmul.f32 %v329_v27, %v988_v38 }
 0x122   : > { %v572_v21 = vadd.f32 %v1146_v60, %v553_v44  ;;  %v388_v22 = vsub.f32 1.5, %v387_v7  ;;  %v429_v23 = vmul.f32 %v1117_v41, %v428_v8  ;;  %v1167_v28 = vpop.eup %751  ;;  %v1180_v29 = vadd.f32 1e-05, %v349_v11 }
 0x123   : > { %590 = vst.msk [vmem:[%s1169_s8 + $0x10] sm:$0xff] %vm190_vm0, %v574_v45  ;;  %v409_v13 = vmul.f32 %v1119_v42, %v408_v9  ;;  %v415_v12 = vmul.f32 %v1167_v28, %v1124_v46  ;;  %v1192_v17 = vpop.eup %753  ;;  %vm440_vm3 = vweird.f32 %v1136_v24  ;;  %vm421_vm4 = vweird.f32 %v1167_v28 }
 0x124   : > { %588 = vst.msk [vmem:[%s1169_s8] sm:$0xff] %vm190_vm0, %v572_v21  ;;  %v389_v31 = vmul.f32 %v1126_v49, %v388_v22  ;;  %v433_v34 = vsel %vm432_vm14, %v1117_v41, %v429_v23  ;;  %757 = vrsqrt.f32 %v1180_v29  ;;  %v756_v40 = vpop.eup %755  ;;  %v435_v19 = vmul.f32 %v1192_v17, %v1136_v24  ;;  %vm422_vm7 = vmor %vm420_vm1, %vm421_vm4 }
 0x125   : > { %v413_v36 = vsel %vm412_vm15, %v1119_v42, %v409_v13  ;;  %v539_v37 = vmul.f32 %v433_v34, %v1006_v56  ;;  %v416_v20 = vmul.f32 %v1167_v28, %v415_v12  ;;  %v455_v56 = vmul.f32 %v756_v40, %v1141_v58 }
 0x126   : > { %v537_v18 = vmul.f32 %v413_v36, %v1009_v57  ;;  %v393_v41 = vsel %vm392_vm2, %v1126_v49, %v389_v31  ;;  %v436_v49 = vmul.f32 %v1192_v17, %v435_v19  ;;  %v1214_v55 = vadd.f32 1e-05, %v351_v14  ;;  %v338_v9 = vpop.xlane.xlu0 %337 }
 0x127   : > { %v535_v42 = vmul.f32 %v393_v41, %v1013_v59  ;;  %v558_v43 = vmul.f32 %v1131_v51, %v539_v37  ;;  %v326_v52 = vpop.xlane.xlu2 %325  ;;  %v417_v57 = vmul.f32 0.5, %v416_v20  ;;  %v456_v54 = vmul.f32 %v756_v40, %v455_v56  ;;  %v332_v30 = vpop.xlane.xlu1 %331 }
 0x128   : > { %v556_v53 = vmul.f32 %v1131_v51, %v537_v18  ;;  %v437_v63 = vmul.f32 0.5, %v436_v49  ;;  %v1217_v1 = vadd.f32 1e-05, %v353_v39  ;;  %vm460_vm5 = vweird.f32 %v1141_v58 }
 0x129   : > { %v554_v26 = vmul.f32 %v1131_v51, %v535_v42  ;;  %v577_v59 = vadd.f32 %v1146_v60, %v558_v43  ;;  %v418_v62 = vsub.f32 1.5, %v417_v57  ;;  %v457_v5 = vmul.f32 0.5, %v456_v54 }
 0x12a   : > { %v575_v61 = vadd.f32 %v1146_v60, %v556_v53  ;;  %v1219_v3 = vpop.eup %757  ;;  %759 = vrsqrt.f32 %v1214_v55  ;;  %v438_v44 = vsub.f32 1.5, %v437_v63  ;;  %vm441_vm6 = vweird.f32 %v1192_v17 }
 0x12b   : > { %v573_v4 = vadd.f32 %v1146_v60, %v554_v26  ;;  %593 = vst.msk [vmem:[%s1169_s8 + $0x28] sm:$0xff] %vm190_vm0, %v577_v59  ;;  %v419_v6 = vmul.f32 %v1167_v28, %v418_v62  ;;  %v445_v7 = vmul.f32 %v1219_v3, %v1180_v29  ;;  %v458_v8 = vsub.f32 1.5, %v457_v5  ;;  %vm442_vm9 = vmor %vm440_vm3, %vm441_vm6 }
 0x12c   : > { %591 = vst.msk [vmem:[%s1169_s8 + $0x18] sm:$0xff] %vm190_vm0, %v575_v61  ;;  %vm461_vm8 = vweird.f32 %v756_v40  ;;  %761 = vrsqrt.f32 %v1217_v1  ;;  %v352_v45 = vmul.f32 %v326_v52, %v988_v38  ;;  %v439_v15 = vmul.f32 %v1192_v17, %v438_v44 }
 0x12d   : > { %589 = vst.msk [vmem:[%s1169_s8 + $0x8] sm:$0xff] %vm190_vm0, %v573_v4  ;;  %v423_v11 = vsel %vm422_vm7, %v1167_v28, %v419_v6  ;;  %v446_v21 = vmul.f32 %v1219_v3, %v445_v7  ;;  %v354_v22 = vmul.f32 %v332_v30, %v988_v38  ;;  %v459_v46 = vmul.f32 %v756_v40, %v458_v8  ;;  %vm462_vm11 = vmor %vm460_vm5, %vm461_vm8 }
 0x12e   : > { %v538_v23 = vmul.f32 %v423_v11, %v1024_v2  ;;  %vm450_vm10 = vweird.f32 %v1180_v29  ;;  %v1248_v27 = vadd.f32 1e-05, %v352_v45  ;;  %v443_v13 = vsel %vm442_vm9, %v1192_v17, %v439_v15 }
 0x12f   : > { %v447_v28 = vmul.f32 0.5, %v446_v21  ;;  %v1253_v31 = vadd.f32 1e-05, %v354_v22  ;;  %v356_v34 = vmul.f32 %v338_v9, %v988_v38  ;;  %v335_v12 = vpop.xlane.xlu2 %334  ;;  %v540_v14 = vmul.f32 %v443_v13, %v1034_v0  ;;  %v341_v49 = vpop.xlane.xlu1 %340 }
 0x130   : > { %v760_v2 = vpop.eup %759  ;;  %v557_v24 = vmul.f32 %v1131_v51, %v538_v23  ;;  %v463_v36 = vsel %vm462_vm11, %v756_v40, %v459_v46  ;;  %763 = vrsqrt.f32 %v1248_v27  ;;  %vm451_vm12 = vweird.f32 %v1219_v3 }
 0x131   : > { %v542_v17 = vmul.f32 %v463_v36, %v1031_v10  ;;  %v448_v37 = vsub.f32 1.5, %v447_v28  ;;  %v465_v58 = vmul.f32 %v760_v2, %v1214_v55  ;;  %v559_v41 = vmul.f32 %v1131_v51, %v540_v14  ;;  %vm452_vm13 = vmor %vm450_vm10, %vm451_vm12 }
 0x132   : > { %v762_v39 = vpop.eup %761  ;;  %v576_v18 = vadd.f32 %v1146_v60, %v557_v24  ;;  %765 = vrsqrt.f32 %v1253_v31  ;;  %v355_v0 = vmul.f32 %v335_v12, %v988_v38  ;;  %vm470_vm14 = vweird.f32 %v1214_v55 }
 0x133   : > { %v561_v40 = vmul.f32 %v1131_v51, %v542_v17  ;;  %v449_v20 = vmul.f32 %v1219_v3, %v448_v37  ;;  %v466_v10 = vmul.f32 %v760_v2, %v465_v58  ;;  %v485_v19 = vmul.f32 %v762_v39, %v1217_v1 }
 0x134   : > { %592 = vst.msk [vmem:[%s1169_s8 + $0x20] sm:$0xff] %vm190_vm0, %v576_v18  ;;  %v578_v42 = vadd.f32 %v1146_v60, %v559_v41  ;;  %v1275_v43 = vadd.f32 1e-05, %v356_v34  ;;  %vm490_vm15 = vweird.f32 %v1217_v1  ;;  %v1284_v29 = vadd.f32 1e-05, %v355_v0 }
 0x135   : > { %v580_v56 = vadd.f32 %v1146_v60, %v561_v40  ;;  %v453_v52 = vsel %vm452_vm13, %v1219_v3, %v449_v20  ;;  %v467_v53 = vmul.f32 0.5, %v466_v10  ;;  %v486_v57 = vmul.f32 %v762_v39, %v485_v19 }
 0x136   : > { %v764_v26 = vpop.eup %763  ;;  %594 = vst.msk [vmem:[%s1169_s8 + $0x30] sm:$0xff] %vm190_vm0, %v578_v42  ;;  %v541_v59 = vmul.f32 %v453_v52, %v1041_v16  ;;  %767 = vrsqrt.f32 %v1275_v43  ;;  %vm471_vm1 = vweird.f32 %v760_v2  ;;  %vm491_vm2 = vweird.f32 %v762_v39 }
 0x137   : > { %596 = vst.msk [vmem:[%s1169_s8 + $0x40] sm:$0xff] %vm190_vm0, %v580_v56  ;;  %v468_v54 = vsub.f32 1.5, %v467_v53  ;;  %v487_v61 = vmul.f32 0.5, %v486_v57  ;;  %v475_v62 = vmul.f32 %v764_v26, %v1248_v27  ;;  %769 = vrsqrt.f32 %v1284_v29  ;;  %vm472_vm3 = vmor %vm470_vm14, %vm471_vm1 }
 0x138   : > { %v766_v63 = vpop.eup %765  ;;  %v560_v3 = vmul.f32 %v1131_v51, %v541_v59  ;;  %v357_v16 = vmul.f32 %v341_v49, %v988_v38  ;;  %vm492_vm4 = vmor %vm490_vm15, %vm491_vm2  ;;  %vm481_vm5 = vweird.f32 %v764_v26  ;;  %vm480_vm6 = vweird.f32 %v1248_v27 }
 0x139   : > { %v469_v4 = vmul.f32 %v760_v2, %v468_v54  ;;  %v488_v5 = vsub.f32 1.5, %v487_v61  ;;  %v476_v30 = vmul.f32 %v764_v26, %v475_v62  ;;  %v495_v6 = vmul.f32 %v766_v63, %v1253_v31  ;;  %vm482_vm8 = vmor %vm480_vm6, %vm481_vm5 }
 0x13a   : > { %v579_v44 = vadd.f32 %v1146_v60, %v560_v3  ;;  %v1296_v7 = vadd.f32 1e-05, %v357_v16  ;;  %vm501_vm7 = vweird.f32 %v766_v63  ;;  %vm500_vm9 = vweird.f32 %v1253_v31 }
 0x13b   : > { %v473_v8 = vsel %vm472_vm3, %v760_v2, %v469_v4  ;;  %v489_v45 = vmul.f32 %v762_v39, %v488_v5  ;;  %v477_v9 = vmul.f32 0.5, %v476_v30  ;;  %v496_v11 = vmul.f32 %v766_v63, %v495_v6  ;;  %vm502_vm10 = vmor %vm500_vm9, %vm501_vm7 }
 0x13c   : > { %v768_v15 = vpop.eup %767  ;;  %595 = vst.msk [vmem:[%s1169_s8 + $0x38] sm:$0xff] %vm190_vm0, %v579_v44  ;;  %v543_v38 = vmul.f32 %v473_v8, %v1057_v33  ;;  %771 = vrsqrt.f32 %v1296_v7  ;;  %vm520_vm11 = vweird.f32 %v1275_v43  ;;  %vm510_vm15 = vweird.f32 %v1284_v29 }
 0x13d   : > { %v493_v55 = vsel %vm492_vm4, %v762_v39, %v489_v45  ;;  %v478_v21 = vsub.f32 1.5, %v477_v9  ;;  %v497_v22 = vmul.f32 0.5, %v496_v11  ;;  %v515_v23 = vmul.f32 %v768_v15, %v1275_v43  ;;  %v770_v46 = vpop.eup %769 }
 0x13e   : > { %v562_v13 = vmul.f32 %v1131_v51, %v543_v38  ;;  %v545_v28 = vmul.f32 %v493_v55, %v1054_v32  ;;  %v505_v12 = vmul.f32 %v770_v46, %v1284_v29  ;;  %vm521_vm12 = vweird.f32 %v768_v15 }
 0x13f   : > { %v479_v33 = vmul.f32 %v764_v26, %v478_v21  ;;  %v498_v1 = vsub.f32 1.5, %v497_v22  ;;  %v516_v34 = vmul.f32 %v768_v15, %v515_v23  ;;  %vm511_vm13 = vweird.f32 %v770_v46  ;;  %vm522_vm14 = vmor %vm520_vm11, %vm521_vm12 }
 0x140   : > { %v581_v2 = vadd.f32 %v1146_v60, %v562_v13  ;;  %v564_v24 = vmul.f32 %v1131_v51, %v545_v28  ;;  %v506_v17 = vmul.f32 %v770_v46, %v505_v12  ;;  %vm512_vm1 = vmor %vm510_vm15, %vm511_vm13  ;;  %vm530_vm3 = vweird.f32 %v1296_v7 }
 0x141   : > { %v483_v14 = vsel %vm482_vm8, %v764_v26, %v479_v33  ;;  %v499_v32 = vmul.f32 %v766_v63, %v498_v1  ;;  %v517_v36 = vmul.f32 0.5, %v516_v34 }
 0x142   : > { %v772_v27 = vpop.eup %771  ;;  %597 = vst.msk [vmem:[%s1169_s8 + $0x48] sm:$0xff] %vm190_vm0, %v581_v2  ;;  %v583_v37 = vadd.f32 %v1146_v60, %v564_v24  ;;  %v544_v58 = vmul.f32 %v483_v14, %v1062_v35  ;;  %v507_v31 = vmul.f32 0.5, %v506_v17 }
 0x143   : > { %v503_v39 = vsel %vm502_vm10, %v766_v63, %v499_v32  ;;  %v518_v18 = vsub.f32 1.5, %v517_v36  ;;  %v525_v41 = vmul.f32 %v772_v27, %v1296_v7  ;;  %vm531_vm2 = vweird.f32 %v772_v27 }
 0x144   : > { %599 = vst.msk [vmem:[%s1169_s8 + $0x58] sm:$0xff] %vm190_vm0, %v583_v37  ;;  %v563_v0 = vmul.f32 %v1131_v51, %v544_v58  ;;  %v546_v40 = vmul.f32 %v503_v39, %v1078_v48  ;;  %v508_v35 = vsub.f32 1.5, %v507_v31  ;;  %vm532_vm4 = vmor %vm530_vm3, %vm531_vm2 }
 0x145   : > { %v519_v20 = vmul.f32 %v768_v15, %v518_v18  ;;  %v526_v10 = vmul.f32 %v772_v27, %v525_v41 }
 0x146   : > { %v582_v19 = vadd.f32 %v1146_v60, %v563_v0  ;;  %v565_v42 = vmul.f32 %v1131_v51, %v546_v40  ;;  %v509_v52 = vmul.f32 %v770_v46, %v508_v35 }
 0x147   : > { %v523_v56 = vsel %vm522_vm14, %v768_v15, %v519_v20  ;;  %v527_v53 = vmul.f32 0.5, %v526_v10 }
 0x148   : > { %598 = vst.msk [vmem:[%s1169_s8 + $0x50] sm:$0xff] %vm190_vm0, %v582_v19  ;;  %v584_v48 = vadd.f32 %v1146_v60, %v565_v42  ;;  %v548_v57 = vmul.f32 %v523_v56, %v1075_v47  ;;  %v513_v49 = vsel %vm512_vm1, %v770_v46, %v509_v52 }
 0x149   : > { %v528_v26 = vsub.f32 1.5, %v527_v53  ;;  %v547_v59 = vmul.f32 %v513_v49, %v1083_v50 }
 0x14a   : > { %600 = vst.msk [vmem:[%s1169_s8 + $0x60] sm:$0xff] %vm190_vm0, %v584_v48  ;;  %v567_v43 = vmul.f32 %v1131_v51, %v548_v57 }
 0x14b   : > { %v529_v29 = vmul.f32 %v772_v27, %v528_v26  ;;  %v566_v54 = vmul.f32 %v1131_v51, %v547_v59 }
 0x14c   : > { %v586_v47 = vadd.f32 %v1146_v60, %v567_v43 }
 0x14d   : > { %v533_v61 = vsel %vm532_vm4, %v772_v27, %v529_v29  ;;  %v585_v50 = vadd.f32 %v1146_v60, %v566_v54 }
 0x14e   : > { %602 = vst.msk [vmem:[%s1169_s8 + $0x70] sm:$0xff] %vm190_vm0, %v586_v47  ;;  %v549_v62 = vmul.f32 %v533_v61, %v1094_v25 }
 0x14f   : > { %601 = vst.msk [vmem:[%s1169_s8 + $0x68] sm:$0xff] %vm190_vm0, %v585_v50 }
 0x150   : > { %v568_v63 = vmul.f32 %v1131_v51, %v549_v62 }
 0x152   : > { %v587_v3 = vadd.f32 %v1146_v60, %v568_v63 }
 0x154   : > { %603 = vst.msk [vmem:[%s1169_s8 + $0x78] sm:$0xff] %vm190_vm0, %v587_v3 }
 0x155   : > { %800 = shalt.err (!%p797_p3)
}
 0x156   : > { %s838_s29 = smov 128   ;;  %s839_s5 = smov 8  }
 0x157   : > { %695 = dma.vmem_to_hbm [thread:$0]  (%p898_p5), %s618_s16, 2048, %s620_s19, %s605_s20, %s838_s29, %s838_s29, %s839_s5  }
 0x158 PF: > { %p701_p4 = scmp.ge.s32.totalorder %s835_s15, 2  ;;  %s634_s6 = sand.u32 1, %s823_s12  }
 0x159   : > { %s635_s7 = scalar_lea.sflag [#allocation3], %s634_s6 }
 0x15a   : > { %p698_p7 = pnand %p701_p4, %p902_p6 }
 0x15c   : > { %p699_p8 = pneg %p698_p7 }
 0x15e   : > { %818 = dma.done.wait (%p699_p8), %s635_s7, 2048  }
 0x15f   : > { %820 = vsyncadd (%p699_p8), %s635_s7, 4294965248  ;;  %p13_p9 = scmp.ge.s32.totalorder %s885_s18, 4   ;;  %s1391_s12 = smov %s827_s13 }
 0x160   : > { %s1392_s13 = smov %s831_s14  ;;  %s1393_s14 = smov %s896_s21 }
 0x161   : > { %s1394_s15 = smov %s885_s18  ;;  %15 = sbr.rel (!%p13_p9) target bundleno = 3 (0x3), region = 67 }
 0x166   :  { %641 = vsyncpa [#allocation3], 1 }
 0x167   :  { %643 = vsyncpa [#allocation3 + $0x1], 1 }

// kernel: _lambda_.7
= control target key start
LH: loop header
LB: loop body
LE: loop exit
PB: predicated region body
PF: predicated region fallthrough
CT: control target
= control target key end

     0   :  { %s2884_s29 = smov 0   ;;  %s3954_s0 = inlined_call_operand.vmem [shape: f32[256,32], index: 0, kind: input, shape index: {}]   ;;  %s3955_s1 = inlined_call_operand.vmem [shape: bf16[32,96], index: 1, kind: input, shape index: {}]   ;;  %s3956_s2 = inlined_call_operand.vmem [shape: f32[1,96], index: 2, kind: input, shape index: {}]   ;;  %s3957_s3 = inlined_call_operand.vmem [shape: f32[2,64,64], index: 3, kind: input, shape index: {}]   ;;  %s3958_s4 = inlined_call_operand.vmem [shape: bf16[32,32], index: 4, kind: input, shape index: {}]   ;;  %s3959_s5 = inlined_call_operand.vmem [shape: f32[1,32], index: 5, kind: input, shape index: {}, may-alias: {5,7,11,13}]   ;;  %s3960_s6 = inlined_call_operand.vmem [shape: f32[1,32], index: 6, kind: input, shape index: {}, may-alias: {6,12}]   ;;  %s3961_s7 = inlined_call_operand.vmem [shape: f32[1,32], index: 7, kind: input, shape index: {}, may-alias: {5,7,11,13}]   ;;  %s3962_s8 = inlined_call_operand.vmem [shape: bf16[32,128], index: 8, kind: input, shape index: {}]   ;;  %s3963_s9 = inlined_call_operand.vmem [shape: f32[1,128], index: 9, kind: input, shape index: {}]   ;;  %s3964_s10 = inlined_call_operand.vmem [shape: bf16[128,32], index: 10, kind: input, shape index: {}]   ;;  %s3965_s11 = inlined_call_operand.vmem [shape: f32[1,32], index: 11, kind: input, shape index: {}, may-alias: {5,7,11,13}]   ;;  %s3966_s12 = inlined_call_operand.vmem [shape: f32[1,32], index: 12, kind: input, shape index: {}, may-alias: {6,12}]   ;;  %s3967_s13 = inlined_call_operand.vmem [shape: f32[1,32], index: 13, kind: input, shape index: {}, may-alias: {5,7,11,13}]   ;;  %s3968_s14 = inlined_call_operand.vmem [shape: f32[256,32], index: 14, kind: output, shape index: {}]  }
   0x1 LB: > { %s2464_s30 = sadd.s32 4294967295, %s2801_s29   ;;  %p2468_p0 = scmp.ge.s32.totalorder %s2801_s29, 1  ;;  %s2801_s29 = sphi %s2884_s29, %s24_s29  }
   0x2   : > { %p413_p1 = scmp.lt.s32.totalorder %s2801_s29, 5 }
   0x4   : > { %p414_p2 = pnand %p2468_p0, %p413_p1 }
   0x5   : > { %s2469_s17 = sshll.u32 (!%p414_p2), %s2464_s30, 3  ;;  %s2803_s26 = smov (!%p414_p2), 112  }
   0x6   : > { %417 = sbr.rel (%p414_p2) target bundleno = 2426 (0x97a), region = 76  ;;  %p460_p3 = scmp.lt.s32.totalorder (!%p414_p2), %s2469_s17, 31 }
   0x7   : > { %s2804_s27 = smov (!%p414_p2), 96   ;;  %s2805_s28 = smov (!%p414_p2), 80  }
   0x8   : > { %s2806_s19 = smov (!%p414_p2), 48   ;;  %s2807_s21 = smov (!%p414_p2), 64  }
   0xb   : > { %v2572_v0 = vld [vmem:[%s3955_s1 + $0x8] sm:$0xff]  ;;  %v2571_v1 = vld [vmem:[%s3955_s1] sm:$0xff]  ;;  %s3988_s17 = smov (!%p460_p3, %s2469_s17), 31  ;;  %vm504_vm0 = vcmask 261120   ;;  %vm554_vm1 = vcmask 130048  }
   0xc   : > { %523 = vmatpush.bf16.msra.mxu0 %v2572_v0  ;;  %2585 = vmatpush.bf16.msra.mxu2 %v2572_v0  ;;  %s2470_s20 = sshll.u32 %s3988_s17, 3  ;;  %v2601_v14 = vld [vmem:[%s3956_s2] ss:$0 sm:$0xff] }
   0xd   : > { %s2906_s23 = scalar_lea.vmem %s3954_s0, %s2470_s20  ;;  %s3898_s18 = scalar_lea.vmem %s3968_s14, %s2470_s20 }
   0xe   : > { %v472_v2 = vld [vmem:[%s2906_s23] sm:$0xff]  ;;  %v473_v3 = vld [vmem:[%s2906_s23 + $0x8] sm:$0xff]  ;;  %v474_v8 = vld [vmem:[%s2906_s23 + $0x10] sm:$0xff] }
   0xf   : > { %v476_v4 = vld [vmem:[%s2906_s23 + $0x20] sm:$0xff]  ;;  %v480_v5 = vpack.c.bf16 %v473_v3, %v472_v2  ;;  %v477_v6 = vld [vmem:[%s2906_s23 + $0x28] sm:$0xff]  ;;  %v475_v9 = vld [vmem:[%s2906_s23 + $0x18] sm:$0xff] }
  0x10   : > { %524 = vmatpush.bf16.msra.mxu0 %v2571_v1  ;;  %2586 = vmatpush.bf16.msra.mxu2 %v2571_v1  ;;  %v482_v7 = vpack.c.bf16 %v477_v6, %v476_v4  ;;  %v478_v10 = vld [vmem:[%s2906_s23 + $0x30] sm:$0xff]  ;;  %v479_v11 = vld [vmem:[%s2906_s23 + $0x38] sm:$0xff]  ;;  %v481_v12 = vpack.c.bf16 %v475_v9, %v474_v8 }
  0x11   : > { %v483_v13 = vpack.c.bf16 %v479_v11, %v478_v10 }
  0x13   : > { %2481 = vmatmul.msk.bf16.vlgmr.msra.gmra.mxu0 %vm504_vm0, %v480_v5  ;;  %2483 = vmatmul.msk.bf16.vlgmr.msra.gmra.mxu2 %vm504_vm0, %v482_v7 }
  0x23   : > { %2482 = vmatmul.msk.bf16.gmra.mxu0 %vm504_vm0, %v481_v12  ;;  %2484 = vmatmul.msk.bf16.gmra.mxu2 %vm504_vm0, %v483_v13 }
  0x90   : > { %v526_v15 = vpop.f32.mrf.mxu0 }
  0x91   : > { %v2923_v16 = vadd.f32 %v2601_v14, %v526_v15 }
  0x93   : > { %v546_v17 = vmul.f32 %v2923_v16, %v2923_v16 }
  0x95   : > { %1084 = vrot.lane.b32.xlu1 %v546_v17, %s2803_s26  ;;  %683 = vrot.lane.b32.xlu2 %v546_v17, %s2804_s27  ;;  %v555_v34 = vsel %vm554_vm1, %v546_v17, 0.0 }
  0x96   : > { %1228 = vrot.lane.b32.xlu0 %v546_v17, %s2805_s28  ;;  %v536_v18 = vpop.f32.mrf.mxu2 }
  0x97   : > { %v2930_v20 = vadd.f32 %v2601_v14, %v536_v18 }
  0x98   : > { %v528_v19 = vpop.f32.mrf.mxu0 }
  0x99   : > { %v2932_v21 = vadd.f32 %v2601_v14, %v528_v19  ;;  %v2936_v22 = vmul.f32 %v2930_v20, %v2930_v20 }
  0x9b   : > { %v547_v23 = vmul.f32 %v2932_v21, %v2932_v21 }
  0x9d   : > { %1230 = vrot.lane.b32.xlu1 %v547_v23, %s2805_s28  ;;  %v558_v38 = vsel %vm554_vm1, %v547_v23, 0.0 }
  0x9e   : > { %691 = vrot.lane.b32.xlu0 %v2936_v22, %s2804_s27  ;;  %v538_v24 = vpop.f32.mrf.mxu2 }
  0x9f   : > { %v2944_v25 = vadd.f32 %v2601_v14, %v538_v24 }
  0xa0   : > { %v531_v27 = vpop.f32.mrf.mxu0 }
  0xa1   : > { %v2948_v26 = vmul.f32 %v2944_v25, %v2944_v25  ;;  %v2952_v28 = vadd.f32 %v2601_v14, %v531_v27 }
  0xa3   : > { %v2956_v29 = vmul.f32 %v2952_v28, %v2952_v28 }
  0xa6   : > { %685 = vrot.lane.b32.xlu0 %v547_v23, %s2804_s27  ;;  %v541_v30 = vpop.f32.mrf.mxu2 }
  0xa7   : > { %v2960_v31 = vadd.f32 %v2601_v14, %v541_v30 }
  0xa8   : > { %v533_v33 = vpop.f32.mrf.mxu0 }
  0xa9   : > { %v2964_v32 = vmul.f32 %v2960_v31, %v2960_v31  ;;  %v2969_v35 = vadd.f32 %v2601_v14, %v533_v33 }
  0xab   : > { %v2973_v36 = vmul.f32 %v2969_v35, %v2969_v35 }
  0xae   : > { %1094 = vrot.lane.b32.xlu0 %v2948_v26, %s2803_s26  ;;  %v543_v37 = vpop.f32.mrf.mxu2 }
  0xaf   : > { %v2978_v39 = vadd.f32 %v2601_v14, %v543_v37 }
  0xb1   : > { %v2982_v40 = vmul.f32 %v2978_v39, %v2978_v39 }
  0xb6   : > { %1088 = vrot.lane.b32.xlu0 %v2956_v29, %s2803_s26 }
  0xbe   : > { %556 = vadd.xlane.f32.xlu2 %v555_v34  ;;  %1240 = vrot.lane.b32.xlu0 %v2964_v32, %s2805_s28 }
  0xc6   : > { %1234 = vrot.lane.b32.xlu0 %v2973_v36, %s2805_s28 }
  0xc7   : > { %559 = vadd.xlane.f32.xlu1 %v558_v38 }
  0xce   : > { %1242 = vrot.lane.b32.xlu0 %v2982_v40, %s2805_s28 }
  0xd6   : > { %1236 = vrot.lane.b32.xlu2 %v2936_v22, %s2805_s28 }
  0xde   : > { %1092 = vrot.lane.b32.xlu2 %v2936_v22, %s2803_s26 }
  0xe0   : > { %693 = vrot.lane.b32.xlu1 %v2948_v26, %s2804_s27 }
  0xe6   : > { %1086 = vrot.lane.b32.xlu2 %v547_v23, %s2803_s26 }
  0xe8   : > { %687 = vrot.lane.b32.xlu1 %v2956_v29, %s2804_s27 }
  0xee   : > { %1238 = vrot.lane.b32.xlu2 %v2948_v26, %s2805_s28 }
  0xef   : > { %v684_v45 = vpop.permute.xlu2 %683 }
  0xf0   : > { %695 = vrot.lane.b32.xlu1 %v2964_v32, %s2804_s27  ;;  %v707_v46 = vsel %vm554_vm1, %v684_v45, 0.0 }
  0xf6   : > { %1232 = vrot.lane.b32.xlu2 %v2956_v29, %s2805_s28 }
  0xf8   : > { %1096 = vrot.lane.b32.xlu1 %v2964_v32, %s2803_s26 }
  0xfe   : > { %689 = vrot.lane.b32.xlu2 %v2973_v36, %s2804_s27 }
 0x100   : > { %1090 = vrot.lane.b32.xlu1 %v2973_v36, %s2803_s26 }
 0x106   : > { %1098 = vrot.lane.b32.xlu2 %v2982_v40, %s2803_s26 }
 0x107   : > { %v1085_v44 = vpop.permute.xlu1 %1084 }
 0x108   : > { %v1229_v41 = vpop.permute.xlu0 %1228  ;;  %697 = vrot.lane.b32.xlu1 %v2982_v40, %s2804_s27  ;;  %v1108_v52 = vsel %vm554_vm1, %v1085_v44, 0.0 }
 0x109   : > { %v1252_v48 = vsel %vm554_vm1, %v1229_v41, 0.0 }
 0x10f   : > { %v1231_v49 = vpop.permute.xlu1 %1230 }
 0x110   : > { %v692_v42 = vpop.permute.xlu0 %691  ;;  %v1255_v61 = vsel %vm554_vm1, %v1231_v49, 0.0 }
 0x111   : > { %v719_v43 = vsel %vm554_vm1, %v692_v42, 0.0 }
 0x112   : > { %720 = vadd.xlane.f32.xlu0 %v719_v43 }
 0x118   : > { %v686_v0 = vpop.permute.xlu0 %685 }
 0x119   : > { %v710_v7 = vsel %vm554_vm1, %v686_v0, 0.0 }
 0x120   : > { %v1095_v10 = vpop.permute.xlu0 %1094 }
 0x121   : > { %v1123_v23 = vsel %vm554_vm1, %v1095_v10, 0.0 }
 0x128   : > { %v1089_v27 = vpop.permute.xlu0 %1088 }
 0x129   : > { %v1114_v30 = vsel %vm554_vm1, %v1089_v27, 0.0 }
 0x12f   : > { %708 = vadd.xlane.f32.xlu2 %v707_v46 }
 0x130   : > { %v1241_v41 = vpop.permute.xlu0 %1240 }
 0x131   : > { %v557_v47 = vpop.xlane.xlu2 %556  ;;  %v1270_v42 = vsel %vm554_vm1, %v1241_v41, 0.0 }
 0x132   : > { %v579_v50 = vadd.f32 1e-12, %v557_v47  ;;  %1253 = vadd.xlane.f32.xlu1 %v1252_v48 }
 0x134   : > { %2609 = vrsqrt.f32 %v579_v50  ;;  %vm593_vm3 = vweird.f32 %v579_v50 }
 0x139   : > { %v1237_v51 = vpop.permute.xlu2 %1236 }
 0x13a   : > { %v2610_v53 = vpop.eup %2609  ;;  %v560_v54 = vpop.xlane.xlu1 %559  ;;  %1109 = vadd.xlane.f32.xlu1 %v1108_v52  ;;  %v1264_v55 = vsel %vm554_vm1, %v1237_v51, 0.0 }
 0x13b   : > { %v588_v56 = vmul.f32 %v2610_v53, %v579_v50  ;;  %v580_v57 = vadd.f32 1e-12, %v560_v54  ;;  %1265 = vadd.xlane.f32.xlu2 %v1264_v55  ;;  %vm594_vm2 = vweird.f32 %v2610_v53  ;;  %v1235_v51 = vpop.permute.xlu0 %1234 }
 0x13c   : > { %vm595_vm5 = vmor %vm593_vm3, %vm594_vm2 }
 0x13d   : > { %v589_v58 = vmul.f32 %v2610_v53, %v588_v56  ;;  %2611 = vrsqrt.f32 %v580_v57  ;;  %vm603_vm6 = vweird.f32 %v580_v57 }
 0x13f   : > { %v590_v59 = vmul.f32 0.5, %v589_v58 }
 0x141   : > { %v1093_v60 = vpop.permute.xlu2 %1092  ;;  %v591_v1 = vsub.f32 1.5, %v590_v59 }
 0x142   : > { %1256 = vadd.xlane.f32.xlu1 %v1255_v61  ;;  %v1120_v62 = vsel %vm554_vm1, %v1093_v60, 0.0 }
 0x143   : > { %v2612_v63 = vpop.eup %2611  ;;  %1121 = vadd.xlane.f32.xlu0 %v1120_v62  ;;  %v592_v4 = vmul.f32 %v2610_v53, %v591_v1  ;;  %v1243_v55 = vpop.permute.xlu0 %1242 }
 0x144   : > { %v598_v2 = vmul.f32 %v2612_v63, %v580_v57  ;;  %vm604_vm4 = vweird.f32 %v2612_v63  ;;  %v1273_v57 = vsel %vm554_vm1, %v1243_v55, 0.0 }
 0x145   : > { %v596_v12 = vsel %vm595_vm5, %v2610_v53, %v592_v4  ;;  %vm605_vm7 = vmor %vm603_vm6, %vm604_vm4  ;;  %v1261_v53 = vsel %vm554_vm1, %v1235_v51, 0.0 }
 0x146   : > { %v599_v3 = vmul.f32 %v2612_v63, %v598_v2  ;;  %v3021_v14 = vmul.f32 %v596_v12, %v2923_v16 }
 0x148   : > { %v600_v5 = vmul.f32 0.5, %v599_v3 }
 0x149   : > { %v1087_v6 = vpop.permute.xlu2 %1086 }
 0x14a   : > { %v601_v8 = vsub.f32 1.5, %v600_v5  ;;  %v1111_v9 = vsel %vm554_vm1, %v1087_v6, 0.0 }
 0x14b   : > { %711 = vadd.xlane.f32.xlu0 %v710_v7  ;;  %1112 = vadd.xlane.f32.xlu1 %v1111_v9 }
 0x14c   : > { %v602_v11 = vmul.f32 %v2612_v63, %v601_v8 }
 0x14e   : > { %v606_v13 = vsel %vm605_vm7, %v2612_v63, %v602_v11 }
 0x14f   : > { %v3024_v15 = vmul.f32 %v606_v13, %v2932_v21 }
 0x151   : > { %v1239_v17 = vpop.permute.xlu2 %1238  ;;  %v827_v18 = vpack.c.bf16 %v3024_v15, %v3021_v14 }
 0x152   : > { %v694_v19 = vpop.permute.xlu1 %693  ;;  %v1267_v24 = vsel %vm554_vm1, %v1239_v17, 0.0 }
 0x153   : > { %1124 = vadd.xlane.f32.xlu0 %v1123_v23  ;;  %1268 = vadd.xlane.f32.xlu2 %v1267_v24  ;;  %v722_v37 = vsel %vm554_vm1, %v694_v19, 0.0 }
 0x159   : > { %v1233_v33 = vpop.permute.xlu2 %1232 }
 0x15a   : > { %v688_v34 = vpop.permute.xlu1 %687  ;;  %v1258_v38 = vsel %vm554_vm1, %v1233_v33, 0.0 }
 0x15b   : > { %1115 = vadd.xlane.f32.xlu0 %v1114_v30  ;;  %723 = vadd.xlane.f32.xlu2 %v722_v37  ;;  %v713_v43 = vsel %vm554_vm1, %v688_v34, 0.0 }
 0x15c   : > { %1259 = vadd.xlane.f32.xlu1 %v1258_v38 }
 0x161   : > { %v690_v44 = vpop.permute.xlu2 %689 }
 0x162   : > { %v696_v45 = vpop.permute.xlu1 %695  ;;  %v716_v56 = vsel %vm554_vm1, %v690_v44, 0.0 }
 0x163   : > { %1271 = vadd.xlane.f32.xlu0 %v1270_v42  ;;  %714 = vadd.xlane.f32.xlu2 %v713_v43  ;;  %v725_v46 = vsel %vm554_vm1, %v696_v45, 0.0 }
 0x169   : > { %v1099_v47 = vpop.permute.xlu2 %1098 }
 0x16a   : > { %v1097_v48 = vpop.permute.xlu1 %1096  ;;  %v1129_v49 = vsel %vm554_vm1, %v1099_v47, 0.0 }
 0x16b   : > { %726 = vadd.xlane.f32.xlu2 %v725_v46  ;;  %1130 = vadd.xlane.f32.xlu0 %v1129_v49  ;;  %v1126_v50 = vsel %vm554_vm1, %v1097_v48, 0.0 }
 0x16c   : > { %1127 = vadd.xlane.f32.xlu1 %v1126_v50 }
 0x172   : > { %v1091_v52 = vpop.permute.xlu1 %1090 }
 0x173   : > { %1262 = vadd.xlane.f32.xlu2 %v1261_v53  ;;  %v1117_v54 = vsel %vm554_vm1, %v1091_v52, 0.0 }
 0x174   : > { %1118 = vadd.xlane.f32.xlu1 %v1117_v54 }
 0x17a   : > { %v698_v58 = vpop.permute.xlu1 %697 }
 0x17b   : > { %717 = vadd.xlane.f32.xlu2 %v716_v56  ;;  %v728_v59 = vsel %vm554_vm1, %v698_v58, 0.0 }
 0x17c   : > { %1274 = vadd.xlane.f32.xlu1 %v1273_v57 }
 0x183   : > { %729 = vadd.xlane.f32.xlu2 %v728_v59 }
 0x185   : > { %v721_v0 = vpop.xlane.xlu0 %720 }
 0x186   : > { %v3060_v27 = vadd.f32 1e-12, %v721_v0 }
 0x1a2   : > { %v3043_v62 = vpop.xlane.xlu2 %708 }
 0x1a5   : > { %v1254_v60 = vpop.xlane.xlu1 %1253 }
 0x1a6   : > { %v1276_v61 = vadd.f32 1e-12, %v1254_v60 }
 0x1a8   : > { %2613 = vrsqrt.f32 %v1276_v61  ;;  %vm1290_vm9 = vweird.f32 %v1276_v61 }
 0x1ad   : > { %v1110_v63 = vpop.xlane.xlu1 %1109 }
 0x1ae   : > { %v2614_v1 = vpop.eup %2613  ;;  %v3045_v2 = vadd.f32 1e-12, %v1110_v63  ;;  %v1266_v4 = vpop.xlane.xlu2 %1265 }
 0x1af   : > { %v1285_v3 = vmul.f32 %v2614_v1, %v1276_v61  ;;  %v3048_v8 = vadd.f32 1e-12, %v1266_v4  ;;  %vm1291_vm8 = vweird.f32 %v2614_v1 }
 0x1b0   : > { %2615 = vrsqrt.f32 %v3045_v2  ;;  %vm3075_vm11 = vmor %vm1290_vm9, %vm1291_vm8  ;;  %vm1146_vm15 = vweird.f32 %v3045_v2 }
 0x1b1   : > { %v1286_v9 = vmul.f32 %v2614_v1, %v1285_v3  ;;  %vm1330_vm7 = vweird.f32 %v3048_v8 }
 0x1b3   : > { %v1287_v12 = vmul.f32 0.5, %v1286_v9 }
 0x1b5   : > { %v1257_v5 = vpop.xlane.xlu1 %1256  ;;  %v1288_v30 = vsub.f32 1.5, %v1287_v12 }
 0x1b6   : > { %v1277_v6 = vadd.f32 1e-12, %v1257_v5  ;;  %v1122_v7 = vpop.xlane.xlu0 %1121  ;;  %v3052_v11 = vpop.eup %2615 }
 0x1b7   : > { %v3050_v10 = vadd.f32 1e-12, %v1122_v7  ;;  %v1141_v17 = vmul.f32 %v3052_v11, %v3045_v2  ;;  %v1289_v43 = vmul.f32 %v2614_v1, %v1288_v30  ;;  %vm1147_vm14 = vweird.f32 %v3052_v11 }
 0x1b8   : > { %2617 = vrsqrt.f32 %v1277_v6  ;;  %vm1300_vm12 = vweird.f32 %v1277_v6  ;;  %vm3107_vm3 = vmor %vm1146_vm15, %vm1147_vm14 }
 0x1b9   : > { %2619 = vrsqrt.f32 %v3048_v8  ;;  %v1142_v38 = vmul.f32 %v3052_v11, %v1141_v17  ;;  %v1293_v56 = vsel %vm3075_vm11, %v2614_v1, %v1289_v43 }
 0x1ba   : > { %2621 = vrsqrt.f32 %v3050_v10  ;;  %v1364_v0 = vmul.f32 %v1293_v56, %v2923_v16 }
 0x1bb   : > { %v1143_v46 = vmul.f32 0.5, %v1142_v38 }
 0x1bd   : > { %v1144_v59 = vsub.f32 1.5, %v1143_v46 }
 0x1be   : > { %v2618_v13 = vpop.eup %2617  ;;  %v3058_v19 = vpop.xlane.xlu0 %711 }
 0x1bf   : > { %v1113_v23 = vpop.xlane.xlu1 %1112  ;;  %v1295_v24 = vmul.f32 %v2618_v13, %v1277_v6  ;;  %v3064_v34 = vpop.eup %2619  ;;  %vm1301_vm10 = vweird.f32 %v2618_v13  ;;  %v1145_v7 = vmul.f32 %v3052_v11, %v1144_v59 }
 0x1c0   : > { %v3062_v33 = vadd.f32 1e-12, %v1113_v23  ;;  %v3068_v41 = vpop.eup %2621  ;;  %v1325_v44 = vmul.f32 %v3064_v34, %v3048_v8  ;;  %vm1302_vm13 = vmor %vm1300_vm12, %vm1301_vm10  ;;  %vm1331_vm6 = vweird.f32 %v3064_v34  ;;  %vm1186_vm10 = vweird.f32 %v3050_v10 }
 0x1c1   : > { %v1296_v37 = vmul.f32 %v2618_v13, %v1295_v24  ;;  %v1181_v47 = vmul.f32 %v3068_v41, %v3050_v10  ;;  %v1149_v2 = vsel %vm3107_vm3, %v3052_v11, %v1145_v7  ;;  %vm1187_vm8 = vweird.f32 %v3068_v41  ;;  %vm3129_vm9 = vmor %vm1330_vm7, %vm1331_vm6 }
 0x1c2   : > { %2623 = vrsqrt.f32 %v3062_v33  ;;  %v1326_v55 = vmul.f32 %v3064_v34, %v1325_v44  ;;  %vm1156_vm4 = vweird.f32 %v3062_v33  ;;  %vm785_vm3 = vweird.f32 %v3060_v27 }
 0x1c3   : > { %v1297_v42 = vmul.f32 0.5, %v1296_v37  ;;  %2625 = vrsqrt.f32 %v3060_v27  ;;  %v1182_v60 = vmul.f32 %v3068_v41, %v1181_v47 }
 0x1c4   : > { %v1327_v4 = vmul.f32 0.5, %v1326_v55 }
 0x1c5   : > { %v1298_v45 = vsub.f32 1.5, %v1297_v42  ;;  %v1183_v9 = vmul.f32 0.5, %v1182_v60 }
 0x1c6   : > { %v1125_v48 = vpop.xlane.xlu0 %1124  ;;  %v1269_v49 = vpop.xlane.xlu2 %1268  ;;  %v1328_v30 = vsub.f32 1.5, %v1327_v4 }
 0x1c7   : > { %v1299_v51 = vmul.f32 %v2618_v13, %v1298_v45  ;;  %v3079_v52 = vadd.f32 1e-12, %v1125_v48  ;;  %v3081_v53 = vadd.f32 1e-12, %v1269_v49  ;;  %v1184_v45 = vsub.f32 1.5, %v1183_v9 }
 0x1c8   : > { %v2624_v54 = vpop.eup %2623  ;;  %v1329_v48 = vmul.f32 %v3064_v34, %v1328_v30 }
 0x1c9   : > { %v1151_v57 = vmul.f32 %v2624_v54, %v3062_v33  ;;  %2627 = vrsqrt.f32 %v3079_v52  ;;  %v3088_v58 = vpop.eup %2625  ;;  %v1303_v61 = vsel %vm1302_vm13, %v2618_v13, %v1299_v51  ;;  %vm1157_vm2 = vweird.f32 %v2624_v54  ;;  %vm3145_vm13 = vmor %vm1186_vm10, %vm1187_vm8 }
 0x1ca   : > { %2629 = vrsqrt.f32 %v3081_v53  ;;  %v1365_v3 = vmul.f32 %v1303_v61, %v2932_v21  ;;  %v780_v1 = vmul.f32 %v3088_v58, %v3060_v27  ;;  %vm1158_vm5 = vmor %vm1156_vm4, %vm1157_vm2  ;;  %v3121_v33 = vmul.f32 %v1149_v2, %v2923_v16 }
 0x1cb   : > { %v1152_v63 = vmul.f32 %v2624_v54, %v1151_v57  ;;  %v1185_v11 = vmul.f32 %v3068_v41, %v1184_v45  ;;  %v1333_v4 = vsel %vm3129_vm9, %v3064_v34, %v1329_v48  ;;  %vm1340_vm14 = vweird.f32 %v3081_v53 }
 0x1cc   : > { %v1376_v6 = vpack.c.bf16 %v1365_v3, %v1364_v0  ;;  %v781_v38 = vmul.f32 %v3088_v58, %v780_v1  ;;  %vm1196_vm15 = vweird.f32 %v3079_v52  ;;  %vm786_vm4 = vweird.f32 %v3088_v58 }
 0x1cd   : > { %v1153_v5 = vmul.f32 0.5, %v1152_v63  ;;  %v1189_v9 = vsel %vm3145_vm13, %v3068_v41, %v1185_v11  ;;  %vm3174_vm6 = vmor %vm785_vm3, %vm786_vm4 }
 0x1ce   : > { %v724_v12 = vpop.xlane.xlu2 %723  ;;  %1396 = vrot.lane.b32.xlu1 %v1376_v6, %s2805_s28  ;;  %v782_v51 = vmul.f32 0.5, %v781_v38  ;;  %v3134_v63 = vpop.xlane.xlu0 %1115  ;;  %v3162_v30 = vmul.f32 %v1189_v9, %v2930_v20 }
 0x1cf   : > { %v3098_v17 = vpop.eup %2627  ;;  %v1154_v13 = vsub.f32 1.5, %v1153_v5  ;;  %v3101_v23 = vadd.f32 1e-12, %v724_v12  ;;  %v1260_v56 = vpop.xlane.xlu1 %1259  ;;  %v1368_v12 = vmul.f32 %v1333_v4, %v2930_v20 }
 0x1d0   : > { %v2630_v24 = vpop.eup %2629  ;;  %v1191_v37 = vmul.f32 %v3098_v17, %v3079_v52  ;;  %vm1197_vm12 = vweird.f32 %v3098_v17  ;;  %v3140_v3 = vadd.f32 1e-12, %v1260_v56  ;;  %v783_v6 = vsub.f32 1.5, %v782_v51 }
 0x1d1   : > { %v1155_v43 = vmul.f32 %v2624_v54, %v1154_v13  ;;  %v1335_v44 = vmul.f32 %v2630_v24, %v3081_v53  ;;  %2631 = vrsqrt.f32 %v3101_v23  ;;  %vm1341_vm11 = vweird.f32 %v2630_v24 }
 0x1d2   : > { %v1192_v46 = vmul.f32 %v3098_v17, %v1191_v37  ;;  %vm1342_vm2 = vmor %vm1340_vm14, %vm1341_vm11  ;;  %2633 = vrsqrt.f32 %v3140_v3  ;;  %v784_v37 = vmul.f32 %v3088_v58, %v783_v6  ;;  %vm795_vm8 = vweird.f32 %v3101_v23 }
 0x1d3   : > { %v1336_v47 = vmul.f32 %v2630_v24, %v1335_v44  ;;  %v1159_v50 = vsel %vm1158_vm5, %v2624_v54, %v1155_v43  ;;  %vm1198_vm5 = vmor %vm1196_vm15, %vm1197_vm12  ;;  %vm1310_vm11 = vweird.f32 %v3140_v3 }
 0x1d4   : > { %v1193_v49 = vmul.f32 0.5, %v1192_v46  ;;  %v3124_v57 = vmul.f32 %v1159_v50, %v2932_v21  ;;  %v788_v27 = vsel %vm3174_vm6, %v3088_v58, %v784_v37 }
 0x1d5   : > { %v1337_v55 = vmul.f32 0.5, %v1336_v47 }
 0x1d6   : > { %v1194_v59 = vsub.f32 1.5, %v1193_v49  ;;  %v715_v60 = vpop.xlane.xlu2 %714  ;;  %v1372_v0 = vpack.c.bf16 %v3124_v57, %v3121_v33  ;;  %v1272_v2 = vpop.xlane.xlu0 %1271  ;;  %v576_v33 = vsel %vm554_vm1, %v2982_v40, 0.0 }
 0x1d7   : > { %v1338_v54 = vsub.f32 1.5, %v1337_v55  ;;  %v2632_v1 = vpop.eup %2631  ;;  %v3168_v42 = vadd.f32 1e-12, %v715_v60  ;;  %v3190_v49 = vadd.f32 1e-12, %v1272_v2  ;;  %v823_v55 = vmul.f32 %v788_v27, %v2930_v20 }
 0x1d8   : > { %v1195_v8 = vmul.f32 %v3098_v17, %v1194_v59  ;;  %v790_v7 = vmul.f32 %v2632_v1, %v3101_v23  ;;  %vm796_vm7 = vweird.f32 %v2632_v1  ;;  %v3183_v47 = vpop.eup %2633 }
 0x1d9   : > { %v1339_v5 = vmul.f32 %v2630_v24, %v1338_v54  ;;  %2635 = vrsqrt.f32 %v3168_v42  ;;  %vm797_vm9 = vmor %vm795_vm8, %vm796_vm7  ;;  %v1305_v51 = vmul.f32 %v3183_v47, %v3140_v3  ;;  %vm1311_vm10 = vweird.f32 %v3183_v47 }
 0x1da   : > { %v791_v53 = vmul.f32 %v2632_v1, %v790_v7  ;;  %v1199_v13 = vsel %vm1198_vm5, %v3098_v17, %v1195_v8  ;;  %2637 = vrsqrt.f32 %v3190_v49  ;;  %v3207_v8 = vadd.f32 1e-12, %v3043_v62  ;;  %vm3244_vm13 = vmor %vm1310_vm11, %vm1311_vm10 }
 0x1db   : > { %v1343_v34 = vsel %vm1342_vm2, %v2630_v24, %v1339_v5  ;;  %v3165_v41 = vmul.f32 %v1199_v13, %v2944_v25  ;;  %v1306_v58 = vmul.f32 %v3183_v47, %v1305_v51  ;;  %vm765_vm3 = vweird.f32 %v3168_v42 }
 0x1dc   : > { %v1369_v52 = vmul.f32 %v1343_v34, %v2944_v25  ;;  %v792_v38 = vmul.f32 0.5, %v791_v53  ;;  %vm1350_vm7 = vweird.f32 %v3190_v49 }
 0x1dd   : > { %v1374_v45 = vpack.c.bf16 %v3165_v41, %v3162_v30  ;;  %v1307_v10 = vmul.f32 0.5, %v1306_v58 }
 0x1de   : > { %v727_v24 = vpop.xlane.xlu2 %726  ;;  %v1378_v43 = vpack.c.bf16 %v1369_v52, %v1368_v12  ;;  %v793_v46 = vsub.f32 1.5, %v792_v38 }
 0x1df   : > { %v3178_v17 = vpop.xlane.xlu1 %1127  ;;  %v3196_v11 = vadd.f32 1e-12, %v727_v24  ;;  %v3200_v54 = vpop.eup %2635  ;;  %v1308_v52 = vsub.f32 1.5, %v1307_v10 }
 0x1e0   : > { %1400 = vrot.lane.b32.xlu2 %v1378_v43, %s2805_s28  ;;  %v794_v48 = vmul.f32 %v2632_v1, %v793_v46  ;;  %v760_v4 = vmul.f32 %v3200_v54, %v3168_v42  ;;  %v3214_v5 = vpop.eup %2637  ;;  %vm766_vm15 = vweird.f32 %v3200_v54 }
 0x1e1   : > { %v1345_v13 = vmul.f32 %v3214_v5, %v3190_v49  ;;  %v1309_v46 = vmul.f32 %v3183_v47, %v1308_v52  ;;  %vm3269_vm4 = vmor %vm765_vm3, %vm766_vm15  ;;  %vm1351_vm10 = vweird.f32 %v3214_v5  ;;  %vm805_vm15 = vweird.f32 %v3196_v11 }
 0x1e2   : > { %v798_v50 = vsel %vm797_vm9, %v2632_v1, %v794_v48  ;;  %v3212_v1 = vadd.f32 1e-12, %v3058_v19  ;;  %v761_v9 = vmul.f32 %v3200_v54, %v760_v4 }
 0x1e3   : > { %v824_v56 = vmul.f32 %v798_v50, %v2944_v25  ;;  %v1346_v48 = vmul.f32 %v3214_v5, %v1345_v13 }
 0x1e4   : > { %v762_v38 = vmul.f32 0.5, %v761_v9  ;;  %v1313_v9 = vsel %vm3244_vm13, %v3183_v47, %v1309_v46 }
 0x1e5   : > { %v833_v61 = vpack.c.bf16 %v824_v56, %v823_v55  ;;  %v1347_v52 = vmul.f32 0.5, %v1346_v48 }
 0x1e6   : > { %v1263_v23 = vpop.xlane.xlu2 %1262  ;;  %v763_v55 = vsub.f32 1.5, %v762_v38 }
 0x1e7   : > { %v1279_v59 = vadd.f32 1e-12, %v1263_v23  ;;  %v3198_v60 = vpop.xlane.xlu1 %1118  ;;  %843 = vrot.lane.b32.xlu0 %v833_v61, %s2804_s27  ;;  %v1348_v58 = vsub.f32 1.5, %v1347_v52 }
 0x1e8   : > { %v764_v13 = vmul.f32 %v3200_v54, %v763_v55 }
 0x1e9   : > { %2639 = vrsqrt.f32 %v1279_v59  ;;  %vm1320_vm14 = vweird.f32 %v1279_v59 }
 0x1ea   : > { %2641 = vrsqrt.f32 %v3196_v11 }
 0x1eb   : > { %2643 = vrsqrt.f32 %v3207_v8 }
 0x1ec   : > { %2645 = vrsqrt.f32 %v3212_v1 }
 0x1ee   : > { %v718_v6 = vpop.xlane.xlu2 %717 }
 0x1ef   : > { %v2640_v7 = vpop.eup %2639  ;;  %v3218_v34 = vadd.f32 1e-12, %v718_v6  ;;  %v1275_v12 = vpop.xlane.xlu1 %1274 }
 0x1f0   : > { %v3220_v62 = vpop.eup %2641  ;;  %v1315_v53 = vmul.f32 %v2640_v7, %v1279_v59  ;;  %v3224_v19 = vadd.f32 1e-12, %v1275_v12  ;;  %vm1321_vm12 = vweird.f32 %v2640_v7 }
 0x1f1   : > { %2647 = vrsqrt.f32 %v3218_v34  ;;  %v800_v24 = vmul.f32 %v3220_v62, %v3196_v11  ;;  %v3231_v44 = vpop.eup %2643  ;;  %vm1322_vm2 = vmor %vm1320_vm14, %vm1321_vm12  ;;  %vm775_vm6 = vweird.f32 %v3218_v34  ;;  %vm806_vm11 = vweird.f32 %v3220_v62 }
 0x1f2   : > { %v1316_v37 = vmul.f32 %v2640_v7, %v1315_v53  ;;  %2649 = vrsqrt.f32 %v3224_v19  ;;  %v3235_v2 = vpop.eup %2645  ;;  %v740_v61 = vmul.f32 %v3231_v44, %v3207_v8  ;;  %vm1360_vm12 = vweird.f32 %v3224_v19  ;;  %vm3296_vm14 = vmor %vm1350_vm7, %vm1351_vm10 }
 0x1f3   : > { %v801_v56 = vmul.f32 %v3220_v62, %v800_v24  ;;  %v750_v6 = vmul.f32 %v3235_v2, %v3212_v1  ;;  %vm807_vm3 = vmor %vm805_vm15, %vm806_vm11  ;;  %vm746_vm7 = vweird.f32 %v3231_v44  ;;  %vm745_vm10 = vweird.f32 %v3207_v8 }
 0x1f4   : > { %v1317_v43 = vmul.f32 0.5, %v1316_v37  ;;  %v741_v47 = vmul.f32 %v3231_v44, %v740_v61  ;;  %v768_v61 = vsel %vm3269_vm4, %v3200_v54, %v764_v13  ;;  %v1349_v13 = vmul.f32 %v3214_v5, %v1348_v58  ;;  %vm747_vm11 = vmor %vm745_vm10, %vm746_vm7 }
 0x1f5   : > { %v802_v37 = vmul.f32 0.5, %v801_v56  ;;  %v751_v46 = vmul.f32 %v3235_v2, %v750_v6  ;;  %v1134_v8 = vadd.f32 1e-12, %v3134_v63  ;;  %v564_v63 = vsel %vm554_vm1, %v2973_v36, 0.0 }
 0x1f6   : > { %v1318_v27 = vsub.f32 1.5, %v1317_v43  ;;  %v730_v50 = vpop.xlane.xlu2 %729  ;;  %v1366_v43 = vmul.f32 %v1313_v9, %v2952_v28  ;;  %v742_v9 = vmul.f32 0.5, %v741_v47  ;;  %v1353_v49 = vsel %vm3296_vm14, %v3214_v5, %v1349_v13 }
 0x1f7   : > { %v2648_v51 = vpop.eup %2647  ;;  %v3240_v23 = vadd.f32 1e-12, %v730_v50  ;;  %v573_v36 = vsel %vm554_vm1, %v2964_v32, 0.0 }
 0x1f8   : > { %v1319_v4 = vmul.f32 %v2640_v7, %v1318_v27  ;;  %v770_v3 = vmul.f32 %v2648_v51, %v3218_v34  ;;  %v3249_v10 = vpop.eup %2649  ;;  %vm776_vm5 = vweird.f32 %v2648_v51  ;;  %v821_v34 = vmul.f32 %v768_v61, %v2952_v28 }
 0x1f9   : > { %2651 = vrsqrt.f32 %v3240_v23  ;;  %v1355_v53 = vmul.f32 %v3249_v10, %v3224_v19  ;;  %vm777_vm8 = vmor %vm775_vm6, %vm776_vm5  ;;  %vm1361_vm9 = vweird.f32 %v3249_v10  ;;  %vm815_vm4 = vweird.f32 %v3240_v23 }
 0x1fa   : > { %v771_v12 = vmul.f32 %v2648_v51, %v770_v3  ;;  %v1323_v38 = vsel %vm1322_vm2, %v2640_v7, %v1319_v4  ;;  %v803_v4 = vsub.f32 1.5, %v802_v37  ;;  %vm3290_vm13 = vmor %vm1360_vm12, %vm1361_vm9  ;;  %vm756_vm6 = vweird.f32 %v3235_v2 }
 0x1fb   : > { %v1356_v59 = vmul.f32 %v3249_v10, %v1355_v53  ;;  %v1367_v27 = vmul.f32 %v1323_v38, %v2969_v35 }
 0x1fc   : > { %v772_v24 = vmul.f32 0.5, %v771_v12  ;;  %v752_v12 = vmul.f32 0.5, %v751_v46  ;;  %v804_v38 = vmul.f32 %v3220_v62, %v803_v4  ;;  %v743_v46 = vsub.f32 1.5, %v742_v9 }
 0x1fd   : > { %v1357_v50 = vmul.f32 0.5, %v1356_v59  ;;  %v1377_v55 = vpack.c.bf16 %v1367_v27, %v1366_v43 }
 0x1fe   : > { %v773_v7 = vsub.f32 1.5, %v772_v24  ;;  %v753_v59 = vsub.f32 1.5, %v752_v12  ;;  %v744_v4 = vmul.f32 %v3231_v44, %v743_v46  ;;  %v1131_v46 = vpop.xlane.xlu0 %1130 }
 0x1ff   : > { %v2652_v56 = vpop.eup %2651  ;;  %v1358_v42 = vsub.f32 1.5, %v1357_v50  ;;  %1398 = vrot.lane.b32.xlu1 %v1377_v55, %s2805_s28  ;;  %v1370_v55 = vmul.f32 %v1353_v49, %v2960_v31 }
 0x200   : > { %v774_v3 = vmul.f32 %v2648_v51, %v773_v7  ;;  %v810_v6 = vmul.f32 %v2652_v56, %v3240_v23  ;;  %vm816_vm2 = vweird.f32 %v2652_v56  ;;  %v808_v7 = vsel %vm807_vm3, %v3220_v62, %v804_v38 }
 0x201   : > { %v1359_v53 = vmul.f32 %v3249_v10, %v1358_v42  ;;  %vm817_vm5 = vmor %vm815_vm4, %vm816_vm2  ;;  %v754_v50 = vmul.f32 %v3235_v2, %v753_v59  ;;  %v825_v58 = vmul.f32 %v808_v7, %v2960_v31 }
 0x202   : > { %v811_v52 = vmul.f32 %v2652_v56, %v810_v6  ;;  %v778_v54 = vsel %vm777_vm8, %v2648_v51, %v774_v3  ;;  %vm755_vm8 = vweird.f32 %v3212_v1  ;;  %v1135_v1 = vadd.f32 1e-12, %v3198_v60 }
 0x203   : > { %v822_v37 = vmul.f32 %v778_v54, %v2969_v35  ;;  %v1363_v19 = vsel %vm3290_vm13, %v3249_v10, %v1359_v53  ;;  %vm757_vm9 = vmor %vm755_vm8, %vm756_vm6  ;;  %vm1166_vm13 = vweird.f32 %v1134_v8 }
 0x204   : > { %v812_v24 = vmul.f32 0.5, %v811_v52  ;;  %v1371_v11 = vmul.f32 %v1363_v19, %v2978_v39  ;;  %v758_v61 = vsel %vm757_vm9, %v3235_v2, %v754_v50  ;;  %2653 = vrsqrt.f32 %v1135_v1 }
 0x205   : > { %v832_v51 = vpack.c.bf16 %v822_v37, %v821_v34  ;;  %v820_v3 = vmul.f32 %v758_v61, %v2932_v21  ;;  %2655 = vrsqrt.f32 %v1134_v8  ;;  %vm1176_vm15 = vweird.f32 %v1135_v1 }
 0x206   : > { %v813_v47 = vsub.f32 1.5, %v812_v24  ;;  %v1379_v5 = vpack.c.bf16 %v1371_v11, %v1370_v55 }
 0x207   : > { %841 = vrot.lane.b32.xlu2 %v832_v51, %s2804_s27  ;;  %v567_v51 = vsel %vm554_vm1, %v2936_v22, 0.0  ;;  %v1138_v22 = vadd.f32 1e-12, %v3178_v17 }
 0x208   : > { %v814_v48 = vmul.f32 %v2652_v56, %v813_v47 }
 0x209   : > { %vm1206_vm8 = vweird.f32 %v1138_v22 }
 0x20a   : > { %v818_v10 = vsel %vm817_vm5, %v2652_v56, %v814_v48  ;;  %v748_v56 = vsel %vm747_vm11, %v3231_v44, %v744_v4  ;;  %v2654_v2 = vpop.eup %2653  ;;  %v561_v44 = vsel %vm554_vm1, %v2956_v29, 0.0  ;;  %v1139_v48 = vadd.f32 1e-12, %v1131_v46 }
 0x20b   : > { %v826_v23 = vmul.f32 %v818_v10, %v2978_v39  ;;  %v819_v42 = vmul.f32 %v748_v56, %v2923_v16  ;;  %v2656_v9 = vpop.eup %2655  ;;  %v1171_v12 = vmul.f32 %v2654_v2, %v1135_v1  ;;  %vm1177_vm12 = vweird.f32 %v2654_v2 }
 0x20c   : > { %v1161_v53 = vmul.f32 %v2656_v9, %v1134_v8  ;;  %vm1167_vm14 = vweird.f32 %v2656_v9  ;;  %vm1178_vm2 = vmor %vm1176_vm15, %vm1177_vm12  ;;  %2657 = vrsqrt.f32 %v1139_v48  ;;  %vm1216_vm6 = vweird.f32 %v1139_v48 }
 0x20d   : > { %v834_v62 = vpack.c.bf16 %v826_v23, %v825_v58  ;;  %v831_v6 = vpack.c.bf16 %v820_v3, %v819_v42  ;;  %v1172_v52 = vmul.f32 %v2654_v2, %v1171_v12  ;;  %vm1168_vm3 = vmor %vm1166_vm13, %vm1167_vm14  ;;  %2659 = vrsqrt.f32 %v1138_v22 }
 0x20e   : > { %v1162_v54 = vmul.f32 %v2656_v9, %v1161_v53  ;;  %v570_v58 = vsel %vm554_vm1, %v2948_v26, 0.0 }
 0x20f   : > { %1402 = vrot.lane.b32.xlu2 %v1379_v5, %s2805_s28  ;;  %845 = vrot.lane.b32.xlu0 %v834_v62, %s2804_s27  ;;  %v1173_v13 = vmul.f32 0.5, %v1172_v52 }
 0x210   : > { %v1163_v34 = vmul.f32 0.5, %v1162_v54 }
 0x211   : > { %v1174_v37 = vsub.f32 1.5, %v1173_v13 }
 0x212   : > { %v1164_v38 = vsub.f32 1.5, %v1163_v34  ;;  %v2658_v7 = vpop.eup %2657 }
 0x213   : > { %v1175_v24 = vmul.f32 %v2654_v2, %v1174_v37  ;;  %v2660_v50 = vpop.eup %2659  ;;  %v1211_v57 = vmul.f32 %v2658_v7, %v1139_v48  ;;  %vm1217_vm4 = vweird.f32 %v2658_v7 }
 0x214   : > { %v1165_v60 = vmul.f32 %v2656_v9, %v1164_v38  ;;  %vm1207_vm5 = vweird.f32 %v2660_v50  ;;  %vm1218_vm7 = vmor %vm1216_vm6, %vm1217_vm4 }
 0x215   : > { %v1179_v59 = vsel %vm1178_vm2, %v2654_v2, %v1175_v24  ;;  %v1212_v30 = vmul.f32 %v2658_v7, %v1211_v57  ;;  %vm1208_vm9 = vmor %vm1206_vm8, %vm1207_vm5 }
 0x216   : > { %v1169_v29 = vsel %vm1168_vm3, %v2656_v9, %v1165_v60  ;;  %v1223_v43 = vmul.f32 %v1179_v59, %v2969_v35 }
 0x217   : > { %839 = vrot.lane.b32.xlu2 %v831_v6, %s2804_s27  ;;  %v1222_v27 = vmul.f32 %v1169_v29, %v2952_v28 }
 0x219   : > { %v1373_v47 = vpack.c.bf16 %v1223_v43, %v1222_v27 }
 0x229   : > { %562 = vadd.xlane.f32.xlu1 %v561_v44 }
 0x239   : > { %565 = vadd.xlane.f32.xlu0 %v564_v63 }
 0x23a   : > { %v1401_v19 = vpop.permute.xlu2 %1400 }
 0x23b   : > { %v1423_v17 = vsel %vm554_vm1, %v1401_v19, 0 }
 0x240   : > { %568 = vadd.xlane.f32.xlu2 %v567_v51  ;;  %v1397_v10 = vpop.permute.xlu1 %1396 }
 0x241   : > { %v1417_v26 = vsel %vm554_vm1, %v1397_v10, 0 }
 0x242   : > { %1386 = vrot.lane.b32.xlu1 %v1373_v47, %s2803_s26 }
 0x248   : > { %574 = vadd.xlane.f32.xlu2 %v573_v36 }
 0x24d   : > { %1384 = vrot.lane.b32.xlu0 %v1372_v0, %s2803_s26  ;;  %v1201_v0 = vmul.f32 %v2660_v50, %v1138_v22 }
 0x24f   : > { %v1202_v41 = vmul.f32 %v2660_v50, %v1201_v0 }
 0x251   : > { %v1203_v55 = vmul.f32 0.5, %v1202_v41 }
 0x253   : > { %v1204_v62 = vsub.f32 1.5, %v1203_v55 }
 0x255   : > { %v1205_v56 = vmul.f32 %v2660_v50, %v1204_v62 }
 0x257   : > { %v1209_v6 = vsel %vm1208_vm9, %v2660_v50, %v1205_v56 }
 0x258   : > { %v1226_v8 = vmul.f32 %v1209_v6, %v2960_v31 }
 0x259   : > { %v844_v4 = vpop.permute.xlu0 %843 }
 0x25a   : > { %v866_v12 = vsel %vm554_vm1, %v844_v4, 0 }
 0x260   : > { %1388 = vrot.lane.b32.xlu2 %v1374_v45, %s2803_s26  ;;  %v1213_v45 = vmul.f32 0.5, %v1212_v30 }
 0x261   : > { %v842_v49 = vpop.permute.xlu2 %841 }
 0x262   : > { %v1214_v5 = vsub.f32 1.5, %v1213_v45  ;;  %v863_v53 = vsel %vm554_vm1, %v842_v49, 0 }
 0x264   : > { %v1215_v61 = vmul.f32 %v2658_v7, %v1214_v5 }
 0x266   : > { %v1219_v1 = vsel %vm1218_vm7, %v2658_v7, %v1215_v61 }
 0x267   : > { %v1227_v2 = vmul.f32 %v1219_v1, %v2978_v39 }
 0x269   : > { %v1403_v32 = vpop.permute.xlu2 %1402  ;;  %v1375_v9 = vpack.c.bf16 %v1227_v2, %v1226_v8 }
 0x26a   : > { %v1426_v11 = vsel %vm554_vm1, %v1403_v32, 0 }
 0x26b   : > { %1432 = vmatpush.bf16.xpose.msra.mxu3 %v1426_v11 }
 0x26c   : > { %577 = vadd.xlane.f32.xlu1 %v576_v33 }
 0x271   : > { %v1399_v23 = vpop.permute.xlu1 %1398  ;;  %v840_v44 = vpop.permute.xlu2 %839 }
 0x272   : > { %v1420_v40 = vsel %vm554_vm1, %v1399_v23, 0  ;;  %v860_v52 = vsel %vm554_vm1, %v840_v44, 0 }
 0x273   : > { %1433 = vmatpush.bf16.xpose.msra.mxu3 %v1423_v17 }
 0x277   : > { %571 = vadd.xlane.f32.xlu0 %v570_v58 }
 0x27b   : > { %1434 = vmatpush.bf16.xpose.msra.mxu3 %v1420_v40 }
 0x281   : > { %v846_v3 = vpop.permute.xlu0 %845 }
 0x282   : > { %v869_v42 = vsel %vm554_vm1, %v846_v3, 0 }
 0x283   : > { %875 = vmatpush.bf16.xpose.msra.mxu1 %v869_v42  ;;  %1435 = vmatpush.bf16.xpose.msra.mxu3 %v1417_v26 }
 0x28b   : > { %1390 = vrot.lane.b32.xlu0 %v1375_v9, %s2803_s26  ;;  %876 = vmatpush.bf16.xpose.msra.mxu1 %v866_v12 }
 0x293   : > { %877 = vmatpush.bf16.xpose.msra.mxu1 %v863_v53 }
 0x29b   : > { %878 = vmatpush.bf16.xpose.msra.mxu1 %v860_v52 }
 0x29c   : > { %v563_v54 = vpop.xlane.xlu1 %562 }
 0x29d   : > { %v581_v13 = vadd.f32 1e-12, %v563_v54 }
 0x29f   : > { %2661 = vrsqrt.f32 %v581_v13  ;;  %vm613_vm11 = vweird.f32 %v581_v13 }
 0x2a2   : > { %2485 = vmatmul.msk.bf16.vlgmr.msra.gmra.mxu1 %vm554_vm1, %v827_v18 }
 0x2a5   : > { %v2662_v34 = vpop.eup %2661 }
 0x2a6   : > { %v608_v37 = vmul.f32 %v2662_v34, %v581_v13  ;;  %vm614_vm10 = vweird.f32 %v2662_v34 }
 0x2a7   : > { %vm615_vm13 = vmor %vm613_vm11, %vm614_vm10 }
 0x2a8   : > { %v609_v63 = vmul.f32 %v2662_v34, %v608_v37 }
 0x2aa   : > { %v610_v60 = vmul.f32 0.5, %v609_v63 }
 0x2ac   : > { %v566_v38 = vpop.xlane.xlu0 %565  ;;  %v611_v29 = vsub.f32 1.5, %v610_v60 }
 0x2ad   : > { %v582_v24 = vadd.f32 1e-12, %v566_v38 }
 0x2ae   : > { %v612_v27 = vmul.f32 %v2662_v34, %v611_v29 }
 0x2af   : > { %2663 = vrsqrt.f32 %v582_v24  ;;  %vm623_vm14 = vweird.f32 %v582_v24 }
 0x2b0   : > { %v616_v15 = vsel %vm615_vm13, %v2662_v34, %v612_v27  ;;  %v908_v27 = vld [vmem:[%s3957_s3] sm:$0xff] }
 0x2b1   : > { %v669_v46 = vmul.f32 %v616_v15, %v2952_v28 }
 0x2b3   : > { %v569_v49 = vpop.xlane.xlu2 %568 }
 0x2b4   : > { %v1387_v32 = vpop.permute.xlu1 %1386  ;;  %v583_v11 = vadd.f32 1e-12, %v569_v49 }
 0x2b5   : > { %v2664_v59 = vpop.eup %2663 }
 0x2b6   : > { %v618_v43 = vmul.f32 %v2664_v59, %v582_v24  ;;  %vm624_vm12 = vweird.f32 %v2664_v59  ;;  %2665 = vrsqrt.f32 %v583_v11  ;;  %vm633_vm3 = vweird.f32 %v583_v11 }
 0x2b7   : > { %vm625_vm15 = vmor %vm623_vm14, %vm624_vm12  ;;  %vm924_vm14 = vcmask 523264  }
 0x2b8   : > { %v619_v51 = vmul.f32 %v2664_v59, %v618_v43 }
 0x2ba   : > { %v620_v47 = vmul.f32 0.5, %v619_v51 }
 0x2bb   : > { %v575_v7 = vpop.xlane.xlu2 %574 }
 0x2bc   : > { %v621_v36 = vsub.f32 1.5, %v620_v47  ;;  %v2666_v33 = vpop.eup %2665  ;;  %v585_v41 = vadd.f32 1e-12, %v575_v7  ;;  %v2497_v7 = vld [vmem:[%s3957_s3 + $0x40] sm:$0xff] }
 0x2bd   : > { %v628_v0 = vmul.f32 %v2666_v33, %v583_v11  ;;  %vm634_vm2 = vweird.f32 %v2666_v33 }
 0x2be   : > { %v622_v14 = vmul.f32 %v2664_v59, %v621_v36  ;;  %vm635_vm5 = vmor %vm633_vm3, %vm634_vm2  ;;  %vm653_vm12 = vweird.f32 %v585_v41 }
 0x2bf   : > { %v1385_v18 = vpop.permute.xlu0 %1384  ;;  %v629_v45 = vmul.f32 %v2666_v33, %v628_v0  ;;  %v2500_v0 = vld [vmem:[%s3957_s3 + $0x58] sm:$0xff] }
 0x2c0   : > { %2493 = vmatmul.msk.bf16.vlgmr.msra.gmra.mxu3 %vm554_vm1, %v1385_v18  ;;  %v626_v19 = vsel %vm625_vm15, %v2664_v59, %v622_v14  ;;  %v909_v18 = vld [vmem:[%s3957_s3 + $0x8] sm:$0xff] }
 0x2c1   : > { %v670_v48 = vmul.f32 %v626_v19, %v2969_v35  ;;  %v630_v55 = vmul.f32 0.5, %v629_v45 }
 0x2c3   : > { %v828_v22 = vpack.c.bf16 %v670_v48, %v669_v46  ;;  %v1389_v50 = vpop.permute.xlu2 %1388  ;;  %v631_v4 = vsub.f32 1.5, %v630_v55 }
 0x2c5   : > { %2486 = vmatmul.msk.bf16.gmra.mxu1 %vm554_vm1, %v828_v22  ;;  %v632_v56 = vmul.f32 %v2666_v33, %v631_v4  ;;  %v1020_v22 = vpack.c.bf16 %v2978_v39, %v2960_v31  ;;  %v911_v4 = vld [vmem:[%s3957_s3 + $0x18] sm:$0xff] }
 0x2c7   : > { %v636_v2 = vsel %vm635_vm5, %v2666_v33, %v632_v56  ;;  %v1018_v33 = vpack.c.bf16 %v2969_v35, %v2952_v28  ;;  %v2501_v35 = vld [vmem:[%s3957_s3 + $0x60] sm:$0xff] }
 0x2c8   : > { %v671_v44 = vmul.f32 %v636_v2, %v2930_v20  ;;  %v2502_v2 = vld [vmem:[%s3957_s3 + $0x68] sm:$0xff] }
 0x2d0   : > { %2494 = vmatmul.msk.bf16.gmra.mxu3 %vm554_vm1, %v1387_v32  ;;  %v1019_v32 = vpack.c.bf16 %v2944_v25, %v2930_v20 }
 0x2df   : > { %v578_v57 = vpop.xlane.xlu1 %577 }
 0x2e0   : > { %2495 = vmatmul.msk.bf16.gmra.mxu3 %vm554_vm1, %v1389_v50  ;;  %v586_v10 = vadd.f32 1e-12, %v578_v57 }
 0x2e2   : > { %2667 = vrsqrt.f32 %v586_v10  ;;  %vm663_vm10 = vweird.f32 %v586_v10 }
 0x2e8   : > { %v2668_v58 = vpop.eup %2667 }
 0x2e9   : > { %v658_v40 = vmul.f32 %v2668_v58, %v586_v10  ;;  %vm664_vm8 = vweird.f32 %v2668_v58 }
 0x2ea   : > { %v572_v30 = vpop.xlane.xlu0 %571  ;;  %vm665_vm11 = vmor %vm663_vm10, %vm664_vm8 }
 0x2eb   : > { %v584_v17 = vadd.f32 1e-12, %v572_v30  ;;  %v659_v26 = vmul.f32 %v2668_v58, %v658_v40 }
 0x2ed   : > { %2669 = vrsqrt.f32 %v584_v17  ;;  %vm643_vm6 = vweird.f32 %v584_v17  ;;  %v660_v12 = vmul.f32 0.5, %v659_v26 }
 0x2ee   : > { %2671 = vrsqrt.f32 %v585_v41 }
 0x2ef   : > { %v661_v34 = vsub.f32 1.5, %v660_v12 }
 0x2f1   : > { %v662_v38 = vmul.f32 %v2668_v58, %v661_v34 }
 0x2f3   : > { %v2670_v23 = vpop.eup %2669  ;;  %v666_v63 = vsel %vm665_vm11, %v2668_v58, %v662_v38  ;;  %v2503_v38 = vld [vmem:[%s3957_s3 + $0x70] sm:$0xff] }
 0x2f4   : > { %v638_v5 = vmul.f32 %v2670_v23, %v584_v17  ;;  %v2672_v62 = vpop.eup %2671  ;;  %vm644_vm4 = vweird.f32 %v2670_v23  ;;  %v674_v59 = vmul.f32 %v666_v63, %v2978_v39 }
 0x2f5   : > { %v648_v3 = vmul.f32 %v2672_v62, %v585_v41  ;;  %vm645_vm7 = vmor %vm643_vm6, %vm644_vm4  ;;  %vm654_vm9 = vweird.f32 %v2672_v62 }
 0x2f6   : > { %v639_v61 = vmul.f32 %v2670_v23, %v638_v5  ;;  %vm655_vm13 = vmor %vm653_vm12, %vm654_vm9 }
 0x2f7   : > { %v649_v1 = vmul.f32 %v2672_v62, %v648_v3 }
 0x2f8   : > { %v640_v42 = vmul.f32 0.5, %v639_v61  ;;  %v912_v61 = vld [vmem:[%s3957_s3 + $0x20] sm:$0xff] }
 0x2f9   : > { %v650_v54 = vmul.f32 0.5, %v649_v1 }
 0x2fa   : > { %v641_v6 = vsub.f32 1.5, %v640_v42 }
 0x2fb   : > { %v651_v37 = vsub.f32 1.5, %v650_v54 }
 0x2fc   : > { %v642_v8 = vmul.f32 %v2670_v23, %v641_v6  ;;  %v2498_v6 = vld [vmem:[%s3957_s3 + $0x48] sm:$0xff] }
 0x2fd   : > { %v1391_v9 = vpop.permute.xlu0 %1390  ;;  %v652_v24 = vmul.f32 %v2672_v62, %v651_v37 }
 0x2fe   : > { %2496 = vmatmul.msk.bf16.gmra.mxu3 %vm554_vm1, %v1391_v9  ;;  %v646_v53 = vsel %vm645_vm7, %v2670_v23, %v642_v8 }
 0x2ff   : > { %v672_v52 = vmul.f32 %v646_v53, %v2944_v25  ;;  %v656_v60 = vsel %vm655_vm13, %v2672_v62, %v652_v24 }
 0x300   : > { %v673_v29 = vmul.f32 %v656_v60, %v2960_v31 }
 0x301   : > { %v829_v13 = vpack.c.bf16 %v672_v52, %v671_v44 }
 0x302   : > { %v830_v43 = vpack.c.bf16 %v674_v59, %v673_v29 }
 0x303   : > { %2487 = vmatmul.msk.bf16.gmra.mxu1 %vm554_vm1, %v829_v13  ;;  %v910_v13 = vld [vmem:[%s3957_s3 + $0x10] sm:$0xff] }
 0x313   : > { %2488 = vmatmul.msk.bf16.gmra.mxu1 %vm554_vm1, %v830_v43  ;;  %v2499_v43 = vld [vmem:[%s3957_s3 + $0x50] sm:$0xff] }
 0x31f   : > { %v880_v51 = vpop.f32.mrf.mxu1 }
 0x320   : > { %v900_v47 = vmul.f32 10.0, %v880_v51 }
 0x322   : > { %v3384_v36 = vadd.f32 %v908_v27, %v900_v47 }
 0x324   : > { %v925_v14 = vsel %vm924_vm14, %v3384_v36, -inf }
 0x325   : > { %926 = vmax.xlane.f32.xlu2 %v925_v14 }
 0x327   : > { %v882_v15 = vpop.f32.mrf.mxu1 }
 0x328   : > { %v901_v19 = vmul.f32 10.0, %v882_v15  ;;  %v915_v15 = vld [vmem:[%s3957_s3 + $0x38] sm:$0xff] }
 0x32a   : > { %v3391_v46 = vadd.f32 %v909_v18, %v901_v19 }
 0x32c   : > { %v928_v48 = vsel %vm924_vm14, %v3391_v46, -inf }
 0x32d   : > { %929 = vmax.xlane.f32.xlu0 %v928_v48 }
 0x33d   : > { %1580 = vrot.lane.b32.xlu2 %v1020_v22, %s2806_s19 }
 0x341   : > { %1031 = vrot.lane.b32.xlu0 %v1020_v22, %s2807_s21 }
 0x342   : > { %v885_v41 = vpop.f32.mrf.mxu1 }
 0x343   : > { %v1437_v49 = vpop.f32.mrf.mxu3  ;;  %v902_v52 = vmul.f32 10.0, %v885_v41 }
 0x344   : > { %v1457_v11 = vmul.f32 10.0, %v1437_v49  ;;  %v913_v49 = vld [vmem:[%s3957_s3 + $0x28] sm:$0xff] }
 0x345   : > { %1029 = vrot.lane.b32.xlu2 %v1019_v32, %s2807_s21  ;;  %v3462_v24 = vadd.f32 %v910_v13, %v902_v52 }
 0x346   : > { %v3405_v50 = vadd.f32 %v2497_v7, %v1457_v11 }
 0x347   : > { %v931_v29 = vsel %vm924_vm14, %v3462_v24, -inf }
 0x348   : > { %v1482_v31 = vsel %vm924_vm14, %v3405_v50, -inf }
 0x349   : > { %1483 = vmax.xlane.f32.xlu1 %v1482_v31 }
 0x34a   : > { %v887_v55 = vpop.f32.mrf.mxu1 }
 0x34b   : > { %v1439_v39 = vpop.f32.mrf.mxu3  ;;  %v903_v23 = vmul.f32 10.0, %v887_v55 }
 0x34c   : > { %v1458_v42 = vmul.f32 10.0, %v1439_v39 }
 0x34d   : > { %1027 = vrot.lane.b32.xlu2 %v1018_v33, %s2807_s21  ;;  %v3431_v5 = vadd.f32 %v911_v4, %v903_v23 }
 0x34e   : > { %v3448_v9 = vadd.f32 %v2498_v6, %v1458_v42 }
 0x34f   : > { %v934_v62 = vsel %vm924_vm14, %v3431_v5, -inf }
 0x350   : > { %v1485_v54 = vsel %vm924_vm14, %v3448_v9, -inf }
 0x353   : > { %v1442_v20 = vpop.f32.mrf.mxu3 }
 0x354   : > { %v1459_v59 = vmul.f32 10.0, %v1442_v20 }
 0x355   : > { %1576 = vrot.lane.b32.xlu2 %v1018_v33, %s2806_s19  ;;  %v914_v33 = vld [vmem:[%s3957_s3 + $0x30] sm:$0xff] }
 0x356   : > { %v3473_v27 = vadd.f32 %v2499_v43, %v1459_v59 }
 0x358   : > { %v1488_v48 = vsel %vm924_vm14, %v3473_v27, -inf }
 0x35b   : > { %v1444_v25 = vpop.f32.mrf.mxu3 }
 0x35c   : > { %v1460_v57 = vmul.f32 10.0, %v1444_v25 }
 0x35e   : > { %v3417_v10 = vadd.f32 %v2500_v0, %v1460_v57 }
 0x360   : > { %v1491_v28 = vsel %vm924_vm14, %v3417_v10, -inf }
 0x362   : > { %1578 = vrot.lane.b32.xlu1 %v1019_v32, %s2806_s19 }
 0x363   : > { %v1447_v30 = vpop.f32.mrf.mxu3 }
 0x364   : > { %v1461_v17 = vmul.f32 10.0, %v1447_v30 }
 0x366   : > { %v3424_v45 = vadd.f32 %v2501_v35, %v1461_v17  ;;  %v3501_v17 = vpack.c.bf16 %v2932_v21, %v2923_v16 }
 0x368   : > { %v1494_v58 = vsel %vm924_vm14, %v3424_v45, -inf }
 0x36b   : > { %1492 = vmax.xlane.f32.xlu0 %v1491_v28  ;;  %v1449_v3 = vpop.f32.mrf.mxu3  ;;  %v2504_v28 = vld [vmem:[%s3957_s3 + $0x78] sm:$0xff] }
 0x36c   : > { %v1462_v1 = vmul.f32 10.0, %v1449_v3 }
 0x36e   : > { %v3450_v53 = vadd.f32 %v2502_v2, %v1462_v1 }
 0x370   : > { %v1497_v37 = vsel %vm924_vm14, %v3450_v53, -inf }
 0x373   : > { %1495 = vmax.xlane.f32.xlu0 %v1494_v58 }
 0x37e   : > { %935 = vmax.xlane.f32.xlu2 %v934_v62 }
 0x380   : > { %v890_v40 = vpop.f32.mrf.mxu1 }
 0x381   : > { %v904_v56 = vmul.f32 10.0, %v890_v40  ;;  %v1452_v44 = vpop.f32.mrf.mxu3 }
 0x382   : > { %v1463_v34 = vmul.f32 10.0, %v1452_v44 }
 0x383   : > { %v3438_v26 = vadd.f32 %v912_v61, %v904_v56 }
 0x384   : > { %v3464_v60 = vadd.f32 %v2503_v38, %v1463_v34 }
 0x385   : > { %v937_v8 = vsel %vm924_vm14, %v3438_v26, -inf }
 0x386   : > { %938 = vmax.xlane.f32.xlu2 %v937_v8  ;;  %v1500_v51 = vsel %vm924_vm14, %v3464_v60, -inf }
 0x388   : > { %v892_v12 = vpop.f32.mrf.mxu1 }
 0x389   : > { %v905_v19 = vmul.f32 10.0, %v892_v12  ;;  %v1454_v25 = vpop.f32.mrf.mxu3 }
 0x38a   : > { %v1464_v0 = vmul.f32 10.0, %v1454_v25 }
 0x38b   : > { %v3487_v7 = vadd.f32 %v913_v49, %v905_v19 }
 0x38c   : > { %1486 = vmax.xlane.f32.xlu1 %v1485_v54  ;;  %v3508_v55 = vadd.f32 %v2504_v28, %v1464_v0 }
 0x38d   : > { %v940_v39 = vsel %vm924_vm14, %v3487_v7, -inf }
 0x38e   : > { %1498 = vmax.xlane.f32.xlu2 %v1497_v37  ;;  %v1503_v4 = vsel %vm924_vm14, %v3508_v55, -inf }
 0x390   : > { %v895_v63 = vpop.f32.mrf.mxu1 }
 0x391   : > { %v906_v31 = vmul.f32 10.0, %v895_v63 }
 0x393   : > { %v3494_v20 = vadd.f32 %v914_v33, %v906_v31 }
 0x394   : > { %932 = vmax.xlane.f32.xlu1 %v931_v29 }
 0x395   : > { %v943_v41 = vsel %vm924_vm14, %v3494_v20, -inf }
 0x396   : > { %1501 = vmax.xlane.f32.xlu2 %v1500_v51 }
 0x398   : > { %v897_v47 = vpop.f32.mrf.mxu1  ;;  %v927_v14 = vpop.xlane.xlu2 %926 }
 0x399   : > { %v907_v18 = vmul.f32 10.0, %v897_v47  ;;  %v949_v57 = vsub.f32 %v3384_v36, %v927_v14 }
 0x39b   : > { %v3480_v22 = vadd.f32 %v915_v15, %v907_v18  ;;  %v957_v35 = vmul.f32 1.442695, %v949_v57 }
 0x39c   : > { %1489 = vmax.xlane.f32.xlu1 %v1488_v48 }
 0x39d   : > { %v946_v32 = vsel %vm924_vm14, %v3480_v22, -inf  ;;  %2673 = vpow2.f32 %v957_v35 }
 0x39e   : > { %947 = vmax.xlane.f32.xlu0 %v946_v32 }
 0x3a0   : > { %v1581_v11 = vpop.permute.xlu2 %1580  ;;  %v930_v30 = vpop.xlane.xlu0 %929 }
 0x3a1   : > { %1602 = vmatpush.bf16.msrb.mxu0 %v1581_v11  ;;  %v950_v58 = vsub.f32 %v3391_v46, %v930_v30 }
 0x3a3   : > { %v959_v16 = vmul.f32 1.442695, %v950_v58  ;;  %v3513_v21 = vpop.eup %2673 }
 0x3a4   : > { %941 = vmax.xlane.f32.xlu1 %v940_v39  ;;  %v973_v40 = vsel %vm924_vm14, %v3513_v21, 0.0 }
 0x3a5   : > { %2675 = vpow2.f32 %v959_v16 }
 0x3a8   : > { %v1030_v36 = vpop.permute.xlu2 %1029 }
 0x3ab   : > { %v3518_v3 = vpop.eup %2675 }
 0x3ac   : > { %944 = vmax.xlane.f32.xlu1 %v943_v41  ;;  %v976_v42 = vsel %vm924_vm14, %v3518_v3, 0.0 }
 0x3ae   : > { %1025 = vrot.lane.b32.xlu2 %v3501_v17, %s2807_s21 }
 0x3b0   : > { %v1028_v62 = vpop.permute.xlu2 %1027 }
 0x3b3   : > { %v1032_v23 = vpop.permute.xlu0 %1031 }
 0x3b4   : > { %1053 = vmatpush.bf16.msrb.mxu2 %v1032_v23  ;;  %1504 = vmax.xlane.f32.xlu1 %v1503_v4 }
 0x3b8   : > { %1054 = vmatpush.bf16.msrb.mxu2 %v1030_v36  ;;  %v1577_v2 = vpop.permute.xlu2 %1576 }
 0x3bc   : > { %v1484_v61 = vpop.xlane.xlu1 %1483  ;;  %974 = vadd.xlane.f32.xlu1 %v973_v40  ;;  %1055 = vmatpush.bf16.msrb.mxu2 %v1028_v62 }
 0x3bd   : > { %v1506_v46 = vsub.f32 %v3405_v50, %v1484_v61 }
 0x3bf   : > { %v1514_v56 = vmul.f32 1.442695, %v1506_v46 }
 0x3c1   : > { %2677 = vpow2.f32 %v1514_v56 }
 0x3c4   : > { %977 = vadd.xlane.f32.xlu1 %v976_v42 }
 0x3c7   : > { %v3522_v6 = vpop.eup %2677 }
 0x3c8   : > { %v1530_v1 = vsel %vm924_vm14, %v3522_v6, 0.0 }
 0x3c9   : > { %1531 = vadd.xlane.f32.xlu0 %v1530_v1 }
 0x3d4   : > { %v1579_v8 = vpop.permute.xlu1 %1578 }
 0x3d5   : > { %1603 = vmatpush.bf16.msrb.mxu0 %v1579_v8 }
 0x3d9   : > { %1604 = vmatpush.bf16.msrb.mxu0 %v1577_v2 }
 0x3de   : > { %v1493_v12 = vpop.xlane.xlu0 %1492 }
 0x3df   : > { %v1509_v52 = vsub.f32 %v3417_v10, %v1493_v12 }
 0x3e1   : > { %v1520_v13 = vmul.f32 1.442695, %v1509_v52 }
 0x3e6   : > { %v1496_v43 = vpop.xlane.xlu0 %1495 }
 0x3e7   : > { %v1510_v14 = vsub.f32 %v3424_v45, %v1496_v43 }
 0x3e9   : > { %v1522_v15 = vmul.f32 1.442695, %v1510_v14 }
 0x3f1   : > { %v936_v50 = vpop.xlane.xlu2 %935 }
 0x3f2   : > { %v952_v44 = vsub.f32 %v3431_v5, %v936_v50 }
 0x3f4   : > { %v963_v54 = vmul.f32 1.442695, %v952_v44 }
 0x3f6   : > { %2679 = vpow2.f32 %v963_v54 }
 0x3f7   : > { %2681 = vpow2.f32 %v1520_v13 }
 0x3f9   : > { %v939_v34 = vpop.xlane.xlu2 %938 }
 0x3fa   : > { %v953_v37 = vsub.f32 %v3438_v26, %v939_v34 }
 0x3fc   : > { %v3529_v38 = vpop.eup %2679  ;;  %v965_v59 = vmul.f32 1.442695, %v953_v37 }
 0x3fd   : > { %v982_v63 = vsel %vm924_vm14, %v3529_v38, 0.0  ;;  %v3534_v10 = vpop.eup %2681 }
 0x3fe   : > { %983 = vadd.xlane.f32.xlu0 %v982_v63  ;;  %2683 = vpow2.f32 %v965_v59  ;;  %v1539_v26 = vsel %vm924_vm14, %v3534_v10, 0.0 }
 0x3ff   : > { %v1487_v29 = vpop.xlane.xlu1 %1486 }
 0x400   : > { %v1507_v5 = vsub.f32 %v3448_v9, %v1487_v29 }
 0x401   : > { %v1499_v51 = vpop.xlane.xlu2 %1498 }
 0x402   : > { %v1516_v47 = vmul.f32 1.442695, %v1507_v5  ;;  %v1511_v41 = vsub.f32 %v3450_v53, %v1499_v51 }
 0x404   : > { %2685 = vpow2.f32 %v1516_v47  ;;  %v3540_v48 = vpop.eup %2683  ;;  %v1524_v35 = vmul.f32 1.442695, %v1511_v41 }
 0x405   : > { %2687 = vpow2.f32 %v1522_v15  ;;  %v985_v11 = vsel %vm924_vm14, %v3540_v48, 0.0 }
 0x406   : > { %1540 = vadd.xlane.f32.xlu0 %v1539_v26 }
 0x407   : > { %v933_v18 = vpop.xlane.xlu1 %932 }
 0x408   : > { %v951_v19 = vsub.f32 %v3462_v24, %v933_v18 }
 0x409   : > { %v1502_v49 = vpop.xlane.xlu2 %1501 }
 0x40a   : > { %v3542_v9 = vpop.eup %2685  ;;  %v961_v32 = vmul.f32 1.442695, %v951_v19  ;;  %v1512_v4 = vsub.f32 %v3464_v60, %v1502_v49 }
 0x40b   : > { %v1533_v45 = vsel %vm924_vm14, %v3542_v9, 0.0  ;;  %v3548_v39 = vpop.eup %2687 }
 0x40c   : > { %2689 = vpow2.f32 %v961_v32  ;;  %1534 = vadd.xlane.f32.xlu1 %v1533_v45  ;;  %v1542_v57 = vsel %vm924_vm14, %v3548_v39, 0.0  ;;  %v1526_v53 = vmul.f32 1.442695, %v1512_v4 }
 0x40e   : > { %986 = vadd.xlane.f32.xlu0 %v985_v11 }
 0x40f   : > { %v1490_v31 = vpop.xlane.xlu1 %1489 }
 0x410   : > { %v1508_v50 = vsub.f32 %v3473_v27, %v1490_v31 }
 0x411   : > { %v1026_v24 = vpop.permute.xlu2 %1025  ;;  %v948_v37 = vpop.xlane.xlu0 %947 }
 0x412   : > { %v3550_v33 = vpop.eup %2689  ;;  %1056 = vmatpush.bf16.msrb.mxu2 %v1026_v24  ;;  %v1518_v13 = vmul.f32 1.442695, %v1508_v50  ;;  %v956_v63 = vsub.f32 %v3480_v22, %v948_v37 }
 0x413   : > { %v979_v25 = vsel %vm924_vm14, %v3550_v33, 0.0 }
 0x414   : > { %980 = vadd.xlane.f32.xlu2 %v979_v25  ;;  %v971_v59 = vmul.f32 1.442695, %v956_v63 }
 0x416   : > { %1543 = vadd.xlane.f32.xlu0 %v1542_v57 }
 0x417   : > { %v942_v0 = vpop.xlane.xlu1 %941 }
 0x418   : > { %v954_v30 = vsub.f32 %v3487_v7, %v942_v0 }
 0x41a   : > { %v967_v28 = vmul.f32 1.442695, %v954_v30 }
 0x41c   : > { %2691 = vpow2.f32 %v967_v28 }
 0x41d   : > { %2693 = vpow2.f32 %v1524_v35 }
 0x41f   : > { %v945_v36 = vpop.xlane.xlu1 %944 }
 0x420   : > { %v955_v58 = vsub.f32 %v3494_v20, %v945_v36 }
 0x422   : > { %v3559_v23 = vpop.eup %2691  ;;  %v969_v16 = vmul.f32 1.442695, %v955_v58 }
 0x423   : > { %v988_v62 = vsel %vm924_vm14, %v3559_v23, 0.0  ;;  %v3566_v40 = vpop.eup %2693 }
 0x424   : > { %2695 = vpow2.f32 %v969_v16  ;;  %989 = vadd.xlane.f32.xlu0 %v988_v62  ;;  %v1545_v56 = vsel %vm924_vm14, %v3566_v40, 0.0 }
 0x425   : > { %1574 = vrot.lane.b32.xlu1 %v3501_v17, %s2806_s19  ;;  %2697 = vpow2.f32 %v1526_v53 }
 0x427   : > { %v1505_v7 = vpop.xlane.xlu1 %1504 }
 0x428   : > { %v1513_v20 = vsub.f32 %v3508_v55, %v1505_v7 }
 0x42a   : > { %v3569_v61 = vpop.eup %2695  ;;  %v1528_v46 = vmul.f32 1.442695, %v1513_v20 }
 0x42b   : > { %v991_v60 = vsel %vm924_vm14, %v3569_v61, 0.0  ;;  %v3575_v42 = vpop.eup %2697 }
 0x42c   : > { %2699 = vpow2.f32 %v1528_v46  ;;  %992 = vadd.xlane.f32.xlu2 %v991_v60  ;;  %1546 = vadd.xlane.f32.xlu0 %v1545_v56  ;;  %v1548_v8 = vsel %vm924_vm14, %v3575_v42, 0.0 }
 0x42f   : > { %v975_v17 = vpop.xlane.xlu1 %974 }
 0x430   : > { %2701 = vrcp.f32 %v975_v17 }
 0x432   : > { %v3577_v1 = vpop.eup %2699 }
 0x433   : > { %v1551_v55 = vsel %vm924_vm14, %v3577_v1, 0.0 }
 0x434   : > { %1552 = vadd.xlane.f32.xlu2 %v1551_v55  ;;  %1549 = vadd.xlane.f32.xlu0 %v1548_v8 }
 0x436   : > { %v2702_v12 = vpop.eup %2701 }
 0x437   : > { %v978_v2 = vpop.xlane.xlu1 %977  ;;  %v1005_v52 = vmul.f32 %v2702_v12, %v3513_v21 }
 0x438   : > { %2703 = vrcp.f32 %v978_v2 }
 0x439   : > { %2705 = vpow2.f32 %v1518_v13 }
 0x43a   : > { %2707 = vpow2.f32 %v971_v59 }
 0x43e   : > { %v2704_v44 = vpop.eup %2703 }
 0x43f   : > { %v1006_v54 = vmul.f32 %v2704_v44, %v3518_v3  ;;  %v2706_v29 = vpop.eup %2705  ;;  %v1532_v3 = vpop.xlane.xlu0 %1531 }
 0x440   : > { %v1536_v43 = vsel %vm924_vm14, %v2706_v29, 0.0  ;;  %v3589_v27 = vpop.eup %2707 }
 0x441   : > { %v1013_v34 = vpack.c.bf16 %v1006_v54, %v1005_v52  ;;  %v994_v21 = vsel %vm924_vm14, %v3589_v27, 0.0 }
 0x443   : > { %2489 = vmatmul.msk.bf16.vlgmr.msrb.gmra.mxu2 %vm924_vm14, %v1013_v34 }
 0x44f   : > { %1537 = vadd.xlane.f32.xlu1 %v1536_v43 }
 0x457   : > { %995 = vadd.xlane.f32.xlu1 %v994_v21 }
 0x471   : > { %v984_v5 = vpop.xlane.xlu0 %983 }
 0x472   : > { %2709 = vrcp.f32 %v984_v5 }
 0x478   : > { %v2710_v26 = vpop.eup %2709 }
 0x479   : > { %v1541_v51 = vpop.xlane.xlu0 %1540  ;;  %v1008_v49 = vmul.f32 %v2710_v26, %v3529_v38 }
 0x47f   : > { %v1535_v22 = vpop.xlane.xlu1 %1534 }
 0x481   : > { %v987_v47 = vpop.xlane.xlu0 %986 }
 0x487   : > { %v981_v14 = vpop.xlane.xlu2 %980 }
 0x488   : > { %2711 = vrcp.f32 %v981_v14 }
 0x489   : > { %2713 = vrcp.f32 %v1535_v22  ;;  %v1544_v18 = vpop.xlane.xlu0 %1543 }
 0x48a   : > { %2715 = vrcp.f32 %v1532_v3 }
 0x48b   : > { %2717 = vrcp.f32 %v987_v47 }
 0x48e   : > { %v2712_v15 = vpop.eup %2711 }
 0x48f   : > { %v1007_v19 = vmul.f32 %v2712_v15, %v3550_v33  ;;  %v2714_v45 = vpop.eup %2713 }
 0x490   : > { %v2716_v11 = vpop.eup %2715  ;;  %v1563_v31 = vmul.f32 %v2714_v45, %v3542_v9  ;;  %v2574_v9 = vld [vmem:[%s3958_s4 + $0x8] sm:$0xff] }
 0x491   : > { %v1014_v32 = vpack.c.bf16 %v1008_v49, %v1007_v19  ;;  %v1562_v24 = vmul.f32 %v2716_v11, %v3522_v6  ;;  %v2718_v33 = vpop.eup %2717  ;;  %v2573_v6 = vld [vmem:[%s3958_s4] sm:$0xff]  ;;  %1658 = vmatpush.bf16.msra.mxu2 %v2574_v9 }
 0x492   : > { %v1009_v38 = vmul.f32 %v2718_v33, %v3540_v48  ;;  %1705 = vmatpush.bf16.msrb.mxu1 %v2573_v6  ;;  %v3630_v11 = vld [vmem:[%s3959_s5] ss:$0 sm:$0xff] }
 0x493   : > { %2490 = vmatmul.msk.bf16.gmra.mxu2 %vm924_vm14, %v1014_v32  ;;  %v1570_v0 = vpack.c.bf16 %v1563_v31, %v1562_v24 }
 0x497   : > { %v1575_v25 = vpop.permute.xlu1 %1574  ;;  %v990_v57 = vpop.xlane.xlu0 %989 }
 0x498   : > { %2719 = vrcp.f32 %v990_v57  ;;  %1605 = vmatpush.bf16.msrb.mxu0 %v1575_v25 }
 0x499   : > { %2721 = vrcp.f32 %v1541_v51 }
 0x49b   : > { %2505 = vmatmul.msk.bf16.vlgmr.msrb.gmra.mxu0 %vm924_vm14, %v1570_v0 }
 0x49e   : > { %v2720_v30 = vpop.eup %2719 }
 0x49f   : > { %v1010_v41 = vmul.f32 %v2720_v30, %v3559_v23  ;;  %v993_v36 = vpop.xlane.xlu2 %992  ;;  %v2722_v58 = vpop.eup %2721 }
 0x4a0   : > { %v1565_v62 = vmul.f32 %v2722_v58, %v3534_v10  ;;  %v1547_v53 = vpop.xlane.xlu0 %1546 }
 0x4a1   : > { %v1015_v28 = vpack.c.bf16 %v1010_v41, %v1009_v38 }
 0x4a3   : > { %2491 = vmatmul.msk.bf16.gmra.mxu2 %vm924_vm14, %v1015_v28 }
 0x4a7   : > { %v1553_v52 = vpop.xlane.xlu2 %1552 }
 0x4a8   : > { %v1550_v44 = vpop.xlane.xlu0 %1549 }
 0x4c2   : > { %v1538_v35 = vpop.xlane.xlu1 %1537 }
 0x4c3   : > { %2723 = vrcp.f32 %v1538_v35 }
 0x4c4   : > { %2725 = vrcp.f32 %v993_v36 }
 0x4c6   : > { %v1058_v48 = vpop.f32.mrf.mxu2 }
 0x4c9   : > { %v2724_v23 = vpop.eup %2723 }
 0x4ca   : > { %v996_v4 = vpop.xlane.xlu1 %995  ;;  %v1564_v16 = vmul.f32 %v2724_v23, %v2706_v29  ;;  %v2726_v46 = vpop.eup %2725 }
 0x4cb   : > { %2727 = vrcp.f32 %v996_v4  ;;  %v1011_v17 = vmul.f32 %v2726_v46, %v3569_v61 }
 0x4cc   : > { %v1571_v7 = vpack.c.bf16 %v1565_v62, %v1564_v16  ;;  %2729 = vrcp.f32 %v1547_v53 }
 0x4cd   : > { %2731 = vrcp.f32 %v1544_v18 }
 0x4ce   : > { %v1060_v20 = vpop.f32.mrf.mxu2  ;;  %2506 = vmatmul.msk.bf16.gmra.mxu0 %vm924_vm14, %v1571_v7  ;;  %2733 = vrcp.f32 %v1550_v44 }
 0x4cf   : > { %v1078_v60 = vpack.c.bf16 %v1060_v20, %v1058_v48  ;;  %2735 = vrcp.f32 %v1553_v52  ;;  %v2808_v52 = vmov 32.0  }
 0x4d0   : > { %2737 = vrcp.f32 %v2808_v52 }
 0x4d1   : > { %v2728_v56 = vpop.eup %2727  ;;  %2521 = vmatmul.msk.bf16.vlgmr.msrb.gmra.mxu1 %vm554_vm1, %v1078_v60 }
 0x4d2   : > { %v1012_v55 = vmul.f32 %v2728_v56, %v3589_v27  ;;  %v2730_v2 = vpop.eup %2729 }
 0x4d3   : > { %v2732_v10 = vpop.eup %2731  ;;  %v1567_v12 = vmul.f32 %v2730_v2, %v3566_v40 }
 0x4d4   : > { %v1016_v8 = vpack.c.bf16 %v1012_v55, %v1011_v17  ;;  %v1566_v50 = vmul.f32 %v2732_v10, %v3548_v39  ;;  %v2734_v13 = vpop.eup %2733 }
 0x4d5   : > { %v2736_v61 = vpop.eup %2735  ;;  %v1568_v34 = vmul.f32 %v2734_v13, %v3575_v42 }
 0x4d6   : > { %2492 = vmatmul.msk.bf16.gmra.mxu2 %vm924_vm14, %v1016_v8  ;;  %v1572_v54 = vpack.c.bf16 %v1567_v12, %v1566_v50  ;;  %v1569_v37 = vmul.f32 %v2736_v61, %v3577_v1 }
 0x4d8   : > { %v1573_v63 = vpack.c.bf16 %v1569_v37, %v1568_v34 }
 0x4de   : > { %2507 = vmatmul.msk.bf16.gmra.mxu0 %vm924_vm14, %v1572_v54  ;;  %v2738_v54 = vpop.eup %2737 }
 0x4df   : > { %v1766_v13 = vmul.f32 32.0, %v2738_v54 }
 0x4e1   : > { %v1767_v61 = vsub.f32 1.0, %v1766_v13 }
 0x4e3   : > { %v1768_v34 = vmul.f32 %v2738_v54, %v1767_v61 }
 0x4e5   : > { %v1769_v37 = vadd.f32 %v2738_v54, %v1768_v34 }
 0x4ee   : > { %2508 = vmatmul.msk.bf16.gmra.mxu0 %vm924_vm14, %v1573_v63 }
 0x516   : > { %v1063_v59 = vpop.f32.mrf.mxu2 }
 0x518   : > { %v1607_v40 = vpop.f32.mrf.mxu0 }
 0x51e   : > { %v1065_v29 = vpop.f32.mrf.mxu2 }
 0x51f   : > { %v1079_v39 = vpack.c.bf16 %v1065_v29, %v1063_v59 }
 0x520   : > { %v1609_v43 = vpop.f32.mrf.mxu0 }
 0x521   : > { %v1627_v27 = vpack.c.bf16 %v1609_v43, %v1607_v40  ;;  %2522 = vmatmul.msk.bf16.gmra.mxu1 %vm554_vm1, %v1079_v39 }
 0x523   : > { %2513 = vmatmul.msk.bf16.vlgmr.msra.gmra.mxu2 %vm554_vm1, %v1627_v27 }
 0x526   : > { %v1068_v21 = vpop.f32.mrf.mxu2 }
 0x52e   : > { %v1070_v3 = vpop.f32.mrf.mxu2 }
 0x52f   : > { %v1080_v5 = vpack.c.bf16 %v1070_v3, %v1068_v21 }
 0x531   : > { %2523 = vmatmul.msk.bf16.gmra.mxu1 %vm554_vm1, %v1080_v5 }
 0x54b   : > { %v1612_v42 = vpop.f32.mrf.mxu0 }
 0x54e   : > { %v1707_v45 = vpop.f32.mrf.mxu1 }
 0x553   : > { %v1614_v1 = vpop.f32.mrf.mxu0 }
 0x554   : > { %v1628_v51 = vpack.c.bf16 %v1614_v1, %v1612_v42 }
 0x556   : > { %2514 = vmatmul.msk.bf16.gmra.mxu2 %vm554_vm1, %v1628_v51  ;;  %v1709_v0 = vpop.f32.mrf.mxu1 }
 0x559   : > { %v1073_v47 = vpop.f32.mrf.mxu2 }
 0x55b   : > { %v1617_v14 = vpop.f32.mrf.mxu0 }
 0x561   : > { %v1075_v22 = vpop.f32.mrf.mxu2 }
 0x562   : > { %v1081_v26 = vpack.c.bf16 %v1075_v22, %v1073_v47 }
 0x563   : > { %v1619_v15 = vpop.f32.mrf.mxu0 }
 0x564   : > { %v1629_v18 = vpack.c.bf16 %v1619_v15, %v1617_v14  ;;  %2524 = vmatmul.msk.bf16.gmra.mxu1 %vm554_vm1, %v1081_v26 }
 0x566   : > { %2515 = vmatmul.msk.bf16.gmra.mxu2 %vm554_vm1, %v1629_v18 }
 0x56b   : > { %v1622_v19 = vpop.f32.mrf.mxu0 }
 0x573   : > { %v1624_v49 = vpop.f32.mrf.mxu0 }
 0x574   : > { %v1630_v32 = vpack.c.bf16 %v1624_v49, %v1622_v19 }
 0x576   : > { %2516 = vmatmul.msk.bf16.gmra.mxu2 %vm554_vm1, %v1630_v32  ;;  %vm1770_vm1 = vweird.f32 %v2738_v54 }
 0x577   : > { %v3646_v63 = vsel %vm1770_vm1, %v2738_v54, %v1769_v37 }
 0x59e   : > { %v1712_v28 = vpop.f32.mrf.mxu1 }
 0x5a6   : > { %v1660_v31 = vpop.f32.mrf.mxu2  ;;  %v1714_v36 = vpop.f32.mrf.mxu1 }
 0x5a7   : > { %v1708_v24 = vadd.f32 %v1707_v45, %v1660_v31 }
 0x5a9   : > { %v1731_v25 = vadd.f32 %v3630_v11, %v1708_v24 }
 0x5ab   : > { %v1741_v57 = vsel %vm504_vm0, %v1731_v25, 0.0 }
 0x5ac   : > { %1742 = vadd.xlane.f32.xlu1 %v1741_v57 }
 0x5ae   : > { %v1662_v33 = vpop.f32.mrf.mxu2  ;;  %v1717_v62 = vpop.f32.mrf.mxu1 }
 0x5af   : > { %v1710_v30 = vadd.f32 %v1709_v0, %v1662_v33 }
 0x5b1   : > { %v1732_v38 = vadd.f32 %v3630_v11, %v1710_v30 }
 0x5b3   : > { %v1744_v41 = vsel %vm504_vm0, %v1732_v38, 0.0 }
 0x5b4   : > { %1745 = vadd.xlane.f32.xlu0 %v1744_v41 }
 0x5b6   : > { %v1719_v60 = vpop.f32.mrf.mxu1 }
 0x5d9   : > { %v1665_v6 = vpop.f32.mrf.mxu2 }
 0x5da   : > { %v1713_v9 = vadd.f32 %v1712_v28, %v1665_v6 }
 0x5dc   : > { %v1733_v35 = vadd.f32 %v3630_v11, %v1713_v9 }
 0x5de   : > { %v1747_v48 = vsel %vm504_vm0, %v1733_v35, 0.0 }
 0x5df   : > { %1748 = vadd.xlane.f32.xlu2 %v1747_v48 }
 0x5e1   : > { %v1667_v58 = vpop.f32.mrf.mxu2  ;;  %v1722_v2 = vpop.f32.mrf.mxu1 }
 0x5e2   : > { %v1715_v23 = vadd.f32 %v1714_v36, %v1667_v58 }
 0x5e4   : > { %v1734_v4 = vadd.f32 %v3630_v11, %v1715_v23 }
 0x5e6   : > { %v1750_v16 = vsel %vm504_vm0, %v1734_v4, 0.0 }
 0x5e7   : > { %1751 = vadd.xlane.f32.xlu1 %v1750_v16 }
 0x5e9   : > { %v1670_v53 = vpop.f32.mrf.mxu2  ;;  %v1724_v27 = vpop.f32.mrf.mxu1 }
 0x5ea   : > { %v1718_v7 = vadd.f32 %v1717_v62, %v1670_v53  ;;  %v2576_v62 = vld [vmem:[%s3962_s8 + $0x8] sm:$0xff] }
 0x5eb   : > { %1996 = vmatpush.bf16.msrb.mxu3 %v2576_v62 }
 0x5ec   : > { %v1735_v20 = vadd.f32 %v3630_v11, %v1718_v7  ;;  %v2575_v7 = vld [vmem:[%s3962_s8] sm:$0xff] }
 0x5ee   : > { %v1753_v46 = vsel %vm504_vm0, %v1735_v20, 0.0 }
 0x5ef   : > { %1754 = vadd.xlane.f32.xlu0 %v1753_v46  ;;  %1997 = vmatpush.bf16.msrb.mxu3 %v2575_v7 }
 0x5f1   : > { %v1672_v56 = vpop.f32.mrf.mxu2 }
 0x5f2   : > { %v1720_v17 = vadd.f32 %v1719_v60, %v1672_v56 }
 0x5f4   : > { %v1736_v55 = vadd.f32 %v3630_v11, %v1720_v17 }
 0x5f6   : > { %v1756_v8 = vsel %vm504_vm0, %v1736_v55, 0.0 }
 0x5f7   : > { %1757 = vadd.xlane.f32.xlu2 %v1756_v8 }
 0x5f9   : > { %v1675_v10 = vpop.f32.mrf.mxu2 }
 0x5fa   : > { %v1723_v12 = vadd.f32 %v1722_v2, %v1675_v10 }
 0x5fc   : > { %v1737_v50 = vadd.f32 %v3630_v11, %v1723_v12 }
 0x5fe   : > { %v1759_v44 = vsel %vm504_vm0, %v1737_v50, 0.0 }
 0x5ff   : > { %1760 = vadd.xlane.f32.xlu2 %v1759_v44 }
 0x601   : > { %v1677_v39 = vpop.f32.mrf.mxu2 }
 0x602   : > { %v1725_v21 = vadd.f32 %v1724_v27, %v1677_v39 }
 0x604   : > { %v1738_v51 = vadd.f32 %v3630_v11, %v1725_v21 }
 0x606   : > { %v1762_v22 = vsel %vm504_vm0, %v1738_v51, 0.0 }
 0x61f   : > { %v1743_v59 = vpop.xlane.xlu1 %1742 }
 0x620   : > { %v1772_v40 = vmul.f32 %v3646_v63, %v1743_v59 }
 0x622   : > { %v3649_v29 = vsub.f32 %v1731_v25, %v1772_v40  ;;  %v3709_v40 = vld [vmem:[%s3960_s6] ss:$0 sm:$0xff] }
 0x624   : > { %v1788_v43 = vmul.f32 %v3649_v29, %v3649_v29 }
 0x626   : > { %v1796_v3 = vsel %vm504_vm0, %v1788_v43, 0.0 }
 0x627   : > { %v1746_v5 = vpop.xlane.xlu0 %1745  ;;  %1797 = vadd.xlane.f32.xlu1 %v1796_v3  ;;  %v3716_v3 = vld [vmem:[%s3961_s7] ss:$0 sm:$0xff] }
 0x628   : > { %v1773_v42 = vmul.f32 %v3646_v63, %v1746_v5 }
 0x62a   : > { %v3655_v1 = vsub.f32 %v1732_v38, %v1773_v42 }
 0x62c   : > { %v1789_v47 = vmul.f32 %v3655_v1, %v3655_v1 }
 0x62e   : > { %v1799_v14 = vsel %vm504_vm0, %v1789_v47, 0.0 }
 0x62f   : > { %1800 = vadd.xlane.f32.xlu0 %v1799_v14  ;;  %1763 = vadd.xlane.f32.xlu1 %v1762_v22  ;;  %v2787_v14 = vld [vmem:[%s2906_s23] sm:$0xff] }
 0x652   : > { %v1749_v26 = vpop.xlane.xlu2 %1748 }
 0x653   : > { %v1774_v15 = vmul.f32 %v3646_v63, %v1749_v26  ;;  %v2788_v26 = vld [vmem:[%s2906_s23 + $0x8] sm:$0xff] }
 0x655   : > { %v3663_v18 = vsub.f32 %v1733_v35, %v1774_v15 }
 0x657   : > { %v1790_v19 = vmul.f32 %v3663_v18, %v3663_v18 }
 0x659   : > { %v1802_v49 = vsel %vm504_vm0, %v1790_v19, 0.0 }
 0x65a   : > { %v1752_v32 = vpop.xlane.xlu1 %1751  ;;  %1803 = vadd.xlane.f32.xlu0 %v1802_v49 }
 0x65b   : > { %v1775_v45 = vmul.f32 %v3646_v63, %v1752_v32 }
 0x65d   : > { %v3669_v11 = vsub.f32 %v1734_v4, %v1775_v45 }
 0x65f   : > { %v1791_v31 = vmul.f32 %v3669_v11, %v3669_v11 }
 0x661   : > { %v1805_v24 = vsel %vm504_vm0, %v1791_v31, 0.0 }
 0x662   : > { %v1755_v25 = vpop.xlane.xlu0 %1754  ;;  %1806 = vadd.xlane.f32.xlu2 %v1805_v24 }
 0x663   : > { %v1776_v57 = vmul.f32 %v3646_v63, %v1755_v25 }
 0x665   : > { %v3675_v0 = vsub.f32 %v1735_v20, %v1776_v57 }
 0x667   : > { %v1792_v33 = vmul.f32 %v3675_v0, %v3675_v0 }
 0x669   : > { %v1808_v30 = vsel %vm504_vm0, %v1792_v33, 0.0 }
 0x66a   : > { %1809 = vadd.xlane.f32.xlu1 %v1808_v30  ;;  %v1758_v38 = vpop.xlane.xlu2 %1757 }
 0x66b   : > { %v1777_v41 = vmul.f32 %v3646_v63, %v1758_v38 }
 0x66d   : > { %v3681_v28 = vsub.f32 %v1736_v55, %v1777_v41 }
 0x66f   : > { %v1793_v6 = vmul.f32 %v3681_v28, %v3681_v28 }
 0x671   : > { %v1811_v9 = vsel %vm504_vm0, %v1793_v6, 0.0 }
 0x672   : > { %1812 = vadd.xlane.f32.xlu0 %v1811_v9  ;;  %v1761_v35 = vpop.xlane.xlu2 %1760 }
 0x673   : > { %v1778_v36 = vmul.f32 %v3646_v63, %v1761_v35 }
 0x675   : > { %v3687_v48 = vsub.f32 %v1737_v50, %v1778_v36 }
 0x677   : > { %v1794_v58 = vmul.f32 %v3687_v48, %v3687_v48 }
 0x679   : > { %v1814_v23 = vsel %vm504_vm0, %v1794_v58, 0.0 }
 0x67a   : > { %1815 = vadd.xlane.f32.xlu2 %v1814_v23 }
 0x69a   : > { %v1798_v4 = vpop.xlane.xlu1 %1797 }
 0x69b   : > { %v1820_v16 = vmul.f32 %v1798_v4, %v3646_v63 }
 0x69d   : > { %v1828_v53 = vadd.f32 1e-05, %v1820_v16 }
 0x69f   : > { %2739 = vrsqrt.f32 %v1828_v53  ;;  %vm1842_vm2 = vweird.f32 %v1828_v53 }
 0x6a2   : > { %v1801_v20 = vpop.xlane.xlu0 %1800  ;;  %v1764_v46 = vpop.xlane.xlu1 %1763 }
 0x6a3   : > { %v1821_v60 = vmul.f32 %v1801_v20, %v3646_v63  ;;  %v1779_v56 = vmul.f32 %v3646_v63, %v1764_v46 }
 0x6a5   : > { %v2740_v17 = vpop.eup %2739  ;;  %v1829_v55 = vadd.f32 1e-05, %v1821_v60  ;;  %v3701_v8 = vsub.f32 %v1738_v51, %v1779_v56 }
 0x6a6   : > { %v1837_v2 = vmul.f32 %v2740_v17, %v1828_v53  ;;  %vm1843_vm15 = vweird.f32 %v2740_v17 }
 0x6a7   : > { %2741 = vrsqrt.f32 %v1829_v55  ;;  %v1795_v10 = vmul.f32 %v3701_v8, %v3701_v8  ;;  %vm1844_vm3 = vmor %vm1842_vm2, %vm1843_vm15  ;;  %vm1852_vm5 = vweird.f32 %v1829_v55 }
 0x6a8   : > { %v1838_v12 = vmul.f32 %v2740_v17, %v1837_v2 }
 0x6a9   : > { %v1817_v50 = vsel %vm504_vm0, %v1795_v10, 0.0 }
 0x6aa   : > { %v1839_v44 = vmul.f32 0.5, %v1838_v12  ;;  %1818 = vadd.xlane.f32.xlu1 %v1817_v50 }
 0x6ac   : > { %v1840_v52 = vsub.f32 1.5, %v1839_v44 }
 0x6ad   : > { %v2742_v54 = vpop.eup %2741 }
 0x6ae   : > { %v1841_v13 = vmul.f32 %v2740_v17, %v1840_v52  ;;  %v1847_v61 = vmul.f32 %v2742_v54, %v1829_v55  ;;  %vm1853_vm4 = vweird.f32 %v2742_v54 }
 0x6af   : > { %vm1854_vm6 = vmor %vm1852_vm5, %vm1853_vm4 }
 0x6b0   : > { %v1845_v34 = vsel %vm1844_vm3, %v2740_v17, %v1841_v13  ;;  %v1848_v37 = vmul.f32 %v2742_v54, %v1847_v61 }
 0x6b1   : > { %v1916_v39 = vmul.f32 %v1845_v34, %v3649_v29 }
 0x6b2   : > { %v1849_v59 = vmul.f32 0.5, %v1848_v37  ;;  %v2789_v37 = vld [vmem:[%s2906_s23 + $0x10] sm:$0xff] }
 0x6b3   : > { %v1927_v21 = vmul.f32 %v3709_v40, %v1916_v39  ;;  %v2790_v39 = vld [vmem:[%s2906_s23 + $0x18] sm:$0xff] }
 0x6b4   : > { %v1850_v43 = vsub.f32 1.5, %v1849_v59 }
 0x6b5   : > { %v1938_v47 = vadd.f32 %v3716_v3, %v1927_v21 }
 0x6b6   : > { %v1851_v27 = vmul.f32 %v2742_v54, %v1850_v43 }
 0x6b7   : > { %v3723_v22 = vadd.f32 %v2787_v14, %v1938_v47 }
 0x6b8   : > { %v1855_v5 = vsel %vm1854_vm6, %v2742_v54, %v1851_v27 }
 0x6b9   : > { %v1917_v42 = vmul.f32 %v1855_v5, %v3655_v1 }
 0x6bb   : > { %v1928_v51 = vmul.f32 %v3709_v40, %v1917_v42 }
 0x6bd   : > { %v1939_v29 = vadd.f32 %v3716_v3, %v1928_v51 }
 0x6bf   : > { %v3726_v15 = vadd.f32 %v2788_v26, %v1939_v29 }
 0x6c1   : > { %v1954_v19 = vpack.c.bf16 %v3726_v15, %v3723_v22 }
 0x6c3   : > { %2533 = vmatmul.msk.bf16.vlgmr.msrb.gmra.mxu3 %vm504_vm0, %v1954_v19 }
 0x6cd   : > { %v1804_v49 = vpop.xlane.xlu0 %1803 }
 0x6ce   : > { %v1822_v1 = vmul.f32 %v1804_v49, %v3646_v63 }
 0x6d0   : > { %v1830_v32 = vadd.f32 1e-05, %v1822_v1 }
 0x6d2   : > { %2743 = vrsqrt.f32 %v1830_v32  ;;  %vm1862_vm8 = vweird.f32 %v1830_v32 }
 0x6d5   : > { %v1807_v45 = vpop.xlane.xlu2 %1806 }
 0x6d6   : > { %v1823_v31 = vmul.f32 %v1807_v45, %v3646_v63  ;;  %v2792_v45 = vld [vmem:[%s2906_s23 + $0x28] sm:$0xff] }
 0x6d8   : > { %v2744_v24 = vpop.eup %2743  ;;  %v1831_v25 = vadd.f32 1e-05, %v1823_v31 }
 0x6d9   : > { %v1857_v57 = vmul.f32 %v2744_v24, %v1830_v32  ;;  %vm1863_vm7 = vweird.f32 %v2744_v24  ;;  %v2791_v32 = vld [vmem:[%s2906_s23 + $0x20] sm:$0xff] }
 0x6da   : > { %2745 = vrsqrt.f32 %v1831_v25  ;;  %vm1864_vm9 = vmor %vm1862_vm8, %vm1863_vm7  ;;  %vm1872_vm11 = vweird.f32 %v1831_v25 }
 0x6db   : > { %v1858_v33 = vmul.f32 %v2744_v24, %v1857_v57 }
 0x6dd   : > { %v1859_v30 = vmul.f32 0.5, %v1858_v33  ;;  %v1810_v38 = vpop.xlane.xlu1 %1809 }
 0x6de   : > { %v1824_v41 = vmul.f32 %v1810_v38, %v3646_v63 }
 0x6df   : > { %v1860_v6 = vsub.f32 1.5, %v1859_v30 }
 0x6e0   : > { %v2746_v9 = vpop.eup %2745  ;;  %v1832_v35 = vadd.f32 1e-05, %v1824_v41 }
 0x6e1   : > { %v1861_v36 = vmul.f32 %v2744_v24, %v1860_v6  ;;  %v1867_v58 = vmul.f32 %v2746_v9, %v1831_v25  ;;  %vm1873_vm10 = vweird.f32 %v2746_v9 }
 0x6e2   : > { %2747 = vrsqrt.f32 %v1832_v35  ;;  %vm1874_vm12 = vmor %vm1872_vm11, %vm1873_vm10  ;;  %vm1882_vm14 = vweird.f32 %v1832_v35 }
 0x6e3   : > { %v1865_v23 = vsel %vm1864_vm9, %v2744_v24, %v1861_v36  ;;  %v1868_v4 = vmul.f32 %v2746_v9, %v1867_v58 }
 0x6e4   : > { %v1918_v53 = vmul.f32 %v1865_v23, %v3663_v18 }
 0x6e5   : > { %v1869_v16 = vmul.f32 0.5, %v1868_v4  ;;  %v1813_v62 = vpop.xlane.xlu0 %1812 }
 0x6e6   : > { %v1825_v7 = vmul.f32 %v1813_v62, %v3646_v63  ;;  %v1929_v55 = vmul.f32 %v3709_v40, %v1918_v53 }
 0x6e7   : > { %v1870_v20 = vsub.f32 1.5, %v1869_v16  ;;  %v2584_v16 = vld [vmem:[%s3964_s10 + $0x38] sm:$0xff] }
 0x6e8   : > { %v2748_v46 = vpop.eup %2747  ;;  %v1833_v60 = vadd.f32 1e-05, %v1825_v7  ;;  %v1940_v44 = vadd.f32 %v3716_v3, %v1929_v55  ;;  %2163 = vmatpush.bf16.msra.mxu0 %v2584_v16  ;;  %v2582_v55 = vld [vmem:[%s3964_s10 + $0x28] sm:$0xff] }
 0x6e9   : > { %v1871_v56 = vmul.f32 %v2746_v9, %v1870_v20  ;;  %v1877_v17 = vmul.f32 %v2748_v46, %v1832_v35  ;;  %vm1883_vm13 = vweird.f32 %v2748_v46 }
 0x6ea   : > { %2749 = vrsqrt.f32 %v1833_v60  ;;  %vm1884_vm1 = vmor %vm1882_vm14, %vm1883_vm13  ;;  %v3742_v59 = vadd.f32 %v2789_v37, %v1940_v44  ;;  %vm1892_vm2 = vweird.f32 %v1833_v60  ;;  %v2580_v44 = vld [vmem:[%s3964_s10 + $0x18] sm:$0xff]  ;;  %v2577_v37 = vld [vmem:[%s3964_s10] sm:$0xff] }
 0x6eb   : > { %v1875_v2 = vsel %vm1874_vm12, %v2746_v9, %v1871_v56  ;;  %v1878_v10 = vmul.f32 %v2748_v46, %v1877_v17 }
 0x6ec   : > { %v1919_v12 = vmul.f32 %v1875_v2, %v3669_v11 }
 0x6ed   : > { %v1879_v18 = vmul.f32 0.5, %v1878_v10  ;;  %v1816_v24 = vpop.xlane.xlu2 %1815 }
 0x6ee   : > { %v1930_v50 = vmul.f32 %v3709_v40, %v1919_v12  ;;  %v1826_v57 = vmul.f32 %v1816_v24, %v3646_v63 }
 0x6ef   : > { %v1880_v52 = vsub.f32 1.5, %v1879_v18  ;;  %v2581_v18 = vld [vmem:[%s3964_s10 + $0x20] sm:$0xff] }
 0x6f0   : > { %v2750_v54 = vpop.eup %2749  ;;  %v1941_v13 = vadd.f32 %v3716_v3, %v1930_v50 }
 0x6f1   : > { %v1881_v61 = vmul.f32 %v2748_v46, %v1880_v52  ;;  %v1887_v34 = vmul.f32 %v2750_v54, %v1833_v60  ;;  %vm1893_vm15 = vweird.f32 %v2750_v54  ;;  %v2793_v52 = vld [vmem:[%s2906_s23 + $0x30] sm:$0xff] }
 0x6f2   : > { %v3745_v43 = vadd.f32 %v2790_v39, %v1941_v13  ;;  %vm1894_vm3 = vmor %vm1892_vm2, %vm1893_vm15 }
 0x6f3   : > { %v1885_v11 = vsel %vm1884_vm1, %v2748_v46, %v1881_v61  ;;  %v1888_v27 = vmul.f32 %v2750_v54, %v1887_v34  ;;  %v2583_v46 = vld [vmem:[%s3964_s10 + $0x30] sm:$0xff]  ;;  %v3806_v34 = vld [vmem:[%s3963_s9] ss:$0 sm:$0xff] }
 0x6f4   : > { %v1955_v21 = vpack.c.bf16 %v3745_v43, %v3742_v59  ;;  %v1920_v42 = vmul.f32 %v1885_v11, %v3675_v0  ;;  %2164 = vmatpush.bf16.msra.mxu0 %v2583_v46  ;;  %v2579_v61 = vld [vmem:[%s3964_s10 + $0x10] sm:$0xff] }
 0x6f5   : > { %v1889_v5 = vmul.f32 0.5, %v1888_v27 }
 0x6f6   : > { %2534 = vmatmul.msk.bf16.gmra.mxu3 %vm504_vm0, %v1955_v21  ;;  %v1931_v29 = vmul.f32 %v3709_v40, %v1920_v42 }
 0x6f7   : > { %v1890_v51 = vsub.f32 1.5, %v1889_v5 }
 0x6f8   : > { %v1942_v49 = vadd.f32 %v3716_v3, %v1931_v29  ;;  %2165 = vmatpush.bf16.msra.mxu0 %v2582_v55 }
 0x6f9   : > { %v1891_v47 = vmul.f32 %v2750_v54, %v1890_v51 }
 0x6fa   : > { %v3757_v0 = vadd.f32 %v2791_v32, %v1942_v49 }
 0x6fb   : > { %v1895_v14 = vsel %vm1894_vm3, %v2750_v54, %v1891_v47 }
 0x6fc   : > { %v1921_v26 = vmul.f32 %v1895_v14, %v3681_v28  ;;  %v1834_v28 = vadd.f32 1e-05, %v1826_v57  ;;  %2166 = vmatpush.bf16.msra.mxu0 %v2581_v18 }
 0x6fe   : > { %v1932_v19 = vmul.f32 %v3709_v40, %v1921_v26  ;;  %2751 = vrsqrt.f32 %v1834_v28  ;;  %vm1902_vm5 = vweird.f32 %v1834_v28 }
 0x700   : > { %v1943_v1 = vadd.f32 %v3716_v3, %v1932_v19  ;;  %2167 = vmatpush.bf16.msra.mxu0 %v2580_v44 }
 0x702   : > { %v3760_v31 = vadd.f32 %v2792_v45, %v1943_v1 }
 0x704   : > { %v1956_v25 = vpack.c.bf16 %v3760_v31, %v3757_v0  ;;  %v2752_v33 = vpop.eup %2751  ;;  %2168 = vmatpush.bf16.msra.mxu0 %v2579_v61 }
 0x705   : > { %v1897_v30 = vmul.f32 %v2752_v33, %v1834_v28  ;;  %vm1903_vm4 = vweird.f32 %v2752_v33 }
 0x706   : > { %2535 = vmatmul.msk.bf16.gmra.mxu3 %vm504_vm0, %v1956_v25  ;;  %vm1904_vm6 = vmor %vm1902_vm5, %vm1903_vm4 }
 0x707   : > { %v1898_v38 = vmul.f32 %v2752_v33, %v1897_v30 }
 0x709   : > { %v1899_v9 = vmul.f32 0.5, %v1898_v38 }
 0x70b   : > { %v1900_v36 = vsub.f32 1.5, %v1899_v9 }
 0x70d   : > { %v1901_v58 = vmul.f32 %v2752_v33, %v1900_v36 }
 0x70f   : > { %v1905_v62 = vsel %vm1904_vm6, %v2752_v33, %v1901_v58 }
 0x710   : > { %v1922_v20 = vmul.f32 %v1905_v62, %v3687_v48 }
 0x712   : > { %v1933_v17 = vmul.f32 %v3709_v40, %v1922_v20 }
 0x714   : > { %v1944_v12 = vadd.f32 %v3716_v3, %v1933_v17 }
 0x716   : > { %v3789_v54 = vadd.f32 %v2793_v52, %v1944_v12 }
 0x71d   : > { %v1819_v41 = vpop.xlane.xlu1 %1818 }
 0x71e   : > { %v1827_v6 = vmul.f32 %v1819_v41, %v3646_v63 }
 0x720   : > { %v1835_v35 = vadd.f32 1e-05, %v1827_v6 }
 0x722   : > { %2753 = vrsqrt.f32 %v1835_v35  ;;  %vm1912_vm8 = vweird.f32 %v1835_v35 }
 0x728   : > { %v2754_v23 = vpop.eup %2753 }
 0x729   : > { %v1907_v4 = vmul.f32 %v2754_v23, %v1835_v35  ;;  %vm1913_vm7 = vweird.f32 %v2754_v23 }
 0x72a   : > { %vm1914_vm9 = vmor %vm1912_vm8, %vm1913_vm7 }
 0x72b   : > { %v1908_v53 = vmul.f32 %v2754_v23, %v1907_v4 }
 0x72d   : > { %v1909_v7 = vmul.f32 0.5, %v1908_v53 }
 0x72f   : > { %v1910_v60 = vsub.f32 1.5, %v1909_v7 }
 0x731   : > { %v1911_v56 = vmul.f32 %v2754_v23, %v1910_v60 }
 0x733   : > { %v1915_v2 = vsel %vm1914_vm9, %v2754_v23, %v1911_v56 }
 0x734   : > { %v1923_v48 = vmul.f32 %v1915_v2, %v3701_v8  ;;  %v2794_v8 = vld [vmem:[%s2906_s23 + $0x38] sm:$0xff] }
 0x736   : > { %v1934_v10 = vmul.f32 %v3709_v40, %v1923_v48 }
 0x738   : > { %v1945_v50 = vadd.f32 %v3716_v3, %v1934_v10  ;;  %v2578_v3 = vld [vmem:[%s3964_s10 + $0x8] sm:$0xff] }
 0x739   : > { %2169 = vmatpush.bf16.msra.mxu0 %v2578_v3 }
 0x73a   : > { %v3792_v13 = vadd.f32 %v2794_v8, %v1945_v50 }
 0x73c   : > { %v1957_v40 = vpack.c.bf16 %v3792_v13, %v3789_v54 }
 0x73d   : > { %2170 = vmatpush.bf16.msra.mxu0 %v2577_v37 }
 0x73e   : > { %2536 = vmatmul.msk.bf16.gmra.mxu3 %vm504_vm0, %v1957_v40 }
 0x746   : > { %v1999_v39 = vpop.f32.mrf.mxu3 }
 0x747   : > { %v2000_v11 = vadd.f32 %v3806_v34, %v1999_v39 }
 0x749   : > { %v2027_v27 = vmul.f32 0.044715, %v2000_v11  ;;  %v2019_v25 = vmul.f32 0.5, %v2000_v11 }
 0x74b   : > { %v2035_v21 = vmul.f32 %v2027_v27, %v2000_v11 }
 0x74d   : > { %v2043_v5 = vmul.f32 %v2035_v21, %v2000_v11 }
 0x74e   : > { %v2001_v42 = vpop.f32.mrf.mxu3 }
 0x74f   : > { %v2051_v51 = vadd.f32 %v2043_v5, %v2000_v11  ;;  %v2002_v47 = vadd.f32 %v3806_v34, %v2001_v42 }
 0x751   : > { %v2028_v29 = vmul.f32 0.044715, %v2002_v47  ;;  %v2059_v14 = vmul.f32 0.7978846, %v2051_v51  ;;  %v2020_v57 = vmul.f32 0.5, %v2002_v47 }
 0x753   : > { %v2036_v26 = vmul.f32 %v2028_v29, %v2002_v47  ;;  %2755 = vtanh.f32 %v2059_v14 }
 0x755   : > { %v2044_v19 = vmul.f32 %v2036_v26, %v2002_v47 }
 0x757   : > { %v2052_v49 = vadd.f32 %v2044_v19, %v2002_v47 }
 0x759   : > { %v2060_v1 = vmul.f32 0.7978846, %v2052_v49  ;;  %v2756_v32 = vpop.eup %2755 }
 0x75a   : > { %v2075_v45 = vadd.f32 1.0, %v2756_v32 }
 0x75b   : > { %2757 = vtanh.f32 %v2060_v1 }
 0x75c   : > { %v2083_v33 = vmul.f32 %v2075_v45, %v2019_v25 }
 0x761   : > { %v2758_v24 = vpop.eup %2757 }
 0x762   : > { %v2076_v28 = vadd.f32 1.0, %v2758_v24 }
 0x764   : > { %v2084_v30 = vmul.f32 %v2076_v28, %v2020_v57 }
 0x766   : > { %v2091_v38 = vpack.c.bf16 %v2084_v30, %v2083_v33 }
 0x768   : > { %2171 = vmatmul.bf16.vlgmr.msra.gmra.mxu0 %v2091_v38 }
 0x779   : > { %v2004_v41 = vpop.f32.mrf.mxu3 }
 0x77a   : > { %v2005_v6 = vadd.f32 %v3806_v34, %v2004_v41 }
 0x77c   : > { %v2029_v9 = vmul.f32 0.044715, %v2005_v6  ;;  %v2021_v8 = vmul.f32 0.5, %v2005_v6 }
 0x77e   : > { %v2037_v35 = vmul.f32 %v2029_v9, %v2005_v6 }
 0x780   : > { %v2045_v36 = vmul.f32 %v2037_v35, %v2005_v6 }
 0x781   : > { %v2006_v58 = vpop.f32.mrf.mxu3 }
 0x782   : > { %v2007_v23 = vadd.f32 %v3806_v34, %v2006_v58  ;;  %v2053_v4 = vadd.f32 %v2045_v36, %v2005_v6 }
 0x784   : > { %v2030_v16 = vmul.f32 0.044715, %v2007_v23  ;;  %v2061_v53 = vmul.f32 0.7978846, %v2053_v4  ;;  %v2022_v40 = vmul.f32 0.5, %v2007_v23 }
 0x786   : > { %v2038_v62 = vmul.f32 %v2030_v16, %v2007_v23  ;;  %2759 = vtanh.f32 %v2061_v53 }
 0x788   : > { %v2046_v7 = vmul.f32 %v2038_v62, %v2007_v23 }
 0x789   : > { %v2009_v20 = vpop.f32.mrf.mxu3 }
 0x78a   : > { %v2010_v46 = vadd.f32 %v3806_v34, %v2009_v20  ;;  %v2054_v60 = vadd.f32 %v2046_v7, %v2007_v23 }
 0x78c   : > { %v2031_v56 = vmul.f32 0.044715, %v2010_v46  ;;  %v2062_v17 = vmul.f32 0.7978846, %v2054_v60  ;;  %v2760_v2 = vpop.eup %2759  ;;  %v2023_v14 = vmul.f32 0.5, %v2010_v46 }
 0x78d   : > { %v2077_v50 = vadd.f32 1.0, %v2760_v2 }
 0x78e   : > { %2761 = vtanh.f32 %v2062_v17  ;;  %v2039_v55 = vmul.f32 %v2031_v56, %v2010_v46 }
 0x78f   : > { %v2085_v39 = vmul.f32 %v2077_v50, %v2021_v8 }
 0x790   : > { %v2047_v48 = vmul.f32 %v2039_v55, %v2010_v46 }
 0x791   : > { %v2011_v10 = vpop.f32.mrf.mxu3 }
 0x792   : > { %v2012_v12 = vadd.f32 %v3806_v34, %v2011_v10  ;;  %v2055_v18 = vadd.f32 %v2047_v48, %v2010_v46 }
 0x794   : > { %v2762_v44 = vpop.eup %2761  ;;  %v2032_v52 = vmul.f32 0.044715, %v2012_v12  ;;  %v2063_v37 = vmul.f32 0.7978846, %v2055_v18  ;;  %v2024_v26 = vmul.f32 0.5, %v2012_v12 }
 0x795   : > { %v2078_v61 = vadd.f32 1.0, %v2762_v44 }
 0x796   : > { %v2040_v3 = vmul.f32 %v2032_v52, %v2012_v12  ;;  %2763 = vtanh.f32 %v2063_v37 }
 0x797   : > { %v2086_v11 = vmul.f32 %v2078_v61, %v2022_v40 }
 0x798   : > { %v2048_v27 = vmul.f32 %v2040_v3, %v2012_v12 }
 0x799   : > { %v2092_v21 = vpack.c.bf16 %v2086_v11, %v2085_v39 }
 0x79a   : > { %v2056_v5 = vadd.f32 %v2048_v27, %v2012_v12 }
 0x79b   : > { %2176 = vmatmul.bf16.gmra.mxu0 %v2092_v21 }
 0x79c   : > { %v2064_v42 = vmul.f32 0.7978846, %v2056_v5  ;;  %v2764_v51 = vpop.eup %2763 }
 0x79d   : > { %v2079_v47 = vadd.f32 1.0, %v2764_v51 }
 0x79e   : > { %2765 = vtanh.f32 %v2064_v42 }
 0x79f   : > { %v2087_v49 = vmul.f32 %v2079_v47, %v2023_v14 }
 0x7a4   : > { %v2766_v29 = vpop.eup %2765 }
 0x7a5   : > { %v2080_v19 = vadd.f32 1.0, %v2766_v29 }
 0x7a7   : > { %v2088_v1 = vmul.f32 %v2080_v19, %v2024_v26 }
 0x7a9   : > { %v2093_v32 = vpack.c.bf16 %v2088_v1, %v2087_v49 }
 0x7ab   : > { %2181 = vmatmul.bf16.gmra.mxu0 %v2093_v32 }
 0x7c1   : > { %v2014_v45 = vpop.f32.mrf.mxu3 }
 0x7c2   : > { %v2015_v24 = vadd.f32 %v3806_v34, %v2014_v45 }
 0x7c4   : > { %v2033_v25 = vmul.f32 0.044715, %v2015_v24  ;;  %v2025_v62 = vmul.f32 0.5, %v2015_v24 }
 0x7c6   : > { %v2041_v57 = vmul.f32 %v2033_v25, %v2015_v24 }
 0x7c8   : > { %v2049_v28 = vmul.f32 %v2041_v57, %v2015_v24 }
 0x7c9   : > { %v2016_v33 = vpop.f32.mrf.mxu3 }
 0x7ca   : > { %v2017_v30 = vadd.f32 %v3806_v34, %v2016_v33  ;;  %v2057_v38 = vadd.f32 %v2049_v28, %v2015_v24  ;;  %v2606_v34 = vld [vmem:[%s3965_s11] ss:$0 sm:$0xff] }
 0x7cc   : > { %v2034_v41 = vmul.f32 0.044715, %v2017_v30  ;;  %v2065_v9 = vmul.f32 0.7978846, %v2057_v38  ;;  %v2026_v53 = vmul.f32 0.5, %v2017_v30 }
 0x7ce   : > { %v2042_v6 = vmul.f32 %v2034_v41, %v2017_v30  ;;  %2767 = vtanh.f32 %v2065_v9 }
 0x7d0   : > { %v2050_v35 = vmul.f32 %v2042_v6, %v2017_v30 }
 0x7d2   : > { %v2058_v36 = vadd.f32 %v2050_v35, %v2017_v30 }
 0x7d4   : > { %v2066_v58 = vmul.f32 0.7978846, %v2058_v36  ;;  %v2768_v23 = vpop.eup %2767 }
 0x7d5   : > { %v2081_v4 = vadd.f32 1.0, %v2768_v23 }
 0x7d6   : > { %2769 = vtanh.f32 %v2066_v58 }
 0x7d7   : > { %v2089_v20 = vmul.f32 %v2081_v4, %v2025_v62 }
 0x7dc   : > { %v2770_v16 = vpop.eup %2769 }
 0x7dd   : > { %v2082_v7 = vadd.f32 1.0, %v2770_v16 }
 0x7df   : > { %v2090_v46 = vmul.f32 %v2082_v7, %v2026_v53 }
 0x7e1   : > { %v2094_v60 = vpack.c.bf16 %v2090_v46, %v2089_v20 }
 0x7e3   : > { %2186 = vmatmul.bf16.gmra.mxu0 %v2094_v60 }
 0x7e5   : > { %v2172_v56 = vpop.f32.mrf.mxu0 }
 0x7e6   : > { %v2173_v17 = vadd.f32 %v2606_v34, %v2172_v56 }
 0x7e8   : > { %v2194_v55 = vsel %vm504_vm0, %v2173_v17, 0.0 }
 0x7e9   : > { %2195 = vadd.xlane.f32.xlu0 %v2194_v55 }
 0x7ed   : > { %v2174_v2 = vpop.f32.mrf.mxu0 }
 0x7ee   : > { %v2175_v48 = vadd.f32 %v2606_v34, %v2174_v2 }
 0x7f0   : > { %v2197_v10 = vsel %vm504_vm0, %v2175_v48, 0.0 }
 0x7f1   : > { %2198 = vadd.xlane.f32.xlu2 %v2197_v10 }
 0x818   : > { %v2177_v12 = vpop.f32.mrf.mxu0 }
 0x819   : > { %v2178_v18 = vadd.f32 %v2606_v34, %v2177_v12 }
 0x81b   : > { %v2200_v50 = vsel %vm504_vm0, %v2178_v18, 0.0 }
 0x81c   : > { %2201 = vadd.xlane.f32.xlu1 %v2200_v50 }
 0x820   : > { %v2179_v44 = vpop.f32.mrf.mxu0 }
 0x821   : > { %v2180_v52 = vadd.f32 %v2606_v34, %v2179_v44 }
 0x823   : > { %v2203_v8 = vsel %vm504_vm0, %v2180_v52, 0.0 }
 0x824   : > { %2204 = vadd.xlane.f32.xlu0 %v2203_v8 }
 0x828   : > { %v2182_v40 = vpop.f32.mrf.mxu0 }
 0x829   : > { %v2183_v61 = vadd.f32 %v2606_v34, %v2182_v40 }
 0x82b   : > { %v2206_v3 = vsel %vm504_vm0, %v2183_v61, 0.0 }
 0x82c   : > { %2207 = vadd.xlane.f32.xlu2 %v2206_v3 }
 0x830   : > { %v2184_v37 = vpop.f32.mrf.mxu0 }
 0x831   : > { %v2185_v39 = vadd.f32 %v2606_v34, %v2184_v37 }
 0x833   : > { %v2209_v11 = vsel %vm504_vm0, %v2185_v39, 0.0 }
 0x834   : > { %2210 = vadd.xlane.f32.xlu1 %v2209_v11 }
 0x85c   : > { %v2196_v27 = vpop.xlane.xlu0 %2195 }
 0x85d   : > { %v2218_v21 = vmul.f32 %v2196_v27, %v3646_v63 }
 0x85f   : > { %v3829_v5 = vsub.f32 %v2173_v17, %v2218_v21 }
 0x860   : > { %v2187_v42 = vpop.f32.mrf.mxu0 }
 0x861   : > { %v2188_v51 = vadd.f32 %v2606_v34, %v2187_v42  ;;  %v2234_v47 = vmul.f32 %v3829_v5, %v3829_v5 }
 0x863   : > { %v2242_v29 = vsel %vm504_vm0, %v2234_v47, 0.0  ;;  %v2212_v14 = vsel %vm504_vm0, %v2188_v51, 0.0 }
 0x864   : > { %2243 = vadd.xlane.f32.xlu1 %v2242_v29  ;;  %2213 = vadd.xlane.f32.xlu0 %v2212_v14  ;;  %v2199_v26 = vpop.xlane.xlu2 %2198  ;;  %v3883_v29 = vld [vmem:[%s3966_s12] ss:$0 sm:$0xff] }
 0x865   : > { %v2219_v19 = vmul.f32 %v2199_v26, %v3646_v63 }
 0x867   : > { %v3836_v49 = vsub.f32 %v2175_v48, %v2219_v19  ;;  %v3888_v19 = vld [vmem:[%s3967_s13] ss:$0 sm:$0xff] }
 0x868   : > { %v2189_v1 = vpop.f32.mrf.mxu0 }
 0x869   : > { %v2190_v32 = vadd.f32 %v2606_v34, %v2189_v1  ;;  %v2235_v45 = vmul.f32 %v3836_v49, %v3836_v49 }
 0x86b   : > { %v2215_v24 = vsel %vm504_vm0, %v2190_v32, 0.0  ;;  %v2245_v25 = vsel %vm504_vm0, %v2235_v45, 0.0 }
 0x86c   : > { %2216 = vadd.xlane.f32.xlu2 %v2215_v24  ;;  %2246 = vadd.xlane.f32.xlu0 %v2245_v25 }
 0x88f   : > { %v2202_v57 = vpop.xlane.xlu1 %2201 }
 0x890   : > { %v2220_v28 = vmul.f32 %v2202_v57, %v3646_v63 }
 0x892   : > { %v3843_v33 = vsub.f32 %v2178_v18, %v2220_v28 }
 0x894   : > { %v2236_v30 = vmul.f32 %v3843_v33, %v3843_v33 }
 0x896   : > { %v2248_v38 = vsel %vm504_vm0, %v2236_v30, 0.0 }
 0x897   : > { %v2205_v41 = vpop.xlane.xlu0 %2204  ;;  %2249 = vadd.xlane.f32.xlu2 %v2248_v38 }
 0x898   : > { %v2221_v6 = vmul.f32 %v2205_v41, %v3646_v63 }
 0x89a   : > { %v3849_v9 = vsub.f32 %v2180_v52, %v2221_v6 }
 0x89c   : > { %v2237_v35 = vmul.f32 %v3849_v9, %v3849_v9 }
 0x89e   : > { %v2251_v36 = vsel %vm504_vm0, %v2237_v35, 0.0 }
 0x89f   : > { %2252 = vadd.xlane.f32.xlu1 %v2251_v36  ;;  %v2208_v58 = vpop.xlane.xlu2 %2207 }
 0x8a0   : > { %v2222_v23 = vmul.f32 %v2208_v58, %v3646_v63 }
 0x8a2   : > { %v3855_v4 = vsub.f32 %v2183_v61, %v2222_v23 }
 0x8a4   : > { %v2238_v16 = vmul.f32 %v3855_v4, %v3855_v4 }
 0x8a6   : > { %v2254_v62 = vsel %vm504_vm0, %v2238_v16, 0.0 }
 0x8a7   : > { %v2211_v53 = vpop.xlane.xlu1 %2210  ;;  %2255 = vadd.xlane.f32.xlu0 %v2254_v62 }
 0x8a8   : > { %v2223_v7 = vmul.f32 %v2211_v53, %v3646_v63 }
 0x8aa   : > { %v3861_v20 = vsub.f32 %v2185_v39, %v2223_v7 }
 0x8ac   : > { %v2239_v46 = vmul.f32 %v3861_v20, %v3861_v20 }
 0x8ae   : > { %v2257_v60 = vsel %vm504_vm0, %v2239_v46, 0.0 }
 0x8af   : > { %2258 = vadd.xlane.f32.xlu2 %v2257_v60 }
 0x8d7   : > { %v2244_v34 = vpop.xlane.xlu1 %2243  ;;  %v2214_v56 = vpop.xlane.xlu0 %2213 }
 0x8d8   : > { %v2266_v17 = vmul.f32 %v2244_v34, %v3646_v63  ;;  %v2224_v55 = vmul.f32 %v2214_v56, %v3646_v63 }
 0x8da   : > { %v2274_v2 = vadd.f32 1e-05, %v2266_v17  ;;  %v3868_v48 = vsub.f32 %v2188_v51, %v2224_v55 }
 0x8dc   : > { %2771 = vrsqrt.f32 %v2274_v2  ;;  %v2240_v10 = vmul.f32 %v3868_v48, %v3868_v48  ;;  %vm2288_vm11 = vweird.f32 %v2274_v2 }
 0x8de   : > { %v2260_v12 = vsel %vm504_vm0, %v2240_v10, 0.0 }
 0x8df   : > { %2261 = vadd.xlane.f32.xlu1 %v2260_v12  ;;  %v2247_v18 = vpop.xlane.xlu0 %2246  ;;  %v2217_v50 = vpop.xlane.xlu2 %2216 }
 0x8e0   : > { %v2267_v44 = vmul.f32 %v2247_v18, %v3646_v63  ;;  %v2225_v52 = vmul.f32 %v2217_v50, %v3646_v63 }
 0x8e2   : > { %v2772_v8 = vpop.eup %2771  ;;  %v2275_v40 = vadd.f32 1e-05, %v2267_v44  ;;  %v3875_v61 = vsub.f32 %v2190_v32, %v2225_v52 }
 0x8e3   : > { %v2283_v3 = vmul.f32 %v2772_v8, %v2274_v2  ;;  %vm2289_vm10 = vweird.f32 %v2772_v8 }
 0x8e4   : > { %2773 = vrsqrt.f32 %v2275_v40  ;;  %v2241_v37 = vmul.f32 %v3875_v61, %v3875_v61  ;;  %vm2290_vm12 = vmor %vm2288_vm11, %vm2289_vm10  ;;  %vm2298_vm14 = vweird.f32 %v2275_v40 }
 0x8e5   : > { %v2284_v39 = vmul.f32 %v2772_v8, %v2283_v3 }
 0x8e6   : > { %v2263_v11 = vsel %vm504_vm0, %v2241_v37, 0.0 }
 0x8e7   : > { %v2285_v27 = vmul.f32 0.5, %v2284_v39  ;;  %2264 = vadd.xlane.f32.xlu0 %v2263_v11 }
 0x8e9   : > { %v2286_v21 = vsub.f32 1.5, %v2285_v27 }
 0x8ea   : > { %v2774_v42 = vpop.eup %2773 }
 0x8eb   : > { %v2287_v51 = vmul.f32 %v2772_v8, %v2286_v21  ;;  %v2293_v47 = vmul.f32 %v2774_v42, %v2275_v40  ;;  %vm2299_vm13 = vweird.f32 %v2774_v42 }
 0x8ec   : > { %vm2300_vm1 = vmor %vm2298_vm14, %vm2299_vm13 }
 0x8ed   : > { %v2291_v14 = vsel %vm2290_vm12, %v2772_v8, %v2287_v51  ;;  %v2294_v26 = vmul.f32 %v2774_v42, %v2293_v47 }
 0x8ee   : > { %v2362_v1 = vmul.f32 %v2291_v14, %v3829_v5 }
 0x8ef   : > { %v2295_v32 = vmul.f32 0.5, %v2294_v26 }
 0x8f0   : > { %v2373_v45 = vmul.f32 %v3883_v29, %v2362_v1 }
 0x8f1   : > { %v2296_v24 = vsub.f32 1.5, %v2295_v32 }
 0x8f2   : > { %v2384_v25 = vadd.f32 %v3888_v19, %v2373_v45 }
 0x8f3   : > { %v2297_v57 = vmul.f32 %v2774_v42, %v2296_v24 }
 0x8f4   : > { %v2392_v28 = vadd.f32 %v2384_v25, %v3723_v22 }
 0x8f5   : > { %v2301_v5 = vsel %vm2300_vm1, %v2774_v42, %v2297_v57 }
 0x8f6   : > { %2400 = vst.msk [vmem:[%s3898_s18] sm:$0xff] %vm504_vm0, %v2392_v28  ;;  %v2363_v30 = vmul.f32 %v2301_v5, %v3836_v49 }
 0x8f8   : > { %v2374_v38 = vmul.f32 %v3883_v29, %v2363_v30 }
 0x8fa   : > { %v2385_v41 = vadd.f32 %v3888_v19, %v2374_v38 }
 0x8fc   : > { %v2393_v6 = vadd.f32 %v2385_v41, %v3726_v15 }
 0x8fe   : > { %2401 = vst.msk [vmem:[%s3898_s18 + $0x8] sm:$0xff] %vm504_vm0, %v2393_v6 }
 0x90a   : > { %v2250_v35 = vpop.xlane.xlu2 %2249 }
 0x90b   : > { %v2268_v36 = vmul.f32 %v2250_v35, %v3646_v63 }
 0x90d   : > { %v2276_v58 = vadd.f32 1e-05, %v2268_v36 }
 0x90f   : > { %2775 = vrsqrt.f32 %v2276_v58  ;;  %vm2308_vm2 = vweird.f32 %v2276_v58 }
 0x912   : > { %v2253_v22 = vpop.xlane.xlu1 %2252 }
 0x913   : > { %v2269_v23 = vmul.f32 %v2253_v22, %v3646_v63 }
 0x915   : > { %v2776_v16 = vpop.eup %2775  ;;  %v2277_v62 = vadd.f32 1e-05, %v2269_v23 }
 0x916   : > { %v2303_v53 = vmul.f32 %v2776_v16, %v2276_v58  ;;  %vm2309_vm15 = vweird.f32 %v2776_v16 }
 0x917   : > { %2777 = vrsqrt.f32 %v2277_v62  ;;  %vm2310_vm3 = vmor %vm2308_vm2, %vm2309_vm15  ;;  %vm2318_vm5 = vweird.f32 %v2277_v62 }
 0x918   : > { %v2304_v49 = vmul.f32 %v2776_v16, %v2303_v53 }
 0x91a   : > { %v2305_v7 = vmul.f32 0.5, %v2304_v49  ;;  %v2256_v46 = vpop.xlane.xlu0 %2255 }
 0x91b   : > { %v2270_v60 = vmul.f32 %v2256_v46, %v3646_v63 }
 0x91c   : > { %v2306_v15 = vsub.f32 1.5, %v2305_v7 }
 0x91d   : > { %v2778_v34 = vpop.eup %2777  ;;  %v2278_v56 = vadd.f32 1e-05, %v2270_v60 }
 0x91e   : > { %v2307_v17 = vmul.f32 %v2776_v16, %v2306_v15  ;;  %v2313_v55 = vmul.f32 %v2778_v34, %v2277_v62  ;;  %vm2319_vm4 = vweird.f32 %v2778_v34 }
 0x91f   : > { %2779 = vrsqrt.f32 %v2278_v56  ;;  %vm2320_vm6 = vmor %vm2318_vm5, %vm2319_vm4  ;;  %vm2328_vm8 = vweird.f32 %v2278_v56 }
 0x920   : > { %v2311_v2 = vsel %vm2310_vm3, %v2776_v16, %v2307_v17  ;;  %v2314_v10 = vmul.f32 %v2778_v34, %v2313_v55 }
 0x921   : > { %v2364_v12 = vmul.f32 %v2311_v2, %v3843_v33 }
 0x922   : > { %v2315_v18 = vmul.f32 0.5, %v2314_v10  ;;  %v2259_v50 = vpop.xlane.xlu2 %2258 }
 0x923   : > { %v2375_v44 = vmul.f32 %v3883_v29, %v2364_v12  ;;  %v2271_v52 = vmul.f32 %v2259_v50, %v3646_v63 }
 0x924   : > { %v2316_v8 = vsub.f32 1.5, %v2315_v18 }
 0x925   : > { %v2780_v40 = vpop.eup %2779  ;;  %v2386_v3 = vadd.f32 %v3888_v19, %v2375_v44  ;;  %v2279_v37 = vadd.f32 1e-05, %v2271_v52 }
 0x926   : > { %v2317_v39 = vmul.f32 %v2778_v34, %v2316_v8  ;;  %v2323_v11 = vmul.f32 %v2780_v40, %v2278_v56  ;;  %vm2329_vm7 = vweird.f32 %v2780_v40 }
 0x927   : > { %v2394_v27 = vadd.f32 %v2386_v3, %v3742_v59  ;;  %2781 = vrsqrt.f32 %v2279_v37  ;;  %vm2330_vm9 = vmor %vm2328_vm8, %vm2329_vm7  ;;  %vm2338_vm11 = vweird.f32 %v2279_v37 }
 0x928   : > { %v2321_v33 = vsel %vm2320_vm6, %v2778_v34, %v2317_v39  ;;  %v2324_v21 = vmul.f32 %v2780_v40, %v2323_v11 }
 0x929   : > { %2402 = vst.msk [vmem:[%s3898_s18 + $0x10] sm:$0xff] %vm504_vm0, %v2394_v27  ;;  %v2365_v42 = vmul.f32 %v2321_v33, %v3849_v9 }
 0x92a   : > { %v2325_v51 = vmul.f32 0.5, %v2324_v21 }
 0x92b   : > { %v2376_v47 = vmul.f32 %v3883_v29, %v2365_v42 }
 0x92c   : > { %v2326_v14 = vsub.f32 1.5, %v2325_v51 }
 0x92d   : > { %v2782_v26 = vpop.eup %2781  ;;  %v2387_v1 = vadd.f32 %v3888_v19, %v2376_v47 }
 0x92e   : > { %v2327_v32 = vmul.f32 %v2780_v40, %v2326_v14  ;;  %v2333_v59 = vmul.f32 %v2782_v26, %v2279_v37  ;;  %vm2339_vm10 = vweird.f32 %v2782_v26 }
 0x92f   : > { %v2395_v45 = vadd.f32 %v2387_v1, %v3745_v43  ;;  %vm2340_vm12 = vmor %vm2338_vm11, %vm2339_vm10 }
 0x930   : > { %v2331_v24 = vsel %vm2330_vm9, %v2780_v40, %v2327_v32  ;;  %v2334_v25 = vmul.f32 %v2782_v26, %v2333_v59 }
 0x931   : > { %2403 = vst.msk [vmem:[%s3898_s18 + $0x18] sm:$0xff] %vm504_vm0, %v2395_v45  ;;  %v2366_v9 = vmul.f32 %v2331_v24, %v3855_v4 }
 0x932   : > { %v2335_v57 = vmul.f32 0.5, %v2334_v25 }
 0x933   : > { %v2377_v28 = vmul.f32 %v3883_v29, %v2366_v9 }
 0x934   : > { %v2336_v5 = vsub.f32 1.5, %v2335_v57 }
 0x935   : > { %v2388_v30 = vadd.f32 %v3888_v19, %v2377_v28 }
 0x936   : > { %v2337_v38 = vmul.f32 %v2782_v26, %v2336_v5 }
 0x937   : > { %v2396_v43 = vadd.f32 %v2388_v30, %v3757_v0 }
 0x938   : > { %v2341_v41 = vsel %vm2340_vm12, %v2782_v26, %v2337_v38 }
 0x939   : > { %2404 = vst.msk [vmem:[%s3898_s18 + $0x20] sm:$0xff] %vm504_vm0, %v2396_v43  ;;  %v2367_v6 = vmul.f32 %v2341_v41, %v3861_v20 }
 0x93b   : > { %v2378_v4 = vmul.f32 %v3883_v29, %v2367_v6 }
 0x93d   : > { %v2389_v35 = vadd.f32 %v3888_v19, %v2378_v4 }
 0x93f   : > { %v2397_v36 = vadd.f32 %v2389_v35, %v3760_v31 }
 0x941   : > { %2405 = vst.msk [vmem:[%s3898_s18 + $0x28] sm:$0xff] %vm504_vm0, %v2397_v36 }
 0x952   : > { %v2262_v58 = vpop.xlane.xlu1 %2261 }
 0x953   : > { %v2272_v22 = vmul.f32 %v2262_v58, %v3646_v63 }
 0x955   : > { %v2280_v23 = vadd.f32 1e-05, %v2272_v22 }
 0x957   : > { %2783 = vrsqrt.f32 %v2280_v23  ;;  %vm2348_vm14 = vweird.f32 %v2280_v23 }
 0x95a   : > { %v2265_v0 = vpop.xlane.xlu0 %2264 }
 0x95b   : > { %v2273_v16 = vmul.f32 %v2265_v0, %v3646_v63 }
 0x95d   : > { %v2784_v62 = vpop.eup %2783  ;;  %v2281_v53 = vadd.f32 1e-05, %v2273_v16 }
 0x95e   : > { %v2343_v49 = vmul.f32 %v2784_v62, %v2280_v23  ;;  %vm2349_vm13 = vweird.f32 %v2784_v62 }
 0x95f   : > { %2785 = vrsqrt.f32 %v2281_v53  ;;  %vm2350_vm1 = vmor %vm2348_vm14, %vm2349_vm13  ;;  %vm2358_vm2 = vweird.f32 %v2281_v53 }
 0x960   : > { %v2344_v20 = vmul.f32 %v2784_v62, %v2343_v49 }
 0x962   : > { %v2345_v7 = vmul.f32 0.5, %v2344_v20 }
 0x964   : > { %v2346_v46 = vsub.f32 1.5, %v2345_v7 }
 0x965   : > { %v2786_v60 = vpop.eup %2785 }
 0x966   : > { %v2347_v31 = vmul.f32 %v2784_v62, %v2346_v46  ;;  %v2353_v15 = vmul.f32 %v2786_v60, %v2281_v53  ;;  %vm2359_vm15 = vweird.f32 %v2786_v60 }
 0x967   : > { %vm2360_vm3 = vmor %vm2358_vm2, %vm2359_vm15 }
 0x968   : > { %v2351_v34 = vsel %vm2350_vm1, %v2784_v62, %v2347_v31  ;;  %v2354_v56 = vmul.f32 %v2786_v60, %v2353_v15 }
 0x969   : > { %v2368_v17 = vmul.f32 %v2351_v34, %v3868_v48 }
 0x96a   : > { %v2355_v63 = vmul.f32 0.5, %v2354_v56 }
 0x96b   : > { %v2379_v55 = vmul.f32 %v3883_v29, %v2368_v17 }
 0x96c   : > { %v2356_v2 = vsub.f32 1.5, %v2355_v63 }
 0x96d   : > { %v2390_v10 = vadd.f32 %v3888_v19, %v2379_v55 }
 0x96e   : > { %v2357_v12 = vmul.f32 %v2786_v60, %v2356_v2 }
 0x96f   : > { %v2398_v18 = vadd.f32 %v2390_v10, %v3789_v54 }
 0x970   : > { %v2361_v50 = vsel %vm2360_vm3, %v2786_v60, %v2357_v12 }
 0x971   : > { %2406 = vst.msk [vmem:[%s3898_s18 + $0x30] sm:$0xff] %vm504_vm0, %v2398_v18  ;;  %v2369_v44 = vmul.f32 %v2361_v50, %v3875_v61 }
 0x973   : > { %v2380_v48 = vmul.f32 %v3883_v29, %v2369_v44 }
 0x975   : > { %v2391_v52 = vadd.f32 %v3888_v19, %v2380_v48 }
 0x977   : > { %v2399_v8 = vadd.f32 %v2391_v52, %v3792_v13 }
 0x979   : > { %2407 = vst.msk [vmem:[%s3898_s18 + $0x38] sm:$0xff] %vm504_vm0, %v2399_v8 }
 0x97a PF: > { %s24_s29 = sadd.s32 1, %s2801_s29  }
 0x97b   : > { %p21_p4 = scmp.ge.s32.totalorder %s24_s29, 6  }
 0x97d   :  { %23 = sbr.rel (!%p21_p4) target bundleno = 1 (0x1), region = 107 }

// kernel: _lambda_.9
= control target key start
LH: loop header
LB: loop body
LE: loop exit
PB: predicated region body
PF: predicated region fallthrough
CT: control target
= control target key end

     0   :  { %s576_s15 = smov 0   ;;  %s657_s0 = inlined_call_operand.vmem [shape: f32[64,128], index: 0, kind: input, shape index: {}]   ;;  %s658_s1 = inlined_call_operand.vmem [shape: bf16[128,64], index: 1, kind: input, shape index: {}]   ;;  %s659_s2 = inlined_call_operand.vmem [shape: f32[1,64], index: 2, kind: input, shape index: {}]   ;;  %s660_s3 = inlined_call_operand.vmem [shape: f32[1,64], index: 3, kind: input, shape index: {}]   ;;  %s661_s4 = inlined_call_operand.vmem [shape: f32[64,64], index: 4, kind: output, shape index: {}]  }
   0x1 LB: > { %s462_s16 = sadd.s32 4294967295, %s548_s15   ;;  %p466_p0 = scmp.ge.s32.totalorder %s548_s15, 1  ;;  %s548_s15 = sphi %s576_s15, %s14_s15  }
   0x2   : > { %p163_p1 = scmp.lt.s32.totalorder %s548_s15, 3 }
   0x4   : > { %p164_p2 = pnand %p466_p0, %p163_p1 }
   0x5   : > { %s467_s23 = sshll.u32 (!%p164_p2), %s462_s16, 2 }
   0x6   : > { %167 = sbr.rel (%p164_p2) target bundleno = 447 (0x1bf), region = 36  ;;  %p190_p3 = scmp.lt.s32.totalorder (!%p164_p2), %s467_s23, 7 }
   0xb   : > { %v512_v0 = vld [vmem:[%s658_s1 + $0x38] sm:$0xff]  ;;  %v511_v1 = vld [vmem:[%s658_s1 + $0x30] sm:$0xff]  ;;  %v510_v2 = vld [vmem:[%s658_s1 + $0x28] sm:$0xff]  ;;  %s663_s23 = smov (!%p190_p3, %s467_s23), 7  ;;  %vm292_vm0 = vcmask 523264   ;;  %v550_v22 = vmov 64.0  }
   0xc   : > { %271 = vmatpush.bf16.msra.mxu0 %v512_v0  ;;  %513 = vmatpush.bf16.msra.mxu1 %v512_v0  ;;  %v509_v3 = vld [vmem:[%s658_s1 + $0x20] sm:$0xff]  ;;  %v508_v4 = vld [vmem:[%s658_s1 + $0x18] sm:$0xff]  ;;  %v507_v5 = vld [vmem:[%s658_s1 + $0x10] sm:$0xff]  ;;  %s468_s30 = sshll.u32 %s663_s23, 3  ;;  %532 = vrcp.f32 %v550_v22 }
   0xd   : > { %v506_v6 = vld [vmem:[%s658_s1 + $0x8] sm:$0xff]  ;;  %s193_s9 = scalar_lea.vmem %s657_s0, %s468_s30  ;;  %v505_v7 = vld [vmem:[%s658_s1] sm:$0xff]  ;;  %s199_s19 = scalar_lea.vmem %s661_s4, %s468_s30 }
   0xe   : > { %v201_v8 = vld [vmem:[%s193_s9] sm:$0xff]  ;;  %v202_v9 = vld [vmem:[%s193_s9 + $0x8] sm:$0xff]  ;;  %v203_v10 = vld [vmem:[%s193_s9 + $0x10] sm:$0xff] }
   0xf   : > { %v204_v11 = vld [vmem:[%s193_s9 + $0x18] sm:$0xff]  ;;  %v205_v12 = vpack.c.bf16 %v202_v9, %v201_v8 }
  0x10   : > { %272 = vmatpush.bf16.msra.mxu0 %v511_v1  ;;  %514 = vmatpush.bf16.msra.mxu1 %v511_v1  ;;  %v206_v13 = vpack.c.bf16 %v204_v11, %v203_v10  ;;  %v530_v11 = vld [vmem:[%s659_s2] ss:$0 sm:$0xff] }
  0x12   : > { %v533_v23 = vpop.eup %532 }
  0x13   : > { %v306_v24 = vmul.f32 64.0, %v533_v23  ;;  %vm310_vm1 = vweird.f32 %v533_v23 }
  0x14   : > { %273 = vmatpush.bf16.msra.mxu0 %v510_v2  ;;  %515 = vmatpush.bf16.msra.mxu1 %v510_v2 }
  0x15   : > { %v307_v25 = vsub.f32 1.0, %v306_v24 }
  0x17   : > { %v308_v26 = vmul.f32 %v533_v23, %v307_v25 }
  0x18   : > { %274 = vmatpush.bf16.msra.mxu0 %v509_v3  ;;  %516 = vmatpush.bf16.msra.mxu1 %v509_v3 }
  0x19   : > { %v309_v27 = vadd.f32 %v533_v23, %v308_v26 }
  0x1b   : > { %v311_v28 = vsel %vm310_vm1, %v533_v23, %v309_v27 }
  0x1c   : > { %275 = vmatpush.bf16.msra.mxu0 %v508_v4  ;;  %517 = vmatpush.bf16.msra.mxu1 %v508_v4 }
  0x20   : > { %276 = vmatpush.bf16.msra.mxu0 %v507_v5  ;;  %518 = vmatpush.bf16.msra.mxu1 %v507_v5 }
  0x24   : > { %277 = vmatpush.bf16.msra.mxu0 %v506_v6  ;;  %519 = vmatpush.bf16.msra.mxu1 %v506_v6 }
  0x28   : > { %278 = vmatpush.bf16.msra.mxu0 %v505_v7  ;;  %520 = vmatpush.bf16.msra.mxu1 %v505_v7 }
  0x2b   : > { %279 = vmatmul.bf16.vlgmr.msra.gmra.mxu0 %v205_v12  ;;  %284 = vmatmul.bf16.vlgmr.msra.gmra.mxu1 %v206_v13 }
  0xa8   : > { %v280_v14 = vpop.f32.mrf.mxu0  ;;  %v285_v15 = vpop.f32.mrf.mxu1 }
  0xa9   : > { %v299_v16 = vsel %vm292_vm0, %v285_v15, 0.0  ;;  %v293_v17 = vsel %vm292_vm0, %v280_v14, 0.0 }
  0xaa   : > { %300 = vadd.xlane.f32.xlu1 %v299_v16  ;;  %294 = vadd.xlane.f32.xlu0 %v293_v17  ;;  %v531_v16 = vld [vmem:[%s660_s3] ss:$0 sm:$0xff] }
  0xb0   : > { %v282_v18 = vpop.f32.mrf.mxu0  ;;  %v287_v19 = vpop.f32.mrf.mxu1 }
  0xb1   : > { %v302_v20 = vsel %vm292_vm0, %v287_v19, 0.0  ;;  %v296_v21 = vsel %vm292_vm0, %v282_v18, 0.0 }
  0xb2   : > { %303 = vadd.xlane.f32.xlu1 %v302_v20  ;;  %297 = vadd.xlane.f32.xlu0 %v296_v21 }
 0x11d   : > { %v301_v29 = vpop.xlane.xlu1 %300  ;;  %v295_v30 = vpop.xlane.xlu0 %294 }
 0x11e   : > { %v314_v31 = vmul.f32 %v311_v28, %v301_v29  ;;  %v312_v32 = vmul.f32 %v311_v28, %v295_v30 }
 0x120   : > { %v620_v33 = vsub.f32 %v285_v15, %v314_v31  ;;  %v316_v34 = vsub.f32 %v280_v14, %v312_v32 }
 0x122   : > { %v320_v35 = vmul.f32 %v316_v34, %v316_v34  ;;  %v322_v36 = vmul.f32 %v620_v33, %v620_v33 }
 0x124   : > { %v324_v37 = vsel %vm292_vm0, %v320_v35, 0.0  ;;  %v330_v38 = vsel %vm292_vm0, %v322_v36, 0.0 }
 0x125   : > { %v304_v39 = vpop.xlane.xlu1 %303  ;;  %325 = vadd.xlane.f32.xlu2 %v324_v37  ;;  %331 = vadd.xlane.f32.xlu0 %v330_v38  ;;  %v298_v40 = vpop.xlane.xlu0 %297 }
 0x126   : > { %v315_v41 = vmul.f32 %v311_v28, %v304_v39  ;;  %v313_v42 = vmul.f32 %v311_v28, %v298_v40 }
 0x128   : > { %v626_v43 = vsub.f32 %v287_v19, %v315_v41  ;;  %v628_v44 = vsub.f32 %v282_v18, %v313_v42 }
 0x12a   : > { %v323_v45 = vmul.f32 %v626_v43, %v626_v43  ;;  %v321_v46 = vmul.f32 %v628_v44, %v628_v44 }
 0x12c   : > { %v333_v47 = vsel %vm292_vm0, %v323_v45, 0.0  ;;  %v327_v48 = vsel %vm292_vm0, %v321_v46, 0.0 }
 0x12d   : > { %334 = vadd.xlane.f32.xlu1 %v333_v47  ;;  %328 = vadd.xlane.f32.xlu2 %v327_v48 }
 0x198   : > { %v326_v49 = vpop.xlane.xlu2 %325  ;;  %v332_v50 = vpop.xlane.xlu0 %331 }
 0x199   : > { %v336_v51 = vmul.f32 %v326_v49, %v311_v28  ;;  %v338_v52 = vmul.f32 %v332_v50, %v311_v28 }
 0x19b   : > { %v340_v53 = vadd.f32 1e-05, %v336_v51  ;;  %v342_v54 = vadd.f32 1e-05, %v338_v52 }
 0x19d   : > { %534 = vrsqrt.f32 %v340_v53  ;;  %vm350_vm3 = vweird.f32 %v340_v53  ;;  %vm370_vm6 = vweird.f32 %v342_v54 }
 0x19e   : > { %536 = vrsqrt.f32 %v342_v54 }
 0x1a0   : > { %v335_v55 = vpop.xlane.xlu1 %334  ;;  %v329_v56 = vpop.xlane.xlu2 %328 }
 0x1a1   : > { %v339_v57 = vmul.f32 %v335_v55, %v311_v28  ;;  %v337_v58 = vmul.f32 %v329_v56, %v311_v28 }
 0x1a3   : > { %v535_v59 = vpop.eup %534  ;;  %v343_v60 = vadd.f32 1e-05, %v339_v57  ;;  %v341_v61 = vadd.f32 1e-05, %v337_v58 }
 0x1a4   : > { %v537_v62 = vpop.eup %536  ;;  %v345_v63 = vmul.f32 %v535_v59, %v340_v53  ;;  %vm351_vm2 = vweird.f32 %v535_v59 }
 0x1a5   : > { %v365_v0 = vmul.f32 %v537_v62, %v342_v54  ;;  %538 = vrsqrt.f32 %v343_v60  ;;  %vm352_vm4 = vmor %vm350_vm3, %vm351_vm2  ;;  %vm371_vm5 = vweird.f32 %v537_v62  ;;  %vm380_vm10 = vweird.f32 %v343_v60 }
 0x1a6   : > { %v346_v1 = vmul.f32 %v535_v59, %v345_v63  ;;  %540 = vrsqrt.f32 %v341_v61  ;;  %vm372_vm7 = vmor %vm370_vm6, %vm371_vm5  ;;  %vm360_vm12 = vweird.f32 %v341_v61 }
 0x1a7   : > { %v366_v2 = vmul.f32 %v537_v62, %v365_v0 }
 0x1a8   : > { %v347_v3 = vmul.f32 0.5, %v346_v1 }
 0x1a9   : > { %v367_v4 = vmul.f32 0.5, %v366_v2 }
 0x1aa   : > { %v348_v5 = vsub.f32 1.5, %v347_v3 }
 0x1ab   : > { %v539_v6 = vpop.eup %538  ;;  %v368_v7 = vsub.f32 1.5, %v367_v4 }
 0x1ac   : > { %v541_v8 = vpop.eup %540  ;;  %v349_v9 = vmul.f32 %v535_v59, %v348_v5  ;;  %v375_v10 = vmul.f32 %v539_v6, %v343_v60  ;;  %vm381_vm8 = vweird.f32 %v539_v6 }
 0x1ad   : > { %v355_v12 = vmul.f32 %v541_v8, %v341_v61  ;;  %v369_v14 = vmul.f32 %v537_v62, %v368_v7  ;;  %vm361_vm9 = vweird.f32 %v541_v8  ;;  %vm382_vm11 = vmor %vm380_vm10, %vm381_vm8 }
 0x1ae   : > { %v353_v13 = vsel %vm352_vm4, %v535_v59, %v349_v9  ;;  %v376_v15 = vmul.f32 %v539_v6, %v375_v10  ;;  %vm362_vm13 = vmor %vm360_vm12, %vm361_vm9 }
 0x1af   : > { %v384_v17 = vmul.f32 %v353_v13, %v316_v34  ;;  %v356_v18 = vmul.f32 %v541_v8, %v355_v12  ;;  %v373_v22 = vsel %vm372_vm7, %v537_v62, %v369_v14 }
 0x1b0   : > { %v377_v19 = vmul.f32 0.5, %v376_v15  ;;  %v386_v27 = vmul.f32 %v373_v22, %v620_v33 }
 0x1b1   : > { %v391_v20 = vmul.f32 %v530_v11, %v384_v17  ;;  %v357_v21 = vmul.f32 0.5, %v356_v18 }
 0x1b2   : > { %v378_v23 = vsub.f32 1.5, %v377_v19  ;;  %v393_v34 = vmul.f32 %v530_v11, %v386_v27 }
 0x1b3   : > { %v398_v24 = vadd.f32 %v531_v16, %v391_v20  ;;  %v358_v25 = vsub.f32 1.5, %v357_v21 }
 0x1b4   : > { %v379_v26 = vmul.f32 %v539_v6, %v378_v23  ;;  %v400_v38 = vadd.f32 %v531_v16, %v393_v34 }
 0x1b5   : > { %402 = vst.msk [vmem:[%s199_s19] sm:$0xff] %vm292_vm0, %v398_v24  ;;  %v359_v28 = vmul.f32 %v541_v8, %v358_v25 }
 0x1b6   : > { %v383_v29 = vsel %vm382_vm11, %v539_v6, %v379_v26  ;;  %404 = vst.msk [vmem:[%s199_s19 + $0x10] sm:$0xff] %vm292_vm0, %v400_v38 }
 0x1b7   : > { %v387_v30 = vmul.f32 %v383_v29, %v626_v43  ;;  %v363_v31 = vsel %vm362_vm13, %v541_v8, %v359_v28 }
 0x1b8   : > { %v385_v32 = vmul.f32 %v363_v31, %v628_v44 }
 0x1b9   : > { %v394_v35 = vmul.f32 %v530_v11, %v387_v30 }
 0x1ba   : > { %v392_v36 = vmul.f32 %v530_v11, %v385_v32 }
 0x1bb   : > { %v401_v39 = vadd.f32 %v531_v16, %v394_v35 }
 0x1bc   : > { %v399_v37 = vadd.f32 %v531_v16, %v392_v36 }
 0x1bd   : > { %405 = vst.msk [vmem:[%s199_s19 + $0x18] sm:$0xff] %vm292_vm0, %v401_v39 }
 0x1be   : > { %403 = vst.msk [vmem:[%s199_s19 + $0x8] sm:$0xff] %vm292_vm0, %v399_v37 }
 0x1bf PF: > { %s14_s15 = sadd.s32 1, %s548_s15  }
 0x1c0   : > { %p11_p4 = scmp.ge.s32.totalorder %s14_s15, 4  }
 0x1c2   :  { %13 = sbr.rel (!%p11_p4) target bundleno = 1 (0x1), region = 66 }

// kernel: _lambda_.11
= control target key start
LH: loop header
LB: loop body
LE: loop exit
PB: predicated region body
PF: predicated region fallthrough
CT: control target
= control target key end

     0   :  { %8 = vsyncpa [#allocation3], 0  ;;  %s650_s0 = inlined_call_operand.vmem [shape: f32[64,64], index: 0, kind: input, shape index: {}]   ;;  %s651_s1 = inlined_call_operand.vmem [shape: f32[1,64], index: 1, kind: input, shape index: {}]   ;;  %s652_s2 = inlined_call_operand.vmem [shape: f32[1,64], index: 2, kind: input, shape index: {}]   ;;  %s653_s3 = inlined_call_operand.hbm [shape: f32[64,64], index: 3, kind: output, shape index: {}]  }
   0x1   :  { %10 = vsyncpa [#allocation3 + $0x1], 0  ;;  %s524_s12 = smov 0   ;;  %s526_s13 = smov 0  }
   0x2   :  { %s528_s14 = smov 0   ;;  %s530_s15 = smov 0  }
   0x3 LB: > { %s545_s16 = sadd.s32 4294967295, %s499_s15   ;;  %s370_s17 = sadd.s32 4294967294, %s499_s15   ;;  %s499_s15 = sphi %s530_s15, %s659_s15   ;;  %s495_s14 = sphi %s528_s14, %s658_s14   ;;  %s491_s13 = sphi %s526_s13, %s657_s13   ;;  %s487_s12 = sphi %s524_s12, %s656_s12  }
   0x4   : > { %s549_s18 = sadd.s32 1, %s499_s15   ;;  %s91_s19 = sadd.s32 1, %s495_s14 }
   0x5   : > { %s88_s20 = ssub.s32 %s499_s15, %s549_s18  ;;  %p101_p0 = scmp.ne.s32.totalorder %s495_s14, %s491_s13 }
   0x6   : > { %p89_p1 = scmp.eq.s32.totalorder %s88_s20, 0  ;;  %p102_p2 = scmp.eq.s32.totalorder %s545_s16, 1 }
   0x7   : > { %p107_p3 = scmp.ne.s32.totalorder %s491_s13, %s487_s12  ;;  %p108_p4 = scmp.eq.s32.totalorder %s370_s17, 1 }
   0x8   : > { %s560_s21 = scalar_select %p89_p1, %s495_s14, %s91_s19  }
   0x9   : > { %p562_p5 = por %p102_p2, %p101_p0  ;;  %p566_p6 = por %p108_p4, %p107_p3 }
   0xa   : > { %p373_p7 = scmp.ge.s32.totalorder %s499_s15, 1  ;;  %p141_p8 = scmp.lt.s32.totalorder %s499_s15, 3 }
   0xc   : > { %p142_p9 = pnand %p373_p7, %p141_p8 }
   0xd   : > { %s375_s24 = sshll.u32 (!%p142_p9), %s545_s16, 2  ;;  %s162_s29 = sand.u32 (!%p142_p9), 1, %s491_s13  }
   0xe   : > { %145 = sbr.rel (%p142_p9) target bundleno = 304 (0x130), region = 32  ;;  %p166_p10 = scmp.lt.s32.totalorder (!%p142_p9), %s375_s24, 7 }
   0xf   : > { %s374_s7 = sshll.u32 (!%p142_p9), %s162_s29, 5  ;;  %s382_s8 = sshll.u32 (!%p142_p9), %s545_s16, 5 }
  0x10   : > { %s164_s9 = scalar_lea.vmem (!%p142_p9), [#allocation2], %s374_s7  ;;  %s304_s17 = scalar_lea.hbm (!%p142_p9), %s653_s3, %s382_s8 }
  0x11   : > { %s305_s16 = sshll.u32 (!%p142_p9), %s164_s9, 4  ;;  %s307_s19 = sshll.u32 (!%p142_p9), %s304_s17, 4  ;;  %s306_s16 = int_to_ptr.vmem [resolvable:$true] %s305_s16  ;;  %s308_s19 = int_to_ptr.hbm [resolvable:$true] %s307_s19 }
  0x12   : > { %s293_s20 = scalar_lea.sflag (!%p142_p9), [#allocation3], %s162_s29 }
  0x13   : > { %s661_s24 = smov (!%p166_p10, %s375_s24), 7  ;;  %vm178_vm0 = vcmask 523264   ;;  %v501_v8 = vmov 64.0   ;;  %v425_v61 = vld [vmem:[%s651_s1] ss:$0 sm:$0xff] }
  0x14   : > { %s376_s25 = sshll.u32 %s661_s24, 3  ;;  %427 = vrcp.f32 %v501_v8  ;;  %s451_s24 = sshra.s32 %s308_s19, 4  ;;  %s452_s24 = int_to_ptr.hbm [resolvable:$true] %s451_s24 }
  0x15   : > { %s169_s28 = scalar_lea.vmem %s650_s0, %s376_s25  ;;  %s453_s25 = scalar_lea.hbm %s452_s24, 32 }
  0x16   : > { %v174_v0 = vld [vmem:[%s169_s28 + $0x10] sm:$0xff]  ;;  %v172_v1 = vld [vmem:[%s169_s28] sm:$0xff]  ;;  %v175_v4 = vld [vmem:[%s169_s28 + $0x18] sm:$0xff]  ;;  %p454_p11 = scmp.ne.s32.totalorder %s452_s24, %s453_s25  ;;  %p458_p0 = scmp.lt.s32.totalorder %s452_s24, %s653_s3 }
  0x17   : > { %v185_v2 = vsel %vm178_vm0, %v174_v0, 0.0  ;;  %v179_v3 = vsel %vm178_vm0, %v172_v1, 0.0  ;;  %v173_v5 = vld [vmem:[%s169_s28 + $0x8] sm:$0xff]  ;;  %v188_v6 = vsel %vm178_vm0, %v175_v4, 0.0  ;;  %s457_s28 = scalar_lea.hbm %s653_s3, 64 }
  0x18   : > { %186 = vadd.xlane.f32.xlu1 %v185_v2  ;;  %180 = vadd.xlane.f32.xlu0 %v179_v3  ;;  %v182_v7 = vsel %vm178_vm0, %v173_v5, 0.0  ;;  %v426_v2 = vld [vmem:[%s652_s2] ss:$0 sm:$0xff]  ;;  %p455_p12 = pnand %p454_p11, %p562_p5  ;;  %p459_p1 = scmp.lt.s32.totalorder %s457_s28, %s453_s25 }
  0x1a   : > { %v428_v9 = vpop.eup %427  ;;  %p456_p13 = pneg %p455_p12  ;;  %p460_p2 = por %p459_p1, %p458_p0 }
  0x1b   : > { %v192_v10 = vmul.f32 64.0, %v428_v9  ;;  %vm196_vm1 = vweird.f32 %v428_v9 }
  0x1c   : > { %p461_p3 = pnand %p460_p2, %p456_p13 }
  0x1d   : > { %v193_v11 = vsub.f32 1.0, %v192_v10 }
  0x1f   : > { %v194_v12 = vmul.f32 %v428_v9, %v193_v11 }
  0x20   : > { %189 = vadd.xlane.f32.xlu1 %v188_v6  ;;  %183 = vadd.xlane.f32.xlu0 %v182_v7 }
  0x21   : > { %v195_v13 = vadd.f32 %v428_v9, %v194_v12 }
  0x23   : > { %v197_v14 = vsel %vm196_vm1, %v428_v9, %v195_v13 }
  0x8b   : > { %v187_v15 = vpop.xlane.xlu1 %186  ;;  %v181_v16 = vpop.xlane.xlu0 %180 }
  0x8c   : > { %v200_v17 = vmul.f32 %v197_v14, %v187_v15  ;;  %v198_v18 = vmul.f32 %v197_v14, %v181_v16 }
  0x8e   : > { %v580_v19 = vsub.f32 %v174_v0, %v200_v17  ;;  %v582_v20 = vsub.f32 %v172_v1, %v198_v18 }
  0x90   : > { %v208_v21 = vmul.f32 %v580_v19, %v580_v19  ;;  %v206_v22 = vmul.f32 %v582_v20, %v582_v20 }
  0x92   : > { %v216_v23 = vsel %vm178_vm0, %v208_v21, 0.0  ;;  %v210_v24 = vsel %vm178_vm0, %v206_v22, 0.0 }
  0x93   : > { %v190_v25 = vpop.xlane.xlu1 %189  ;;  %217 = vadd.xlane.f32.xlu0 %v216_v23  ;;  %211 = vadd.xlane.f32.xlu2 %v210_v24  ;;  %v184_v26 = vpop.xlane.xlu0 %183 }
  0x94   : > { %v201_v27 = vmul.f32 %v197_v14, %v190_v25  ;;  %v199_v28 = vmul.f32 %v197_v14, %v184_v26 }
  0x96   : > { %v590_v29 = vsub.f32 %v175_v4, %v201_v27  ;;  %v592_v30 = vsub.f32 %v173_v5, %v199_v28 }
  0x98   : > { %v209_v31 = vmul.f32 %v590_v29, %v590_v29  ;;  %v207_v32 = vmul.f32 %v592_v30, %v592_v30 }
  0x9a   : > { %v219_v33 = vsel %vm178_vm0, %v209_v31, 0.0  ;;  %v213_v34 = vsel %vm178_vm0, %v207_v32, 0.0 }
  0x9b   : > { %220 = vadd.xlane.f32.xlu1 %v219_v33  ;;  %214 = vadd.xlane.f32.xlu2 %v213_v34 }
 0x106   : > { %v212_v35 = vpop.xlane.xlu2 %211  ;;  %v218_v36 = vpop.xlane.xlu0 %217 }
 0x107   : > { %v222_v37 = vmul.f32 %v212_v35, %v197_v14  ;;  %v224_v38 = vmul.f32 %v218_v36, %v197_v14 }
 0x109   : > { %v226_v39 = vadd.f32 1e-05, %v222_v37  ;;  %v228_v40 = vadd.f32 1e-05, %v224_v38 }
 0x10b   : > { %429 = vrsqrt.f32 %v226_v39  ;;  %vm236_vm4 = vweird.f32 %v226_v39  ;;  %vm256_vm6 = vweird.f32 %v228_v40 }
 0x10c   : > { %431 = vrsqrt.f32 %v228_v40 }
 0x10e   : > { %v221_v41 = vpop.xlane.xlu1 %220  ;;  %v215_v42 = vpop.xlane.xlu2 %214 }
 0x10f   : > { %v225_v43 = vmul.f32 %v221_v41, %v197_v14  ;;  %v223_v44 = vmul.f32 %v215_v42, %v197_v14 }
 0x111   : > { %v430_v45 = vpop.eup %429  ;;  %v229_v46 = vadd.f32 1e-05, %v225_v43  ;;  %v227_v47 = vadd.f32 1e-05, %v223_v44 }
 0x112   : > { %v432_v48 = vpop.eup %431  ;;  %v231_v49 = vmul.f32 %v430_v45, %v226_v39  ;;  %vm237_vm2 = vweird.f32 %v430_v45 }
 0x113   : > { %v251_v50 = vmul.f32 %v432_v48, %v228_v40  ;;  %433 = vrsqrt.f32 %v229_v46  ;;  %vm257_vm3 = vweird.f32 %v432_v48  ;;  %vm238_vm5 = vmor %vm236_vm4, %vm237_vm2  ;;  %vm266_vm10 = vweird.f32 %v229_v46 }
 0x114   : > { %v232_v51 = vmul.f32 %v430_v45, %v231_v49  ;;  %435 = vrsqrt.f32 %v227_v47  ;;  %vm258_vm7 = vmor %vm256_vm6, %vm257_vm3  ;;  %vm246_vm12 = vweird.f32 %v227_v47 }
 0x115   : > { %v252_v52 = vmul.f32 %v432_v48, %v251_v50 }
 0x116   : > { %v233_v53 = vmul.f32 0.5, %v232_v51 }
 0x117   : > { %v253_v54 = vmul.f32 0.5, %v252_v52 }
 0x118   : > { %v234_v55 = vsub.f32 1.5, %v233_v53 }
 0x119   : > { %v434_v56 = vpop.eup %433  ;;  %v254_v57 = vsub.f32 1.5, %v253_v54 }
 0x11a   : > { %v436_v58 = vpop.eup %435  ;;  %v235_v59 = vmul.f32 %v430_v45, %v234_v55  ;;  %v261_v60 = vmul.f32 %v434_v56, %v229_v46  ;;  %vm267_vm8 = vweird.f32 %v434_v56 }
 0x11b   : > { %v255_v62 = vmul.f32 %v432_v48, %v254_v57  ;;  %v241_v63 = vmul.f32 %v436_v58, %v227_v47  ;;  %vm247_vm9 = vweird.f32 %v436_v58  ;;  %vm268_vm11 = vmor %vm266_vm10, %vm267_vm8 }
 0x11c   : > { %v239_v0 = vsel %vm238_vm5, %v430_v45, %v235_v59  ;;  %v262_v1 = vmul.f32 %v434_v56, %v261_v60  ;;  %vm248_vm13 = vmor %vm246_vm12, %vm247_vm9 }
 0x11d   : > { %v270_v3 = vmul.f32 %v239_v0, %v582_v20  ;;  %v259_v4 = vsel %vm258_vm7, %v432_v48, %v255_v62  ;;  %v242_v5 = vmul.f32 %v436_v58, %v241_v63 }
 0x11e   : > { %v272_v6 = vmul.f32 %v259_v4, %v580_v19  ;;  %v263_v7 = vmul.f32 0.5, %v262_v1 }
 0x11f   : > { %v277_v8 = vmul.f32 %v425_v61, %v270_v3  ;;  %v243_v9 = vmul.f32 0.5, %v242_v5 }
 0x120   : > { %v279_v10 = vmul.f32 %v425_v61, %v272_v6  ;;  %v264_v11 = vsub.f32 1.5, %v263_v7 }
 0x121   : > { %v284_v12 = vadd.f32 %v426_v2, %v277_v8  ;;  %v244_v13 = vsub.f32 1.5, %v243_v9 }
 0x122   : > { %v286_v14 = vadd.f32 %v426_v2, %v279_v10  ;;  %v265_v15 = vmul.f32 %v434_v56, %v264_v11 }
 0x123   : > { %288 = vst.msk [vmem:[%s164_s9] sm:$0xff] %vm178_vm0, %v284_v12  ;;  %v245_v16 = vmul.f32 %v436_v58, %v244_v13 }
 0x124   : > { %290 = vst.msk [vmem:[%s164_s9 + $0x10] sm:$0xff] %vm178_vm0, %v286_v14  ;;  %v269_v17 = vsel %vm268_vm11, %v434_v56, %v265_v15 }
 0x125   : > { %v273_v18 = vmul.f32 %v269_v17, %v590_v29  ;;  %v249_v19 = vsel %vm248_vm13, %v436_v58, %v245_v16 }
 0x126   : > { %v271_v20 = vmul.f32 %v249_v19, %v592_v30 }
 0x127   : > { %v280_v21 = vmul.f32 %v425_v61, %v273_v18 }
 0x128   : > { %v278_v22 = vmul.f32 %v425_v61, %v271_v20 }
 0x129   : > { %v287_v23 = vadd.f32 %v426_v2, %v280_v21 }
 0x12a   : > { %v285_v24 = vadd.f32 %v426_v2, %v278_v22 }
 0x12b   : > { %291 = vst.msk [vmem:[%s164_s9 + $0x18] sm:$0xff] %vm178_vm0, %v287_v23 }
 0x12c   : > { %289 = vst.msk [vmem:[%s164_s9 + $0x8] sm:$0xff] %vm178_vm0, %v285_v24 }
 0x12d   : > { %464 = shalt.err (!%p461_p3)
}
 0x12e   : > { %s502_s29 = smov 128   ;;  %s503_s5 = smov 8  }
 0x12f   : > { %383 = dma.vmem_to_hbm [thread:$0]  (%p562_p5), %s306_s16, 512, %s308_s19, %s293_s20, %s502_s29, %s502_s29, %s503_s5  }
 0x130 PF: > { %p389_p4 = scmp.ge.s32.totalorder %s499_s15, 2  ;;  %s322_s6 = sand.u32 1, %s487_s12  }
 0x131   : > { %s323_s7 = scalar_lea.sflag [#allocation3], %s322_s6 }
 0x132   : > { %p386_p7 = pnand %p389_p4, %p566_p6 }
 0x134   : > { %p387_p8 = pneg %p386_p7 }
 0x136   : > { %482 = dma.done.wait (%p387_p8), %s323_s7, 512  }
 0x137   : > { %484 = vsyncadd (%p387_p8), %s323_s7, 4294966784  ;;  %p13_p9 = scmp.ge.s32.totalorder %s549_s18, 4   ;;  %s656_s12 = smov %s491_s13 }
 0x138   : > { %s657_s13 = smov %s495_s14  ;;  %s658_s14 = smov %s560_s21 }
 0x139   : > { %s659_s15 = smov %s549_s18  ;;  %15 = sbr.rel (!%p13_p9) target bundleno = 3 (0x3), region = 67 }
 0x13e   :  { %329 = vsyncpa [#allocation3], 1 }
 0x13f   :  { %331 = vsyncpa [#allocation3 + $0x1], 1 }

// kernel: _lambda_.10
= control target key start
LH: loop header
LB: loop body
LE: loop exit
PB: predicated region body
PF: predicated region fallthrough
CT: control target
= control target key end

     0   :  { %s2144_s29 = smov 0   ;;  %s2568_s0 = inlined_call_operand.vmem [shape: f32[64,64], index: 0, kind: input, shape index: {}]   ;;  %s2569_s1 = inlined_call_operand.vmem [shape: bf16[64,192], index: 1, kind: input, shape index: {}]   ;;  %s2570_s2 = inlined_call_operand.vmem [shape: f32[1,192], index: 2, kind: input, shape index: {}]   ;;  %s2571_s3 = inlined_call_operand.vmem [shape: f32[4,16,16], index: 3, kind: input, shape index: {}]   ;;  %s2572_s4 = inlined_call_operand.vmem [shape: bf16[64,64], index: 4, kind: input, shape index: {}]   ;;  %s2573_s5 = inlined_call_operand.vmem [shape: f32[1,64], index: 5, kind: input, shape index: {}, may-alias: {5,7,11,13}]   ;;  %s2574_s6 = inlined_call_operand.vmem [shape: f32[1,64], index: 6, kind: input, shape index: {}, may-alias: {6,12}]   ;;  %s2575_s7 = inlined_call_operand.vmem [shape: f32[1,64], index: 7, kind: input, shape index: {}, may-alias: {5,7,11,13}]   ;;  %s2576_s8 = inlined_call_operand.vmem [shape: bf16[64,256], index: 8, kind: input, shape index: {}]   ;;  %s2577_s9 = inlined_call_operand.vmem [shape: f32[1,256], index: 9, kind: input, shape index: {}]   ;;  %s2578_s10 = inlined_call_operand.vmem [shape: bf16[256,64], index: 10, kind: input, shape index: {}]   ;;  %s2579_s11 = inlined_call_operand.vmem [shape: f32[1,64], index: 11, kind: input, shape index: {}, may-alias: {5,7,11,13}]   ;;  %s2580_s12 = inlined_call_operand.vmem [shape: f32[1,64], index: 12, kind: input, shape index: {}, may-alias: {6,12}]   ;;  %s2581_s13 = inlined_call_operand.vmem [shape: f32[1,64], index: 13, kind: input, shape index: {}, may-alias: {5,7,11,13}]   ;;  %s2582_s14 = inlined_call_operand.vmem [shape: f32[64,64], index: 14, kind: output, shape index: {}]  }
   0x1 LB: > { %s1734_s30 = sadd.s32 4294967295, %s2059_s29   ;;  %p1738_p0 = scmp.ge.s32.totalorder %s2059_s29, 1  ;;  %s2059_s29 = sphi %s2144_s29, %s24_s29  }
   0x2   : > { %p413_p1 = scmp.lt.s32.totalorder %s2059_s29, 5 }
   0x4   : > { %p414_p2 = pnand %p1738_p0, %p413_p1 }
   0x5   : > { %s1739_s23 = sshll.u32 (!%p414_p2), %s1734_s30, 1  ;;  %s2061_s24 = smov (!%p414_p2), 64  }
   0x6   : > { %417 = sbr.rel (%p414_p2) target bundleno = 2759 (0xac7), region = 76  ;;  %p460_p3 = scmp.lt.s32.totalorder (!%p414_p2), %s1739_s23, 7 }
   0x7   : > { %s2062_s30 = smov (!%p414_p2), 48   ;;  %s2063_s16 = smov (!%p414_p2), 32  }
   0x8   : > { %s2064_s17 = smov (!%p414_p2), 112   ;;  %s2065_s21 = smov (!%p414_p2), 96  }
   0x9   : > { %s2066_s22 = smov (!%p414_p2), 80   ;;  %s2067_s27 = smov (!%p414_p2), 16  }
   0xb   : > { %v1769_v0 = vld [vmem:[%s2569_s1 + $0x30] sm:$0xf]  ;;  %v1918_v1 = vld [vmem:[%s2569_s1 + $0x34] sm:$0xf0]  ;;  %v1761_v2 = vld [vmem:[%s2569_s1 + $0x20] sm:$0xf] }
   0xc   : > { %v1770_v3 = vor.u32 %v1918_v1, %v1769_v0  ;;  %v1916_v4 = vld [vmem:[%s2569_s1 + $0x24] sm:$0xf0]  ;;  %v1753_v6 = vld [vmem:[%s2569_s1 + $0x10] sm:$0xf]  ;;  %v1914_v7 = vld [vmem:[%s2569_s1 + $0x14] sm:$0xf0] }
   0xd   : > { %v1762_v5 = vor.u32 %v1916_v4, %v1761_v2  ;;  %s2586_s23 = smov (!%p460_p3, %s1739_s23), 7  ;;  %v1754_v8 = vor.u32 %v1914_v7, %v1753_v6  ;;  %v1745_v9 = vld [vmem:[%s2569_s1] sm:$0xf]  ;;  %v1912_v10 = vld [vmem:[%s2569_s1 + $0x4] sm:$0xf0]  ;;  %vm529_vm0 = vcmask 523264  }
   0xe   : > { %537 = vmatpush.bf16.msra.mxu0 %v1770_v3  ;;  %s2583_s28 = sshll.u32 %s2586_s23, 3  ;;  %v1746_v11 = vor.u32 %v1912_v10, %v1745_v9  ;;  %v2195_v15 = vld [vmem:[%s2570_s2] sm:$0x3]  ;;  %vm563_vm1 = vcmask 130048   ;;  %s2584_s19 = sshll.u32 %s2586_s23, 3 }
   0xf   : > { %s2184_s20 = scalar_lea.vmem %s2568_s0, %s2583_s28  ;;  %v485_v16 = vperm.slane %v2195_v15, 0  ;;  %v659_v10 = vld [vmem:[%s2571_s3] sm:$0xff]  ;;  %s469_s25 = scalar_lea.vmem %s2582_s14, %s2584_s19 }
  0x10   : > { %v472_v12 = vld [vmem:[%s2184_s20] sm:$0xff]  ;;  %v473_v13 = vld [vmem:[%s2184_s20 + $0x8] sm:$0xff] }
  0x11   : > { %v2188_v14 = vpack.c.bf16 %v473_v13, %v472_v12 }
  0x12   : > { %538 = vmatpush.bf16.msra.mxu0 %v1762_v5 }
  0x16   : > { %539 = vmatpush.bf16.msra.mxu0 %v1754_v8 }
  0x1a   : > { %540 = vmatpush.bf16.msra.mxu0 %v1746_v11 }
  0x1d   : > { %1775 = vmatmul.msk.bf16.vlgmr.msra.gmra.mxu0 %vm529_vm0, %v2188_v14 }
  0x9a   : > { %v542_v17 = vpop.f32.mrf.mxu0 }
  0x9b   : > { %v2198_v18 = vadd.f32 %v542_v17, %v485_v16  ;;  %v660_v17 = vld [vmem:[%s2571_s3 + $0x8] sm:$0xff] }
  0x9d   : > { %v2202_v19 = vmul.f32 %v2198_v18, %v2198_v18 }
  0x9f   : > { %596 = vrot.lane.b32.xlu0 %v2202_v19, %s2061_s24  ;;  %v564_v20 = vsel %vm563_vm1, %v2202_v19, 0.0 }
  0xa0   : > { %565 = vadd.xlane.f32.xlu2 %v564_v20 }
  0xa2   : > { %v544_v21 = vpop.f32.mrf.mxu0 }
  0xa3   : > { %v2208_v22 = vadd.f32 %v544_v21, %v485_v16 }
  0xa5   : > { %v2212_v23 = vmul.f32 %v2208_v22, %v2208_v22 }
  0xa7   : > { %598 = vrot.lane.b32.xlu0 %v2212_v23, %s2061_s24  ;;  %v567_v24 = vsel %vm563_vm1, %v2212_v23, 0.0 }
  0xa8   : > { %568 = vadd.xlane.f32.xlu2 %v567_v24 }
 0x111   : > { %v597_v25 = vpop.permute.xlu0 %596 }
 0x112   : > { %v602_v26 = vsel %vm563_vm1, %v597_v25, 0.0  ;;  %v1917_v25 = vld [vmem:[%s2569_s1 + $0x34] sm:$0xf] }
 0x113   : > { %603 = vadd.xlane.f32.xlu1 %v602_v26  ;;  %v566_v50 = vpop.xlane.xlu2 %565  ;;  %v1771_v26 = vld [vmem:[%s2569_s1 + $0x38] sm:$0xf0] }
 0x114   : > { %v570_v53 = vadd.f32 1e-12, %v566_v50 }
 0x116   : > { %vm578_vm12 = vweird.f32 %v570_v53 }
 0x119   : > { %v599_v27 = vpop.permute.xlu0 %598 }
 0x11a   : > { %v605_v28 = vsel %vm563_vm1, %v599_v27, 0.0  ;;  %v1915_v27 = vld [vmem:[%s2569_s1 + $0x24] sm:$0xf] }
 0x11b   : > { %606 = vadd.xlane.f32.xlu1 %v605_v28  ;;  %v569_v51 = vpop.xlane.xlu2 %568  ;;  %v1774_v28 = vor.u32 %v1917_v25, %v1771_v26 }
 0x11c   : > { %v571_v52 = vadd.f32 1e-12, %v569_v51 }
 0x11d   : > { %551 = vmatpush.bf16.msra.mxu1 %v1774_v28 }
 0x11e   : > { %vm588_vm10 = vweird.f32 %v571_v52 }
 0x186   : > { %v604_v29 = vpop.xlane.xlu1 %603 }
 0x187   : > { %v608_v30 = vadd.f32 1e-12, %v604_v29  ;;  %v1763_v29 = vld [vmem:[%s2569_s1 + $0x28] sm:$0xf0] }
 0x189   : > { %1969 = vrsqrt.f32 %v608_v30  ;;  %vm616_vm3 = vweird.f32 %v608_v30 }
 0x18e   : > { %v607_v31 = vpop.xlane.xlu1 %606 }
 0x18f   : > { %v1970_v32 = vpop.eup %1969  ;;  %v609_v33 = vadd.f32 1e-12, %v607_v31  ;;  %v1913_v31 = vld [vmem:[%s2569_s1 + $0x14] sm:$0xf] }
 0x190   : > { %v611_v34 = vmul.f32 %v1970_v32, %v608_v30  ;;  %vm617_vm2 = vweird.f32 %v1970_v32  ;;  %v1766_v30 = vor.u32 %v1915_v27, %v1763_v29 }
 0x191   : > { %1971 = vrsqrt.f32 %v609_v33  ;;  %vm618_vm5 = vmor %vm616_vm3, %vm617_vm2  ;;  %vm626_vm6 = vweird.f32 %v609_v33 }
 0x192   : > { %v612_v35 = vmul.f32 %v1970_v32, %v611_v34  ;;  %1973 = vrsqrt.f32 %v571_v52  ;;  %552 = vmatpush.bf16.msra.mxu1 %v1766_v30  ;;  %v1911_v34 = vld [vmem:[%s2569_s1 + $0x4] sm:$0xf] }
 0x193   : > { %1975 = vrsqrt.f32 %v570_v53 }
 0x194   : > { %v613_v36 = vmul.f32 0.5, %v612_v35  ;;  %v1747_v35 = vld [vmem:[%s2569_s1 + $0x8] sm:$0xf0] }
 0x196   : > { %v614_v38 = vsub.f32 1.5, %v613_v36  ;;  %v1750_v36 = vor.u32 %v1911_v34, %v1747_v35 }
 0x197   : > { %v1972_v37 = vpop.eup %1971 }
 0x198   : > { %v621_v39 = vmul.f32 %v1972_v37, %v609_v33  ;;  %v615_v41 = vmul.f32 %v1970_v32, %v614_v38  ;;  %vm627_vm4 = vweird.f32 %v1972_v37  ;;  %v1974_v54 = vpop.eup %1973 }
 0x199   : > { %vm628_vm7 = vmor %vm626_vm6, %vm627_vm4  ;;  %v1976_v55 = vpop.eup %1975  ;;  %v583_v56 = vmul.f32 %v1974_v54, %v571_v52  ;;  %vm589_vm8 = vweird.f32 %v1974_v54 }
 0x19a   : > { %v622_v40 = vmul.f32 %v1972_v37, %v621_v39  ;;  %v619_v45 = vsel %vm618_vm5, %v1970_v32, %v615_v41  ;;  %v573_v57 = vmul.f32 %v1976_v55, %v570_v53  ;;  %vm579_vm9 = vweird.f32 %v1976_v55  ;;  %vm590_vm11 = vmor %vm588_vm10, %vm589_vm8  ;;  %v1755_v32 = vld [vmem:[%s2569_s1 + $0x18] sm:$0xf0] }
 0x19b   : > { %v630_v47 = vmul.f32 %v619_v45, %v2198_v18  ;;  %v584_v58 = vmul.f32 %v1974_v54, %v583_v56  ;;  %vm580_vm13 = vmor %vm578_vm12, %vm579_vm9  ;;  %v1758_v33 = vor.u32 %v1913_v31, %v1755_v32 }
 0x19c   : > { %v623_v42 = vmul.f32 0.5, %v622_v40  ;;  %v574_v59 = vmul.f32 %v1976_v55, %v573_v57 }
 0x19d   : > { %v585_v60 = vmul.f32 0.5, %v584_v58  ;;  %553 = vmatpush.bf16.msra.mxu1 %v1758_v33 }
 0x19e   : > { %v624_v43 = vsub.f32 1.5, %v623_v42  ;;  %v575_v61 = vmul.f32 0.5, %v574_v59 }
 0x19f   : > { %v586_v62 = vsub.f32 1.5, %v585_v60 }
 0x1a0   : > { %v625_v44 = vmul.f32 %v1972_v37, %v624_v43  ;;  %v576_v63 = vsub.f32 1.5, %v575_v61 }
 0x1a1   : > { %v587_v0 = vmul.f32 %v1974_v54, %v586_v62  ;;  %554 = vmatpush.bf16.msra.mxu1 %v1750_v36 }
 0x1a2   : > { %v629_v46 = vsel %vm628_vm7, %v1972_v37, %v625_v44  ;;  %v577_v1 = vmul.f32 %v1976_v55, %v576_v63 }
 0x1a3   : > { %v631_v48 = vmul.f32 %v629_v46, %v2208_v22  ;;  %v591_v2 = vsel %vm590_vm11, %v1974_v54, %v587_v0 }
 0x1a4   : > { %v581_v5 = vsel %vm580_vm13, %v1976_v55, %v577_v1  ;;  %v593_v6 = vmul.f32 %v591_v2, %v2208_v22  ;;  %1776 = vmatmul.msk.bf16.vlgmr.msra.gmra.mxu1 %vm529_vm0, %v2188_v14 }
 0x1a5   : > { %v633_v49 = vpack.c.bf16 %v631_v48, %v630_v47  ;;  %v592_v7 = vmul.f32 %v581_v5, %v2198_v18 }
 0x1a7   : > { %635 = vrot.lane.b32.xlu0 %v633_v49, %s2061_s24  ;;  %v632_v8 = vpack.c.bf16 %v593_v6, %v592_v7 }
 0x219   : > { %v636_v3 = vpop.permute.xlu0 %635 }
 0x21a   : > { %v641_v4 = vsel %vm563_vm1, %v636_v3, 0 }
 0x21b   : > { %650 = vmatpush.bf16.xpose.msrb.mxu0 %v641_v4 }
 0x221   : > { %v556_v55 = vpop.f32.mrf.mxu1 }
 0x222   : > { %1777 = vmatmul.msk.bf16.vlgmr.msrb.gmra.mxu0 %vm563_vm1, %v632_v8 }
 0x229   : > { %v558_v59 = vpop.f32.mrf.mxu1 }
 0x29f   : > { %v652_v9 = vpop.f32.mrf.mxu0 }
 0x2a0   : > { %v657_v11 = vmul.f32 10.0, %v652_v9 }
 0x2a2   : > { %v661_v12 = vadd.f32 %v659_v10, %v657_v11 }
 0x2a4   : > { %v663_v13 = vsel %vm563_vm1, %v661_v12, -inf }
 0x2a5   : > { %664 = vmax.xlane.f32.xlu1 %v663_v13 }
 0x2a7   : > { %v654_v16 = vpop.f32.mrf.mxu0 }
 0x2a8   : > { %v658_v20 = vmul.f32 10.0, %v654_v16 }
 0x2aa   : > { %v662_v21 = vadd.f32 %v660_v17, %v658_v20 }
 0x2ac   : > { %v666_v24 = vsel %vm563_vm1, %v662_v21, -inf }
 0x2ad   : > { %667 = vmax.xlane.f32.xlu2 %v666_v24 }
 0x2be   : > { %745 = vrot.lane.b32.xlu1 %v2212_v23, %s2062_s30 }
 0x2c5   : > { %743 = vrot.lane.b32.xlu2 %v2202_v19, %s2062_s30 }
 0x2c6   : > { %943 = vrot.lane.b32.xlu1 %v2202_v19, %s2063_s16 }
 0x2cd   : > { %707 = vrot.lane.b32.xlu2 %v2202_v19, %s2064_s17 }
 0x2d5   : > { %709 = vrot.lane.b32.xlu2 %v2212_v23, %s2064_s17 }
 0x2dd   : > { %945 = vrot.lane.b32.xlu2 %v2212_v23, %s2063_s16 }
 0x2e5   : > { %907 = vrot.lane.b32.xlu2 %v2202_v19, %s2065_s21 }
 0x2ed   : > { %1085 = vrot.lane.b32.xlu2 %v2202_v19, %s2066_s22 }
 0x318   : > { %v665_v37 = vpop.xlane.xlu1 %664 }
 0x319   : > { %v669_v38 = vsub.f32 %v661_v12, %v665_v37 }
 0x31b   : > { %v671_v39 = vmul.f32 1.442695, %v669_v38 }
 0x31d   : > { %1977 = vpow2.f32 %v671_v39 }
 0x320   : > { %v668_v40 = vpop.xlane.xlu2 %667 }
 0x321   : > { %v670_v41 = vsub.f32 %v662_v21, %v668_v40 }
 0x323   : > { %v1978_v42 = vpop.eup %1977  ;;  %v673_v43 = vmul.f32 1.442695, %v670_v41 }
 0x324   : > { %v675_v44 = vsel %vm563_vm1, %v1978_v42, 0.0 }
 0x325   : > { %1979 = vpow2.f32 %v673_v43  ;;  %676 = vadd.xlane.f32.xlu0 %v675_v44 }
 0x328   : > { %v744_v50 = vpop.permute.xlu2 %743 }
 0x329   : > { %v749_v52 = vsel %vm563_vm1, %v744_v50, 0.0 }
 0x32b   : > { %v1980_v45 = vpop.eup %1979 }
 0x32c   : > { %v678_v46 = vsel %vm563_vm1, %v1980_v45, 0.0 }
 0x32d   : > { %679 = vadd.xlane.f32.xlu1 %v678_v46 }
 0x330   : > { %v746_v47 = vpop.permute.xlu1 %745  ;;  %v708_v51 = vpop.permute.xlu2 %707 }
 0x331   : > { %v752_v48 = vsel %vm563_vm1, %v746_v47, 0.0  ;;  %v713_v56 = vsel %vm563_vm1, %v708_v51, 0.0 }
 0x332   : > { %753 = vadd.xlane.f32.xlu2 %v752_v48 }
 0x338   : > { %v944_v14 = vpop.permute.xlu1 %943  ;;  %v710_v53 = vpop.permute.xlu2 %709 }
 0x339   : > { %1123 = vrot.lane.b32.xlu0 %v2212_v23, %s2067_s27  ;;  %v949_v49 = vsel %vm563_vm1, %v944_v14, 0.0  ;;  %v716_v54 = vsel %vm563_vm1, %v710_v53, 0.0 }
 0x33a   : > { %950 = vadd.xlane.f32.xlu2 %v949_v49 }
 0x340   : > { %v946_v57 = vpop.permute.xlu2 %945 }
 0x346   : > { %1121 = vrot.lane.b32.xlu1 %v2202_v19, %s2067_s27  ;;  %v486_v19 = vperm.slane %v2195_v15, 1 }
 0x348   : > { %v557_v58 = vadd.f32 %v556_v55, %v486_v19  ;;  %v559_v60 = vadd.f32 %v558_v59, %v486_v19  ;;  %v908_v62 = vpop.permute.xlu2 %907 }
 0x349   : > { %v913_v63 = vsel %vm563_vm1, %v908_v62, 0.0 }
 0x34a   : > { %v2294_v61 = vpack.c.bf16 %v559_v60, %v557_v58 }
 0x34c   : > { %697 = vmatpush.bf16.msrb.mxu1 %v2294_v61 }
 0x34e   : > { %909 = vrot.lane.b32.xlu1 %v2212_v23, %s2065_s21 }
 0x350   : > { %v1086_v8 = vpop.permute.xlu2 %1085 }
 0x351   : > { %v1091_v9 = vsel %vm563_vm1, %v1086_v8, 0.0 }
 0x356   : > { %1087 = vrot.lane.b32.xlu1 %v2212_v23, %s2066_s22  ;;  %v952_v23 = vsel %vm563_vm1, %v946_v57, 0.0 }
 0x363   : > { %750 = vadd.xlane.f32.xlu0 %v749_v52 }
 0x36b   : > { %717 = vadd.xlane.f32.xlu0 %v716_v54 }
 0x380   : > { %714 = vadd.xlane.f32.xlu1 %v713_v56 }
 0x388   : > { %953 = vadd.xlane.f32.xlu1 %v952_v23 }
 0x390   : > { %914 = vadd.xlane.f32.xlu1 %v913_v63 }
 0x398   : > { %v677_v0 = vpop.xlane.xlu0 %676 }
 0x399   : > { %1981 = vrcp.f32 %v677_v0 }
 0x39f   : > { %v1982_v15 = vpop.eup %1981 }
 0x3a0   : > { %v680_v1 = vpop.xlane.xlu1 %679  ;;  %v683_v3 = vmul.f32 %v1982_v15, %v1978_v42 }
 0x3a1   : > { %1983 = vrcp.f32 %v680_v1 }
 0x3a5   : > { %v754_v16 = vpop.xlane.xlu2 %753 }
 0x3a6   : > { %v756_v17 = vadd.f32 1e-12, %v754_v16 }
 0x3a7   : > { %v1984_v2 = vpop.eup %1983 }
 0x3a8   : > { %v684_v4 = vmul.f32 %v1984_v2, %v1980_v45  ;;  %1985 = vrsqrt.f32 %v756_v17  ;;  %vm773_vm15 = vweird.f32 %v756_v17 }
 0x3aa   : > { %v685_v5 = vpack.c.bf16 %v684_v4, %v683_v3 }
 0x3ab   : > { %v1124_v6 = vpop.permute.xlu0 %1123 }
 0x3ac   : > { %1778 = vmatmul.msk.bf16.vlgmr.msrb.gmra.mxu1 %vm563_vm1, %v685_v5  ;;  %v1130_v7 = vsel %vm563_vm1, %v1124_v6, 0.0 }
 0x3ad   : > { %1131 = vadd.xlane.f32.xlu2 %v1130_v7  ;;  %v951_v39 = vpop.xlane.xlu2 %950 }
 0x3ae   : > { %v1986_v24 = vpop.eup %1985  ;;  %v955_v43 = vadd.f32 1e-12, %v951_v39 }
 0x3af   : > { %v768_v25 = vmul.f32 %v1986_v24, %v756_v17  ;;  %vm774_vm14 = vweird.f32 %v1986_v24  ;;  %v1919_v17 = vld [vmem:[%s2572_s4] sm:$0xff] }
 0x3b0   : > { %vm775_vm3 = vmor %vm773_vm15, %vm774_vm14  ;;  %vm963_vm13 = vweird.f32 %v955_v43  ;;  %900 = vmatpush.bf16.msra.mxu1 %v1919_v17 }
 0x3b1   : > { %v769_v28 = vmul.f32 %v1986_v24, %v768_v25 }
 0x3b3   : > { %v770_v29 = vmul.f32 0.5, %v769_v28 }
 0x3b5   : > { %1092 = vadd.xlane.f32.xlu2 %v1091_v9  ;;  %v771_v31 = vsub.f32 1.5, %v770_v29 }
 0x3b7   : > { %v772_v35 = vmul.f32 %v1986_v24, %v771_v31 }
 0x3b8   : > { %v1122_v10 = vpop.permute.xlu1 %1121 }
 0x3b9   : > { %v1127_v11 = vsel %vm563_vm1, %v1122_v10, 0.0  ;;  %v776_v41 = vsel %vm775_vm3, %v1986_v24, %v772_v35 }
 0x3ba   : > { %1128 = vadd.xlane.f32.xlu0 %v1127_v11  ;;  %v778_v45 = vmul.f32 %v776_v41, %v2208_v22 }
 0x3c0   : > { %v910_v12 = vpop.permute.xlu1 %909 }
 0x3c1   : > { %v916_v13 = vsel %vm563_vm1, %v910_v12, 0.0 }
 0x3c2   : > { %917 = vadd.xlane.f32.xlu0 %v916_v13 }
 0x3c8   : > { %v1088_v20 = vpop.permute.xlu1 %1087 }
 0x3c9   : > { %v1094_v21 = vsel %vm563_vm1, %v1088_v20, 0.0 }
 0x3ca   : > { %1095 = vadd.xlane.f32.xlu1 %v1094_v21 }
 0x3d6   : > { %v751_v26 = vpop.xlane.xlu0 %750 }
 0x3d7   : > { %v755_v27 = vadd.f32 1e-12, %v751_v26 }
 0x3d9   : > { %1987 = vrsqrt.f32 %v755_v27  ;;  %vm763_vm4 = vweird.f32 %v755_v27 }
 0x3de   : > { %v718_v33 = vpop.xlane.xlu0 %717 }
 0x3df   : > { %v1988_v30 = vpop.eup %1987  ;;  %v720_v37 = vadd.f32 1e-12, %v718_v33 }
 0x3e0   : > { %v758_v32 = vmul.f32 %v1988_v30, %v755_v27  ;;  %vm764_vm2 = vweird.f32 %v1988_v30 }
 0x3e1   : > { %1989 = vrsqrt.f32 %v720_v37  ;;  %vm765_vm5 = vmor %vm763_vm4, %vm764_vm2  ;;  %vm737_vm7 = vweird.f32 %v720_v37 }
 0x3e2   : > { %v759_v34 = vmul.f32 %v1988_v30, %v758_v32  ;;  %1991 = vrsqrt.f32 %v955_v43 }
 0x3e4   : > { %v760_v36 = vmul.f32 0.5, %v759_v34 }
 0x3e6   : > { %v761_v38 = vsub.f32 1.5, %v760_v36 }
 0x3e7   : > { %v1990_v47 = vpop.eup %1989 }
 0x3e8   : > { %v762_v40 = vmul.f32 %v1988_v30, %v761_v38  ;;  %v732_v48 = vmul.f32 %v1990_v47, %v720_v37  ;;  %v1992_v50 = vpop.eup %1991  ;;  %vm738_vm6 = vweird.f32 %v1990_v47 }
 0x3e9   : > { %v958_v52 = vmul.f32 %v1992_v50, %v955_v43  ;;  %vm739_vm9 = vmor %vm737_vm7, %vm738_vm6  ;;  %vm964_vm12 = vweird.f32 %v1992_v50 }
 0x3ea   : > { %v766_v42 = vsel %vm765_vm5, %v1988_v30, %v762_v40  ;;  %v733_v51 = vmul.f32 %v1990_v47, %v732_v48  ;;  %vm965_vm15 = vmor %vm963_vm13, %vm964_vm12 }
 0x3eb   : > { %v777_v44 = vmul.f32 %v766_v42, %v2198_v18  ;;  %v959_v56 = vmul.f32 %v1992_v50, %v958_v52 }
 0x3ec   : > { %v734_v53 = vmul.f32 0.5, %v733_v51 }
 0x3ed   : > { %v780_v46 = vpack.c.bf16 %v778_v45, %v777_v44  ;;  %v960_v60 = vmul.f32 0.5, %v959_v56 }
 0x3ee   : > { %v735_v57 = vsub.f32 1.5, %v734_v53 }
 0x3ef   : > { %785 = vrot.lane.b32.xlu0 %v780_v46, %s2062_s30  ;;  %v961_v1 = vsub.f32 1.5, %v960_v60 }
 0x3f0   : > { %v736_v23 = vmul.f32 %v1990_v47, %v735_v57 }
 0x3f1   : > { %v962_v8 = vmul.f32 %v1992_v50, %v961_v1 }
 0x3f2   : > { %v740_v3 = vsel %vm739_vm9, %v1990_v47, %v736_v23 }
 0x3f3   : > { %v715_v14 = vpop.xlane.xlu1 %714  ;;  %v742_v7 = vmul.f32 %v740_v3, %v2208_v22  ;;  %v966_v13 = vsel %vm965_vm15, %v1992_v50, %v962_v8 }
 0x3f4   : > { %v719_v49 = vadd.f32 1e-12, %v715_v14  ;;  %v977_v20 = vmul.f32 %v966_v13, %v2198_v18 }
 0x3f6   : > { %1993 = vrsqrt.f32 %v719_v49  ;;  %vm727_vm10 = vweird.f32 %v719_v49 }
 0x3fb   : > { %v954_v54 = vpop.xlane.xlu1 %953 }
 0x3fc   : > { %v1994_v55 = vpop.eup %1993  ;;  %v956_v19 = vadd.f32 1e-12, %v954_v54 }
 0x3fd   : > { %v722_v58 = vmul.f32 %v1994_v55, %v719_v49  ;;  %vm728_vm8 = vweird.f32 %v1994_v55 }
 0x3fe   : > { %1995 = vrsqrt.f32 %v956_v19  ;;  %vm729_vm11 = vmor %vm727_vm10, %vm728_vm8  ;;  %vm973_vm2 = vweird.f32 %v956_v19 }
 0x3ff   : > { %v723_v59 = vmul.f32 %v1994_v55, %v722_v58 }
 0x401   : > { %v724_v62 = vmul.f32 0.5, %v723_v59 }
 0x403   : > { %v725_v63 = vsub.f32 1.5, %v724_v62  ;;  %v915_v27 = vpop.xlane.xlu1 %914 }
 0x404   : > { %v1996_v0 = vpop.eup %1995  ;;  %v919_v28 = vadd.f32 1e-12, %v915_v27 }
 0x405   : > { %v726_v15 = vmul.f32 %v1994_v55, %v725_v63  ;;  %v968_v2 = vmul.f32 %v1996_v0, %v956_v19  ;;  %vm974_vm14 = vweird.f32 %v1996_v0 }
 0x406   : > { %vm975_vm3 = vmor %vm973_vm2, %vm974_vm14 }
 0x407   : > { %v969_v4 = vmul.f32 %v1996_v0, %v968_v2  ;;  %v730_v5 = vsel %vm729_vm11, %v1994_v55, %v726_v15  ;;  %vm927_vm11 = vweird.f32 %v919_v28 }
 0x408   : > { %v741_v6 = vmul.f32 %v730_v5, %v2198_v18 }
 0x409   : > { %v970_v9 = vmul.f32 0.5, %v969_v4 }
 0x40a   : > { %v779_v10 = vpack.c.bf16 %v742_v7, %v741_v6 }
 0x40b   : > { %v971_v11 = vsub.f32 1.5, %v970_v9 }
 0x40c   : > { %782 = vrot.lane.b32.xlu2 %v779_v10, %s2064_s17 }
 0x40d   : > { %v972_v12 = vmul.f32 %v1996_v0, %v971_v11 }
 0x40f   : > { %v976_v16 = vsel %vm975_vm3, %v1996_v0, %v972_v12 }
 0x410   : > { %v978_v21 = vmul.f32 %v976_v16, %v2208_v22 }
 0x412   : > { %v980_v24 = vpack.c.bf16 %v978_v21, %v977_v20 }
 0x414   : > { %985 = vrot.lane.b32.xlu1 %v980_v24, %s2063_s16 }
 0x420   : > { %v1132_v25 = vpop.xlane.xlu2 %1131 }
 0x421   : > { %v1134_v26 = vadd.f32 1e-12, %v1132_v25 }
 0x423   : > { %1997 = vrsqrt.f32 %v1134_v26  ;;  %vm1151_vm5 = vweird.f32 %v1134_v26 }
 0x424   : > { %1999 = vrsqrt.f32 %v919_v28 }
 0x428   : > { %v1093_v32 = vpop.xlane.xlu2 %1092 }
 0x429   : > { %v1998_v29 = vpop.eup %1997  ;;  %v699_v30 = vpop.f32.mrf.mxu1  ;;  %v2316_v34 = vadd.f32 1e-12, %v1093_v32 }
 0x42a   : > { %v1146_v31 = vmul.f32 %v1998_v29, %v1134_v26  ;;  %v2000_v36 = vpop.eup %1999  ;;  %vm1152_vm4 = vweird.f32 %v1998_v29 }
 0x42b   : > { %v922_v39 = vmul.f32 %v2000_v36, %v919_v28  ;;  %vm1153_vm7 = vmor %vm1151_vm5, %vm1152_vm4  ;;  %vm928_vm10 = vweird.f32 %v2000_v36  ;;  %vm1105_vm3 = vweird.f32 %v2316_v34 }
 0x42c   : > { %v1147_v37 = vmul.f32 %v1998_v29, %v1146_v31  ;;  %vm929_vm12 = vmor %vm927_vm11, %vm928_vm10 }
 0x42d   : > { %v1129_v33 = vpop.xlane.xlu0 %1128  ;;  %v923_v44 = vmul.f32 %v2000_v36, %v922_v39 }
 0x42e   : > { %v1133_v35 = vadd.f32 1e-12, %v1129_v33  ;;  %v1148_v41 = vmul.f32 0.5, %v1147_v37 }
 0x42f   : > { %v924_v49 = vmul.f32 0.5, %v923_v44 }
 0x430   : > { %2001 = vrsqrt.f32 %v1133_v35  ;;  %v1149_v46 = vsub.f32 1.5, %v1148_v41  ;;  %vm1141_vm8 = vweird.f32 %v1133_v35 }
 0x431   : > { %v701_v38 = vpop.f32.mrf.mxu1  ;;  %2003 = vrsqrt.f32 %v2316_v34  ;;  %v925_v56 = vsub.f32 1.5, %v924_v49 }
 0x432   : > { %v704_v40 = vpack.c.bf16 %v701_v38, %v699_v30  ;;  %v1150_v50 = vmul.f32 %v1998_v29, %v1149_v46  ;;  %v1780_v38 = vld [vmem:[%s2571_s3 + $0x10] sm:$0xff] }
 0x433   : > { %v926_v63 = vmul.f32 %v2000_v36, %v925_v56 }
 0x434   : > { %1792 = vmatmul.msk.bf16.vlgmr.msra.gmra.mxu1 %vm563_vm1, %v704_v40  ;;  %v1154_v60 = vsel %vm1153_vm7, %v1998_v29, %v1150_v50 }
 0x435   : > { %v918_v42 = vpop.xlane.xlu0 %917  ;;  %v1156_v1 = vmul.f32 %v1154_v60, %v2208_v22  ;;  %v930_v6 = vsel %vm929_vm12, %v2000_v36, %v926_v63 }
 0x436   : > { %v2002_v43 = vpop.eup %2001  ;;  %v920_v45 = vadd.f32 1e-12, %v918_v42  ;;  %v941_v12 = vmul.f32 %v930_v6, %v2198_v18 }
 0x437   : > { %v1136_v47 = vmul.f32 %v2002_v43, %v1133_v35  ;;  %v2320_v48 = vpop.eup %2003  ;;  %vm1142_vm6 = vweird.f32 %v2002_v43 }
 0x438   : > { %2005 = vrsqrt.f32 %v920_v45  ;;  %v1100_v51 = vmul.f32 %v2320_v48, %v2316_v34  ;;  %vm1143_vm9 = vmor %vm1141_vm8, %vm1142_vm6  ;;  %vm937_vm14 = vweird.f32 %v920_v45  ;;  %vm1106_vm2 = vweird.f32 %v2320_v48 }
 0x439   : > { %v1137_v14 = vmul.f32 %v2002_v43, %v1136_v47  ;;  %vm1107_vm5 = vmor %vm1105_vm3, %vm1106_vm2 }
 0x43a   : > { %v1101_v57 = vmul.f32 %v2320_v48, %v1100_v51 }
 0x43b   : > { %v1138_v52 = vmul.f32 0.5, %v1137_v14 }
 0x43c   : > { %v1102_v15 = vmul.f32 0.5, %v1101_v57 }
 0x43d   : > { %v1139_v53 = vsub.f32 1.5, %v1138_v52  ;;  %v1096_v54 = vpop.xlane.xlu1 %1095 }
 0x43e   : > { %v2006_v55 = vpop.eup %2005  ;;  %v1098_v19 = vadd.f32 1e-12, %v1096_v54  ;;  %v1103_v7 = vsub.f32 1.5, %v1102_v15  ;;  %v1803_v54 = vld [vmem:[%s2571_s3 + $0x30] sm:$0xff] }
 0x43f   : > { %v1140_v58 = vmul.f32 %v2002_v43, %v1139_v53  ;;  %v932_v59 = vmul.f32 %v2006_v55, %v920_v45  ;;  %vm938_vm13 = vweird.f32 %v2006_v55 }
 0x440   : > { %2007 = vrsqrt.f32 %v1098_v19  ;;  %vm939_vm15 = vmor %vm937_vm14, %vm938_vm13  ;;  %v1104_v16 = vmul.f32 %v2320_v48, %v1103_v7  ;;  %vm1115_vm6 = vweird.f32 %v1098_v19 }
 0x441   : > { %v933_v23 = vmul.f32 %v2006_v55, %v932_v59  ;;  %v1144_v62 = vsel %vm1143_vm9, %v2002_v43, %v1140_v58  ;;  %v1781_v43 = vld [vmem:[%s2571_s3 + $0x18] sm:$0xff]  ;;  %v1795_v59 = vld [vmem:[%s2571_s3 + $0x28] sm:$0xff] }
 0x442   : > { %v1155_v0 = vmul.f32 %v1144_v62, %v2198_v18  ;;  %v1108_v25 = vsel %vm1107_vm5, %v2320_v48, %v1104_v16  ;;  %v1794_v48 = vld [vmem:[%s2571_s3 + $0x20] sm:$0xff] }
 0x443   : > { %v934_v2 = vmul.f32 0.5, %v933_v23  ;;  %v1119_v27 = vmul.f32 %v1108_v25, %v2198_v18  ;;  %v1804_v23 = vld [vmem:[%s2571_s3 + $0x38] sm:$0xff] }
 0x444   : > { %v1158_v3 = vpack.c.bf16 %v1156_v1, %v1155_v0 }
 0x445   : > { %v935_v4 = vsub.f32 1.5, %v934_v2 }
 0x446   : > { %v2008_v5 = vpop.eup %2007  ;;  %1163 = vrot.lane.b32.xlu0 %v1158_v3, %s2067_s27 }
 0x447   : > { %v936_v8 = vmul.f32 %v2006_v55, %v935_v4  ;;  %v1110_v9 = vmul.f32 %v2008_v5, %v1098_v19  ;;  %vm1116_vm4 = vweird.f32 %v2008_v5 }
 0x448   : > { %vm1117_vm7 = vmor %vm1115_vm6, %vm1116_vm4 }
 0x449   : > { %v1111_v10 = vmul.f32 %v2008_v5, %v1110_v9  ;;  %v940_v11 = vsel %vm939_vm15, %v2006_v55, %v936_v8 }
 0x44a   : > { %v942_v13 = vmul.f32 %v940_v11, %v2208_v22 }
 0x44b   : > { %v1112_v17 = vmul.f32 0.5, %v1111_v10 }
 0x44c   : > { %v979_v20 = vpack.c.bf16 %v942_v13, %v941_v12 }
 0x44d   : > { %v1113_v21 = vsub.f32 1.5, %v1112_v17 }
 0x44e   : > { %982 = vrot.lane.b32.xlu2 %v979_v20, %s2065_s21 }
 0x44f   : > { %v1114_v24 = vmul.f32 %v2008_v5, %v1113_v21 }
 0x451   : > { %v1118_v26 = vsel %vm1117_vm7, %v2008_v5, %v1114_v24 }
 0x452   : > { %v1120_v28 = vmul.f32 %v1118_v26, %v2208_v22 }
 0x454   : > { %v1157_v29 = vpack.c.bf16 %v1120_v28, %v1119_v27 }
 0x456   : > { %1160 = vrot.lane.b32.xlu0 %v1157_v29, %s2066_s22 }
 0x461   : > { %v786_v30 = vpop.permute.xlu0 %785 }
 0x462   : > { %v791_v31 = vsel %vm563_vm1, %v786_v30, 0 }
 0x463   : > { %800 = vmatpush.bf16.xpose.msra.mxu3 %v791_v31 }
 0x466   : > { %v783_v32 = vpop.permute.xlu2 %782 }
 0x46a   : > { %1779 = vmatmul.msk.bf16.vlgmr.msra.gmra.mxu3 %vm563_vm1, %v783_v32 }
 0x486   : > { %v986_v33 = vpop.permute.xlu1 %985 }
 0x487   : > { %v991_v34 = vsel %vm563_vm1, %v986_v33, 0 }
 0x488   : > { %1000 = vmatpush.bf16.xpose.msrb.mxu3 %v991_v34 }
 0x4a8   : > { %v983_v35 = vpop.permute.xlu2 %982 }
 0x4a9   : > { %1793 = vmatmul.msk.bf16.vlgmr.msrb.gmra.mxu3 %vm563_vm1, %v983_v35 }
 0x4b1   : > { %v2356_v51 = vpop.f32.mrf.mxu1 }
 0x4b8   : > { %v1164_v18 = vpop.permute.xlu0 %1163 }
 0x4b9   : > { %v1169_v22 = vsel %vm563_vm1, %v1164_v18, 0  ;;  %v2358_v52 = vpop.f32.mrf.mxu1 }
 0x4ba   : > { %1178 = vmatpush.bf16.xpose.msrb.mxu1 %v1169_v22 }
 0x4c8   : > { %v1161_v36 = vpop.permute.xlu0 %1160 }
 0x4c9   : > { %1802 = vmatmul.msk.bf16.vlgmr.msrb.gmra.mxu1 %vm563_vm1, %v1161_v36 }
 0x4ed   : > { %v802_v37 = vpop.f32.mrf.mxu3 }
 0x4ee   : > { %v807_v39 = vmul.f32 10.0, %v802_v37 }
 0x4f0   : > { %v812_v40 = vadd.f32 %v1780_v38, %v807_v39 }
 0x4f2   : > { %v814_v41 = vsel %vm563_vm1, %v812_v40, -inf }
 0x4f3   : > { %815 = vmax.xlane.f32.xlu1 %v814_v41 }
 0x4f5   : > { %v804_v42 = vpop.f32.mrf.mxu3 }
 0x4f6   : > { %v808_v44 = vmul.f32 10.0, %v804_v42 }
 0x4f8   : > { %v813_v45 = vadd.f32 %v1781_v43, %v808_v44 }
 0x4fa   : > { %v817_v46 = vsel %vm563_vm1, %v813_v45, -inf }
 0x4fb   : > { %818 = vmax.xlane.f32.xlu2 %v817_v46 }
 0x52c   : > { %v1002_v47 = vpop.f32.mrf.mxu3 }
 0x52d   : > { %v1007_v14 = vmul.f32 10.0, %v1002_v47 }
 0x52f   : > { %v1012_v49 = vadd.f32 %v1794_v48, %v1007_v14 }
 0x531   : > { %v1014_v50 = vsel %vm563_vm1, %v1012_v49, -inf }
 0x532   : > { %1015 = vmax.xlane.f32.xlu2 %v1014_v50 }
 0x534   : > { %v1004_v56 = vpop.f32.mrf.mxu3 }
 0x535   : > { %v1008_v57 = vmul.f32 10.0, %v1004_v56 }
 0x537   : > { %v1013_v63 = vadd.f32 %v1795_v59, %v1008_v57  ;;  %v1920_v59 = vld [vmem:[%s2572_s4 + $0x8] sm:$0xff] }
 0x538   : > { %877 = vmatpush.bf16.msra.mxu0 %v1920_v59  ;;  %v1823_v59 = vld [vmem:[%s2576_s8 + $0x18] sm:$0xf0] }
 0x539   : > { %v1017_v15 = vsel %vm563_vm1, %v1013_v63, -inf }
 0x546   : > { %v1180_v53 = vpop.f32.mrf.mxu1 }
 0x547   : > { %v1185_v55 = vmul.f32 10.0, %v1180_v53 }
 0x549   : > { %v1190_v19 = vadd.f32 %v1803_v54, %v1185_v55 }
 0x54b   : > { %v1192_v58 = vsel %vm563_vm1, %v1190_v19, -inf }
 0x54c   : > { %1193 = vmax.xlane.f32.xlu0 %v1192_v58 }
 0x54e   : > { %v1182_v60 = vpop.f32.mrf.mxu1 }
 0x54f   : > { %v1186_v62 = vmul.f32 10.0, %v1182_v60 }
 0x551   : > { %v1191_v0 = vadd.f32 %v1804_v23, %v1186_v62 }
 0x553   : > { %v1195_v1 = vsel %vm563_vm1, %v1191_v0, -inf }
 0x554   : > { %1196 = vmax.xlane.f32.xlu1 %v1195_v1  ;;  %1018 = vmax.xlane.f32.xlu0 %v1017_v15 }
 0x566   : > { %v816_v2 = vpop.xlane.xlu1 %815 }
 0x567   : > { %v820_v3 = vsub.f32 %v812_v40, %v816_v2 }
 0x568   : > { %838 = vrot.lane.b32.xlu0 %v2294_v61, %s2064_s17 }
 0x569   : > { %v822_v4 = vmul.f32 1.442695, %v820_v3 }
 0x56b   : > { %2009 = vpow2.f32 %v822_v4 }
 0x56e   : > { %v819_v5 = vpop.xlane.xlu2 %818 }
 0x56f   : > { %v821_v6 = vsub.f32 %v813_v45, %v819_v5 }
 0x570   : > { %1037 = vrot.lane.b32.xlu0 %v2294_v61, %s2065_s21 }
 0x571   : > { %v2010_v7 = vpop.eup %2009  ;;  %v824_v8 = vmul.f32 1.442695, %v821_v6 }
 0x572   : > { %v826_v9 = vsel %vm563_vm1, %v2010_v7, 0.0 }
 0x573   : > { %2011 = vpow2.f32 %v824_v8  ;;  %827 = vadd.xlane.f32.xlu1 %v826_v9 }
 0x579   : > { %v2012_v10 = vpop.eup %2011 }
 0x57a   : > { %v829_v11 = vsel %vm563_vm1, %v2012_v10, 0.0 }
 0x57b   : > { %830 = vadd.xlane.f32.xlu2 %v829_v11  ;;  %v1963_v11 = vld [vmem:[%s2573_s5] ss:$0 sm:$0xff] }
 0x5a5   : > { %v1016_v12 = vpop.xlane.xlu2 %1015 }
 0x5a6   : > { %v1020_v13 = vsub.f32 %v1012_v49, %v1016_v12 }
 0x5a8   : > { %v1022_v16 = vmul.f32 1.442695, %v1020_v13 }
 0x5aa   : > { %2013 = vpow2.f32 %v1022_v16 }
 0x5b0   : > { %v2014_v17 = vpop.eup %2013 }
 0x5b1   : > { %v1026_v20 = vsel %vm563_vm1, %v2014_v17, 0.0 }
 0x5b2   : > { %1027 = vadd.xlane.f32.xlu1 %v1026_v20 }
 0x5bf   : > { %v1194_v21 = vpop.xlane.xlu0 %1193 }
 0x5c0   : > { %v1198_v24 = vsub.f32 %v1190_v19, %v1194_v21 }
 0x5c2   : > { %v1200_v25 = vmul.f32 1.442695, %v1198_v24 }
 0x5c4   : > { %2015 = vpow2.f32 %v1200_v25 }
 0x5c7   : > { %v1197_v26 = vpop.xlane.xlu1 %1196  ;;  %v1019_v27 = vpop.xlane.xlu0 %1018 }
 0x5c8   : > { %v1199_v28 = vsub.f32 %v1191_v0, %v1197_v26  ;;  %v1021_v31 = vsub.f32 %v1013_v63, %v1019_v27  ;;  %v1921_v63 = vld [vmem:[%s2572_s4 + $0x10] sm:$0xff]  ;;  %v1922_v0 = vld [vmem:[%s2572_s4 + $0x18] sm:$0xff] }
 0x5c9   : > { %1076 = vmatpush.bf16.msrb.mxu0 %v1921_v63  ;;  %v1924_v63 = vld [vmem:[%s2576_s8 + $0x4] sm:$0xf0] }
 0x5ca   : > { %v2016_v29 = vpop.eup %2015  ;;  %v1202_v30 = vmul.f32 1.442695, %v1199_v28  ;;  %v1024_v33 = vmul.f32 1.442695, %v1021_v31  ;;  %v2068_v28 = vmov 64.0  }
 0x5cb   : > { %v1204_v32 = vsel %vm563_vm1, %v2016_v29, 0.0 }
 0x5cc   : > { %2017 = vpow2.f32 %v1202_v30  ;;  %1205 = vadd.xlane.f32.xlu1 %v1204_v32 }
 0x5cd   : > { %2019 = vpow2.f32 %v1024_v33 }
 0x5d2   : > { %v2018_v34 = vpop.eup %2017 }
 0x5d3   : > { %v1207_v35 = vsel %vm563_vm1, %v2018_v34, 0.0  ;;  %v2020_v18 = vpop.eup %2019 }
 0x5d4   : > { %1208 = vadd.xlane.f32.xlu2 %v1207_v35  ;;  %v1029_v36 = vsel %vm563_vm1, %v2020_v18, 0.0 }
 0x5da   : > { %v839_v22 = vpop.permute.xlu0 %838 }
 0x5db   : > { %851 = vmatpush.bf16.msra.mxu2 %v839_v22 }
 0x5dc   : > { %1030 = vadd.xlane.f32.xlu2 %v1029_v36 }
 0x5e2   : > { %v1038_v37 = vpop.permute.xlu0 %1037 }
 0x5e3   : > { %1050 = vmatpush.bf16.msrb.mxu2 %v1038_v37 }
 0x5e5   : > { %1215 = vrot.lane.b32.xlu1 %v2294_v61, %s2066_s22 }
 0x5e6   : > { %v828_v38 = vpop.xlane.xlu1 %827 }
 0x5e7   : > { %2021 = vrcp.f32 %v828_v38 }
 0x5ed   : > { %v2022_v40 = vpop.eup %2021 }
 0x5ee   : > { %v831_v39 = vpop.xlane.xlu2 %830  ;;  %v834_v42 = vmul.f32 %v2022_v40, %v2010_v7 }
 0x5ef   : > { %2023 = vrcp.f32 %v831_v39 }
 0x5f5   : > { %v2024_v41 = vpop.eup %2023 }
 0x5f6   : > { %v835_v43 = vmul.f32 %v2024_v41, %v2012_v10 }
 0x5f8   : > { %v836_v44 = vpack.c.bf16 %v835_v43, %v834_v42  ;;  %v1837_v42 = vld [vmem:[%s2576_s8 + $0x30] sm:$0xf]  ;;  %v1930_v43 = vld [vmem:[%s2576_s8 + $0x34] sm:$0xf0] }
 0x5fa   : > { %1782 = vmatmul.msk.bf16.vlgmr.msra.gmra.mxu2 %vm563_vm1, %v836_v44  ;;  %v1929_v44 = vld [vmem:[%s2576_s8 + $0x34] sm:$0xf] }
 0x5fb   : > { %1254 = vmatpush.bf16.msra.mxu2 %v1922_v0 }
 0x625   : > { %v1028_v45 = vpop.xlane.xlu1 %1027 }
 0x63f   : > { %v1206_v47 = vpop.xlane.xlu1 %1205 }
 0x647   : > { %v1209_v46 = vpop.xlane.xlu2 %1208 }
 0x648   : > { %2025 = vrcp.f32 %v1209_v46  ;;  %v1839_v46 = vld [vmem:[%s2576_s8 + $0x38] sm:$0xf0] }
 0x649   : > { %2027 = vrcp.f32 %v1028_v45  ;;  %v1838_v45 = vor.u32 %v1930_v43, %v1837_v42  ;;  %v1935_v42 = vld [vmem:[%s2578_s10 + $0x20] sm:$0xff] }
 0x64a   : > { %2029 = vrcp.f32 %v1206_v47  ;;  %v1842_v47 = vor.u32 %v1929_v44, %v1839_v46  ;;  %v1943_v43 = vld [vmem:[%s2578_s10 + $0x60] sm:$0xff]  ;;  %v1934_v44 = vld [vmem:[%s2578_s10 + $0x18] sm:$0xff]  ;;  %v1933_v46 = vld [vmem:[%s2578_s10 + $0x10] sm:$0xff] }
 0x64c   : > { %1410 = vmatpush.bf16.msra.mxu1 %v1842_v47  ;;  %v1941_v47 = vld [vmem:[%s2578_s10 + $0x50] sm:$0xff] }
 0x64e   : > { %v2026_v61 = vpop.eup %2025 }
 0x64f   : > { %v1031_v48 = vpop.xlane.xlu2 %1030  ;;  %v2028_v14 = vpop.eup %2027  ;;  %v1213_v50 = vmul.f32 %v2026_v61, %v2018_v34  ;;  %v1928_v61 = vld [vmem:[%s2576_s8 + $0x24] sm:$0xf0] }
 0x650   : > { %2031 = vrcp.f32 %v1031_v48  ;;  %v2030_v49 = vpop.eup %2029  ;;  %v1034_v54 = vmul.f32 %v2028_v14, %v2014_v17  ;;  %v1829_v48 = vld [vmem:[%s2576_s8 + $0x20] sm:$0xf]  ;;  %v1927_v14 = vld [vmem:[%s2576_s8 + $0x24] sm:$0xf] }
 0x651   : > { %v1212_v55 = vmul.f32 %v2030_v49, %v2016_v29  ;;  %2033 = vrcp.f32 %v2068_v28  ;;  %v1830_v49 = vor.u32 %v1928_v61, %v1829_v48  ;;  %v1932_v48 = vld [vmem:[%s2578_s10 + $0x8] sm:$0xff] }
 0x652   : > { %v1940_v61 = vld [vmem:[%s2578_s10 + $0x48] sm:$0xff] }
 0x653   : > { %v1214_v57 = vpack.c.bf16 %v1213_v50, %v1212_v55  ;;  %v1831_v50 = vld [vmem:[%s2576_s8 + $0x28] sm:$0xf0]  ;;  %v1821_v55 = vld [vmem:[%s2576_s8 + $0x10] sm:$0xf] }
 0x656   : > { %v2032_v53 = vpop.eup %2031 }
 0x657   : > { %v1035_v56 = vmul.f32 %v2032_v53, %v2020_v18  ;;  %v1216_v19 = vpop.permute.xlu1 %1215  ;;  %v2034_v29 = vpop.eup %2033  ;;  %v1834_v53 = vor.u32 %v1927_v14, %v1831_v50  ;;  %v1343_v14 = vld [vmem:[%s2577_s9] sm:$0x3] }
 0x658   : > { %1228 = vmatpush.bf16.msra.mxu3 %v1216_v19  ;;  %v1278_v30 = vmul.f32 64.0, %v2034_v29  ;;  %v1925_v19 = vld [vmem:[%s2576_s8 + $0x14] sm:$0xf]  ;;  %v1939_v50 = vld [vmem:[%s2578_s10 + $0x40] sm:$0xff] }
 0x659   : > { %v1036_v58 = vpack.c.bf16 %v1035_v56, %v1034_v54  ;;  %1411 = vmatpush.bf16.msra.mxu1 %v1834_v53  ;;  %v1926_v56 = vld [vmem:[%s2576_s8 + $0x14] sm:$0xf0]  ;;  %v1345_v53 = vperm.slane %v1343_v14, 0 }
 0x65a   : > { %v1279_v31 = vsub.f32 1.0, %v1278_v30 }
 0x65b   : > { %1796 = vmatmul.msk.bf16.vlgmr.msrb.gmra.mxu2 %vm563_vm1, %v1036_v58  ;;  %1805 = vmatmul.msk.bf16.vlgmr.msra.gmra.mxu3 %vm563_vm1, %v1214_v57  ;;  %v1822_v58 = vor.u32 %v1926_v56, %v1821_v55 }
 0x65c   : > { %v1280_v32 = vmul.f32 %v2034_v29, %v1279_v31 }
 0x65e   : > { %v1281_v33 = vadd.f32 %v2034_v29, %v1280_v32 }
 0x67d   : > { %v853_v60 = vpop.f32.mrf.mxu2 }
 0x685   : > { %v855_v23 = vpop.f32.mrf.mxu2 }
 0x686   : > { %v858_v62 = vpack.c.bf16 %v855_v23, %v853_v60  ;;  %v1826_v60 = vor.u32 %v1925_v19, %v1823_v59 }
 0x688   : > { %1787 = vmatmul.msk.bf16.vlgmr.msra.gmra.mxu0 %vm563_vm1, %v858_v62  ;;  %v1813_v62 = vld [vmem:[%s2576_s8] sm:$0xf]  ;;  %1412 = vmatpush.bf16.msra.mxu1 %v1826_v60 }
 0x689   : > { %1396 = vmatpush.bf16.msra.mxu0 %v1838_v45  ;;  %v1814_v0 = vor.u32 %v1924_v63, %v1813_v62  ;;  %v1942_v45 = vld [vmem:[%s2578_s10 + $0x58] sm:$0xff] }
 0x68d   : > { %1397 = vmatpush.bf16.msra.mxu0 %v1830_v49  ;;  %v1931_v49 = vld [vmem:[%s2578_s10] sm:$0xff] }
 0x691   : > { %1398 = vmatpush.bf16.msra.mxu0 %v1822_v58 }
 0x695   : > { %1399 = vmatpush.bf16.msra.mxu0 %v1814_v0 }
 0x6de   : > { %v1052_v1 = vpop.f32.mrf.mxu2  ;;  %v1230_v15 = vpop.f32.mrf.mxu3 }
 0x6e6   : > { %v1054_v2 = vpop.f32.mrf.mxu2  ;;  %v1232_v3 = vpop.f32.mrf.mxu3 }
 0x6e7   : > { %v1057_v4 = vpack.c.bf16 %v1054_v2, %v1052_v1  ;;  %v1235_v5 = vpack.c.bf16 %v1232_v3, %v1230_v15  ;;  %v1923_v1 = vld [vmem:[%s2576_s8 + $0x4] sm:$0xf]  ;;  %v1815_v15 = vld [vmem:[%s2576_s8 + $0x8] sm:$0xf0] }
 0x6e8   : > { %v1818_v2 = vor.u32 %v1923_v1, %v1815_v15 }
 0x6e9   : > { %1801 = vmatmul.msk.bf16.vlgmr.msrb.gmra.mxu0 %vm563_vm1, %v1057_v4  ;;  %1810 = vmatmul.msk.bf16.vlgmr.msra.gmra.mxu2 %vm563_vm1, %v1235_v5  ;;  %vm1282_vm1 = vweird.f32 %v2034_v29 }
 0x6ea   : > { %v2406_v34 = vsel %vm1282_vm1, %v2034_v29, %v1281_v33  ;;  %1413 = vmatpush.bf16.msra.mxu1 %v1818_v2  ;;  %v2051_v33 = vld [vmem:[%s2184_s20] sm:$0xff] }
 0x705   : > { %v879_v6 = vpop.f32.mrf.mxu0 }
 0x706   : > { %v903_v9 = vadd.f32 %v2356_v51, %v879_v6 }
 0x70d   : > { %v881_v7 = vpop.f32.mrf.mxu0 }
 0x70e   : > { %v905_v20 = vadd.f32 %v2358_v52, %v881_v7 }
 0x766   : > { %v1078_v8 = vpop.f32.mrf.mxu0 }
 0x767   : > { %v1083_v10 = vadd.f32 %v1078_v8, %v903_v9 }
 0x76c   : > { %v1256_v12 = vpop.f32.mrf.mxu2 }
 0x76d   : > { %v1261_v13 = vadd.f32 %v1256_v12, %v1083_v10 }
 0x76e   : > { %v1080_v17 = vpop.f32.mrf.mxu0 }
 0x76f   : > { %v1267_v16 = vadd.f32 %v1963_v11, %v1261_v13  ;;  %v1084_v24 = vadd.f32 %v1080_v17, %v905_v20 }
 0x771   : > { %v1271_v21 = vsel %vm529_vm0, %v1267_v16, 0.0 }
 0x772   : > { %1272 = vadd.xlane.f32.xlu2 %v1271_v21  ;;  %v1964_v21 = vld [vmem:[%s2574_s6] ss:$0 sm:$0xff] }
 0x774   : > { %v1258_v25 = vpop.f32.mrf.mxu2 }
 0x775   : > { %v1262_v26 = vadd.f32 %v1258_v25, %v1084_v24 }
 0x777   : > { %v1268_v27 = vadd.f32 %v1963_v11, %v1262_v26 }
 0x779   : > { %v1274_v51 = vsel %vm529_vm0, %v1268_v27, 0.0 }
 0x77a   : > { %1275 = vadd.xlane.f32.xlu0 %v1274_v51 }
 0x7e5   : > { %v1273_v52 = vpop.xlane.xlu2 %1272 }
 0x7e6   : > { %v1284_v35 = vmul.f32 %v2406_v34, %v1273_v52 }
 0x7e8   : > { %v2409_v18 = vsub.f32 %v1267_v16, %v1284_v35  ;;  %v2052_v35 = vld [vmem:[%s2184_s20 + $0x8] sm:$0xff] }
 0x7ea   : > { %v1288_v22 = vmul.f32 %v2409_v18, %v2409_v18 }
 0x7ec   : > { %v1290_v36 = vsel %vm529_vm0, %v1288_v22, 0.0 }
 0x7ed   : > { %1291 = vadd.xlane.f32.xlu2 %v1290_v36  ;;  %v1276_v37 = vpop.xlane.xlu0 %1275  ;;  %v1938_v36 = vld [vmem:[%s2578_s10 + $0x38] sm:$0xff] }
 0x7ee   : > { %v1285_v38 = vmul.f32 %v2406_v34, %v1276_v37  ;;  %v1946_v37 = vld [vmem:[%s2578_s10 + $0x78] sm:$0xff]  ;;  %1590 = vmatpush.bf16.msrb.mxu3 %v1938_v36 }
 0x7ef   : > { %1604 = vmatpush.bf16.msrb.mxu2 %v1946_v37 }
 0x7f0   : > { %v2415_v39 = vsub.f32 %v1268_v27, %v1285_v38  ;;  %v1965_v27 = vld [vmem:[%s2575_s7] ss:$0 sm:$0xff]  ;;  %v1937_v38 = vld [vmem:[%s2578_s10 + $0x30] sm:$0xff] }
 0x7f2   : > { %v1289_v40 = vmul.f32 %v2415_v39, %v2415_v39  ;;  %1591 = vmatpush.bf16.msrb.mxu3 %v1937_v38 }
 0x7f4   : > { %v1293_v41 = vsel %vm529_vm0, %v1289_v40, 0.0  ;;  %v1936_v40 = vld [vmem:[%s2578_s10 + $0x28] sm:$0xff] }
 0x7f5   : > { %1294 = vadd.xlane.f32.xlu2 %v1293_v41  ;;  %v1944_v41 = vld [vmem:[%s2578_s10 + $0x68] sm:$0xff] }
 0x7f6   : > { %1592 = vmatpush.bf16.msrb.mxu3 %v1936_v40  ;;  %v1966_v40 = vld [vmem:[%s2579_s11] ss:$0 sm:$0xff] }
 0x7fa   : > { %1593 = vmatpush.bf16.msrb.mxu3 %v1935_v42 }
 0x7fe   : > { %1594 = vmatpush.bf16.msrb.mxu3 %v1934_v44 }
 0x802   : > { %1595 = vmatpush.bf16.msrb.mxu3 %v1933_v46 }
 0x806   : > { %1596 = vmatpush.bf16.msrb.mxu3 %v1932_v48 }
 0x80a   : > { %1597 = vmatpush.bf16.msrb.mxu3 %v1931_v49 }
 0x860   : > { %v1292_v54 = vpop.xlane.xlu2 %1291 }
 0x861   : > { %v1296_v57 = vmul.f32 %v1292_v54, %v2406_v34  ;;  %v1346_v54 = vperm.slane %v1343_v14, 1 }
 0x863   : > { %v1298_v23 = vadd.f32 1e-05, %v1296_v57 }
 0x865   : > { %2035 = vrsqrt.f32 %v1298_v23  ;;  %vm1306_vm9 = vweird.f32 %v1298_v23 }
 0x868   : > { %v1295_v3 = vpop.xlane.xlu2 %1294 }
 0x869   : > { %v1297_v4 = vmul.f32 %v1295_v3, %v2406_v34 }
 0x86b   : > { %v2036_v5 = vpop.eup %2035  ;;  %v1299_v6 = vadd.f32 1e-05, %v1297_v4 }
 0x86c   : > { %v1301_v7 = vmul.f32 %v2036_v5, %v1298_v23  ;;  %vm1307_vm8 = vweird.f32 %v2036_v5 }
 0x86d   : > { %2037 = vrsqrt.f32 %v1299_v6  ;;  %vm1308_vm10 = vmor %vm1306_vm9, %vm1307_vm8  ;;  %vm1316_vm12 = vweird.f32 %v1299_v6 }
 0x86e   : > { %v1302_v8 = vmul.f32 %v2036_v5, %v1301_v7 }
 0x870   : > { %v1303_v9 = vmul.f32 0.5, %v1302_v8 }
 0x872   : > { %v1304_v10 = vsub.f32 1.5, %v1303_v9 }
 0x873   : > { %v2038_v11 = vpop.eup %2037 }
 0x874   : > { %v1305_v12 = vmul.f32 %v2036_v5, %v1304_v10  ;;  %v1311_v13 = vmul.f32 %v2038_v11, %v1299_v6  ;;  %vm1317_vm11 = vweird.f32 %v2038_v11 }
 0x875   : > { %vm1318_vm13 = vmor %vm1316_vm12, %vm1317_vm11 }
 0x876   : > { %v1309_v16 = vsel %vm1308_vm10, %v2036_v5, %v1305_v12  ;;  %v1312_v17 = vmul.f32 %v2038_v11, %v1311_v13 }
 0x877   : > { %v1320_v24 = vmul.f32 %v1309_v16, %v2409_v18 }
 0x878   : > { %v1313_v20 = vmul.f32 0.5, %v1312_v17 }
 0x879   : > { %v1325_v51 = vmul.f32 %v1964_v21, %v1320_v24 }
 0x87a   : > { %v1314_v25 = vsub.f32 1.5, %v1313_v20 }
 0x87b   : > { %v1330_v30 = vadd.f32 %v1965_v27, %v1325_v51 }
 0x87c   : > { %v1315_v26 = vmul.f32 %v2038_v11, %v1314_v25 }
 0x87d   : > { %v2479_v52 = vadd.f32 %v2051_v33, %v1330_v30 }
 0x87e   : > { %v1319_v28 = vsel %vm1318_vm13, %v2038_v11, %v1315_v26 }
 0x87f   : > { %v1321_v29 = vmul.f32 %v1319_v28, %v2415_v39  ;;  %v1945_v39 = vld [vmem:[%s2578_s10 + $0x70] sm:$0xff] }
 0x880   : > { %1605 = vmatpush.bf16.msrb.mxu2 %v1945_v39 }
 0x881   : > { %v1326_v31 = vmul.f32 %v1964_v21, %v1321_v29 }
 0x883   : > { %v1331_v32 = vadd.f32 %v1965_v27, %v1326_v31 }
 0x884   : > { %1606 = vmatpush.bf16.msrb.mxu2 %v1944_v41 }
 0x885   : > { %v2482_v18 = vadd.f32 %v2052_v35, %v1331_v32 }
 0x887   : > { %v1334_v22 = vpack.c.bf16 %v2482_v18, %v2479_v52 }
 0x888   : > { %1607 = vmatpush.bf16.msrb.mxu2 %v1943_v43 }
 0x889   : > { %1843 = vmatmul.msk.bf16.vlgmr.msra.gmra.mxu0 %vm529_vm0, %v1334_v22  ;;  %1844 = vmatmul.msk.bf16.vlgmr.msra.gmra.mxu1 %vm529_vm0, %v1334_v22 }
 0x88c   : > { %1608 = vmatpush.bf16.msrb.mxu2 %v1942_v45 }
 0x890   : > { %1609 = vmatpush.bf16.msrb.mxu2 %v1941_v47 }
 0x894   : > { %1610 = vmatpush.bf16.msrb.mxu2 %v1940_v61 }
 0x898   : > { %1611 = vmatpush.bf16.msrb.mxu2 %v1939_v50 }
 0x906   : > { %v1401_v55 = vpop.f32.mrf.mxu0  ;;  %v1415_v56 = vpop.f32.mrf.mxu1 }
 0x907   : > { %v1402_v19 = vadd.f32 %v1401_v55, %v1345_v53  ;;  %v1416_v57 = vadd.f32 %v1415_v56, %v1346_v54 }
 0x909   : > { %v1424_v58 = vmul.f32 0.044715, %v1402_v19  ;;  %v1425_v59 = vmul.f32 0.044715, %v1416_v57  ;;  %v1420_v28 = vmul.f32 0.5, %v1402_v19  ;;  %v1421_v31 = vmul.f32 0.5, %v1416_v57 }
 0x90b   : > { %v1428_v60 = vmul.f32 %v1424_v58, %v1402_v19  ;;  %v1429_v23 = vmul.f32 %v1425_v59, %v1416_v57 }
 0x90d   : > { %v1432_v62 = vmul.f32 %v1428_v60, %v1402_v19  ;;  %v1433_v63 = vmul.f32 %v1429_v23, %v1416_v57 }
 0x90e   : > { %v1403_v0 = vpop.f32.mrf.mxu0  ;;  %v1417_v1 = vpop.f32.mrf.mxu1 }
 0x90f   : > { %v1436_v15 = vadd.f32 %v1432_v62, %v1402_v19  ;;  %v1404_v2 = vadd.f32 %v1403_v0, %v1345_v53  ;;  %v1418_v3 = vadd.f32 %v1417_v1, %v1346_v54  ;;  %v1437_v4 = vadd.f32 %v1433_v63, %v1416_v57 }
 0x911   : > { %v1426_v5 = vmul.f32 0.044715, %v1404_v2  ;;  %v1427_v6 = vmul.f32 0.044715, %v1418_v3  ;;  %v1440_v7 = vmul.f32 0.7978846, %v1436_v15 }
 0x912   : > { %v1441_v9 = vmul.f32 0.7978846, %v1437_v4  ;;  %v1422_v29 = vmul.f32 0.5, %v1404_v2  ;;  %v1423_v32 = vmul.f32 0.5, %v1418_v3 }
 0x913   : > { %v1430_v8 = vmul.f32 %v1426_v5, %v1404_v2  ;;  %v1431_v10 = vmul.f32 %v1427_v6, %v1418_v3  ;;  %2039 = vtanh.f32 %v1440_v7 }
 0x914   : > { %2041 = vtanh.f32 %v1441_v9  ;;  %v1967_v9 = vld [vmem:[%s2580_s12] ss:$0 sm:$0xff] }
 0x915   : > { %v1434_v11 = vmul.f32 %v1430_v8, %v1404_v2  ;;  %v1435_v12 = vmul.f32 %v1431_v10, %v1418_v3 }
 0x917   : > { %v1438_v13 = vadd.f32 %v1434_v11, %v1404_v2  ;;  %v1439_v16 = vadd.f32 %v1435_v12, %v1418_v3  ;;  %v1968_v11 = vld [vmem:[%s2581_s13] ss:$0 sm:$0xff] }
 0x919   : > { %v1442_v17 = vmul.f32 0.7978846, %v1438_v13  ;;  %v1443_v20 = vmul.f32 0.7978846, %v1439_v16  ;;  %v2040_v21 = vpop.eup %2039 }
 0x91a   : > { %v2042_v24 = vpop.eup %2041  ;;  %v1448_v25 = vadd.f32 1.0, %v2040_v21 }
 0x91b   : > { %2043 = vtanh.f32 %v1442_v17  ;;  %v1449_v27 = vadd.f32 1.0, %v2042_v24 }
 0x91c   : > { %2045 = vtanh.f32 %v1443_v20  ;;  %v1452_v35 = vmul.f32 %v1448_v25, %v1420_v28 }
 0x91d   : > { %v1453_v36 = vmul.f32 %v1449_v27, %v1421_v31 }
 0x921   : > { %v2044_v26 = vpop.eup %2043 }
 0x922   : > { %v2046_v51 = vpop.eup %2045  ;;  %v1450_v30 = vadd.f32 1.0, %v2044_v26 }
 0x923   : > { %v1451_v33 = vadd.f32 1.0, %v2046_v51 }
 0x924   : > { %v1454_v22 = vmul.f32 %v1450_v30, %v1422_v29 }
 0x925   : > { %v1455_v37 = vmul.f32 %v1451_v33, %v1423_v32 }
 0x926   : > { %v1456_v38 = vpack.c.bf16 %v1454_v22, %v1452_v35 }
 0x927   : > { %v1457_v39 = vpack.c.bf16 %v1455_v37, %v1453_v36 }
 0x928   : > { %1598 = vmatmul.bf16.vlgmr.msrb.gmra.mxu3 %v1456_v38 }
 0x929   : > { %1612 = vmatmul.bf16.vlgmr.msrb.gmra.mxu2 %v1457_v39 }
 0x9ab   : > { %v1599_v41 = vpop.f32.mrf.mxu3 }
 0x9ac   : > { %v1600_v42 = vadd.f32 %v1966_v40, %v1599_v41  ;;  %v1613_v43 = vpop.f32.mrf.mxu2 }
 0x9ae   : > { %v1614_v44 = vadd.f32 %v1613_v43, %v1600_v42 }
 0x9b0   : > { %v1620_v45 = vsel %vm529_vm0, %v1614_v44, 0.0 }
 0x9b1   : > { %1621 = vadd.xlane.f32.xlu1 %v1620_v45 }
 0x9b3   : > { %v1601_v46 = vpop.f32.mrf.mxu3 }
 0x9b4   : > { %v1602_v47 = vadd.f32 %v1966_v40, %v1601_v46  ;;  %v1615_v48 = vpop.f32.mrf.mxu2 }
 0x9b6   : > { %v1616_v61 = vadd.f32 %v1615_v48, %v1602_v47 }
 0x9b8   : > { %v1623_v14 = vsel %vm529_vm0, %v1616_v61, 0.0 }
 0x9b9   : > { %1624 = vadd.xlane.f32.xlu2 %v1623_v14 }
 0xa24   : > { %v1622_v49 = vpop.xlane.xlu1 %1621 }
 0xa25   : > { %v1626_v50 = vmul.f32 %v1622_v49, %v2406_v34 }
 0xa27   : > { %v1628_v53 = vsub.f32 %v1614_v44, %v1626_v50 }
 0xa29   : > { %v1630_v54 = vmul.f32 %v1628_v53, %v1628_v53 }
 0xa2b   : > { %v1632_v55 = vsel %vm529_vm0, %v1630_v54, 0.0 }
 0xa2c   : > { %v1625_v56 = vpop.xlane.xlu2 %1624  ;;  %1633 = vadd.xlane.f32.xlu2 %v1632_v55 }
 0xa2d   : > { %v1627_v19 = vmul.f32 %v1625_v56, %v2406_v34 }
 0xa2f   : > { %v1629_v57 = vsub.f32 %v1616_v61, %v1627_v19 }
 0xa31   : > { %v1631_v58 = vmul.f32 %v1629_v57, %v1629_v57 }
 0xa33   : > { %v1635_v59 = vsel %vm529_vm0, %v1631_v58, 0.0 }
 0xa34   : > { %1636 = vadd.xlane.f32.xlu2 %v1635_v59 }
 0xa9f   : > { %v1634_v60 = vpop.xlane.xlu2 %1633 }
 0xaa0   : > { %v1638_v23 = vmul.f32 %v1634_v60, %v2406_v34 }
 0xaa2   : > { %v1640_v62 = vadd.f32 1e-05, %v1638_v23 }
 0xaa4   : > { %2047 = vrsqrt.f32 %v1640_v62  ;;  %vm1648_vm15 = vweird.f32 %v1640_v62 }
 0xaa7   : > { %v1637_v63 = vpop.xlane.xlu2 %1636 }
 0xaa8   : > { %v1639_v0 = vmul.f32 %v1637_v63, %v2406_v34 }
 0xaaa   : > { %v2048_v1 = vpop.eup %2047  ;;  %v1641_v15 = vadd.f32 1e-05, %v1639_v0 }
 0xaab   : > { %v1643_v2 = vmul.f32 %v2048_v1, %v1640_v62  ;;  %vm1649_vm14 = vweird.f32 %v2048_v1 }
 0xaac   : > { %2049 = vrsqrt.f32 %v1641_v15  ;;  %vm1650_vm2 = vmor %vm1648_vm15, %vm1649_vm14  ;;  %vm1658_vm4 = vweird.f32 %v1641_v15 }
 0xaad   : > { %v1644_v3 = vmul.f32 %v2048_v1, %v1643_v2 }
 0xaaf   : > { %v1645_v4 = vmul.f32 0.5, %v1644_v3 }
 0xab1   : > { %v1646_v5 = vsub.f32 1.5, %v1645_v4 }
 0xab2   : > { %v2050_v6 = vpop.eup %2049 }
 0xab3   : > { %v1647_v7 = vmul.f32 %v2048_v1, %v1646_v5  ;;  %v1653_v8 = vmul.f32 %v2050_v6, %v1641_v15  ;;  %vm1659_vm3 = vweird.f32 %v2050_v6 }
 0xab4   : > { %vm1660_vm5 = vmor %vm1658_vm4, %vm1659_vm3 }
 0xab5   : > { %v1651_v10 = vsel %vm1650_vm2, %v2048_v1, %v1647_v7  ;;  %v1654_v34 = vmul.f32 %v2050_v6, %v1653_v8 }
 0xab6   : > { %v1662_v12 = vmul.f32 %v1651_v10, %v1628_v53 }
 0xab7   : > { %v1655_v13 = vmul.f32 0.5, %v1654_v34 }
 0xab8   : > { %v1667_v16 = vmul.f32 %v1967_v9, %v1662_v12 }
 0xab9   : > { %v1656_v17 = vsub.f32 1.5, %v1655_v13 }
 0xaba   : > { %v1672_v20 = vadd.f32 %v1968_v11, %v1667_v16 }
 0xabb   : > { %v1657_v21 = vmul.f32 %v2050_v6, %v1656_v17 }
 0xabc   : > { %v1674_v24 = vadd.f32 %v1672_v20, %v2479_v52 }
 0xabd   : > { %v1661_v25 = vsel %vm1660_vm5, %v2050_v6, %v1657_v21 }
 0xabe   : > { %1676 = vst.msk [vmem:[%s469_s25] sm:$0xff] %vm529_vm0, %v1674_v24  ;;  %v1663_v26 = vmul.f32 %v1661_v25, %v1629_v57 }
 0xac0   : > { %v1668_v27 = vmul.f32 %v1967_v9, %v1663_v26 }
 0xac2   : > { %v1673_v51 = vadd.f32 %v1968_v11, %v1668_v27 }
 0xac4   : > { %v1675_v28 = vadd.f32 %v1673_v51, %v2482_v18 }
 0xac6   : > { %1677 = vst.msk [vmem:[%s469_s25 + $0x8] sm:$0xff] %vm529_vm0, %v1675_v28 }
 0xac7 PF: > { %s24_s29 = sadd.s32 1, %s2059_s29  }
 0xac8   : > { %p21_p4 = scmp.ge.s32.totalorder %s24_s29, 6  }
 0xaca   :  { %23 = sbr.rel (!%p21_p4) target bundleno = 1 (0x1), region = 109 }

</bundles_post_ra>
